<compile_context>
chip_gen: v7x
topology: tpu7x:2x2x1
jax: 0.10.0
libtpu: 0.0.40
codegen_flags: <defaults>
</compile_context>

<pallas_src>
import numpy as np
import jax
import jax.numpy as jnp
from jax.experimental import pallas as pl
from jax.experimental.pallas import tpu as pltpu

LANES = 128


# ----------------------------------------------------------------------------
# Static shape bookkeeping (mirrors ConvBlock.getOutputDim, floor pooling)
# ----------------------------------------------------------------------------
def layer_dims(filters, K, H, W, Cin0=1):
    dims = []
    Cin, h, w = Cin0, H, W
    for f in filters:
        Ho, Wo = h - K + 1, w - K + 1          # VALID conv
        p = (K - 1) // 2                       # F.pad amount
        Hp, Wp = Ho + 2 * p, Wo + 2 * p        # padded size
        Hq, Wq = Hp // 2, Wp // 2              # maxpool(2), floor semantics
        dims.append(dict(Cin=Cin, Cout=f, K=K, Hin=h, Win=w, Ho=Ho, Wo=Wo,
                         p=p, Hp=Hp, Wp=Wp, Hq=Hq, Wq=Wq))
        Cin, h, w = f, Hq, Wq
    return dims


# ----------------------------------------------------------------------------
# Fused kernel: conv blocks + pooling + flatten + MLP head, 8 samples/step
# ----------------------------------------------------------------------------
def make_kernel(dims, Wb, offs):
    L = len(dims)
    w_off, b_off, s_off, t_off, b3_off = offs

    def roll_lanes(v, shift):
        # jnp.roll semantics on the lane axis: out[l] = in[(l - shift) mod 128]
        s = shift % LANES
        if s == 0:
            return v
        return pltpu.roll(v, shift=s, axis=v.ndim - 1)

    def kernel(x_ref, theta_ref, w1e_ref, w2e_ref, w3t_ref,
               b1_ref, b2_ref, o_ref, *pool_refs):
        # ---------------- conv blocks ----------------
        for l, d in enumerate(dims):
            Cin, Cout, K = d['Cin'], d['Cout'], d['K']
            Ho, Wo, p, Hq = d['Ho'], d['Wo'], d['p'], d['Hq']
            st_in = 1 << l                      # lane stride of this layer's columns

            # Input channels as (Hin, 128) register tiles (8 samples in lanes).
            if l == 0:
                xs = [x_ref[0, ci] for ci in range(Cin)]
            else:
                Hq_prev = dims[l - 1]['Hq']
                prev = pool_refs[l - 1]
                xs = [prev[ci * Hq_prev:(ci + 1) * Hq_prev, :] for ci in range(Cin)]

            # Hoisted lane rolls, one per (ci, kw): XLU slot, shared by all co.
            xroll = [[roll_lanes(xs[ci], -kw * st_in) for kw in range(K)]
                     for ci in range(Cin)]

            # Column-validity mask (same for every output channel of the layer).
            lane = jax.lax.broadcasted_iota(jnp.int32, (Ho, LANES), 1)
            bp = lane % Wb
            col_ok = (bp >= p * st_in) & (bp <= (p + Wo - 1) * st_in)

            # Accumulators initialised with the conv bias (SMEM scalar).
            accs = [jnp.full((Ho, LANES), theta_ref[b_off[l] + co], dtype=jnp.float32)
                    for co in range(Cout)]

            # Direct convolution: weights are SMEM scalars -> sreg splat MACs.
            # TODO(synk): for much larger filter lists switch the unrolled
            # co/ci/kh/kw loops to lax.fori_loop to bound trace size.
            for kh in range(K):
                sls = [[xroll[ci][kw][kh:kh + Ho, :] for kw in range(K)]
                       for ci in range(Cin)]
                for co in range(Cout):
                    a = accs[co]
                    for ci in range(Cin):
                        for kw in range(K):
                            wv = theta_ref[w_off[l] + ((co * Cin + ci) * K + kh) * K + kw]
                            a = a + sls[ci][kw] * wv
                    accs[co] = a

            # pad(0) -> ReLU -> BN -> MaxPool(2), all in registers per channel.
            for co in range(Cout):
                scale = theta_ref[s_off[l] + co]
                shift = theta_ref[t_off[l] + co]
                y = jnp.maximum(accs[co], 0.0) * scale + shift
                # Column padding folded in: padded col c sits at lane c*st_in of
                # each sample block; pad->ReLU->BN of zero is exactly `shift`.
                ycol = jnp.where(col_ok, roll_lanes(y, p * st_in), shift)
                # Column-pair max: pooled col j lands at lane j*(2*st_in).
                mcol = jnp.maximum(ycol, roll_lanes(ycol, -st_in))
                # Row-pair max over interior rows.
                if Ho >= 2:
                    mmid = jnp.maximum(mcol[0:Ho - 1, :], mcol[1:Ho, :])
                base = co * Hq
                for i in range(Hq):
                    rows = [r - p for r in (2 * i, 2 * i + 1) if p <= r <= p + Ho - 1]
                    if len(rows) == 2:
                        val = mmid[rows[0]:rows[0] + 1, :]
                    elif len(rows) == 1:
                        # Window touches the zero-pad ring -> max with `shift`.
                        val = jnp.maximum(mcol[rows[0]:rows[0] + 1, :], shift)
                    else:
                        val = jnp.full((1, LANES), shift, dtype=jnp.float32)
                    # Lane-dense single-row store at an aligned sublane offset.
                    pool_refs[l][base + i: base + i + 1, :] = val

        # ---------------- MLP head (samples stay packed along lanes) ----------
        dl = dims[-1]
        Cl, Hql, Wql = dl['Cout'], dl['Hq'], dl['Wq']
        st_feat = 1 << L                                 # lane stride of pooled cols
        P = pool_refs[L - 1][0:Cl * Hql, :]              # (Cl*Hql, 128)

        hp = jax.lax.Precision.HIGHEST
        h1 = None
        for j in range(Wql):
            part = jnp.dot(w1e_ref[j], P, precision=hp,
                           preferred_element_type=jnp.float32)       # (16, 128)
            part = roll_lanes(part, -j * st_feat)
            h1 = part if h1 is None else h1 + part
        h1 = jnp.maximum(h1 + b1_ref[...], 0.0)
        # TODO(synk): Dropout(0.5) is identity in eval mode; train-mode RNG
        # dropout (pltpu.prng_*) not implemented.
        # BatchNorm1d is folded into w2eff / b2eff on the host.
        h2 = jnp.maximum(jnp.dot(w2e_ref[...], h1, precision=hp,
                                 preferred_element_type=jnp.float32) + b2_ref[...], 0.0)
        out = jnp.dot(w3t_ref[...], h2, precision=hp,
                      preferred_element_type=jnp.float32) + theta_ref[b3_off]
        # One lane-dense store; valid outputs live at lanes s*Wb (s = sample).
        o_ref[0] = out.astype(o_ref.dtype)

    return kernel


# ----------------------------------------------------------------------------
# Host wrapper: batch lane-packing, parameter packing, pallas_call
# ----------------------------------------------------------------------------
def cnn_forward_pallas(x, conv_params, mlp_params, kernel_size):
    N, Cin0, H, W = x.shape
    filters = tuple(int(w.shape[0]) for (w, _, _, _) in conv_params)
    dims = layer_dims(filters, kernel_size, H, W, Cin0)
    L = len(dims)

    Wb = W                                   # lanes per sample block
    assert LANES % Wb == 0, "input width must divide 128 for lane packing"
    B_TILE = LANES // Wb
    for l, d in enumerate(dims):             # lazy column compaction must fit
        assert (1 << l) * d['Wp'] <= Wb

    # ---- pack the batch along lanes: (n_tiles, Cin0, H, B_TILE*W) ----
    n_tiles = -(-N // B_TILE)
    Npad = n_tiles * B_TILE
    xp = jnp.pad(x.astype(jnp.float32), ((0, Npad - N), (0, 0), (0, 0), (0, 0)))
    xp = xp.reshape(n_tiles, B_TILE, Cin0, H, W).transpose(0, 2, 3, 1, 4)
    xp = xp.reshape(n_tiles, Cin0, H, B_TILE * W)

    # ---- one flat SMEM scalar table: conv w / b / BN scale / BN shift + b3 ----
    (w1, b1, s1, sh1, w2, b2, w3, b3) = mlp_params
    w_off, b_off, s_off, t_off = [], [], [], []
    segs = []
    off = 0
    for (w, b, sc, sh), d in zip(conv_params, dims):
        Cout, Cin, K = d['Cout'], d['Cin'], d['K']
        w_off.append(off); segs.append(np.asarray(w, np.float32).reshape(-1)); off += Cout * Cin * K * K
        b_off.append(off); segs.append(np.asarray(b, np.float32).reshape(-1)); off += Cout
        s_off.append(off); segs.append(np.asarray(sc, np.float32).reshape(-1)); off += Cout
        t_off.append(off); segs.append(np.asarray(sh, np.float32).reshape(-1)); off += Cout
    b3_off = off
    segs.append(np.asarray(b3, np.float32).reshape(-1)); off += 1
    theta = jnp.asarray(np.concatenate(segs).astype(np.float32))

    # ---- small VMEM constants for the MLP head ----
    dl = dims[-1]
    Cl, Hql, Wql = dl['Cout'], dl['Hq'], dl['Wq']
    feat = Cl * Hql * Wql
    assert w1.shape[0] == feat
    # W1 regrouped per pooled column j: w1eff[j, u, co*Hq + i] = w1[co*Hq*Wq + i*Wq + j, u]
    w1_r = np.asarray(w1, np.float32).reshape(Cl, Hql, Wql, 16)
    w1eff = np.transpose(w1_r, (2, 3, 0, 1)).reshape(Wql, 16, Cl * Hql)
    # Fold BatchNorm1d into the second Linear layer.
    w2_np = np.asarray(w2, np.float32); s1_np = np.asarray(s1, np.float32)
    t1_np = np.asarray(sh1, np.float32); b2_np = np.asarray(b2, np.float32)
    w2eff = (w2_np * s1_np[:, None]).T                       # (4, 16)
    b2eff = b2_np + w2_np.T @ t1_np                          # (4,)
    w3t = np.asarray(w3, np.float32).T                       # (1, 4)
    b1bc = np.repeat(np.asarray(b1, np.float32)[:, None], LANES, axis=1)   # (16, 128)
    b2bc = np.repeat(b2eff[:, None], LANES, axis=1)                        # (4, 128)

    inputs = [xp, theta, jnp.asarray(w1eff), jnp.asarray(w2eff),
              jnp.asarray(w3t), jnp.asarray(b1bc), jnp.asarray(b2bc)]

    def const_spec(a):
        nd = a.ndim
        return pl.BlockSpec(tuple(a.shape), lambda n: (0,) * nd)

    in_specs = [pl.BlockSpec((1, Cin0, H, LANES), lambda n: (n, 0, 0, 0)),
                pl.BlockSpec(memory_space=pltpu.MemorySpace.SMEM)]
    in_specs += [const_spec(a) for a in inputs[2:]]

    scratch_shapes = [pltpu.VMEM((d['Cout'] * d['Hq'], LANES), jnp.float32)
                      for d in dims]

    out_full = pl.pallas_call(
        make_kernel(dims, Wb, (w_off, b_off, s_off, t_off, b3_off)),
        grid=(n_tiles,),
        in_specs=in_specs,
        out_specs=pl.BlockSpec((1, 1, LANES), lambda n: (n, 0, 0)),
        out_shape=jax.ShapeDtypeStruct((n_tiles, 1, LANES), jnp.float32),
        scratch_shapes=scratch_shapes,
        compiler_params=pltpu.CompilerParams(
            dimension_semantics=("parallel",)),
    )(*inputs)

    # sample s of tile t lives at lane s*Wb of that tile's output row
    return out_full[:, 0, ::Wb].reshape(-1)[:N][:, None]


# ----------------------------------------------------------------------------
# Pure-JAX reference (PyTorch eval-mode semantics) for numerical validation
# ----------------------------------------------------------------------------
def cnn_forward_ref(x, conv_params, mlp_params):
    hp = jax.lax.Precision.HIGHEST
    h = x
    for (w, b, sc, sh) in conv_params:
        K = w.shape[-1]
        p = (K - 1) // 2
        y = jax.lax.conv_general_dilated(
            h, w, window_strides=(1, 1), padding='VALID',
            dimension_numbers=('NCHW', 'OIHW', 'NCHW'), precision=hp)
        y = y + b.reshape(1, -1, 1, 1)
        y = jnp.pad(y, ((0, 0), (0, 0), (p, p), (p, p)))
        y = jnp.maximum(y, 0.0)
        y = y * sc.reshape(1, -1, 1, 1) + sh.reshape(1, -1, 1, 1)
        y = jax.lax.reduce_window(y, jnp.array(-jnp.inf, jnp.float32),
                                  jax.lax.max, (1, 1, 2, 2), (1, 1, 2, 2), 'VALID')
        h = y
    feat = h.reshape(h.shape[0], -1)
    (w1, b1, s1, sh1, w2, b2, w3, b3) = mlp_params
    z = jnp.maximum(jnp.dot(feat, w1, precision=hp) + b1, 0.0)
    z = z * s1 + sh1
    z = jnp.maximum(jnp.dot(z, w2, precision=hp) + b2, 0.0)
    return jnp.dot(z, w3, precision=hp) + b3


# ----------------------------------------------------------------------------
# Deterministic synthetic parameters (shapes follow the nn.Module __init__)
# ----------------------------------------------------------------------------
def bn_affine(key, c, eps=1e-5):
    k1, k2, k3, k4 = jax.random.split(key, 4)
    gamma = 1.0 + 0.1 * jax.random.normal(k1, (c,), jnp.float32)
    beta = 0.1 * jax.random.normal(k2, (c,), jnp.float32)
    mean = 0.1 * jax.random.normal(k3, (c,), jnp.float32)
    var = 0.5 + jnp.abs(jax.random.normal(k4, (c,), jnp.float32))
    scale = gamma * jax.lax.rsqrt(var + eps)
    shift = beta - mean * scale
    return scale, shift


def init_params(key, filters, K, H, W):
    dims = layer_dims(filters, K, H, W, 1)
    conv_params = []
    for d in dims:
        key, kw_, kb_, kbn = jax.random.split(key, 4)
        w = 0.3 * jax.random.normal(kw_, (d['Cout'], d['Cin'], K, K), jnp.float32)
        b = 0.1 * jax.random.normal(kb_, (d['Cout'],), jnp.float32)
        sc, sh = bn_affine(kbn, d['Cout'])
        conv_params.append((w, b, sc, sh))
    dl = dims[-1]
    feat = dl['Cout'] * dl['Hq'] * dl['Wq']
    key, k1, k2, k3, k4, k5, k6, kbn1 = jax.random.split(key, 8)
    w1 = 0.1 * jax.random.normal(k1, (feat, 16), jnp.float32)
    b1 = 0.1 * jax.random.normal(k2, (16,), jnp.float32)
    s1, sh1 = bn_affine(kbn1, 16)
    w2 = 0.2 * jax.random.normal(k3, (16, 4), jnp.float32)
    b2 = 0.1 * jax.random.normal(k4, (4,), jnp.float32)
    w3 = 0.3 * jax.random.normal(k5, (4, 1), jnp.float32)
    b3 = 0.1 * jax.random.normal(k6, (1,), jnp.float32)
    return conv_params, (w1, b1, s1, sh1, w2, b2, w3, b3)


if __name__ == "__main__":
    filters = (4, 8)
    kernel_size = 3
    height = width = 16
    batch = 16      # 2 lane-packed tiles of 8 samples -> even grid (v7x megacore)

    key = jax.random.PRNGKey(0)
    key, kx = jax.random.split(key)
    x = jax.random.normal(kx, (batch, 1, height, width), jnp.float32)  # NCHW

    conv_params, mlp_params = init_params(key, filters, kernel_size, height, width)

    out = cnn_forward_pallas(x, conv_params, mlp_params, kernel_size)
    out = jax.block_until_ready(out)

    ref = jax.block_until_ready(cnn_forward_ref(x, conv_params, mlp_params))
    # Conv/pool path is exact f32 on the VPU; head matmuls use HIGHEST precision.
    np.testing.assert_allclose(np.asarray(out), np.asarray(ref),
                               rtol=1e-3, atol=1e-3)
    assert out.shape == (batch, 1)
    print("KERNEL_OK")
</pallas_src>

<mosaic_0001>
module attributes {stable_mosaic.version = 11 : i64} {
  func.func @kernel(%arg0: i32, %arg1: memref<1x1x16x128xf32, #tpu.memory_space<vmem>>, %arg2: memref<361xf32, #tpu.memory_space<smem>>, %arg3: memref<4x16x32xf32, #tpu.memory_space<vmem>>, %arg4: memref<4x16xf32, #tpu.memory_space<vmem>>, %arg5: memref<1x4xf32, #tpu.memory_space<vmem>>, %arg6: memref<16x128xf32, #tpu.memory_space<vmem>>, %arg7: memref<4x128xf32, #tpu.memory_space<vmem>>, %arg8: memref<1x1x128xf32, #tpu.memory_space<vmem>>, %arg9: memref<32x128xf32, #tpu.memory_space<vmem>>, %arg10: memref<32x128xf32, #tpu.memory_space<vmem>>) attributes {dimension_semantics = [#tpu.dimension_semantics<parallel>], iteration_bounds = array<i64: 2>, scalar_prefetch = 0 : i64, scratch_operands = 2 : i64, tpu.core_type = #tpu.core_type<tc>, window_params = [{transform_indices = @transform_0, window_bounds = array<i64: 1, 1, 16, 128>}, {transform_indices = @transform_1, window_bounds = array<i64: 361>}, {pipeline_mode = #tpu.pipeline_mode<synchronous>, transform_indices = @transform_2, window_bounds = array<i64: 4, 16, 32>}, {pipeline_mode = #tpu.pipeline_mode<synchronous>, transform_indices = @transform_3, window_bounds = array<i64: 4, 16>}, {pipeline_mode = #tpu.pipeline_mode<synchronous>, transform_indices = @transform_4, window_bounds = array<i64: 1, 4>}, {pipeline_mode = #tpu.pipeline_mode<synchronous>, transform_indices = @transform_5, window_bounds = array<i64: 16, 128>}, {pipeline_mode = #tpu.pipeline_mode<synchronous>, transform_indices = @transform_6, window_bounds = array<i64: 4, 128>}, {transform_indices = @transform_7, window_bounds = array<i64: 1, 1, 128>}]} {
    %c0 = arith.constant 0 : index
    %c0_0 = arith.constant 0 : index
    %c0_1 = arith.constant 0 : index
    %c0_2 = arith.constant 0 : index
    %0 = vector.load %arg1[%c0, %c0_0, %c0_1, %c0_2] : memref<1x1x16x128xf32, #tpu.memory_space<vmem>>, vector<1x1x16x128xf32>
    %1 = vector.shape_cast %0 : vector<1x1x16x128xf32> to vector<16x128xf32>
    %c127_i32 = arith.constant 127 : i32
    %2 = tpu.dynamic_rotate %1 by %c127_i32 dim 1 : vector<16x128xf32>, i32 -> vector<16x128xf32>
    %c126_i32 = arith.constant 126 : i32
    %3 = tpu.dynamic_rotate %1 by %c126_i32 dim 1 : vector<16x128xf32>, i32 -> vector<16x128xf32>
    %4 = tpu.iota {dimensions = array<i32: 1>} : vector<14x128xi32>
    %c16_i32 = arith.constant 16 : i32
    %c0_i32 = arith.constant 0 : i32
    %5 = arith.cmpi eq, %c16_i32, %c0_i32 : i32
    %c1_i32 = arith.constant 1 : i32
    %6 = arith.select %5, %c1_i32, %c16_i32 : i32
    %7 = vector.broadcast %6 : i32 to vector<14x128xi32>
    %8 = arith.remsi %4, %7 : vector<14x128xi32>
    %c0_i32_3 = arith.constant 0 : i32
    %9 = vector.broadcast %c0_i32_3 : i32 to vector<14x128xi32>
    %10 = arith.cmpi ne, %8, %9 : vector<14x128xi32>
    %c0_i32_4 = arith.constant 0 : i32
    %11 = vector.broadcast %c0_i32_4 : i32 to vector<14x128xi32>
    %12 = arith.cmpi slt, %8, %11 : vector<14x128xi32>
    %c0_i32_5 = arith.constant 0 : i32
    %13 = arith.cmpi slt, %6, %c0_i32_5 : i32
    %14 = vector.broadcast %13 : i1 to vector<14x128xi1>
    %15 = vector.broadcast %14 : vector<14x128xi1> to vector<14x128xi1>
    %16 = arith.xori %12, %15 : vector<14x128xi1>
    %17 = arith.andi %16, %10 : vector<14x128xi1>
    %18 = vector.broadcast %6 : i32 to vector<14x128xi32>
    %19 = arith.addi %8, %18 : vector<14x128xi32>
    %20 = arith.select %17, %19, %8 : vector<14x128xi1>, vector<14x128xi32>
    %c1_i32_6 = arith.constant 1 : i32
    %21 = vector.broadcast %c1_i32_6 : i32 to vector<14x128xi32>
    %22 = arith.cmpi sge, %20, %21 : vector<14x128xi32>
    %c14_i32 = arith.constant 14 : i32
    %23 = vector.broadcast %c14_i32 : i32 to vector<14x128xi32>
    %24 = arith.cmpi sle, %20, %23 : vector<14x128xi32>
    %25 = arith.andi %22, %24 : vector<14x128xi1>
    %c36 = arith.constant 36 : index
    %26 = memref.load %arg2[%c36] : memref<361xf32, #tpu.memory_space<smem>>
    %27 = vector.broadcast %26 : f32 to vector<14x128xf32>
    %c37 = arith.constant 37 : index
    %28 = memref.load %arg2[%c37] : memref<361xf32, #tpu.memory_space<smem>>
    %29 = vector.broadcast %28 : f32 to vector<14x128xf32>
    %c38 = arith.constant 38 : index
    %30 = memref.load %arg2[%c38] : memref<361xf32, #tpu.memory_space<smem>>
    %31 = vector.broadcast %30 : f32 to vector<14x128xf32>
    %c39 = arith.constant 39 : index
    %32 = memref.load %arg2[%c39] : memref<361xf32, #tpu.memory_space<smem>>
    %33 = vector.broadcast %32 : f32 to vector<14x128xf32>
    %34 = vector.extract_strided_slice %1 {offsets = [0, 0], sizes = [14, 128], strides = [1, 1]} : vector<16x128xf32> to vector<14x128xf32>
    %35 = vector.extract_strided_slice %2 {offsets = [0, 0], sizes = [14, 128], strides = [1, 1]} : vector<16x128xf32> to vector<14x128xf32>
    %36 = vector.extract_strided_slice %3 {offsets = [0, 0], sizes = [14, 128], strides = [1, 1]} : vector<16x128xf32> to vector<14x128xf32>
    %c0_7 = arith.constant 0 : index
    %37 = memref.load %arg2[%c0_7] : memref<361xf32, #tpu.memory_space<smem>>
    %38 = vector.broadcast %37 : f32 to vector<14x128xf32>
    %39 = arith.mulf %34, %38 : vector<14x128xf32>
    %40 = arith.addf %27, %39 : vector<14x128xf32>
    %c1 = arith.constant 1 : index
    %41 = memref.load %arg2[%c1] : memref<361xf32, #tpu.memory_space<smem>>
    %42 = vector.broadcast %41 : f32 to vector<14x128xf32>
    %43 = arith.mulf %35, %42 : vector<14x128xf32>
    %44 = arith.addf %40, %43 : vector<14x128xf32>
    %c2 = arith.constant 2 : index
    %45 = memref.load %arg2[%c2] : memref<361xf32, #tpu.memory_space<smem>>
    %46 = vector.broadcast %45 : f32 to vector<14x128xf32>
    %47 = arith.mulf %36, %46 : vector<14x128xf32>
    %48 = arith.addf %44, %47 : vector<14x128xf32>
    %c9 = arith.constant 9 : index
    %49 = memref.load %arg2[%c9] : memref<361xf32, #tpu.memory_space<smem>>
    %50 = vector.broadcast %49 : f32 to vector<14x128xf32>
    %51 = arith.mulf %34, %50 : vector<14x128xf32>
    %52 = arith.addf %29, %51 : vector<14x128xf32>
    %c10 = arith.constant 10 : index
    %53 = memref.load %arg2[%c10] : memref<361xf32, #tpu.memory_space<smem>>
    %54 = vector.broadcast %53 : f32 to vector<14x128xf32>
    %55 = arith.mulf %35, %54 : vector<14x128xf32>
    %56 = arith.addf %52, %55 : vector<14x128xf32>
    %c11 = arith.constant 11 : index
    %57 = memref.load %arg2[%c11] : memref<361xf32, #tpu.memory_space<smem>>
    %58 = vector.broadcast %57 : f32 to vector<14x128xf32>
    %59 = arith.mulf %36, %58 : vector<14x128xf32>
    %60 = arith.addf %56, %59 : vector<14x128xf32>
    %c18 = arith.constant 18 : index
    %61 = memref.load %arg2[%c18] : memref<361xf32, #tpu.memory_space<smem>>
    %62 = vector.broadcast %61 : f32 to vector<14x128xf32>
    %63 = arith.mulf %34, %62 : vector<14x128xf32>
    %64 = arith.addf %31, %63 : vector<14x128xf32>
    %c19 = arith.constant 19 : index
    %65 = memref.load %arg2[%c19] : memref<361xf32, #tpu.memory_space<smem>>
    %66 = vector.broadcast %65 : f32 to vector<14x128xf32>
    %67 = arith.mulf %35, %66 : vector<14x128xf32>
    %68 = arith.addf %64, %67 : vector<14x128xf32>
    %c20 = arith.constant 20 : index
    %69 = memref.load %arg2[%c20] : memref<361xf32, #tpu.memory_space<smem>>
    %70 = vector.broadcast %69 : f32 to vector<14x128xf32>
    %71 = arith.mulf %36, %70 : vector<14x128xf32>
    %72 = arith.addf %68, %71 : vector<14x128xf32>
    %c27 = arith.constant 27 : index
    %73 = memref.load %arg2[%c27] : memref<361xf32, #tpu.memory_space<smem>>
    %74 = vector.broadcast %73 : f32 to vector<14x128xf32>
    %75 = arith.mulf %34, %74 : vector<14x128xf32>
    %76 = arith.addf %33, %75 : vector<14x128xf32>
    %c28 = arith.constant 28 : index
    %77 = memref.load %arg2[%c28] : memref<361xf32, #tpu.memory_space<smem>>
    %78 = vector.broadcast %77 : f32 to vector<14x128xf32>
    %79 = arith.mulf %35, %78 : vector<14x128xf32>
    %80 = arith.addf %76, %79 : vector<14x128xf32>
    %c29 = arith.constant 29 : index
    %81 = memref.load %arg2[%c29] : memref<361xf32, #tpu.memory_space<smem>>
    %82 = vector.broadcast %81 : f32 to vector<14x128xf32>
    %83 = arith.mulf %36, %82 : vector<14x128xf32>
    %84 = arith.addf %80, %83 : vector<14x128xf32>
    %85 = vector.extract_strided_slice %1 {offsets = [1, 0], sizes = [14, 128], strides = [1, 1]} : vector<16x128xf32> to vector<14x128xf32>
    %86 = vector.extract_strided_slice %2 {offsets = [1, 0], sizes = [14, 128], strides = [1, 1]} : vector<16x128xf32> to vector<14x128xf32>
    %87 = vector.extract_strided_slice %3 {offsets = [1, 0], sizes = [14, 128], strides = [1, 1]} : vector<16x128xf32> to vector<14x128xf32>
    %c3 = arith.constant 3 : index
    %88 = memref.load %arg2[%c3] : memref<361xf32, #tpu.memory_space<smem>>
    %89 = vector.broadcast %88 : f32 to vector<14x128xf32>
    %90 = arith.mulf %85, %89 : vector<14x128xf32>
    %91 = arith.addf %48, %90 : vector<14x128xf32>
    %c4 = arith.constant 4 : index
    %92 = memref.load %arg2[%c4] : memref<361xf32, #tpu.memory_space<smem>>
    %93 = vector.broadcast %92 : f32 to vector<14x128xf32>
    %94 = arith.mulf %86, %93 : vector<14x128xf32>
    %95 = arith.addf %91, %94 : vector<14x128xf32>
    %c5 = arith.constant 5 : index
    %96 = memref.load %arg2[%c5] : memref<361xf32, #tpu.memory_space<smem>>
    %97 = vector.broadcast %96 : f32 to vector<14x128xf32>
    %98 = arith.mulf %87, %97 : vector<14x128xf32>
    %99 = arith.addf %95, %98 : vector<14x128xf32>
    %c12 = arith.constant 12 : index
    %100 = memref.load %arg2[%c12] : memref<361xf32, #tpu.memory_space<smem>>
    %101 = vector.broadcast %100 : f32 to vector<14x128xf32>
    %102 = arith.mulf %85, %101 : vector<14x128xf32>
    %103 = arith.addf %60, %102 : vector<14x128xf32>
    %c13 = arith.constant 13 : index
    %104 = memref.load %arg2[%c13] : memref<361xf32, #tpu.memory_space<smem>>
    %105 = vector.broadcast %104 : f32 to vector<14x128xf32>
    %106 = arith.mulf %86, %105 : vector<14x128xf32>
    %107 = arith.addf %103, %106 : vector<14x128xf32>
    %c14 = arith.constant 14 : index
    %108 = memref.load %arg2[%c14] : memref<361xf32, #tpu.memory_space<smem>>
    %109 = vector.broadcast %108 : f32 to vector<14x128xf32>
    %110 = arith.mulf %87, %109 : vector<14x128xf32>
    %111 = arith.addf %107, %110 : vector<14x128xf32>
    %c21 = arith.constant 21 : index
    %112 = memref.load %arg2[%c21] : memref<361xf32, #tpu.memory_space<smem>>
    %113 = vector.broadcast %112 : f32 to vector<14x128xf32>
    %114 = arith.mulf %85, %113 : vector<14x128xf32>
    %115 = arith.addf %72, %114 : vector<14x128xf32>
    %c22 = arith.constant 22 : index
    %116 = memref.load %arg2[%c22] : memref<361xf32, #tpu.memory_space<smem>>
    %117 = vector.broadcast %116 : f32 to vector<14x128xf32>
    %118 = arith.mulf %86, %117 : vector<14x128xf32>
    %119 = arith.addf %115, %118 : vector<14x128xf32>
    %c23 = arith.constant 23 : index
    %120 = memref.load %arg2[%c23] : memref<361xf32, #tpu.memory_space<smem>>
    %121 = vector.broadcast %120 : f32 to vector<14x128xf32>
    %122 = arith.mulf %87, %121 : vector<14x128xf32>
    %123 = arith.addf %119, %122 : vector<14x128xf32>
    %c30 = arith.constant 30 : index
    %124 = memref.load %arg2[%c30] : memref<361xf32, #tpu.memory_space<smem>>
    %125 = vector.broadcast %124 : f32 to vector<14x128xf32>
    %126 = arith.mulf %85, %125 : vector<14x128xf32>
    %127 = arith.addf %84, %126 : vector<14x128xf32>
    %c31 = arith.constant 31 : index
    %128 = memref.load %arg2[%c31] : memref<361xf32, #tpu.memory_space<smem>>
    %129 = vector.broadcast %128 : f32 to vector<14x128xf32>
    %130 = arith.mulf %86, %129 : vector<14x128xf32>
    %131 = arith.addf %127, %130 : vector<14x128xf32>
    %c32 = arith.constant 32 : index
    %132 = memref.load %arg2[%c32] : memref<361xf32, #tpu.memory_space<smem>>
    %133 = vector.broadcast %132 : f32 to vector<14x128xf32>
    %134 = arith.mulf %87, %133 : vector<14x128xf32>
    %135 = arith.addf %131, %134 : vector<14x128xf32>
    %136 = vector.extract_strided_slice %1 {offsets = [2, 0], sizes = [14, 128], strides = [1, 1]} : vector<16x128xf32> to vector<14x128xf32>
    %137 = vector.extract_strided_slice %2 {offsets = [2, 0], sizes = [14, 128], strides = [1, 1]} : vector<16x128xf32> to vector<14x128xf32>
    %138 = vector.extract_strided_slice %3 {offsets = [2, 0], sizes = [14, 128], strides = [1, 1]} : vector<16x128xf32> to vector<14x128xf32>
    %c6 = arith.constant 6 : index
    %139 = memref.load %arg2[%c6] : memref<361xf32, #tpu.memory_space<smem>>
    %140 = vector.broadcast %139 : f32 to vector<14x128xf32>
    %141 = arith.mulf %136, %140 : vector<14x128xf32>
    %142 = arith.addf %99, %141 : vector<14x128xf32>
    %c7 = arith.constant 7 : index
    %143 = memref.load %arg2[%c7] : memref<361xf32, #tpu.memory_space<smem>>
    %144 = vector.broadcast %143 : f32 to vector<14x128xf32>
    %145 = arith.mulf %137, %144 : vector<14x128xf32>
    %146 = arith.addf %142, %145 : vector<14x128xf32>
    %c8 = arith.constant 8 : index
    %147 = memref.load %arg2[%c8] : memref<361xf32, #tpu.memory_space<smem>>
    %148 = vector.broadcast %147 : f32 to vector<14x128xf32>
    %149 = arith.mulf %138, %148 : vector<14x128xf32>
    %150 = arith.addf %146, %149 : vector<14x128xf32>
    %c15 = arith.constant 15 : index
    %151 = memref.load %arg2[%c15] : memref<361xf32, #tpu.memory_space<smem>>
    %152 = vector.broadcast %151 : f32 to vector<14x128xf32>
    %153 = arith.mulf %136, %152 : vector<14x128xf32>
    %154 = arith.addf %111, %153 : vector<14x128xf32>
    %c16 = arith.constant 16 : index
    %155 = memref.load %arg2[%c16] : memref<361xf32, #tpu.memory_space<smem>>
    %156 = vector.broadcast %155 : f32 to vector<14x128xf32>
    %157 = arith.mulf %137, %156 : vector<14x128xf32>
    %158 = arith.addf %154, %157 : vector<14x128xf32>
    %c17 = arith.constant 17 : index
    %159 = memref.load %arg2[%c17] : memref<361xf32, #tpu.memory_space<smem>>
    %160 = vector.broadcast %159 : f32 to vector<14x128xf32>
    %161 = arith.mulf %138, %160 : vector<14x128xf32>
    %162 = arith.addf %158, %161 : vector<14x128xf32>
    %c24 = arith.constant 24 : index
    %163 = memref.load %arg2[%c24] : memref<361xf32, #tpu.memory_space<smem>>
    %164 = vector.broadcast %163 : f32 to vector<14x128xf32>
    %165 = arith.mulf %136, %164 : vector<14x128xf32>
    %166 = arith.addf %123, %165 : vector<14x128xf32>
    %c25 = arith.constant 25 : index
    %167 = memref.load %arg2[%c25] : memref<361xf32, #tpu.memory_space<smem>>
    %168 = vector.broadcast %167 : f32 to vector<14x128xf32>
    %169 = arith.mulf %137, %168 : vector<14x128xf32>
    %170 = arith.addf %166, %169 : vector<14x128xf32>
    %c26 = arith.constant 26 : index
    %171 = memref.load %arg2[%c26] : memref<361xf32, #tpu.memory_space<smem>>
    %172 = vector.broadcast %171 : f32 to vector<14x128xf32>
    %173 = arith.mulf %138, %172 : vector<14x128xf32>
    %174 = arith.addf %170, %173 : vector<14x128xf32>
    %c33 = arith.constant 33 : index
    %175 = memref.load %arg2[%c33] : memref<361xf32, #tpu.memory_space<smem>>
    %176 = vector.broadcast %175 : f32 to vector<14x128xf32>
    %177 = arith.mulf %136, %176 : vector<14x128xf32>
    %178 = arith.addf %135, %177 : vector<14x128xf32>
    %c34 = arith.constant 34 : index
    %179 = memref.load %arg2[%c34] : memref<361xf32, #tpu.memory_space<smem>>
    %180 = vector.broadcast %179 : f32 to vector<14x128xf32>
    %181 = arith.mulf %137, %180 : vector<14x128xf32>
    %182 = arith.addf %178, %181 : vector<14x128xf32>
    %c35 = arith.constant 35 : index
    %183 = memref.load %arg2[%c35] : memref<361xf32, #tpu.memory_space<smem>>
    %184 = vector.broadcast %183 : f32 to vector<14x128xf32>
    %185 = arith.mulf %138, %184 : vector<14x128xf32>
    %186 = arith.addf %182, %185 : vector<14x128xf32>
    %c40 = arith.constant 40 : index
    %187 = memref.load %arg2[%c40] : memref<361xf32, #tpu.memory_space<smem>>
    %c44 = arith.constant 44 : index
    %188 = memref.load %arg2[%c44] : memref<361xf32, #tpu.memory_space<smem>>
    %cst = arith.constant 0.000000e+00 : f32
    %189 = vector.broadcast %cst : f32 to vector<14x128xf32>
    %190 = arith.maximumf %150, %189 : vector<14x128xf32>
    %191 = vector.broadcast %187 : f32 to vector<14x128xf32>
    %192 = arith.mulf %190, %191 : vector<14x128xf32>
    %193 = vector.broadcast %188 : f32 to vector<14x128xf32>
    %194 = arith.addf %192, %193 : vector<14x128xf32>
    %c1_i32_8 = arith.constant 1 : i32
    %195 = tpu.dynamic_rotate %194 by %c1_i32_8 dim 1 : vector<14x128xf32>, i32 -> vector<14x128xf32>
    %196 = vector.broadcast %188 : f32 to vector<14x128xf32>
    %197 = arith.select %25, %195, %196 : vector<14x128xi1>, vector<14x128xf32>
    %c127_i32_9 = arith.constant 127 : i32
    %198 = tpu.dynamic_rotate %197 by %c127_i32_9 dim 1 : vector<14x128xf32>, i32 -> vector<14x128xf32>
    %199 = arith.maximumf %197, %198 : vector<14x128xf32>
    %200 = vector.extract_strided_slice %199 {offsets = [0, 0], sizes = [13, 128], strides = [1, 1]} : vector<14x128xf32> to vector<13x128xf32>
    %201 = vector.extract_strided_slice %199 {offsets = [1, 0], sizes = [13, 128], strides = [1, 1]} : vector<14x128xf32> to vector<13x128xf32>
    %202 = arith.maximumf %200, %201 : vector<13x128xf32>
    %203 = vector.extract_strided_slice %199 {offsets = [0, 0], sizes = [1, 128], strides = [1, 1]} : vector<14x128xf32> to vector<1x128xf32>
    %204 = vector.broadcast %188 : f32 to vector<1x128xf32>
    %205 = arith.maximumf %203, %204 : vector<1x128xf32>
    %c0_10 = arith.constant 0 : index
    %c0_11 = arith.constant 0 : index
    %206 = vector.load %arg9[%c0_10, %c0_11] : memref<32x128xf32, #tpu.memory_space<vmem>>, vector<1x128xf32>
    tpu.vector_store %arg9[%c0_10, %c0_11], %205 {strides = array<i32>} : memref<32x128xf32, #tpu.memory_space<vmem>>, vector<1x128xf32>,
    %207 = vector.extract_strided_slice %202 {offsets = [1, 0], sizes = [1, 128], strides = [1, 1]} : vector<13x128xf32> to vector<1x128xf32>
    %c1_12 = arith.constant 1 : index
    %c0_13 = arith.constant 0 : index
    %208 = vector.load %arg9[%c1_12, %c0_13] : memref<32x128xf32, #tpu.memory_space<vmem>>, vector<1x128xf32>
    tpu.vector_store %arg9[%c1_12, %c0_13], %207 {strides = array<i32>} : memref<32x128xf32, #tpu.memory_space<vmem>>, vector<1x128xf32>,
    %209 = vector.extract_strided_slice %202 {offsets = [3, 0], sizes = [1, 128], strides = [1, 1]} : vector<13x128xf32> to vector<1x128xf32>
    %c2_14 = arith.constant 2 : index
    %c0_15 = arith.constant 0 : index
    %210 = vector.load %arg9[%c2_14, %c0_15] : memref<32x128xf32, #tpu.memory_space<vmem>>, vector<1x128xf32>
    tpu.vector_store %arg9[%c2_14, %c0_15], %209 {strides = array<i32>} : memref<32x128xf32, #tpu.memory_space<vmem>>, vector<1x128xf32>,
    %211 = vector.extract_strided_slice %202 {offsets = [5, 0], sizes = [1, 128], strides = [1, 1]} : vector<13x128xf32> to vector<1x128xf32>
    %c3_16 = arith.constant 3 : index
    %c0_17 = arith.constant 0 : index
    %212 = vector.load %arg9[%c3_16, %c0_17] : memref<32x128xf32, #tpu.memory_space<vmem>>, vector<1x128xf32>
    tpu.vector_store %arg9[%c3_16, %c0_17], %211 {strides = array<i32>} : memref<32x128xf32, #tpu.memory_space<vmem>>, vector<1x128xf32>,
    %213 = vector.extract_strided_slice %202 {offsets = [7, 0], sizes = [1, 128], strides = [1, 1]} : vector<13x128xf32> to vector<1x128xf32>
    %c4_18 = arith.constant 4 : index
    %c0_19 = arith.constant 0 : index
    %214 = vector.load %arg9[%c4_18, %c0_19] : memref<32x128xf32, #tpu.memory_space<vmem>>, vector<1x128xf32>
    tpu.vector_store %arg9[%c4_18, %c0_19], %213 {strides = array<i32>} : memref<32x128xf32, #tpu.memory_space<vmem>>, vector<1x128xf32>,
    %215 = vector.extract_strided_slice %202 {offsets = [9, 0], sizes = [1, 128], strides = [1, 1]} : vector<13x128xf32> to vector<1x128xf32>
    %c5_20 = arith.constant 5 : index
    %c0_21 = arith.constant 0 : index
    %216 = vector.load %arg9[%c5_20, %c0_21] : memref<32x128xf32, #tpu.memory_space<vmem>>, vector<1x128xf32>
    tpu.vector_store %arg9[%c5_20, %c0_21], %215 {strides = array<i32>} : memref<32x128xf32, #tpu.memory_space<vmem>>, vector<1x128xf32>,
    %217 = vector.extract_strided_slice %202 {offsets = [11, 0], sizes = [1, 128], strides = [1, 1]} : vector<13x128xf32> to vector<1x128xf32>
    %c6_22 = arith.constant 6 : index
    %c0_23 = arith.constant 0 : index
    %218 = vector.load %arg9[%c6_22, %c0_23] : memref<32x128xf32, #tpu.memory_space<vmem>>, vector<1x128xf32>
    tpu.vector_store %arg9[%c6_22, %c0_23], %217 {strides = array<i32>} : memref<32x128xf32, #tpu.memory_space<vmem>>, vector<1x128xf32>,
    %219 = vector.extract_strided_slice %199 {offsets = [13, 0], sizes = [1, 128], strides = [1, 1]} : vector<14x128xf32> to vector<1x128xf32>
    %220 = vector.broadcast %188 : f32 to vector<1x128xf32>
    %221 = arith.maximumf %219, %220 : vector<1x128xf32>
    %c7_24 = arith.constant 7 : index
    %c0_25 = arith.constant 0 : index
    %222 = vector.load %arg9[%c7_24, %c0_25] : memref<32x128xf32, #tpu.memory_space<vmem>>, vector<1x128xf32>
    tpu.vector_store %arg9[%c7_24, %c0_25], %221 {strides = array<i32>} : memref<32x128xf32, #tpu.memory_space<vmem>>, vector<1x128xf32>,
    %c41 = arith.constant 41 : index
    %223 = memref.load %arg2[%c41] : memref<361xf32, #tpu.memory_space<smem>>
    %c45 = arith.constant 45 : index
    %224 = memref.load %arg2[%c45] : memref<361xf32, #tpu.memory_space<smem>>
    %cst_26 = arith.constant 0.000000e+00 : f32
    %225 = vector.broadcast %cst_26 : f32 to vector<14x128xf32>
    %226 = arith.maximumf %162, %225 : vector<14x128xf32>
    %227 = vector.broadcast %223 : f32 to vector<14x128xf32>
    %228 = arith.mulf %226, %227 : vector<14x128xf32>
    %229 = vector.broadcast %224 : f32 to vector<14x128xf32>
    %230 = arith.addf %228, %229 : vector<14x128xf32>
    %c1_i32_27 = arith.constant 1 : i32
    %231 = tpu.dynamic_rotate %230 by %c1_i32_27 dim 1 : vector<14x128xf32>, i32 -> vector<14x128xf32>
    %232 = vector.broadcast %224 : f32 to vector<14x128xf32>
    %233 = arith.select %25, %231, %232 : vector<14x128xi1>, vector<14x128xf32>
    %c127_i32_28 = arith.constant 127 : i32
    %234 = tpu.dynamic_rotate %233 by %c127_i32_28 dim 1 : vector<14x128xf32>, i32 -> vector<14x128xf32>
    %235 = arith.maximumf %233, %234 : vector<14x128xf32>
    %236 = vector.extract_strided_slice %235 {offsets = [0, 0], sizes = [13, 128], strides = [1, 1]} : vector<14x128xf32> to vector<13x128xf32>
    %237 = vector.extract_strided_slice %235 {offsets = [1, 0], sizes = [13, 128], strides = [1, 1]} : vector<14x128xf32> to vector<13x128xf32>
    %238 = arith.maximumf %236, %237 : vector<13x128xf32>
    %239 = vector.extract_strided_slice %235 {offsets = [0, 0], sizes = [1, 128], strides = [1, 1]} : vector<14x128xf32> to vector<1x128xf32>
    %240 = vector.broadcast %224 : f32 to vector<1x128xf32>
    %241 = arith.maximumf %239, %240 : vector<1x128xf32>
    %c8_29 = arith.constant 8 : index
    %c0_30 = arith.constant 0 : index
    %242 = vector.load %arg9[%c8_29, %c0_30] : memref<32x128xf32, #tpu.memory_space<vmem>>, vector<1x128xf32>
    tpu.vector_store %arg9[%c8_29, %c0_30], %241 {strides = array<i32>} : memref<32x128xf32, #tpu.memory_space<vmem>>, vector<1x128xf32>,
    %243 = vector.extract_strided_slice %238 {offsets = [1, 0], sizes = [1, 128], strides = [1, 1]} : vector<13x128xf32> to vector<1x128xf32>
    %c9_31 = arith.constant 9 : index
    %c0_32 = arith.constant 0 : index
    %244 = vector.load %arg9[%c9_31, %c0_32] : memref<32x128xf32, #tpu.memory_space<vmem>>, vector<1x128xf32>
    tpu.vector_store %arg9[%c9_31, %c0_32], %243 {strides = array<i32>} : memref<32x128xf32, #tpu.memory_space<vmem>>, vector<1x128xf32>,
    %245 = vector.extract_strided_slice %238 {offsets = [3, 0], sizes = [1, 128], strides = [1, 1]} : vector<13x128xf32> to vector<1x128xf32>
    %c10_33 = arith.constant 10 : index
    %c0_34 = arith.constant 0 : index
    %246 = vector.load %arg9[%c10_33, %c0_34] : memref<32x128xf32, #tpu.memory_space<vmem>>, vector<1x128xf32>
    tpu.vector_store %arg9[%c10_33, %c0_34], %245 {strides = array<i32>} : memref<32x128xf32, #tpu.memory_space<vmem>>, vector<1x128xf32>,
    %247 = vector.extract_strided_slice %238 {offsets = [5, 0], sizes = [1, 128], strides = [1, 1]} : vector<13x128xf32> to vector<1x128xf32>
    %c11_35 = arith.constant 11 : index
    %c0_36 = arith.constant 0 : index
    %248 = vector.load %arg9[%c11_35, %c0_36] : memref<32x128xf32, #tpu.memory_space<vmem>>, vector<1x128xf32>
    tpu.vector_store %arg9[%c11_35, %c0_36], %247 {strides = array<i32>} : memref<32x128xf32, #tpu.memory_space<vmem>>, vector<1x128xf32>,
    %249 = vector.extract_strided_slice %238 {offsets = [7, 0], sizes = [1, 128], strides = [1, 1]} : vector<13x128xf32> to vector<1x128xf32>
    %c12_37 = arith.constant 12 : index
    %c0_38 = arith.constant 0 : index
    %250 = vector.load %arg9[%c12_37, %c0_38] : memref<32x128xf32, #tpu.memory_space<vmem>>, vector<1x128xf32>
    tpu.vector_store %arg9[%c12_37, %c0_38], %249 {strides = array<i32>} : memref<32x128xf32, #tpu.memory_space<vmem>>, vector<1x128xf32>,
    %251 = vector.extract_strided_slice %238 {offsets = [9, 0], sizes = [1, 128], strides = [1, 1]} : vector<13x128xf32> to vector<1x128xf32>
    %c13_39 = arith.constant 13 : index
    %c0_40 = arith.constant 0 : index
    %252 = vector.load %arg9[%c13_39, %c0_40] : memref<32x128xf32, #tpu.memory_space<vmem>>, vector<1x128xf32>
    tpu.vector_store %arg9[%c13_39, %c0_40], %251 {strides = array<i32>} : memref<32x128xf32, #tpu.memory_space<vmem>>, vector<1x128xf32>,
    %253 = vector.extract_strided_slice %238 {offsets = [11, 0], sizes = [1, 128], strides = [1, 1]} : vector<13x128xf32> to vector<1x128xf32>
    %c14_41 = arith.constant 14 : index
    %c0_42 = arith.constant 0 : index
    %254 = vector.load %arg9[%c14_41, %c0_42] : memref<32x128xf32, #tpu.memory_space<vmem>>, vector<1x128xf32>
    tpu.vector_store %arg9[%c14_41, %c0_42], %253 {strides = array<i32>} : memref<32x128xf32, #tpu.memory_space<vmem>>, vector<1x128xf32>,
    %255 = vector.extract_strided_slice %235 {offsets = [13, 0], sizes = [1, 128], strides = [1, 1]} : vector<14x128xf32> to vector<1x128xf32>
    %256 = vector.broadcast %224 : f32 to vector<1x128xf32>
    %257 = arith.maximumf %255, %256 : vector<1x128xf32>
    %c15_43 = arith.constant 15 : index
    %c0_44 = arith.constant 0 : index
    %258 = vector.load %arg9[%c15_43, %c0_44] : memref<32x128xf32, #tpu.memory_space<vmem>>, vector<1x128xf32>
    tpu.vector_store %arg9[%c15_43, %c0_44], %257 {strides = array<i32>} : memref<32x128xf32, #tpu.memory_space<vmem>>, vector<1x128xf32>,
    %c42 = arith.constant 42 : index
    %259 = memref.load %arg2[%c42] : memref<361xf32, #tpu.memory_space<smem>>
    %c46 = arith.constant 46 : index
    %260 = memref.load %arg2[%c46] : memref<361xf32, #tpu.memory_space<smem>>
    %cst_45 = arith.constant 0.000000e+00 : f32
    %261 = vector.broadcast %cst_45 : f32 to vector<14x128xf32>
    %262 = arith.maximumf %174, %261 : vector<14x128xf32>
    %263 = vector.broadcast %259 : f32 to vector<14x128xf32>
    %264 = arith.mulf %262, %263 : vector<14x128xf32>
    %265 = vector.broadcast %260 : f32 to vector<14x128xf32>
    %266 = arith.addf %264, %265 : vector<14x128xf32>
    %c1_i32_46 = arith.constant 1 : i32
    %267 = tpu.dynamic_rotate %266 by %c1_i32_46 dim 1 : vector<14x128xf32>, i32 -> vector<14x128xf32>
    %268 = vector.broadcast %260 : f32 to vector<14x128xf32>
    %269 = arith.select %25, %267, %268 : vector<14x128xi1>, vector<14x128xf32>
    %c127_i32_47 = arith.constant 127 : i32
    %270 = tpu.dynamic_rotate %269 by %c127_i32_47 dim 1 : vector<14x128xf32>, i32 -> vector<14x128xf32>
    %271 = arith.maximumf %269, %270 : vector<14x128xf32>
    %272 = vector.extract_strided_slice %271 {offsets = [0, 0], sizes = [13, 128], strides = [1, 1]} : vector<14x128xf32> to vector<13x128xf32>
    %273 = vector.extract_strided_slice %271 {offsets = [1, 0], sizes = [13, 128], strides = [1, 1]} : vector<14x128xf32> to vector<13x128xf32>
    %274 = arith.maximumf %272, %273 : vector<13x128xf32>
    %275 = vector.extract_strided_slice %271 {offsets = [0, 0], sizes = [1, 128], strides = [1, 1]} : vector<14x128xf32> to vector<1x128xf32>
    %276 = vector.broadcast %260 : f32 to vector<1x128xf32>
    %277 = arith.maximumf %275, %276 : vector<1x128xf32>
    %c16_48 = arith.constant 16 : index
    %c0_49 = arith.constant 0 : index
    %278 = vector.load %arg9[%c16_48, %c0_49] : memref<32x128xf32, #tpu.memory_space<vmem>>, vector<1x128xf32>
    tpu.vector_store %arg9[%c16_48, %c0_49], %277 {strides = array<i32>} : memref<32x128xf32, #tpu.memory_space<vmem>>, vector<1x128xf32>,
    %279 = vector.extract_strided_slice %274 {offsets = [1, 0], sizes = [1, 128], strides = [1, 1]} : vector<13x128xf32> to vector<1x128xf32>
    %c17_50 = arith.constant 17 : index
    %c0_51 = arith.constant 0 : index
    %280 = vector.load %arg9[%c17_50, %c0_51] : memref<32x128xf32, #tpu.memory_space<vmem>>, vector<1x128xf32>
    tpu.vector_store %arg9[%c17_50, %c0_51], %279 {strides = array<i32>} : memref<32x128xf32, #tpu.memory_space<vmem>>, vector<1x128xf32>,
    %281 = vector.extract_strided_slice %274 {offsets = [3, 0], sizes = [1, 128], strides = [1, 1]} : vector<13x128xf32> to vector<1x128xf32>
    %c18_52 = arith.constant 18 : index
    %c0_53 = arith.constant 0 : index
    %282 = vector.load %arg9[%c18_52, %c0_53] : memref<32x128xf32, #tpu.memory_space<vmem>>, vector<1x128xf32>
    tpu.vector_store %arg9[%c18_52, %c0_53], %281 {strides = array<i32>} : memref<32x128xf32, #tpu.memory_space<vmem>>, vector<1x128xf32>,
    %283 = vector.extract_strided_slice %274 {offsets = [5, 0], sizes = [1, 128], strides = [1, 1]} : vector<13x128xf32> to vector<1x128xf32>
    %c19_54 = arith.constant 19 : index
    %c0_55 = arith.constant 0 : index
    %284 = vector.load %arg9[%c19_54, %c0_55] : memref<32x128xf32, #tpu.memory_space<vmem>>, vector<1x128xf32>
    tpu.vector_store %arg9[%c19_54, %c0_55], %283 {strides = array<i32>} : memref<32x128xf32, #tpu.memory_space<vmem>>, vector<1x128xf32>,
    %285 = vector.extract_strided_slice %274 {offsets = [7, 0], sizes = [1, 128], strides = [1, 1]} : vector<13x128xf32> to vector<1x128xf32>
    %c20_56 = arith.constant 20 : index
    %c0_57 = arith.constant 0 : index
    %286 = vector.load %arg9[%c20_56, %c0_57] : memref<32x128xf32, #tpu.memory_space<vmem>>, vector<1x128xf32>
    tpu.vector_store %arg9[%c20_56, %c0_57], %285 {strides = array<i32>} : memref<32x128xf32, #tpu.memory_space<vmem>>, vector<1x128xf32>,
    %287 = vector.extract_strided_slice %274 {offsets = [9, 0], sizes = [1, 128], strides = [1, 1]} : vector<13x128xf32> to vector<1x128xf32>
    %c21_58 = arith.constant 21 : index
    %c0_59 = arith.constant 0 : index
    %288 = vector.load %arg9[%c21_58, %c0_59] : memref<32x128xf32, #tpu.memory_space<vmem>>, vector<1x128xf32>
    tpu.vector_store %arg9[%c21_58, %c0_59], %287 {strides = array<i32>} : memref<32x128xf32, #tpu.memory_space<vmem>>, vector<1x128xf32>,
    %289 = vector.extract_strided_slice %274 {offsets = [11, 0], sizes = [1, 128], strides = [1, 1]} : vector<13x128xf32> to vector<1x128xf32>
    %c22_60 = arith.constant 22 : index
    %c0_61 = arith.constant 0 : index
    %290 = vector.load %arg9[%c22_60, %c0_61] : memref<32x128xf32, #tpu.memory_space<vmem>>, vector<1x128xf32>
    tpu.vector_store %arg9[%c22_60, %c0_61], %289 {strides = array<i32>} : memref<32x128xf32, #tpu.memory_space<vmem>>, vector<1x128xf32>,
    %291 = vector.extract_strided_slice %271 {offsets = [13, 0], sizes = [1, 128], strides = [1, 1]} : vector<14x128xf32> to vector<1x128xf32>
    %292 = vector.broadcast %260 : f32 to vector<1x128xf32>
    %293 = arith.maximumf %291, %292 : vector<1x128xf32>
    %c23_62 = arith.constant 23 : index
    %c0_63 = arith.constant 0 : index
    %294 = vector.load %arg9[%c23_62, %c0_63] : memref<32x128xf32, #tpu.memory_space<vmem>>, vector<1x128xf32>
    tpu.vector_store %arg9[%c23_62, %c0_63], %293 {strides = array<i32>} : memref<32x128xf32, #tpu.memory_space<vmem>>, vector<1x128xf32>,
    %c43 = arith.constant 43 : index
    %295 = memref.load %arg2[%c43] : memref<361xf32, #tpu.memory_space<smem>>
    %c47 = arith.constant 47 : index
    %296 = memref.load %arg2[%c47] : memref<361xf32, #tpu.memory_space<smem>>
    %cst_64 = arith.constant 0.000000e+00 : f32
    %297 = vector.broadcast %cst_64 : f32 to vector<14x128xf32>
    %298 = arith.maximumf %186, %297 : vector<14x128xf32>
    %299 = vector.broadcast %295 : f32 to vector<14x128xf32>
    %300 = arith.mulf %298, %299 : vector<14x128xf32>
    %301 = vector.broadcast %296 : f32 to vector<14x128xf32>
    %302 = arith.addf %300, %301 : vector<14x128xf32>
    %c1_i32_65 = arith.constant 1 : i32
    %303 = tpu.dynamic_rotate %302 by %c1_i32_65 dim 1 : vector<14x128xf32>, i32 -> vector<14x128xf32>
    %304 = vector.broadcast %296 : f32 to vector<14x128xf32>
    %305 = arith.select %25, %303, %304 : vector<14x128xi1>, vector<14x128xf32>
    %c127_i32_66 = arith.constant 127 : i32
    %306 = tpu.dynamic_rotate %305 by %c127_i32_66 dim 1 : vector<14x128xf32>, i32 -> vector<14x128xf32>
    %307 = arith.maximumf %305, %306 : vector<14x128xf32>
    %308 = vector.extract_strided_slice %307 {offsets = [0, 0], sizes = [13, 128], strides = [1, 1]} : vector<14x128xf32> to vector<13x128xf32>
    %309 = vector.extract_strided_slice %307 {offsets = [1, 0], sizes = [13, 128], strides = [1, 1]} : vector<14x128xf32> to vector<13x128xf32>
    %310 = arith.maximumf %308, %309 : vector<13x128xf32>
    %311 = vector.extract_strided_slice %307 {offsets = [0, 0], sizes = [1, 128], strides = [1, 1]} : vector<14x128xf32> to vector<1x128xf32>
    %312 = vector.broadcast %296 : f32 to vector<1x128xf32>
    %313 = arith.maximumf %311, %312 : vector<1x128xf32>
    %c24_67 = arith.constant 24 : index
    %c0_68 = arith.constant 0 : index
    %314 = vector.load %arg9[%c24_67, %c0_68] : memref<32x128xf32, #tpu.memory_space<vmem>>, vector<1x128xf32>
    tpu.vector_store %arg9[%c24_67, %c0_68], %313 {strides = array<i32>} : memref<32x128xf32, #tpu.memory_space<vmem>>, vector<1x128xf32>,
    %315 = vector.extract_strided_slice %310 {offsets = [1, 0], sizes = [1, 128], strides = [1, 1]} : vector<13x128xf32> to vector<1x128xf32>
    %c25_69 = arith.constant 25 : index
    %c0_70 = arith.constant 0 : index
    %316 = vector.load %arg9[%c25_69, %c0_70] : memref<32x128xf32, #tpu.memory_space<vmem>>, vector<1x128xf32>
    tpu.vector_store %arg9[%c25_69, %c0_70], %315 {strides = array<i32>} : memref<32x128xf32, #tpu.memory_space<vmem>>, vector<1x128xf32>,
    %317 = vector.extract_strided_slice %310 {offsets = [3, 0], sizes = [1, 128], strides = [1, 1]} : vector<13x128xf32> to vector<1x128xf32>
    %c26_71 = arith.constant 26 : index
    %c0_72 = arith.constant 0 : index
    %318 = vector.load %arg9[%c26_71, %c0_72] : memref<32x128xf32, #tpu.memory_space<vmem>>, vector<1x128xf32>
    tpu.vector_store %arg9[%c26_71, %c0_72], %317 {strides = array<i32>} : memref<32x128xf32, #tpu.memory_space<vmem>>, vector<1x128xf32>,
    %319 = vector.extract_strided_slice %310 {offsets = [5, 0], sizes = [1, 128], strides = [1, 1]} : vector<13x128xf32> to vector<1x128xf32>
    %c27_73 = arith.constant 27 : index
    %c0_74 = arith.constant 0 : index
    %320 = vector.load %arg9[%c27_73, %c0_74] : memref<32x128xf32, #tpu.memory_space<vmem>>, vector<1x128xf32>
    tpu.vector_store %arg9[%c27_73, %c0_74], %319 {strides = array<i32>} : memref<32x128xf32, #tpu.memory_space<vmem>>, vector<1x128xf32>,
    %321 = vector.extract_strided_slice %310 {offsets = [7, 0], sizes = [1, 128], strides = [1, 1]} : vector<13x128xf32> to vector<1x128xf32>
    %c28_75 = arith.constant 28 : index
    %c0_76 = arith.constant 0 : index
    %322 = vector.load %arg9[%c28_75, %c0_76] : memref<32x128xf32, #tpu.memory_space<vmem>>, vector<1x128xf32>
    tpu.vector_store %arg9[%c28_75, %c0_76], %321 {strides = array<i32>} : memref<32x128xf32, #tpu.memory_space<vmem>>, vector<1x128xf32>,
    %323 = vector.extract_strided_slice %310 {offsets = [9, 0], sizes = [1, 128], strides = [1, 1]} : vector<13x128xf32> to vector<1x128xf32>
    %c29_77 = arith.constant 29 : index
    %c0_78 = arith.constant 0 : index
    %324 = vector.load %arg9[%c29_77, %c0_78] : memref<32x128xf32, #tpu.memory_space<vmem>>, vector<1x128xf32>
    tpu.vector_store %arg9[%c29_77, %c0_78], %323 {strides = array<i32>} : memref<32x128xf32, #tpu.memory_space<vmem>>, vector<1x128xf32>,
    %325 = vector.extract_strided_slice %310 {offsets = [11, 0], sizes = [1, 128], strides = [1, 1]} : vector<13x128xf32> to vector<1x128xf32>
    %c30_79 = arith.constant 30 : index
    %c0_80 = arith.constant 0 : index
    %326 = vector.load %arg9[%c30_79, %c0_80] : memref<32x128xf32, #tpu.memory_space<vmem>>, vector<1x128xf32>
    tpu.vector_store %arg9[%c30_79, %c0_80], %325 {strides = array<i32>} : memref<32x128xf32, #tpu.memory_space<vmem>>, vector<1x128xf32>,
    %327 = vector.extract_strided_slice %307 {offsets = [13, 0], sizes = [1, 128], strides = [1, 1]} : vector<14x128xf32> to vector<1x128xf32>
    %328 = vector.broadcast %296 : f32 to vector<1x128xf32>
    %329 = arith.maximumf %327, %328 : vector<1x128xf32>
    %c31_81 = arith.constant 31 : index
    %c0_82 = arith.constant 0 : index
    %330 = vector.load %arg9[%c31_81, %c0_82] : memref<32x128xf32, #tpu.memory_space<vmem>>, vector<1x128xf32>
    tpu.vector_store %arg9[%c31_81, %c0_82], %329 {strides = array<i32>} : memref<32x128xf32, #tpu.memory_space<vmem>>, vector<1x128xf32>,
    %c0_83 = arith.constant 0 : index
    %c0_84 = arith.constant 0 : index
    %331 = vector.load %arg9[%c0_83, %c0_84] : memref<32x128xf32, #tpu.memory_space<vmem>>, vector<8x128xf32>
    %c8_85 = arith.constant 8 : index
    %c0_86 = arith.constant 0 : index
    %332 = vector.load %arg9[%c8_85, %c0_86] : memref<32x128xf32, #tpu.memory_space<vmem>>, vector<8x128xf32>
    %c16_87 = arith.constant 16 : index
    %c0_88 = arith.constant 0 : index
    %333 = vector.load %arg9[%c16_87, %c0_88] : memref<32x128xf32, #tpu.memory_space<vmem>>, vector<8x128xf32>
    %c24_89 = arith.constant 24 : index
    %c0_90 = arith.constant 0 : index
    %334 = vector.load %arg9[%c24_89, %c0_90] : memref<32x128xf32, #tpu.memory_space<vmem>>, vector<8x128xf32>
    %c126_i32_91 = arith.constant 126 : i32
    %335 = tpu.dynamic_rotate %331 by %c126_i32_91 dim 1 : vector<8x128xf32>, i32 -> vector<8x128xf32>
    %c124_i32 = arith.constant 124 : i32
    %336 = tpu.dynamic_rotate %331 by %c124_i32 dim 1 : vector<8x128xf32>, i32 -> vector<8x128xf32>
    %c126_i32_92 = arith.constant 126 : i32
    %337 = tpu.dynamic_rotate %332 by %c126_i32_92 dim 1 : vector<8x128xf32>, i32 -> vector<8x128xf32>
    %c124_i32_93 = arith.constant 124 : i32
    %338 = tpu.dynamic_rotate %332 by %c124_i32_93 dim 1 : vector<8x128xf32>, i32 -> vector<8x128xf32>
    %c126_i32_94 = arith.constant 126 : i32
    %339 = tpu.dynamic_rotate %333 by %c126_i32_94 dim 1 : vector<8x128xf32>, i32 -> vector<8x128xf32>
    %c124_i32_95 = arith.constant 124 : i32
    %340 = tpu.dynamic_rotate %333 by %c124_i32_95 dim 1 : vector<8x128xf32>, i32 -> vector<8x128xf32>
    %c126_i32_96 = arith.constant 126 : i32
    %341 = tpu.dynamic_rotate %334 by %c126_i32_96 dim 1 : vector<8x128xf32>, i32 -> vector<8x128xf32>
    %c124_i32_97 = arith.constant 124 : i32
    %342 = tpu.dynamic_rotate %334 by %c124_i32_97 dim 1 : vector<8x128xf32>, i32 -> vector<8x128xf32>
    %343 = tpu.iota {dimensions = array<i32: 1>} : vector<6x128xi32>
    %c16_i32_98 = arith.constant 16 : i32
    %c0_i32_99 = arith.constant 0 : i32
    %344 = arith.cmpi eq, %c16_i32_98, %c0_i32_99 : i32
    %c1_i32_100 = arith.constant 1 : i32
    %345 = arith.select %344, %c1_i32_100, %c16_i32_98 : i32
    %346 = vector.broadcast %345 : i32 to vector<6x128xi32>
    %347 = arith.remsi %343, %346 : vector<6x128xi32>
    %c0_i32_101 = arith.constant 0 : i32
    %348 = vector.broadcast %c0_i32_101 : i32 to vector<6x128xi32>
    %349 = arith.cmpi ne, %347, %348 : vector<6x128xi32>
    %c0_i32_102 = arith.constant 0 : i32
    %350 = vector.broadcast %c0_i32_102 : i32 to vector<6x128xi32>
    %351 = arith.cmpi slt, %347, %350 : vector<6x128xi32>
    %c0_i32_103 = arith.constant 0 : i32
    %352 = arith.cmpi slt, %345, %c0_i32_103 : i32
    %353 = vector.broadcast %352 : i1 to vector<6x128xi1>
    %354 = vector.broadcast %353 : vector<6x128xi1> to vector<6x128xi1>
    %355 = arith.xori %351, %354 : vector<6x128xi1>
    %356 = arith.andi %355, %349 : vector<6x128xi1>
    %357 = vector.broadcast %345 : i32 to vector<6x128xi32>
    %358 = arith.addi %347, %357 : vector<6x128xi32>
    %359 = arith.select %356, %358, %347 : vector<6x128xi1>, vector<6x128xi32>
    %c2_i32 = arith.constant 2 : i32
    %360 = vector.broadcast %c2_i32 : i32 to vector<6x128xi32>
    %361 = arith.cmpi sge, %359, %360 : vector<6x128xi32>
    %c12_i32 = arith.constant 12 : i32
    %362 = vector.broadcast %c12_i32 : i32 to vector<6x128xi32>
    %363 = arith.cmpi sle, %359, %362 : vector<6x128xi32>
    %364 = arith.andi %361, %363 : vector<6x128xi1>
    %c336 = arith.constant 336 : index
    %365 = memref.load %arg2[%c336] : memref<361xf32, #tpu.memory_space<smem>>
    %366 = vector.broadcast %365 : f32 to vector<6x128xf32>
    %c337 = arith.constant 337 : index
    %367 = memref.load %arg2[%c337] : memref<361xf32, #tpu.memory_space<smem>>
    %368 = vector.broadcast %367 : f32 to vector<6x128xf32>
    %c338 = arith.constant 338 : index
    %369 = memref.load %arg2[%c338] : memref<361xf32, #tpu.memory_space<smem>>
    %370 = vector.broadcast %369 : f32 to vector<6x128xf32>
    %c339 = arith.constant 339 : index
    %371 = memref.load %arg2[%c339] : memref<361xf32, #tpu.memory_space<smem>>
    %372 = vector.broadcast %371 : f32 to vector<6x128xf32>
    %c340 = arith.constant 340 : index
    %373 = memref.load %arg2[%c340] : memref<361xf32, #tpu.memory_space<smem>>
    %374 = vector.broadcast %373 : f32 to vector<6x128xf32>
    %c341 = arith.constant 341 : index
    %375 = memref.load %arg2[%c341] : memref<361xf32, #tpu.memory_space<smem>>
    %376 = vector.broadcast %375 : f32 to vector<6x128xf32>
    %c342 = arith.constant 342 : index
    %377 = memref.load %arg2[%c342] : memref<361xf32, #tpu.memory_space<smem>>
    %378 = vector.broadcast %377 : f32 to vector<6x128xf32>
    %c343 = arith.constant 343 : index
    %379 = memref.load %arg2[%c343] : memref<361xf32, #tpu.memory_space<smem>>
    %380 = vector.broadcast %379 : f32 to vector<6x128xf32>
    %381 = vector.extract_strided_slice %331 {offsets = [0, 0], sizes = [6, 128], strides = [1, 1]} : vector<8x128xf32> to vector<6x128xf32>
    %382 = vector.extract_strided_slice %335 {offsets = [0, 0], sizes = [6, 128], strides = [1, 1]} : vector<8x128xf32> to vector<6x128xf32>
    %383 = vector.extract_strided_slice %336 {offsets = [0, 0], sizes = [6, 128], strides = [1, 1]} : vector<8x128xf32> to vector<6x128xf32>
    %384 = vector.extract_strided_slice %332 {offsets = [0, 0], sizes = [6, 128], strides = [1, 1]} : vector<8x128xf32> to vector<6x128xf32>
    %385 = vector.extract_strided_slice %337 {offsets = [0, 0], sizes = [6, 128], strides = [1, 1]} : vector<8x128xf32> to vector<6x128xf32>
    %386 = vector.extract_strided_slice %338 {offsets = [0, 0], sizes = [6, 128], strides = [1, 1]} : vector<8x128xf32> to vector<6x128xf32>
    %387 = vector.extract_strided_slice %333 {offsets = [0, 0], sizes = [6, 128], strides = [1, 1]} : vector<8x128xf32> to vector<6x128xf32>
    %388 = vector.extract_strided_slice %339 {offsets = [0, 0], sizes = [6, 128], strides = [1, 1]} : vector<8x128xf32> to vector<6x128xf32>
    %389 = vector.extract_strided_slice %340 {offsets = [0, 0], sizes = [6, 128], strides = [1, 1]} : vector<8x128xf32> to vector<6x128xf32>
    %390 = vector.extract_strided_slice %334 {offsets = [0, 0], sizes = [6, 128], strides = [1, 1]} : vector<8x128xf32> to vector<6x128xf32>
    %391 = vector.extract_strided_slice %341 {offsets = [0, 0], sizes = [6, 128], strides = [1, 1]} : vector<8x128xf32> to vector<6x128xf32>
    %392 = vector.extract_strided_slice %342 {offsets = [0, 0], sizes = [6, 128], strides = [1, 1]} : vector<8x128xf32> to vector<6x128xf32>
    %c48 = arith.constant 48 : index
    %393 = memref.load %arg2[%c48] : memref<361xf32, #tpu.memory_space<smem>>
    %394 = vector.broadcast %393 : f32 to vector<6x128xf32>
    %395 = arith.mulf %381, %394 : vector<6x128xf32>
    %396 = arith.addf %366, %395 : vector<6x128xf32>
    %c49 = arith.constant 49 : index
    %397 = memref.load %arg2[%c49] : memref<361xf32, #tpu.memory_space<smem>>
    %398 = vector.broadcast %397 : f32 to vector<6x128xf32>
    %399 = arith.mulf %382, %398 : vector<6x128xf32>
    %400 = arith.addf %396, %399 : vector<6x128xf32>
    %c50 = arith.constant 50 : index
    %401 = memref.load %arg2[%c50] : memref<361xf32, #tpu.memory_space<smem>>
    %402 = vector.broadcast %401 : f32 to vector<6x128xf32>
    %403 = arith.mulf %383, %402 : vector<6x128xf32>
    %404 = arith.addf %400, %403 : vector<6x128xf32>
    %c57 = arith.constant 57 : index
    %405 = memref.load %arg2[%c57] : memref<361xf32, #tpu.memory_space<smem>>
    %406 = vector.broadcast %405 : f32 to vector<6x128xf32>
    %407 = arith.mulf %384, %406 : vector<6x128xf32>
    %408 = arith.addf %404, %407 : vector<6x128xf32>
    %c58 = arith.constant 58 : index
    %409 = memref.load %arg2[%c58] : memref<361xf32, #tpu.memory_space<smem>>
    %410 = vector.broadcast %409 : f32 to vector<6x128xf32>
    %411 = arith.mulf %385, %410 : vector<6x128xf32>
    %412 = arith.addf %408, %411 : vector<6x128xf32>
    %c59 = arith.constant 59 : index
    %413 = memref.load %arg2[%c59] : memref<361xf32, #tpu.memory_space<smem>>
    %414 = vector.broadcast %413 : f32 to vector<6x128xf32>
    %415 = arith.mulf %386, %414 : vector<6x128xf32>
    %416 = arith.addf %412, %415 : vector<6x128xf32>
    %c66 = arith.constant 66 : index
    %417 = memref.load %arg2[%c66] : memref<361xf32, #tpu.memory_space<smem>>
    %418 = vector.broadcast %417 : f32 to vector<6x128xf32>
    %419 = arith.mulf %387, %418 : vector<6x128xf32>
    %420 = arith.addf %416, %419 : vector<6x128xf32>
    %c67 = arith.constant 67 : index
    %421 = memref.load %arg2[%c67] : memref<361xf32, #tpu.memory_space<smem>>
    %422 = vector.broadcast %421 : f32 to vector<6x128xf32>
    %423 = arith.mulf %388, %422 : vector<6x128xf32>
    %424 = arith.addf %420, %423 : vector<6x128xf32>
    %c68 = arith.constant 68 : index
    %425 = memref.load %arg2[%c68] : memref<361xf32, #tpu.memory_space<smem>>
    %426 = vector.broadcast %425 : f32 to vector<6x128xf32>
    %427 = arith.mulf %389, %426 : vector<6x128xf32>
    %428 = arith.addf %424, %427 : vector<6x128xf32>
    %c75 = arith.constant 75 : index
    %429 = memref.load %arg2[%c75] : memref<361xf32, #tpu.memory_space<smem>>
    %430 = vector.broadcast %429 : f32 to vector<6x128xf32>
    %431 = arith.mulf %390, %430 : vector<6x128xf32>
    %432 = arith.addf %428, %431 : vector<6x128xf32>
    %c76 = arith.constant 76 : index
    %433 = memref.load %arg2[%c76] : memref<361xf32, #tpu.memory_space<smem>>
    %434 = vector.broadcast %433 : f32 to vector<6x128xf32>
    %435 = arith.mulf %391, %434 : vector<6x128xf32>
    %436 = arith.addf %432, %435 : vector<6x128xf32>
    %c77 = arith.constant 77 : index
    %437 = memref.load %arg2[%c77] : memref<361xf32, #tpu.memory_space<smem>>
    %438 = vector.broadcast %437 : f32 to vector<6x128xf32>
    %439 = arith.mulf %392, %438 : vector<6x128xf32>
    %440 = arith.addf %436, %439 : vector<6x128xf32>
    %c84 = arith.constant 84 : index
    %441 = memref.load %arg2[%c84] : memref<361xf32, #tpu.memory_space<smem>>
    %442 = vector.broadcast %441 : f32 to vector<6x128xf32>
    %443 = arith.mulf %381, %442 : vector<6x128xf32>
    %444 = arith.addf %368, %443 : vector<6x128xf32>
    %c85 = arith.constant 85 : index
    %445 = memref.load %arg2[%c85] : memref<361xf32, #tpu.memory_space<smem>>
    %446 = vector.broadcast %445 : f32 to vector<6x128xf32>
    %447 = arith.mulf %382, %446 : vector<6x128xf32>
    %448 = arith.addf %444, %447 : vector<6x128xf32>
    %c86 = arith.constant 86 : index
    %449 = memref.load %arg2[%c86] : memref<361xf32, #tpu.memory_space<smem>>
    %450 = vector.broadcast %449 : f32 to vector<6x128xf32>
    %451 = arith.mulf %383, %450 : vector<6x128xf32>
    %452 = arith.addf %448, %451 : vector<6x128xf32>
    %c93 = arith.constant 93 : index
    %453 = memref.load %arg2[%c93] : memref<361xf32, #tpu.memory_space<smem>>
    %454 = vector.broadcast %453 : f32 to vector<6x128xf32>
    %455 = arith.mulf %384, %454 : vector<6x128xf32>
    %456 = arith.addf %452, %455 : vector<6x128xf32>
    %c94 = arith.constant 94 : index
    %457 = memref.load %arg2[%c94] : memref<361xf32, #tpu.memory_space<smem>>
    %458 = vector.broadcast %457 : f32 to vector<6x128xf32>
    %459 = arith.mulf %385, %458 : vector<6x128xf32>
    %460 = arith.addf %456, %459 : vector<6x128xf32>
    %c95 = arith.constant 95 : index
    %461 = memref.load %arg2[%c95] : memref<361xf32, #tpu.memory_space<smem>>
    %462 = vector.broadcast %461 : f32 to vector<6x128xf32>
    %463 = arith.mulf %386, %462 : vector<6x128xf32>
    %464 = arith.addf %460, %463 : vector<6x128xf32>
    %c102 = arith.constant 102 : index
    %465 = memref.load %arg2[%c102] : memref<361xf32, #tpu.memory_space<smem>>
    %466 = vector.broadcast %465 : f32 to vector<6x128xf32>
    %467 = arith.mulf %387, %466 : vector<6x128xf32>
    %468 = arith.addf %464, %467 : vector<6x128xf32>
    %c103 = arith.constant 103 : index
    %469 = memref.load %arg2[%c103] : memref<361xf32, #tpu.memory_space<smem>>
    %470 = vector.broadcast %469 : f32 to vector<6x128xf32>
    %471 = arith.mulf %388, %470 : vector<6x128xf32>
    %472 = arith.addf %468, %471 : vector<6x128xf32>
    %c104 = arith.constant 104 : index
    %473 = memref.load %arg2[%c104] : memref<361xf32, #tpu.memory_space<smem>>
    %474 = vector.broadcast %473 : f32 to vector<6x128xf32>
    %475 = arith.mulf %389, %474 : vector<6x128xf32>
    %476 = arith.addf %472, %475 : vector<6x128xf32>
    %c111 = arith.constant 111 : index
    %477 = memref.load %arg2[%c111] : memref<361xf32, #tpu.memory_space<smem>>
    %478 = vector.broadcast %477 : f32 to vector<6x128xf32>
    %479 = arith.mulf %390, %478 : vector<6x128xf32>
    %480 = arith.addf %476, %479 : vector<6x128xf32>
    %c112 = arith.constant 112 : index
    %481 = memref.load %arg2[%c112] : memref<361xf32, #tpu.memory_space<smem>>
    %482 = vector.broadcast %481 : f32 to vector<6x128xf32>
    %483 = arith.mulf %391, %482 : vector<6x128xf32>
    %484 = arith.addf %480, %483 : vector<6x128xf32>
    %c113 = arith.constant 113 : index
    %485 = memref.load %arg2[%c113] : memref<361xf32, #tpu.memory_space<smem>>
    %486 = vector.broadcast %485 : f32 to vector<6x128xf32>
    %487 = arith.mulf %392, %486 : vector<6x128xf32>
    %488 = arith.addf %484, %487 : vector<6x128xf32>
    %c120 = arith.constant 120 : index
    %489 = memref.load %arg2[%c120] : memref<361xf32, #tpu.memory_space<smem>>
    %490 = vector.broadcast %489 : f32 to vector<6x128xf32>
    %491 = arith.mulf %381, %490 : vector<6x128xf32>
    %492 = arith.addf %370, %491 : vector<6x128xf32>
    %c121 = arith.constant 121 : index
    %493 = memref.load %arg2[%c121] : memref<361xf32, #tpu.memory_space<smem>>
    %494 = vector.broadcast %493 : f32 to vector<6x128xf32>
    %495 = arith.mulf %382, %494 : vector<6x128xf32>
    %496 = arith.addf %492, %495 : vector<6x128xf32>
    %c122 = arith.constant 122 : index
    %497 = memref.load %arg2[%c122] : memref<361xf32, #tpu.memory_space<smem>>
    %498 = vector.broadcast %497 : f32 to vector<6x128xf32>
    %499 = arith.mulf %383, %498 : vector<6x128xf32>
    %500 = arith.addf %496, %499 : vector<6x128xf32>
    %c129 = arith.constant 129 : index
    %501 = memref.load %arg2[%c129] : memref<361xf32, #tpu.memory_space<smem>>
    %502 = vector.broadcast %501 : f32 to vector<6x128xf32>
    %503 = arith.mulf %384, %502 : vector<6x128xf32>
    %504 = arith.addf %500, %503 : vector<6x128xf32>
    %c130 = arith.constant 130 : index
    %505 = memref.load %arg2[%c130] : memref<361xf32, #tpu.memory_space<smem>>
    %506 = vector.broadcast %505 : f32 to vector<6x128xf32>
    %507 = arith.mulf %385, %506 : vector<6x128xf32>
    %508 = arith.addf %504, %507 : vector<6x128xf32>
    %c131 = arith.constant 131 : index
    %509 = memref.load %arg2[%c131] : memref<361xf32, #tpu.memory_space<smem>>
    %510 = vector.broadcast %509 : f32 to vector<6x128xf32>
    %511 = arith.mulf %386, %510 : vector<6x128xf32>
    %512 = arith.addf %508, %511 : vector<6x128xf32>
    %c138 = arith.constant 138 : index
    %513 = memref.load %arg2[%c138] : memref<361xf32, #tpu.memory_space<smem>>
    %514 = vector.broadcast %513 : f32 to vector<6x128xf32>
    %515 = arith.mulf %387, %514 : vector<6x128xf32>
    %516 = arith.addf %512, %515 : vector<6x128xf32>
    %c139 = arith.constant 139 : index
    %517 = memref.load %arg2[%c139] : memref<361xf32, #tpu.memory_space<smem>>
    %518 = vector.broadcast %517 : f32 to vector<6x128xf32>
    %519 = arith.mulf %388, %518 : vector<6x128xf32>
    %520 = arith.addf %516, %519 : vector<6x128xf32>
    %c140 = arith.constant 140 : index
    %521 = memref.load %arg2[%c140] : memref<361xf32, #tpu.memory_space<smem>>
    %522 = vector.broadcast %521 : f32 to vector<6x128xf32>
    %523 = arith.mulf %389, %522 : vector<6x128xf32>
    %524 = arith.addf %520, %523 : vector<6x128xf32>
    %c147 = arith.constant 147 : index
    %525 = memref.load %arg2[%c147] : memref<361xf32, #tpu.memory_space<smem>>
    %526 = vector.broadcast %525 : f32 to vector<6x128xf32>
    %527 = arith.mulf %390, %526 : vector<6x128xf32>
    %528 = arith.addf %524, %527 : vector<6x128xf32>
    %c148 = arith.constant 148 : index
    %529 = memref.load %arg2[%c148] : memref<361xf32, #tpu.memory_space<smem>>
    %530 = vector.broadcast %529 : f32 to vector<6x128xf32>
    %531 = arith.mulf %391, %530 : vector<6x128xf32>
    %532 = arith.addf %528, %531 : vector<6x128xf32>
    %c149 = arith.constant 149 : index
    %533 = memref.load %arg2[%c149] : memref<361xf32, #tpu.memory_space<smem>>
    %534 = vector.broadcast %533 : f32 to vector<6x128xf32>
    %535 = arith.mulf %392, %534 : vector<6x128xf32>
    %536 = arith.addf %532, %535 : vector<6x128xf32>
    %c156 = arith.constant 156 : index
    %537 = memref.load %arg2[%c156] : memref<361xf32, #tpu.memory_space<smem>>
    %538 = vector.broadcast %537 : f32 to vector<6x128xf32>
    %539 = arith.mulf %381, %538 : vector<6x128xf32>
    %540 = arith.addf %372, %539 : vector<6x128xf32>
    %c157 = arith.constant 157 : index
    %541 = memref.load %arg2[%c157] : memref<361xf32, #tpu.memory_space<smem>>
    %542 = vector.broadcast %541 : f32 to vector<6x128xf32>
    %543 = arith.mulf %382, %542 : vector<6x128xf32>
    %544 = arith.addf %540, %543 : vector<6x128xf32>
    %c158 = arith.constant 158 : index
    %545 = memref.load %arg2[%c158] : memref<361xf32, #tpu.memory_space<smem>>
    %546 = vector.broadcast %545 : f32 to vector<6x128xf32>
    %547 = arith.mulf %383, %546 : vector<6x128xf32>
    %548 = arith.addf %544, %547 : vector<6x128xf32>
    %c165 = arith.constant 165 : index
    %549 = memref.load %arg2[%c165] : memref<361xf32, #tpu.memory_space<smem>>
    %550 = vector.broadcast %549 : f32 to vector<6x128xf32>
    %551 = arith.mulf %384, %550 : vector<6x128xf32>
    %552 = arith.addf %548, %551 : vector<6x128xf32>
    %c166 = arith.constant 166 : index
    %553 = memref.load %arg2[%c166] : memref<361xf32, #tpu.memory_space<smem>>
    %554 = vector.broadcast %553 : f32 to vector<6x128xf32>
    %555 = arith.mulf %385, %554 : vector<6x128xf32>
    %556 = arith.addf %552, %555 : vector<6x128xf32>
    %c167 = arith.constant 167 : index
    %557 = memref.load %arg2[%c167] : memref<361xf32, #tpu.memory_space<smem>>
    %558 = vector.broadcast %557 : f32 to vector<6x128xf32>
    %559 = arith.mulf %386, %558 : vector<6x128xf32>
    %560 = arith.addf %556, %559 : vector<6x128xf32>
    %c174 = arith.constant 174 : index
    %561 = memref.load %arg2[%c174] : memref<361xf32, #tpu.memory_space<smem>>
    %562 = vector.broadcast %561 : f32 to vector<6x128xf32>
    %563 = arith.mulf %387, %562 : vector<6x128xf32>
    %564 = arith.addf %560, %563 : vector<6x128xf32>
    %c175 = arith.constant 175 : index
    %565 = memref.load %arg2[%c175] : memref<361xf32, #tpu.memory_space<smem>>
    %566 = vector.broadcast %565 : f32 to vector<6x128xf32>
    %567 = arith.mulf %388, %566 : vector<6x128xf32>
    %568 = arith.addf %564, %567 : vector<6x128xf32>
    %c176 = arith.constant 176 : index
    %569 = memref.load %arg2[%c176] : memref<361xf32, #tpu.memory_space<smem>>
    %570 = vector.broadcast %569 : f32 to vector<6x128xf32>
    %571 = arith.mulf %389, %570 : vector<6x128xf32>
    %572 = arith.addf %568, %571 : vector<6x128xf32>
    %c183 = arith.constant 183 : index
    %573 = memref.load %arg2[%c183] : memref<361xf32, #tpu.memory_space<smem>>
    %574 = vector.broadcast %573 : f32 to vector<6x128xf32>
    %575 = arith.mulf %390, %574 : vector<6x128xf32>
    %576 = arith.addf %572, %575 : vector<6x128xf32>
    %c184 = arith.constant 184 : index
    %577 = memref.load %arg2[%c184] : memref<361xf32, #tpu.memory_space<smem>>
    %578 = vector.broadcast %577 : f32 to vector<6x128xf32>
    %579 = arith.mulf %391, %578 : vector<6x128xf32>
    %580 = arith.addf %576, %579 : vector<6x128xf32>
    %c185 = arith.constant 185 : index
    %581 = memref.load %arg2[%c185] : memref<361xf32, #tpu.memory_space<smem>>
    %582 = vector.broadcast %581 : f32 to vector<6x128xf32>
    %583 = arith.mulf %392, %582 : vector<6x128xf32>
    %584 = arith.addf %580, %583 : vector<6x128xf32>
    %c192 = arith.constant 192 : index
    %585 = memref.load %arg2[%c192] : memref<361xf32, #tpu.memory_space<smem>>
    %586 = vector.broadcast %585 : f32 to vector<6x128xf32>
    %587 = arith.mulf %381, %586 : vector<6x128xf32>
    %588 = arith.addf %374, %587 : vector<6x128xf32>
    %c193 = arith.constant 193 : index
    %589 = memref.load %arg2[%c193] : memref<361xf32, #tpu.memory_space<smem>>
    %590 = vector.broadcast %589 : f32 to vector<6x128xf32>
    %591 = arith.mulf %382, %590 : vector<6x128xf32>
    %592 = arith.addf %588, %591 : vector<6x128xf32>
    %c194 = arith.constant 194 : index
    %593 = memref.load %arg2[%c194] : memref<361xf32, #tpu.memory_space<smem>>
    %594 = vector.broadcast %593 : f32 to vector<6x128xf32>
    %595 = arith.mulf %383, %594 : vector<6x128xf32>
    %596 = arith.addf %592, %595 : vector<6x128xf32>
    %c201 = arith.constant 201 : index
    %597 = memref.load %arg2[%c201] : memref<361xf32, #tpu.memory_space<smem>>
    %598 = vector.broadcast %597 : f32 to vector<6x128xf32>
    %599 = arith.mulf %384, %598 : vector<6x128xf32>
    %600 = arith.addf %596, %599 : vector<6x128xf32>
    %c202 = arith.constant 202 : index
    %601 = memref.load %arg2[%c202] : memref<361xf32, #tpu.memory_space<smem>>
    %602 = vector.broadcast %601 : f32 to vector<6x128xf32>
    %603 = arith.mulf %385, %602 : vector<6x128xf32>
    %604 = arith.addf %600, %603 : vector<6x128xf32>
    %c203 = arith.constant 203 : index
    %605 = memref.load %arg2[%c203] : memref<361xf32, #tpu.memory_space<smem>>
    %606 = vector.broadcast %605 : f32 to vector<6x128xf32>
    %607 = arith.mulf %386, %606 : vector<6x128xf32>
    %608 = arith.addf %604, %607 : vector<6x128xf32>
    %c210 = arith.constant 210 : index
    %609 = memref.load %arg2[%c210] : memref<361xf32, #tpu.memory_space<smem>>
    %610 = vector.broadcast %609 : f32 to vector<6x128xf32>
    %611 = arith.mulf %387, %610 : vector<6x128xf32>
    %612 = arith.addf %608, %611 : vector<6x128xf32>
    %c211 = arith.constant 211 : index
    %613 = memref.load %arg2[%c211] : memref<361xf32, #tpu.memory_space<smem>>
    %614 = vector.broadcast %613 : f32 to vector<6x128xf32>
    %615 = arith.mulf %388, %614 : vector<6x128xf32>
    %616 = arith.addf %612, %615 : vector<6x128xf32>
    %c212 = arith.constant 212 : index
    %617 = memref.load %arg2[%c212] : memref<361xf32, #tpu.memory_space<smem>>
    %618 = vector.broadcast %617 : f32 to vector<6x128xf32>
    %619 = arith.mulf %389, %618 : vector<6x128xf32>
    %620 = arith.addf %616, %619 : vector<6x128xf32>
    %c219 = arith.constant 219 : index
    %621 = memref.load %arg2[%c219] : memref<361xf32, #tpu.memory_space<smem>>
    %622 = vector.broadcast %621 : f32 to vector<6x128xf32>
    %623 = arith.mulf %390, %622 : vector<6x128xf32>
    %624 = arith.addf %620, %623 : vector<6x128xf32>
    %c220 = arith.constant 220 : index
    %625 = memref.load %arg2[%c220] : memref<361xf32, #tpu.memory_space<smem>>
    %626 = vector.broadcast %625 : f32 to vector<6x128xf32>
    %627 = arith.mulf %391, %626 : vector<6x128xf32>
    %628 = arith.addf %624, %627 : vector<6x128xf32>
    %c221 = arith.constant 221 : index
    %629 = memref.load %arg2[%c221] : memref<361xf32, #tpu.memory_space<smem>>
    %630 = vector.broadcast %629 : f32 to vector<6x128xf32>
    %631 = arith.mulf %392, %630 : vector<6x128xf32>
    %632 = arith.addf %628, %631 : vector<6x128xf32>
    %c228 = arith.constant 228 : index
    %633 = memref.load %arg2[%c228] : memref<361xf32, #tpu.memory_space<smem>>
    %634 = vector.broadcast %633 : f32 to vector<6x128xf32>
    %635 = arith.mulf %381, %634 : vector<6x128xf32>
    %636 = arith.addf %376, %635 : vector<6x128xf32>
    %c229 = arith.constant 229 : index
    %637 = memref.load %arg2[%c229] : memref<361xf32, #tpu.memory_space<smem>>
    %638 = vector.broadcast %637 : f32 to vector<6x128xf32>
    %639 = arith.mulf %382, %638 : vector<6x128xf32>
    %640 = arith.addf %636, %639 : vector<6x128xf32>
    %c230 = arith.constant 230 : index
    %641 = memref.load %arg2[%c230] : memref<361xf32, #tpu.memory_space<smem>>
    %642 = vector.broadcast %641 : f32 to vector<6x128xf32>
    %643 = arith.mulf %383, %642 : vector<6x128xf32>
    %644 = arith.addf %640, %643 : vector<6x128xf32>
    %c237 = arith.constant 237 : index
    %645 = memref.load %arg2[%c237] : memref<361xf32, #tpu.memory_space<smem>>
    %646 = vector.broadcast %645 : f32 to vector<6x128xf32>
    %647 = arith.mulf %384, %646 : vector<6x128xf32>
    %648 = arith.addf %644, %647 : vector<6x128xf32>
    %c238 = arith.constant 238 : index
    %649 = memref.load %arg2[%c238] : memref<361xf32, #tpu.memory_space<smem>>
    %650 = vector.broadcast %649 : f32 to vector<6x128xf32>
    %651 = arith.mulf %385, %650 : vector<6x128xf32>
    %652 = arith.addf %648, %651 : vector<6x128xf32>
    %c239 = arith.constant 239 : index
    %653 = memref.load %arg2[%c239] : memref<361xf32, #tpu.memory_space<smem>>
    %654 = vector.broadcast %653 : f32 to vector<6x128xf32>
    %655 = arith.mulf %386, %654 : vector<6x128xf32>
    %656 = arith.addf %652, %655 : vector<6x128xf32>
    %c246 = arith.constant 246 : index
    %657 = memref.load %arg2[%c246] : memref<361xf32, #tpu.memory_space<smem>>
    %658 = vector.broadcast %657 : f32 to vector<6x128xf32>
    %659 = arith.mulf %387, %658 : vector<6x128xf32>
    %660 = arith.addf %656, %659 : vector<6x128xf32>
    %c247 = arith.constant 247 : index
    %661 = memref.load %arg2[%c247] : memref<361xf32, #tpu.memory_space<smem>>
    %662 = vector.broadcast %661 : f32 to vector<6x128xf32>
    %663 = arith.mulf %388, %662 : vector<6x128xf32>
    %664 = arith.addf %660, %663 : vector<6x128xf32>
    %c248 = arith.constant 248 : index
    %665 = memref.load %arg2[%c248] : memref<361xf32, #tpu.memory_space<smem>>
    %666 = vector.broadcast %665 : f32 to vector<6x128xf32>
    %667 = arith.mulf %389, %666 : vector<6x128xf32>
    %668 = arith.addf %664, %667 : vector<6x128xf32>
    %c255 = arith.constant 255 : index
    %669 = memref.load %arg2[%c255] : memref<361xf32, #tpu.memory_space<smem>>
    %670 = vector.broadcast %669 : f32 to vector<6x128xf32>
    %671 = arith.mulf %390, %670 : vector<6x128xf32>
    %672 = arith.addf %668, %671 : vector<6x128xf32>
    %c256 = arith.constant 256 : index
    %673 = memref.load %arg2[%c256] : memref<361xf32, #tpu.memory_space<smem>>
    %674 = vector.broadcast %673 : f32 to vector<6x128xf32>
    %675 = arith.mulf %391, %674 : vector<6x128xf32>
    %676 = arith.addf %672, %675 : vector<6x128xf32>
    %c257 = arith.constant 257 : index
    %677 = memref.load %arg2[%c257] : memref<361xf32, #tpu.memory_space<smem>>
    %678 = vector.broadcast %677 : f32 to vector<6x128xf32>
    %679 = arith.mulf %392, %678 : vector<6x128xf32>
    %680 = arith.addf %676, %679 : vector<6x128xf32>
    %c264 = arith.constant 264 : index
    %681 = memref.load %arg2[%c264] : memref<361xf32, #tpu.memory_space<smem>>
    %682 = vector.broadcast %681 : f32 to vector<6x128xf32>
    %683 = arith.mulf %381, %682 : vector<6x128xf32>
    %684 = arith.addf %378, %683 : vector<6x128xf32>
    %c265 = arith.constant 265 : index
    %685 = memref.load %arg2[%c265] : memref<361xf32, #tpu.memory_space<smem>>
    %686 = vector.broadcast %685 : f32 to vector<6x128xf32>
    %687 = arith.mulf %382, %686 : vector<6x128xf32>
    %688 = arith.addf %684, %687 : vector<6x128xf32>
    %c266 = arith.constant 266 : index
    %689 = memref.load %arg2[%c266] : memref<361xf32, #tpu.memory_space<smem>>
    %690 = vector.broadcast %689 : f32 to vector<6x128xf32>
    %691 = arith.mulf %383, %690 : vector<6x128xf32>
    %692 = arith.addf %688, %691 : vector<6x128xf32>
    %c273 = arith.constant 273 : index
    %693 = memref.load %arg2[%c273] : memref<361xf32, #tpu.memory_space<smem>>
    %694 = vector.broadcast %693 : f32 to vector<6x128xf32>
    %695 = arith.mulf %384, %694 : vector<6x128xf32>
    %696 = arith.addf %692, %695 : vector<6x128xf32>
    %c274 = arith.constant 274 : index
    %697 = memref.load %arg2[%c274] : memref<361xf32, #tpu.memory_space<smem>>
    %698 = vector.broadcast %697 : f32 to vector<6x128xf32>
    %699 = arith.mulf %385, %698 : vector<6x128xf32>
    %700 = arith.addf %696, %699 : vector<6x128xf32>
    %c275 = arith.constant 275 : index
    %701 = memref.load %arg2[%c275] : memref<361xf32, #tpu.memory_space<smem>>
    %702 = vector.broadcast %701 : f32 to vector<6x128xf32>
    %703 = arith.mulf %386, %702 : vector<6x128xf32>
    %704 = arith.addf %700, %703 : vector<6x128xf32>
    %c282 = arith.constant 282 : index
    %705 = memref.load %arg2[%c282] : memref<361xf32, #tpu.memory_space<smem>>
    %706 = vector.broadcast %705 : f32 to vector<6x128xf32>
    %707 = arith.mulf %387, %706 : vector<6x128xf32>
    %708 = arith.addf %704, %707 : vector<6x128xf32>
    %c283 = arith.constant 283 : index
    %709 = memref.load %arg2[%c283] : memref<361xf32, #tpu.memory_space<smem>>
    %710 = vector.broadcast %709 : f32 to vector<6x128xf32>
    %711 = arith.mulf %388, %710 : vector<6x128xf32>
    %712 = arith.addf %708, %711 : vector<6x128xf32>
    %c284 = arith.constant 284 : index
    %713 = memref.load %arg2[%c284] : memref<361xf32, #tpu.memory_space<smem>>
    %714 = vector.broadcast %713 : f32 to vector<6x128xf32>
    %715 = arith.mulf %389, %714 : vector<6x128xf32>
    %716 = arith.addf %712, %715 : vector<6x128xf32>
    %c291 = arith.constant 291 : index
    %717 = memref.load %arg2[%c291] : memref<361xf32, #tpu.memory_space<smem>>
    %718 = vector.broadcast %717 : f32 to vector<6x128xf32>
    %719 = arith.mulf %390, %718 : vector<6x128xf32>
    %720 = arith.addf %716, %719 : vector<6x128xf32>
    %c292 = arith.constant 292 : index
    %721 = memref.load %arg2[%c292] : memref<361xf32, #tpu.memory_space<smem>>
    %722 = vector.broadcast %721 : f32 to vector<6x128xf32>
    %723 = arith.mulf %391, %722 : vector<6x128xf32>
    %724 = arith.addf %720, %723 : vector<6x128xf32>
    %c293 = arith.constant 293 : index
    %725 = memref.load %arg2[%c293] : memref<361xf32, #tpu.memory_space<smem>>
    %726 = vector.broadcast %725 : f32 to vector<6x128xf32>
    %727 = arith.mulf %392, %726 : vector<6x128xf32>
    %728 = arith.addf %724, %727 : vector<6x128xf32>
    %c300 = arith.constant 300 : index
    %729 = memref.load %arg2[%c300] : memref<361xf32, #tpu.memory_space<smem>>
    %730 = vector.broadcast %729 : f32 to vector<6x128xf32>
    %731 = arith.mulf %381, %730 : vector<6x128xf32>
    %732 = arith.addf %380, %731 : vector<6x128xf32>
    %c301 = arith.constant 301 : index
    %733 = memref.load %arg2[%c301] : memref<361xf32, #tpu.memory_space<smem>>
    %734 = vector.broadcast %733 : f32 to vector<6x128xf32>
    %735 = arith.mulf %382, %734 : vector<6x128xf32>
    %736 = arith.addf %732, %735 : vector<6x128xf32>
    %c302 = arith.constant 302 : index
    %737 = memref.load %arg2[%c302] : memref<361xf32, #tpu.memory_space<smem>>
    %738 = vector.broadcast %737 : f32 to vector<6x128xf32>
    %739 = arith.mulf %383, %738 : vector<6x128xf32>
    %740 = arith.addf %736, %739 : vector<6x128xf32>
    %c309 = arith.constant 309 : index
    %741 = memref.load %arg2[%c309] : memref<361xf32, #tpu.memory_space<smem>>
    %742 = vector.broadcast %741 : f32 to vector<6x128xf32>
    %743 = arith.mulf %384, %742 : vector<6x128xf32>
    %744 = arith.addf %740, %743 : vector<6x128xf32>
    %c310 = arith.constant 310 : index
    %745 = memref.load %arg2[%c310] : memref<361xf32, #tpu.memory_space<smem>>
    %746 = vector.broadcast %745 : f32 to vector<6x128xf32>
    %747 = arith.mulf %385, %746 : vector<6x128xf32>
    %748 = arith.addf %744, %747 : vector<6x128xf32>
    %c311 = arith.constant 311 : index
    %749 = memref.load %arg2[%c311] : memref<361xf32, #tpu.memory_space<smem>>
    %750 = vector.broadcast %749 : f32 to vector<6x128xf32>
    %751 = arith.mulf %386, %750 : vector<6x128xf32>
    %752 = arith.addf %748, %751 : vector<6x128xf32>
    %c318 = arith.constant 318 : index
    %753 = memref.load %arg2[%c318] : memref<361xf32, #tpu.memory_space<smem>>
    %754 = vector.broadcast %753 : f32 to vector<6x128xf32>
    %755 = arith.mulf %387, %754 : vector<6x128xf32>
    %756 = arith.addf %752, %755 : vector<6x128xf32>
    %c319 = arith.constant 319 : index
    %757 = memref.load %arg2[%c319] : memref<361xf32, #tpu.memory_space<smem>>
    %758 = vector.broadcast %757 : f32 to vector<6x128xf32>
    %759 = arith.mulf %388, %758 : vector<6x128xf32>
    %760 = arith.addf %756, %759 : vector<6x128xf32>
    %c320 = arith.constant 320 : index
    %761 = memref.load %arg2[%c320] : memref<361xf32, #tpu.memory_space<smem>>
    %762 = vector.broadcast %761 : f32 to vector<6x128xf32>
    %763 = arith.mulf %389, %762 : vector<6x128xf32>
    %764 = arith.addf %760, %763 : vector<6x128xf32>
    %c327 = arith.constant 327 : index
    %765 = memref.load %arg2[%c327] : memref<361xf32, #tpu.memory_space<smem>>
    %766 = vector.broadcast %765 : f32 to vector<6x128xf32>
    %767 = arith.mulf %390, %766 : vector<6x128xf32>
    %768 = arith.addf %764, %767 : vector<6x128xf32>
    %c328 = arith.constant 328 : index
    %769 = memref.load %arg2[%c328] : memref<361xf32, #tpu.memory_space<smem>>
    %770 = vector.broadcast %769 : f32 to vector<6x128xf32>
    %771 = arith.mulf %391, %770 : vector<6x128xf32>
    %772 = arith.addf %768, %771 : vector<6x128xf32>
    %c329 = arith.constant 329 : index
    %773 = memref.load %arg2[%c329] : memref<361xf32, #tpu.memory_space<smem>>
    %774 = vector.broadcast %773 : f32 to vector<6x128xf32>
    %775 = arith.mulf %392, %774 : vector<6x128xf32>
    %776 = arith.addf %772, %775 : vector<6x128xf32>
    %777 = vector.extract_strided_slice %331 {offsets = [1, 0], sizes = [6, 128], strides = [1, 1]} : vector<8x128xf32> to vector<6x128xf32>
    %778 = vector.extract_strided_slice %335 {offsets = [1, 0], sizes = [6, 128], strides = [1, 1]} : vector<8x128xf32> to vector<6x128xf32>
    %779 = vector.extract_strided_slice %336 {offsets = [1, 0], sizes = [6, 128], strides = [1, 1]} : vector<8x128xf32> to vector<6x128xf32>
    %780 = vector.extract_strided_slice %332 {offsets = [1, 0], sizes = [6, 128], strides = [1, 1]} : vector<8x128xf32> to vector<6x128xf32>
    %781 = vector.extract_strided_slice %337 {offsets = [1, 0], sizes = [6, 128], strides = [1, 1]} : vector<8x128xf32> to vector<6x128xf32>
    %782 = vector.extract_strided_slice %338 {offsets = [1, 0], sizes = [6, 128], strides = [1, 1]} : vector<8x128xf32> to vector<6x128xf32>
    %783 = vector.extract_strided_slice %333 {offsets = [1, 0], sizes = [6, 128], strides = [1, 1]} : vector<8x128xf32> to vector<6x128xf32>
    %784 = vector.extract_strided_slice %339 {offsets = [1, 0], sizes = [6, 128], strides = [1, 1]} : vector<8x128xf32> to vector<6x128xf32>
    %785 = vector.extract_strided_slice %340 {offsets = [1, 0], sizes = [6, 128], strides = [1, 1]} : vector<8x128xf32> to vector<6x128xf32>
    %786 = vector.extract_strided_slice %334 {offsets = [1, 0], sizes = [6, 128], strides = [1, 1]} : vector<8x128xf32> to vector<6x128xf32>
    %787 = vector.extract_strided_slice %341 {offsets = [1, 0], sizes = [6, 128], strides = [1, 1]} : vector<8x128xf32> to vector<6x128xf32>
    %788 = vector.extract_strided_slice %342 {offsets = [1, 0], sizes = [6, 128], strides = [1, 1]} : vector<8x128xf32> to vector<6x128xf32>
    %c51 = arith.constant 51 : index
    %789 = memref.load %arg2[%c51] : memref<361xf32, #tpu.memory_space<smem>>
    %790 = vector.broadcast %789 : f32 to vector<6x128xf32>
    %791 = arith.mulf %777, %790 : vector<6x128xf32>
    %792 = arith.addf %440, %791 : vector<6x128xf32>
    %c52 = arith.constant 52 : index
    %793 = memref.load %arg2[%c52] : memref<361xf32, #tpu.memory_space<smem>>
    %794 = vector.broadcast %793 : f32 to vector<6x128xf32>
    %795 = arith.mulf %778, %794 : vector<6x128xf32>
    %796 = arith.addf %792, %795 : vector<6x128xf32>
    %c53 = arith.constant 53 : index
    %797 = memref.load %arg2[%c53] : memref<361xf32, #tpu.memory_space<smem>>
    %798 = vector.broadcast %797 : f32 to vector<6x128xf32>
    %799 = arith.mulf %779, %798 : vector<6x128xf32>
    %800 = arith.addf %796, %799 : vector<6x128xf32>
    %c60 = arith.constant 60 : index
    %801 = memref.load %arg2[%c60] : memref<361xf32, #tpu.memory_space<smem>>
    %802 = vector.broadcast %801 : f32 to vector<6x128xf32>
    %803 = arith.mulf %780, %802 : vector<6x128xf32>
    %804 = arith.addf %800, %803 : vector<6x128xf32>
    %c61 = arith.constant 61 : index
    %805 = memref.load %arg2[%c61] : memref<361xf32, #tpu.memory_space<smem>>
    %806 = vector.broadcast %805 : f32 to vector<6x128xf32>
    %807 = arith.mulf %781, %806 : vector<6x128xf32>
    %808 = arith.addf %804, %807 : vector<6x128xf32>
    %c62 = arith.constant 62 : index
    %809 = memref.load %arg2[%c62] : memref<361xf32, #tpu.memory_space<smem>>
    %810 = vector.broadcast %809 : f32 to vector<6x128xf32>
    %811 = arith.mulf %782, %810 : vector<6x128xf32>
    %812 = arith.addf %808, %811 : vector<6x128xf32>
    %c69 = arith.constant 69 : index
    %813 = memref.load %arg2[%c69] : memref<361xf32, #tpu.memory_space<smem>>
    %814 = vector.broadcast %813 : f32 to vector<6x128xf32>
    %815 = arith.mulf %783, %814 : vector<6x128xf32>
    %816 = arith.addf %812, %815 : vector<6x128xf32>
    %c70 = arith.constant 70 : index
    %817 = memref.load %arg2[%c70] : memref<361xf32, #tpu.memory_space<smem>>
    %818 = vector.broadcast %817 : f32 to vector<6x128xf32>
    %819 = arith.mulf %784, %818 : vector<6x128xf32>
    %820 = arith.addf %816, %819 : vector<6x128xf32>
    %c71 = arith.constant 71 : index
    %821 = memref.load %arg2[%c71] : memref<361xf32, #tpu.memory_space<smem>>
    %822 = vector.broadcast %821 : f32 to vector<6x128xf32>
    %823 = arith.mulf %785, %822 : vector<6x128xf32>
    %824 = arith.addf %820, %823 : vector<6x128xf32>
    %c78 = arith.constant 78 : index
    %825 = memref.load %arg2[%c78] : memref<361xf32, #tpu.memory_space<smem>>
    %826 = vector.broadcast %825 : f32 to vector<6x128xf32>
    %827 = arith.mulf %786, %826 : vector<6x128xf32>
    %828 = arith.addf %824, %827 : vector<6x128xf32>
    %c79 = arith.constant 79 : index
    %829 = memref.load %arg2[%c79] : memref<361xf32, #tpu.memory_space<smem>>
    %830 = vector.broadcast %829 : f32 to vector<6x128xf32>
    %831 = arith.mulf %787, %830 : vector<6x128xf32>
    %832 = arith.addf %828, %831 : vector<6x128xf32>
    %c80 = arith.constant 80 : index
    %833 = memref.load %arg2[%c80] : memref<361xf32, #tpu.memory_space<smem>>
    %834 = vector.broadcast %833 : f32 to vector<6x128xf32>
    %835 = arith.mulf %788, %834 : vector<6x128xf32>
    %836 = arith.addf %832, %835 : vector<6x128xf32>
    %c87 = arith.constant 87 : index
    %837 = memref.load %arg2[%c87] : memref<361xf32, #tpu.memory_space<smem>>
    %838 = vector.broadcast %837 : f32 to vector<6x128xf32>
    %839 = arith.mulf %777, %838 : vector<6x128xf32>
    %840 = arith.addf %488, %839 : vector<6x128xf32>
    %c88 = arith.constant 88 : index
    %841 = memref.load %arg2[%c88] : memref<361xf32, #tpu.memory_space<smem>>
    %842 = vector.broadcast %841 : f32 to vector<6x128xf32>
    %843 = arith.mulf %778, %842 : vector<6x128xf32>
    %844 = arith.addf %840, %843 : vector<6x128xf32>
    %c89 = arith.constant 89 : index
    %845 = memref.load %arg2[%c89] : memref<361xf32, #tpu.memory_space<smem>>
    %846 = vector.broadcast %845 : f32 to vector<6x128xf32>
    %847 = arith.mulf %779, %846 : vector<6x128xf32>
    %848 = arith.addf %844, %847 : vector<6x128xf32>
    %c96 = arith.constant 96 : index
    %849 = memref.load %arg2[%c96] : memref<361xf32, #tpu.memory_space<smem>>
    %850 = vector.broadcast %849 : f32 to vector<6x128xf32>
    %851 = arith.mulf %780, %850 : vector<6x128xf32>
    %852 = arith.addf %848, %851 : vector<6x128xf32>
    %c97 = arith.constant 97 : index
    %853 = memref.load %arg2[%c97] : memref<361xf32, #tpu.memory_space<smem>>
    %854 = vector.broadcast %853 : f32 to vector<6x128xf32>
    %855 = arith.mulf %781, %854 : vector<6x128xf32>
    %856 = arith.addf %852, %855 : vector<6x128xf32>
    %c98 = arith.constant 98 : index
    %857 = memref.load %arg2[%c98] : memref<361xf32, #tpu.memory_space<smem>>
    %858 = vector.broadcast %857 : f32 to vector<6x128xf32>
    %859 = arith.mulf %782, %858 : vector<6x128xf32>
    %860 = arith.addf %856, %859 : vector<6x128xf32>
    %c105 = arith.constant 105 : index
    %861 = memref.load %arg2[%c105] : memref<361xf32, #tpu.memory_space<smem>>
    %862 = vector.broadcast %861 : f32 to vector<6x128xf32>
    %863 = arith.mulf %783, %862 : vector<6x128xf32>
    %864 = arith.addf %860, %863 : vector<6x128xf32>
    %c106 = arith.constant 106 : index
    %865 = memref.load %arg2[%c106] : memref<361xf32, #tpu.memory_space<smem>>
    %866 = vector.broadcast %865 : f32 to vector<6x128xf32>
    %867 = arith.mulf %784, %866 : vector<6x128xf32>
    %868 = arith.addf %864, %867 : vector<6x128xf32>
    %c107 = arith.constant 107 : index
    %869 = memref.load %arg2[%c107] : memref<361xf32, #tpu.memory_space<smem>>
    %870 = vector.broadcast %869 : f32 to vector<6x128xf32>
    %871 = arith.mulf %785, %870 : vector<6x128xf32>
    %872 = arith.addf %868, %871 : vector<6x128xf32>
    %c114 = arith.constant 114 : index
    %873 = memref.load %arg2[%c114] : memref<361xf32, #tpu.memory_space<smem>>
    %874 = vector.broadcast %873 : f32 to vector<6x128xf32>
    %875 = arith.mulf %786, %874 : vector<6x128xf32>
    %876 = arith.addf %872, %875 : vector<6x128xf32>
    %c115 = arith.constant 115 : index
    %877 = memref.load %arg2[%c115] : memref<361xf32, #tpu.memory_space<smem>>
    %878 = vector.broadcast %877 : f32 to vector<6x128xf32>
    %879 = arith.mulf %787, %878 : vector<6x128xf32>
    %880 = arith.addf %876, %879 : vector<6x128xf32>
    %c116 = arith.constant 116 : index
    %881 = memref.load %arg2[%c116] : memref<361xf32, #tpu.memory_space<smem>>
    %882 = vector.broadcast %881 : f32 to vector<6x128xf32>
    %883 = arith.mulf %788, %882 : vector<6x128xf32>
    %884 = arith.addf %880, %883 : vector<6x128xf32>
    %c123 = arith.constant 123 : index
    %885 = memref.load %arg2[%c123] : memref<361xf32, #tpu.memory_space<smem>>
    %886 = vector.broadcast %885 : f32 to vector<6x128xf32>
    %887 = arith.mulf %777, %886 : vector<6x128xf32>
    %888 = arith.addf %536, %887 : vector<6x128xf32>
    %c124 = arith.constant 124 : index
    %889 = memref.load %arg2[%c124] : memref<361xf32, #tpu.memory_space<smem>>
    %890 = vector.broadcast %889 : f32 to vector<6x128xf32>
    %891 = arith.mulf %778, %890 : vector<6x128xf32>
    %892 = arith.addf %888, %891 : vector<6x128xf32>
    %c125 = arith.constant 125 : index
    %893 = memref.load %arg2[%c125] : memref<361xf32, #tpu.memory_space<smem>>
    %894 = vector.broadcast %893 : f32 to vector<6x128xf32>
    %895 = arith.mulf %779, %894 : vector<6x128xf32>
    %896 = arith.addf %892, %895 : vector<6x128xf32>
    %c132 = arith.constant 132 : index
    %897 = memref.load %arg2[%c132] : memref<361xf32, #tpu.memory_space<smem>>
    %898 = vector.broadcast %897 : f32 to vector<6x128xf32>
    %899 = arith.mulf %780, %898 : vector<6x128xf32>
    %900 = arith.addf %896, %899 : vector<6x128xf32>
    %c133 = arith.constant 133 : index
    %901 = memref.load %arg2[%c133] : memref<361xf32, #tpu.memory_space<smem>>
    %902 = vector.broadcast %901 : f32 to vector<6x128xf32>
    %903 = arith.mulf %781, %902 : vector<6x128xf32>
    %904 = arith.addf %900, %903 : vector<6x128xf32>
    %c134 = arith.constant 134 : index
    %905 = memref.load %arg2[%c134] : memref<361xf32, #tpu.memory_space<smem>>
    %906 = vector.broadcast %905 : f32 to vector<6x128xf32>
    %907 = arith.mulf %782, %906 : vector<6x128xf32>
    %908 = arith.addf %904, %907 : vector<6x128xf32>
    %c141 = arith.constant 141 : index
    %909 = memref.load %arg2[%c141] : memref<361xf32, #tpu.memory_space<smem>>
    %910 = vector.broadcast %909 : f32 to vector<6x128xf32>
    %911 = arith.mulf %783, %910 : vector<6x128xf32>
    %912 = arith.addf %908, %911 : vector<6x128xf32>
    %c142 = arith.constant 142 : index
    %913 = memref.load %arg2[%c142] : memref<361xf32, #tpu.memory_space<smem>>
    %914 = vector.broadcast %913 : f32 to vector<6x128xf32>
    %915 = arith.mulf %784, %914 : vector<6x128xf32>
    %916 = arith.addf %912, %915 : vector<6x128xf32>
    %c143 = arith.constant 143 : index
    %917 = memref.load %arg2[%c143] : memref<361xf32, #tpu.memory_space<smem>>
    %918 = vector.broadcast %917 : f32 to vector<6x128xf32>
    %919 = arith.mulf %785, %918 : vector<6x128xf32>
    %920 = arith.addf %916, %919 : vector<6x128xf32>
    %c150 = arith.constant 150 : index
    %921 = memref.load %arg2[%c150] : memref<361xf32, #tpu.memory_space<smem>>
    %922 = vector.broadcast %921 : f32 to vector<6x128xf32>
    %923 = arith.mulf %786, %922 : vector<6x128xf32>
    %924 = arith.addf %920, %923 : vector<6x128xf32>
    %c151 = arith.constant 151 : index
    %925 = memref.load %arg2[%c151] : memref<361xf32, #tpu.memory_space<smem>>
    %926 = vector.broadcast %925 : f32 to vector<6x128xf32>
    %927 = arith.mulf %787, %926 : vector<6x128xf32>
    %928 = arith.addf %924, %927 : vector<6x128xf32>
    %c152 = arith.constant 152 : index
    %929 = memref.load %arg2[%c152] : memref<361xf32, #tpu.memory_space<smem>>
    %930 = vector.broadcast %929 : f32 to vector<6x128xf32>
    %931 = arith.mulf %788, %930 : vector<6x128xf32>
    %932 = arith.addf %928, %931 : vector<6x128xf32>
    %c159 = arith.constant 159 : index
    %933 = memref.load %arg2[%c159] : memref<361xf32, #tpu.memory_space<smem>>
    %934 = vector.broadcast %933 : f32 to vector<6x128xf32>
    %935 = arith.mulf %777, %934 : vector<6x128xf32>
    %936 = arith.addf %584, %935 : vector<6x128xf32>
    %c160 = arith.constant 160 : index
    %937 = memref.load %arg2[%c160] : memref<361xf32, #tpu.memory_space<smem>>
    %938 = vector.broadcast %937 : f32 to vector<6x128xf32>
    %939 = arith.mulf %778, %938 : vector<6x128xf32>
    %940 = arith.addf %936, %939 : vector<6x128xf32>
    %c161 = arith.constant 161 : index
    %941 = memref.load %arg2[%c161] : memref<361xf32, #tpu.memory_space<smem>>
    %942 = vector.broadcast %941 : f32 to vector<6x128xf32>
    %943 = arith.mulf %779, %942 : vector<6x128xf32>
    %944 = arith.addf %940, %943 : vector<6x128xf32>
    %c168 = arith.constant 168 : index
    %945 = memref.load %arg2[%c168] : memref<361xf32, #tpu.memory_space<smem>>
    %946 = vector.broadcast %945 : f32 to vector<6x128xf32>
    %947 = arith.mulf %780, %946 : vector<6x128xf32>
    %948 = arith.addf %944, %947 : vector<6x128xf32>
    %c169 = arith.constant 169 : index
    %949 = memref.load %arg2[%c169] : memref<361xf32, #tpu.memory_space<smem>>
    %950 = vector.broadcast %949 : f32 to vector<6x128xf32>
    %951 = arith.mulf %781, %950 : vector<6x128xf32>
    %952 = arith.addf %948, %951 : vector<6x128xf32>
    %c170 = arith.constant 170 : index
    %953 = memref.load %arg2[%c170] : memref<361xf32, #tpu.memory_space<smem>>
    %954 = vector.broadcast %953 : f32 to vector<6x128xf32>
    %955 = arith.mulf %782, %954 : vector<6x128xf32>
    %956 = arith.addf %952, %955 : vector<6x128xf32>
    %c177 = arith.constant 177 : index
    %957 = memref.load %arg2[%c177] : memref<361xf32, #tpu.memory_space<smem>>
    %958 = vector.broadcast %957 : f32 to vector<6x128xf32>
    %959 = arith.mulf %783, %958 : vector<6x128xf32>
    %960 = arith.addf %956, %959 : vector<6x128xf32>
    %c178 = arith.constant 178 : index
    %961 = memref.load %arg2[%c178] : memref<361xf32, #tpu.memory_space<smem>>
    %962 = vector.broadcast %961 : f32 to vector<6x128xf32>
    %963 = arith.mulf %784, %962 : vector<6x128xf32>
    %964 = arith.addf %960, %963 : vector<6x128xf32>
    %c179 = arith.constant 179 : index
    %965 = memref.load %arg2[%c179] : memref<361xf32, #tpu.memory_space<smem>>
    %966 = vector.broadcast %965 : f32 to vector<6x128xf32>
    %967 = arith.mulf %785, %966 : vector<6x128xf32>
    %968 = arith.addf %964, %967 : vector<6x128xf32>
    %c186 = arith.constant 186 : index
    %969 = memref.load %arg2[%c186] : memref<361xf32, #tpu.memory_space<smem>>
    %970 = vector.broadcast %969 : f32 to vector<6x128xf32>
    %971 = arith.mulf %786, %970 : vector<6x128xf32>
    %972 = arith.addf %968, %971 : vector<6x128xf32>
    %c187 = arith.constant 187 : index
    %973 = memref.load %arg2[%c187] : memref<361xf32, #tpu.memory_space<smem>>
    %974 = vector.broadcast %973 : f32 to vector<6x128xf32>
    %975 = arith.mulf %787, %974 : vector<6x128xf32>
    %976 = arith.addf %972, %975 : vector<6x128xf32>
    %c188 = arith.constant 188 : index
    %977 = memref.load %arg2[%c188] : memref<361xf32, #tpu.memory_space<smem>>
    %978 = vector.broadcast %977 : f32 to vector<6x128xf32>
    %979 = arith.mulf %788, %978 : vector<6x128xf32>
    %980 = arith.addf %976, %979 : vector<6x128xf32>
    %c195 = arith.constant 195 : index
    %981 = memref.load %arg2[%c195] : memref<361xf32, #tpu.memory_space<smem>>
    %982 = vector.broadcast %981 : f32 to vector<6x128xf32>
    %983 = arith.mulf %777, %982 : vector<6x128xf32>
    %984 = arith.addf %632, %983 : vector<6x128xf32>
    %c196 = arith.constant 196 : index
    %985 = memref.load %arg2[%c196] : memref<361xf32, #tpu.memory_space<smem>>
    %986 = vector.broadcast %985 : f32 to vector<6x128xf32>
    %987 = arith.mulf %778, %986 : vector<6x128xf32>
    %988 = arith.addf %984, %987 : vector<6x128xf32>
    %c197 = arith.constant 197 : index
    %989 = memref.load %arg2[%c197] : memref<361xf32, #tpu.memory_space<smem>>
    %990 = vector.broadcast %989 : f32 to vector<6x128xf32>
    %991 = arith.mulf %779, %990 : vector<6x128xf32>
    %992 = arith.addf %988, %991 : vector<6x128xf32>
    %c204 = arith.constant 204 : index
    %993 = memref.load %arg2[%c204] : memref<361xf32, #tpu.memory_space<smem>>
    %994 = vector.broadcast %993 : f32 to vector<6x128xf32>
    %995 = arith.mulf %780, %994 : vector<6x128xf32>
    %996 = arith.addf %992, %995 : vector<6x128xf32>
    %c205 = arith.constant 205 : index
    %997 = memref.load %arg2[%c205] : memref<361xf32, #tpu.memory_space<smem>>
    %998 = vector.broadcast %997 : f32 to vector<6x128xf32>
    %999 = arith.mulf %781, %998 : vector<6x128xf32>
    %1000 = arith.addf %996, %999 : vector<6x128xf32>
    %c206 = arith.constant 206 : index
    %1001 = memref.load %arg2[%c206] : memref<361xf32, #tpu.memory_space<smem>>
    %1002 = vector.broadcast %1001 : f32 to vector<6x128xf32>
    %1003 = arith.mulf %782, %1002 : vector<6x128xf32>
    %1004 = arith.addf %1000, %1003 : vector<6x128xf32>
    %c213 = arith.constant 213 : index
    %1005 = memref.load %arg2[%c213] : memref<361xf32, #tpu.memory_space<smem>>
    %1006 = vector.broadcast %1005 : f32 to vector<6x128xf32>
    %1007 = arith.mulf %783, %1006 : vector<6x128xf32>
    %1008 = arith.addf %1004, %1007 : vector<6x128xf32>
    %c214 = arith.constant 214 : index
    %1009 = memref.load %arg2[%c214] : memref<361xf32, #tpu.memory_space<smem>>
    %1010 = vector.broadcast %1009 : f32 to vector<6x128xf32>
    %1011 = arith.mulf %784, %1010 : vector<6x128xf32>
    %1012 = arith.addf %1008, %1011 : vector<6x128xf32>
    %c215 = arith.constant 215 : index
    %1013 = memref.load %arg2[%c215] : memref<361xf32, #tpu.memory_space<smem>>
    %1014 = vector.broadcast %1013 : f32 to vector<6x128xf32>
    %1015 = arith.mulf %785, %1014 : vector<6x128xf32>
    %1016 = arith.addf %1012, %1015 : vector<6x128xf32>
    %c222 = arith.constant 222 : index
    %1017 = memref.load %arg2[%c222] : memref<361xf32, #tpu.memory_space<smem>>
    %1018 = vector.broadcast %1017 : f32 to vector<6x128xf32>
    %1019 = arith.mulf %786, %1018 : vector<6x128xf32>
    %1020 = arith.addf %1016, %1019 : vector<6x128xf32>
    %c223 = arith.constant 223 : index
    %1021 = memref.load %arg2[%c223] : memref<361xf32, #tpu.memory_space<smem>>
    %1022 = vector.broadcast %1021 : f32 to vector<6x128xf32>
    %1023 = arith.mulf %787, %1022 : vector<6x128xf32>
    %1024 = arith.addf %1020, %1023 : vector<6x128xf32>
    %c224 = arith.constant 224 : index
    %1025 = memref.load %arg2[%c224] : memref<361xf32, #tpu.memory_space<smem>>
    %1026 = vector.broadcast %1025 : f32 to vector<6x128xf32>
    %1027 = arith.mulf %788, %1026 : vector<6x128xf32>
    %1028 = arith.addf %1024, %1027 : vector<6x128xf32>
    %c231 = arith.constant 231 : index
    %1029 = memref.load %arg2[%c231] : memref<361xf32, #tpu.memory_space<smem>>
    %1030 = vector.broadcast %1029 : f32 to vector<6x128xf32>
    %1031 = arith.mulf %777, %1030 : vector<6x128xf32>
    %1032 = arith.addf %680, %1031 : vector<6x128xf32>
    %c232 = arith.constant 232 : index
    %1033 = memref.load %arg2[%c232] : memref<361xf32, #tpu.memory_space<smem>>
    %1034 = vector.broadcast %1033 : f32 to vector<6x128xf32>
    %1035 = arith.mulf %778, %1034 : vector<6x128xf32>
    %1036 = arith.addf %1032, %1035 : vector<6x128xf32>
    %c233 = arith.constant 233 : index
    %1037 = memref.load %arg2[%c233] : memref<361xf32, #tpu.memory_space<smem>>
    %1038 = vector.broadcast %1037 : f32 to vector<6x128xf32>
    %1039 = arith.mulf %779, %1038 : vector<6x128xf32>
    %1040 = arith.addf %1036, %1039 : vector<6x128xf32>
    %c240 = arith.constant 240 : index
    %1041 = memref.load %arg2[%c240] : memref<361xf32, #tpu.memory_space<smem>>
    %1042 = vector.broadcast %1041 : f32 to vector<6x128xf32>
    %1043 = arith.mulf %780, %1042 : vector<6x128xf32>
    %1044 = arith.addf %1040, %1043 : vector<6x128xf32>
    %c241 = arith.constant 241 : index
    %1045 = memref.load %arg2[%c241] : memref<361xf32, #tpu.memory_space<smem>>
    %1046 = vector.broadcast %1045 : f32 to vector<6x128xf32>
    %1047 = arith.mulf %781, %1046 : vector<6x128xf32>
    %1048 = arith.addf %1044, %1047 : vector<6x128xf32>
    %c242 = arith.constant 242 : index
    %1049 = memref.load %arg2[%c242] : memref<361xf32, #tpu.memory_space<smem>>
    %1050 = vector.broadcast %1049 : f32 to vector<6x128xf32>
    %1051 = arith.mulf %782, %1050 : vector<6x128xf32>
    %1052 = arith.addf %1048, %1051 : vector<6x128xf32>
    %c249 = arith.constant 249 : index
    %1053 = memref.load %arg2[%c249] : memref<361xf32, #tpu.memory_space<smem>>
    %1054 = vector.broadcast %1053 : f32 to vector<6x128xf32>
    %1055 = arith.mulf %783, %1054 : vector<6x128xf32>
    %1056 = arith.addf %1052, %1055 : vector<6x128xf32>
    %c250 = arith.constant 250 : index
    %1057 = memref.load %arg2[%c250] : memref<361xf32, #tpu.memory_space<smem>>
    %1058 = vector.broadcast %1057 : f32 to vector<6x128xf32>
    %1059 = arith.mulf %784, %1058 : vector<6x128xf32>
    %1060 = arith.addf %1056, %1059 : vector<6x128xf32>
    %c251 = arith.constant 251 : index
    %1061 = memref.load %arg2[%c251] : memref<361xf32, #tpu.memory_space<smem>>
    %1062 = vector.broadcast %1061 : f32 to vector<6x128xf32>
    %1063 = arith.mulf %785, %1062 : vector<6x128xf32>
    %1064 = arith.addf %1060, %1063 : vector<6x128xf32>
    %c258 = arith.constant 258 : index
    %1065 = memref.load %arg2[%c258] : memref<361xf32, #tpu.memory_space<smem>>
    %1066 = vector.broadcast %1065 : f32 to vector<6x128xf32>
    %1067 = arith.mulf %786, %1066 : vector<6x128xf32>
    %1068 = arith.addf %1064, %1067 : vector<6x128xf32>
    %c259 = arith.constant 259 : index
    %1069 = memref.load %arg2[%c259] : memref<361xf32, #tpu.memory_space<smem>>
    %1070 = vector.broadcast %1069 : f32 to vector<6x128xf32>
    %1071 = arith.mulf %787, %1070 : vector<6x128xf32>
    %1072 = arith.addf %1068, %1071 : vector<6x128xf32>
    %c260 = arith.constant 260 : index
    %1073 = memref.load %arg2[%c260] : memref<361xf32, #tpu.memory_space<smem>>
    %1074 = vector.broadcast %1073 : f32 to vector<6x128xf32>
    %1075 = arith.mulf %788, %1074 : vector<6x128xf32>
    %1076 = arith.addf %1072, %1075 : vector<6x128xf32>
    %c267 = arith.constant 267 : index
    %1077 = memref.load %arg2[%c267] : memref<361xf32, #tpu.memory_space<smem>>
    %1078 = vector.broadcast %1077 : f32 to vector<6x128xf32>
    %1079 = arith.mulf %777, %1078 : vector<6x128xf32>
    %1080 = arith.addf %728, %1079 : vector<6x128xf32>
    %c268 = arith.constant 268 : index
    %1081 = memref.load %arg2[%c268] : memref<361xf32, #tpu.memory_space<smem>>
    %1082 = vector.broadcast %1081 : f32 to vector<6x128xf32>
    %1083 = arith.mulf %778, %1082 : vector<6x128xf32>
    %1084 = arith.addf %1080, %1083 : vector<6x128xf32>
    %c269 = arith.constant 269 : index
    %1085 = memref.load %arg2[%c269] : memref<361xf32, #tpu.memory_space<smem>>
    %1086 = vector.broadcast %1085 : f32 to vector<6x128xf32>
    %1087 = arith.mulf %779, %1086 : vector<6x128xf32>
    %1088 = arith.addf %1084, %1087 : vector<6x128xf32>
    %c276 = arith.constant 276 : index
    %1089 = memref.load %arg2[%c276] : memref<361xf32, #tpu.memory_space<smem>>
    %1090 = vector.broadcast %1089 : f32 to vector<6x128xf32>
    %1091 = arith.mulf %780, %1090 : vector<6x128xf32>
    %1092 = arith.addf %1088, %1091 : vector<6x128xf32>
    %c277 = arith.constant 277 : index
    %1093 = memref.load %arg2[%c277] : memref<361xf32, #tpu.memory_space<smem>>
    %1094 = vector.broadcast %1093 : f32 to vector<6x128xf32>
    %1095 = arith.mulf %781, %1094 : vector<6x128xf32>
    %1096 = arith.addf %1092, %1095 : vector<6x128xf32>
    %c278 = arith.constant 278 : index
    %1097 = memref.load %arg2[%c278] : memref<361xf32, #tpu.memory_space<smem>>
    %1098 = vector.broadcast %1097 : f32 to vector<6x128xf32>
    %1099 = arith.mulf %782, %1098 : vector<6x128xf32>
    %1100 = arith.addf %1096, %1099 : vector<6x128xf32>
    %c285 = arith.constant 285 : index
    %1101 = memref.load %arg2[%c285] : memref<361xf32, #tpu.memory_space<smem>>
    %1102 = vector.broadcast %1101 : f32 to vector<6x128xf32>
    %1103 = arith.mulf %783, %1102 : vector<6x128xf32>
    %1104 = arith.addf %1100, %1103 : vector<6x128xf32>
    %c286 = arith.constant 286 : index
    %1105 = memref.load %arg2[%c286] : memref<361xf32, #tpu.memory_space<smem>>
    %1106 = vector.broadcast %1105 : f32 to vector<6x128xf32>
    %1107 = arith.mulf %784, %1106 : vector<6x128xf32>
    %1108 = arith.addf %1104, %1107 : vector<6x128xf32>
    %c287 = arith.constant 287 : index
    %1109 = memref.load %arg2[%c287] : memref<361xf32, #tpu.memory_space<smem>>
    %1110 = vector.broadcast %1109 : f32 to vector<6x128xf32>
    %1111 = arith.mulf %785, %1110 : vector<6x128xf32>
    %1112 = arith.addf %1108, %1111 : vector<6x128xf32>
    %c294 = arith.constant 294 : index
    %1113 = memref.load %arg2[%c294] : memref<361xf32, #tpu.memory_space<smem>>
    %1114 = vector.broadcast %1113 : f32 to vector<6x128xf32>
    %1115 = arith.mulf %786, %1114 : vector<6x128xf32>
    %1116 = arith.addf %1112, %1115 : vector<6x128xf32>
    %c295 = arith.constant 295 : index
    %1117 = memref.load %arg2[%c295] : memref<361xf32, #tpu.memory_space<smem>>
    %1118 = vector.broadcast %1117 : f32 to vector<6x128xf32>
    %1119 = arith.mulf %787, %1118 : vector<6x128xf32>
    %1120 = arith.addf %1116, %1119 : vector<6x128xf32>
    %c296 = arith.constant 296 : index
    %1121 = memref.load %arg2[%c296] : memref<361xf32, #tpu.memory_space<smem>>
    %1122 = vector.broadcast %1121 : f32 to vector<6x128xf32>
    %1123 = arith.mulf %788, %1122 : vector<6x128xf32>
    %1124 = arith.addf %1120, %1123 : vector<6x128xf32>
    %c303 = arith.constant 303 : index
    %1125 = memref.load %arg2[%c303] : memref<361xf32, #tpu.memory_space<smem>>
    %1126 = vector.broadcast %1125 : f32 to vector<6x128xf32>
    %1127 = arith.mulf %777, %1126 : vector<6x128xf32>
    %1128 = arith.addf %776, %1127 : vector<6x128xf32>
    %c304 = arith.constant 304 : index
    %1129 = memref.load %arg2[%c304] : memref<361xf32, #tpu.memory_space<smem>>
    %1130 = vector.broadcast %1129 : f32 to vector<6x128xf32>
    %1131 = arith.mulf %778, %1130 : vector<6x128xf32>
    %1132 = arith.addf %1128, %1131 : vector<6x128xf32>
    %c305 = arith.constant 305 : index
    %1133 = memref.load %arg2[%c305] : memref<361xf32, #tpu.memory_space<smem>>
    %1134 = vector.broadcast %1133 : f32 to vector<6x128xf32>
    %1135 = arith.mulf %779, %1134 : vector<6x128xf32>
    %1136 = arith.addf %1132, %1135 : vector<6x128xf32>
    %c312 = arith.constant 312 : index
    %1137 = memref.load %arg2[%c312] : memref<361xf32, #tpu.memory_space<smem>>
    %1138 = vector.broadcast %1137 : f32 to vector<6x128xf32>
    %1139 = arith.mulf %780, %1138 : vector<6x128xf32>
    %1140 = arith.addf %1136, %1139 : vector<6x128xf32>
    %c313 = arith.constant 313 : index
    %1141 = memref.load %arg2[%c313] : memref<361xf32, #tpu.memory_space<smem>>
    %1142 = vector.broadcast %1141 : f32 to vector<6x128xf32>
    %1143 = arith.mulf %781, %1142 : vector<6x128xf32>
    %1144 = arith.addf %1140, %1143 : vector<6x128xf32>
    %c314 = arith.constant 314 : index
    %1145 = memref.load %arg2[%c314] : memref<361xf32, #tpu.memory_space<smem>>
    %1146 = vector.broadcast %1145 : f32 to vector<6x128xf32>
    %1147 = arith.mulf %782, %1146 : vector<6x128xf32>
    %1148 = arith.addf %1144, %1147 : vector<6x128xf32>
    %c321 = arith.constant 321 : index
    %1149 = memref.load %arg2[%c321] : memref<361xf32, #tpu.memory_space<smem>>
    %1150 = vector.broadcast %1149 : f32 to vector<6x128xf32>
    %1151 = arith.mulf %783, %1150 : vector<6x128xf32>
    %1152 = arith.addf %1148, %1151 : vector<6x128xf32>
    %c322 = arith.constant 322 : index
    %1153 = memref.load %arg2[%c322] : memref<361xf32, #tpu.memory_space<smem>>
    %1154 = vector.broadcast %1153 : f32 to vector<6x128xf32>
    %1155 = arith.mulf %784, %1154 : vector<6x128xf32>
    %1156 = arith.addf %1152, %1155 : vector<6x128xf32>
    %c323 = arith.constant 323 : index
    %1157 = memref.load %arg2[%c323] : memref<361xf32, #tpu.memory_space<smem>>
    %1158 = vector.broadcast %1157 : f32 to vector<6x128xf32>
    %1159 = arith.mulf %785, %1158 : vector<6x128xf32>
    %1160 = arith.addf %1156, %1159 : vector<6x128xf32>
    %c330 = arith.constant 330 : index
    %1161 = memref.load %arg2[%c330] : memref<361xf32, #tpu.memory_space<smem>>
    %1162 = vector.broadcast %1161 : f32 to vector<6x128xf32>
    %1163 = arith.mulf %786, %1162 : vector<6x128xf32>
    %1164 = arith.addf %1160, %1163 : vector<6x128xf32>
    %c331 = arith.constant 331 : index
    %1165 = memref.load %arg2[%c331] : memref<361xf32, #tpu.memory_space<smem>>
    %1166 = vector.broadcast %1165 : f32 to vector<6x128xf32>
    %1167 = arith.mulf %787, %1166 : vector<6x128xf32>
    %1168 = arith.addf %1164, %1167 : vector<6x128xf32>
    %c332 = arith.constant 332 : index
    %1169 = memref.load %arg2[%c332] : memref<361xf32, #tpu.memory_space<smem>>
    %1170 = vector.broadcast %1169 : f32 to vector<6x128xf32>
    %1171 = arith.mulf %788, %1170 : vector<6x128xf32>
    %1172 = arith.addf %1168, %1171 : vector<6x128xf32>
    %1173 = vector.extract_strided_slice %331 {offsets = [2, 0], sizes = [6, 128], strides = [1, 1]} : vector<8x128xf32> to vector<6x128xf32>
    %1174 = vector.extract_strided_slice %335 {offsets = [2, 0], sizes = [6, 128], strides = [1, 1]} : vector<8x128xf32> to vector<6x128xf32>
    %1175 = vector.extract_strided_slice %336 {offsets = [2, 0], sizes = [6, 128], strides = [1, 1]} : vector<8x128xf32> to vector<6x128xf32>
    %1176 = vector.extract_strided_slice %332 {offsets = [2, 0], sizes = [6, 128], strides = [1, 1]} : vector<8x128xf32> to vector<6x128xf32>
    %1177 = vector.extract_strided_slice %337 {offsets = [2, 0], sizes = [6, 128], strides = [1, 1]} : vector<8x128xf32> to vector<6x128xf32>
    %1178 = vector.extract_strided_slice %338 {offsets = [2, 0], sizes = [6, 128], strides = [1, 1]} : vector<8x128xf32> to vector<6x128xf32>
    %1179 = vector.extract_strided_slice %333 {offsets = [2, 0], sizes = [6, 128], strides = [1, 1]} : vector<8x128xf32> to vector<6x128xf32>
    %1180 = vector.extract_strided_slice %339 {offsets = [2, 0], sizes = [6, 128], strides = [1, 1]} : vector<8x128xf32> to vector<6x128xf32>
    %1181 = vector.extract_strided_slice %340 {offsets = [2, 0], sizes = [6, 128], strides = [1, 1]} : vector<8x128xf32> to vector<6x128xf32>
    %1182 = vector.extract_strided_slice %334 {offsets = [2, 0], sizes = [6, 128], strides = [1, 1]} : vector<8x128xf32> to vector<6x128xf32>
    %1183 = vector.extract_strided_slice %341 {offsets = [2, 0], sizes = [6, 128], strides = [1, 1]} : vector<8x128xf32> to vector<6x128xf32>
    %1184 = vector.extract_strided_slice %342 {offsets = [2, 0], sizes = [6, 128], strides = [1, 1]} : vector<8x128xf32> to vector<6x128xf32>
    %c54 = arith.constant 54 : index
    %1185 = memref.load %arg2[%c54] : memref<361xf32, #tpu.memory_space<smem>>
    %1186 = vector.broadcast %1185 : f32 to vector<6x128xf32>
    %1187 = arith.mulf %1173, %1186 : vector<6x128xf32>
    %1188 = arith.addf %836, %1187 : vector<6x128xf32>
    %c55 = arith.constant 55 : index
    %1189 = memref.load %arg2[%c55] : memref<361xf32, #tpu.memory_space<smem>>
    %1190 = vector.broadcast %1189 : f32 to vector<6x128xf32>
    %1191 = arith.mulf %1174, %1190 : vector<6x128xf32>
    %1192 = arith.addf %1188, %1191 : vector<6x128xf32>
    %c56 = arith.constant 56 : index
    %1193 = memref.load %arg2[%c56] : memref<361xf32, #tpu.memory_space<smem>>
    %1194 = vector.broadcast %1193 : f32 to vector<6x128xf32>
    %1195 = arith.mulf %1175, %1194 : vector<6x128xf32>
    %1196 = arith.addf %1192, %1195 : vector<6x128xf32>
    %c63 = arith.constant 63 : index
    %1197 = memref.load %arg2[%c63] : memref<361xf32, #tpu.memory_space<smem>>
    %1198 = vector.broadcast %1197 : f32 to vector<6x128xf32>
    %1199 = arith.mulf %1176, %1198 : vector<6x128xf32>
    %1200 = arith.addf %1196, %1199 : vector<6x128xf32>
    %c64 = arith.constant 64 : index
    %1201 = memref.load %arg2[%c64] : memref<361xf32, #tpu.memory_space<smem>>
    %1202 = vector.broadcast %1201 : f32 to vector<6x128xf32>
    %1203 = arith.mulf %1177, %1202 : vector<6x128xf32>
    %1204 = arith.addf %1200, %1203 : vector<6x128xf32>
    %c65 = arith.constant 65 : index
    %1205 = memref.load %arg2[%c65] : memref<361xf32, #tpu.memory_space<smem>>
    %1206 = vector.broadcast %1205 : f32 to vector<6x128xf32>
    %1207 = arith.mulf %1178, %1206 : vector<6x128xf32>
    %1208 = arith.addf %1204, %1207 : vector<6x128xf32>
    %c72 = arith.constant 72 : index
    %1209 = memref.load %arg2[%c72] : memref<361xf32, #tpu.memory_space<smem>>
    %1210 = vector.broadcast %1209 : f32 to vector<6x128xf32>
    %1211 = arith.mulf %1179, %1210 : vector<6x128xf32>
    %1212 = arith.addf %1208, %1211 : vector<6x128xf32>
    %c73 = arith.constant 73 : index
    %1213 = memref.load %arg2[%c73] : memref<361xf32, #tpu.memory_space<smem>>
    %1214 = vector.broadcast %1213 : f32 to vector<6x128xf32>
    %1215 = arith.mulf %1180, %1214 : vector<6x128xf32>
    %1216 = arith.addf %1212, %1215 : vector<6x128xf32>
    %c74 = arith.constant 74 : index
    %1217 = memref.load %arg2[%c74] : memref<361xf32, #tpu.memory_space<smem>>
    %1218 = vector.broadcast %1217 : f32 to vector<6x128xf32>
    %1219 = arith.mulf %1181, %1218 : vector<6x128xf32>
    %1220 = arith.addf %1216, %1219 : vector<6x128xf32>
    %c81 = arith.constant 81 : index
    %1221 = memref.load %arg2[%c81] : memref<361xf32, #tpu.memory_space<smem>>
    %1222 = vector.broadcast %1221 : f32 to vector<6x128xf32>
    %1223 = arith.mulf %1182, %1222 : vector<6x128xf32>
    %1224 = arith.addf %1220, %1223 : vector<6x128xf32>
    %c82 = arith.constant 82 : index
    %1225 = memref.load %arg2[%c82] : memref<361xf32, #tpu.memory_space<smem>>
    %1226 = vector.broadcast %1225 : f32 to vector<6x128xf32>
    %1227 = arith.mulf %1183, %1226 : vector<6x128xf32>
    %1228 = arith.addf %1224, %1227 : vector<6x128xf32>
    %c83 = arith.constant 83 : index
    %1229 = memref.load %arg2[%c83] : memref<361xf32, #tpu.memory_space<smem>>
    %1230 = vector.broadcast %1229 : f32 to vector<6x128xf32>
    %1231 = arith.mulf %1184, %1230 : vector<6x128xf32>
    %1232 = arith.addf %1228, %1231 : vector<6x128xf32>
    %c90 = arith.constant 90 : index
    %1233 = memref.load %arg2[%c90] : memref<361xf32, #tpu.memory_space<smem>>
    %1234 = vector.broadcast %1233 : f32 to vector<6x128xf32>
    %1235 = arith.mulf %1173, %1234 : vector<6x128xf32>
    %1236 = arith.addf %884, %1235 : vector<6x128xf32>
    %c91 = arith.constant 91 : index
    %1237 = memref.load %arg2[%c91] : memref<361xf32, #tpu.memory_space<smem>>
    %1238 = vector.broadcast %1237 : f32 to vector<6x128xf32>
    %1239 = arith.mulf %1174, %1238 : vector<6x128xf32>
    %1240 = arith.addf %1236, %1239 : vector<6x128xf32>
    %c92 = arith.constant 92 : index
    %1241 = memref.load %arg2[%c92] : memref<361xf32, #tpu.memory_space<smem>>
    %1242 = vector.broadcast %1241 : f32 to vector<6x128xf32>
    %1243 = arith.mulf %1175, %1242 : vector<6x128xf32>
    %1244 = arith.addf %1240, %1243 : vector<6x128xf32>
    %c99 = arith.constant 99 : index
    %1245 = memref.load %arg2[%c99] : memref<361xf32, #tpu.memory_space<smem>>
    %1246 = vector.broadcast %1245 : f32 to vector<6x128xf32>
    %1247 = arith.mulf %1176, %1246 : vector<6x128xf32>
    %1248 = arith.addf %1244, %1247 : vector<6x128xf32>
    %c100 = arith.constant 100 : index
    %1249 = memref.load %arg2[%c100] : memref<361xf32, #tpu.memory_space<smem>>
    %1250 = vector.broadcast %1249 : f32 to vector<6x128xf32>
    %1251 = arith.mulf %1177, %1250 : vector<6x128xf32>
    %1252 = arith.addf %1248, %1251 : vector<6x128xf32>
    %c101 = arith.constant 101 : index
    %1253 = memref.load %arg2[%c101] : memref<361xf32, #tpu.memory_space<smem>>
    %1254 = vector.broadcast %1253 : f32 to vector<6x128xf32>
    %1255 = arith.mulf %1178, %1254 : vector<6x128xf32>
    %1256 = arith.addf %1252, %1255 : vector<6x128xf32>
    %c108 = arith.constant 108 : index
    %1257 = memref.load %arg2[%c108] : memref<361xf32, #tpu.memory_space<smem>>
    %1258 = vector.broadcast %1257 : f32 to vector<6x128xf32>
    %1259 = arith.mulf %1179, %1258 : vector<6x128xf32>
    %1260 = arith.addf %1256, %1259 : vector<6x128xf32>
    %c109 = arith.constant 109 : index
    %1261 = memref.load %arg2[%c109] : memref<361xf32, #tpu.memory_space<smem>>
    %1262 = vector.broadcast %1261 : f32 to vector<6x128xf32>
    %1263 = arith.mulf %1180, %1262 : vector<6x128xf32>
    %1264 = arith.addf %1260, %1263 : vector<6x128xf32>
    %c110 = arith.constant 110 : index
    %1265 = memref.load %arg2[%c110] : memref<361xf32, #tpu.memory_space<smem>>
    %1266 = vector.broadcast %1265 : f32 to vector<6x128xf32>
    %1267 = arith.mulf %1181, %1266 : vector<6x128xf32>
    %1268 = arith.addf %1264, %1267 : vector<6x128xf32>
    %c117 = arith.constant 117 : index
    %1269 = memref.load %arg2[%c117] : memref<361xf32, #tpu.memory_space<smem>>
    %1270 = vector.broadcast %1269 : f32 to vector<6x128xf32>
    %1271 = arith.mulf %1182, %1270 : vector<6x128xf32>
    %1272 = arith.addf %1268, %1271 : vector<6x128xf32>
    %c118 = arith.constant 118 : index
    %1273 = memref.load %arg2[%c118] : memref<361xf32, #tpu.memory_space<smem>>
    %1274 = vector.broadcast %1273 : f32 to vector<6x128xf32>
    %1275 = arith.mulf %1183, %1274 : vector<6x128xf32>
    %1276 = arith.addf %1272, %1275 : vector<6x128xf32>
    %c119 = arith.constant 119 : index
    %1277 = memref.load %arg2[%c119] : memref<361xf32, #tpu.memory_space<smem>>
    %1278 = vector.broadcast %1277 : f32 to vector<6x128xf32>
    %1279 = arith.mulf %1184, %1278 : vector<6x128xf32>
    %1280 = arith.addf %1276, %1279 : vector<6x128xf32>
    %c126 = arith.constant 126 : index
    %1281 = memref.load %arg2[%c126] : memref<361xf32, #tpu.memory_space<smem>>
    %1282 = vector.broadcast %1281 : f32 to vector<6x128xf32>
    %1283 = arith.mulf %1173, %1282 : vector<6x128xf32>
    %1284 = arith.addf %932, %1283 : vector<6x128xf32>
    %c127 = arith.constant 127 : index
    %1285 = memref.load %arg2[%c127] : memref<361xf32, #tpu.memory_space<smem>>
    %1286 = vector.broadcast %1285 : f32 to vector<6x128xf32>
    %1287 = arith.mulf %1174, %1286 : vector<6x128xf32>
    %1288 = arith.addf %1284, %1287 : vector<6x128xf32>
    %c128 = arith.constant 128 : index
    %1289 = memref.load %arg2[%c128] : memref<361xf32, #tpu.memory_space<smem>>
    %1290 = vector.broadcast %1289 : f32 to vector<6x128xf32>
    %1291 = arith.mulf %1175, %1290 : vector<6x128xf32>
    %1292 = arith.addf %1288, %1291 : vector<6x128xf32>
    %c135 = arith.constant 135 : index
    %1293 = memref.load %arg2[%c135] : memref<361xf32, #tpu.memory_space<smem>>
    %1294 = vector.broadcast %1293 : f32 to vector<6x128xf32>
    %1295 = arith.mulf %1176, %1294 : vector<6x128xf32>
    %1296 = arith.addf %1292, %1295 : vector<6x128xf32>
    %c136 = arith.constant 136 : index
    %1297 = memref.load %arg2[%c136] : memref<361xf32, #tpu.memory_space<smem>>
    %1298 = vector.broadcast %1297 : f32 to vector<6x128xf32>
    %1299 = arith.mulf %1177, %1298 : vector<6x128xf32>
    %1300 = arith.addf %1296, %1299 : vector<6x128xf32>
    %c137 = arith.constant 137 : index
    %1301 = memref.load %arg2[%c137] : memref<361xf32, #tpu.memory_space<smem>>
    %1302 = vector.broadcast %1301 : f32 to vector<6x128xf32>
    %1303 = arith.mulf %1178, %1302 : vector<6x128xf32>
    %1304 = arith.addf %1300, %1303 : vector<6x128xf32>
    %c144 = arith.constant 144 : index
    %1305 = memref.load %arg2[%c144] : memref<361xf32, #tpu.memory_space<smem>>
    %1306 = vector.broadcast %1305 : f32 to vector<6x128xf32>
    %1307 = arith.mulf %1179, %1306 : vector<6x128xf32>
    %1308 = arith.addf %1304, %1307 : vector<6x128xf32>
    %c145 = arith.constant 145 : index
    %1309 = memref.load %arg2[%c145] : memref<361xf32, #tpu.memory_space<smem>>
    %1310 = vector.broadcast %1309 : f32 to vector<6x128xf32>
    %1311 = arith.mulf %1180, %1310 : vector<6x128xf32>
    %1312 = arith.addf %1308, %1311 : vector<6x128xf32>
    %c146 = arith.constant 146 : index
    %1313 = memref.load %arg2[%c146] : memref<361xf32, #tpu.memory_space<smem>>
    %1314 = vector.broadcast %1313 : f32 to vector<6x128xf32>
    %1315 = arith.mulf %1181, %1314 : vector<6x128xf32>
    %1316 = arith.addf %1312, %1315 : vector<6x128xf32>
    %c153 = arith.constant 153 : index
    %1317 = memref.load %arg2[%c153] : memref<361xf32, #tpu.memory_space<smem>>
    %1318 = vector.broadcast %1317 : f32 to vector<6x128xf32>
    %1319 = arith.mulf %1182, %1318 : vector<6x128xf32>
    %1320 = arith.addf %1316, %1319 : vector<6x128xf32>
    %c154 = arith.constant 154 : index
    %1321 = memref.load %arg2[%c154] : memref<361xf32, #tpu.memory_space<smem>>
    %1322 = vector.broadcast %1321 : f32 to vector<6x128xf32>
    %1323 = arith.mulf %1183, %1322 : vector<6x128xf32>
    %1324 = arith.addf %1320, %1323 : vector<6x128xf32>
    %c155 = arith.constant 155 : index
    %1325 = memref.load %arg2[%c155] : memref<361xf32, #tpu.memory_space<smem>>
    %1326 = vector.broadcast %1325 : f32 to vector<6x128xf32>
    %1327 = arith.mulf %1184, %1326 : vector<6x128xf32>
    %1328 = arith.addf %1324, %1327 : vector<6x128xf32>
    %c162 = arith.constant 162 : index
    %1329 = memref.load %arg2[%c162] : memref<361xf32, #tpu.memory_space<smem>>
    %1330 = vector.broadcast %1329 : f32 to vector<6x128xf32>
    %1331 = arith.mulf %1173, %1330 : vector<6x128xf32>
    %1332 = arith.addf %980, %1331 : vector<6x128xf32>
    %c163 = arith.constant 163 : index
    %1333 = memref.load %arg2[%c163] : memref<361xf32, #tpu.memory_space<smem>>
    %1334 = vector.broadcast %1333 : f32 to vector<6x128xf32>
    %1335 = arith.mulf %1174, %1334 : vector<6x128xf32>
    %1336 = arith.addf %1332, %1335 : vector<6x128xf32>
    %c164 = arith.constant 164 : index
    %1337 = memref.load %arg2[%c164] : memref<361xf32, #tpu.memory_space<smem>>
    %1338 = vector.broadcast %1337 : f32 to vector<6x128xf32>
    %1339 = arith.mulf %1175, %1338 : vector<6x128xf32>
    %1340 = arith.addf %1336, %1339 : vector<6x128xf32>
    %c171 = arith.constant 171 : index
    %1341 = memref.load %arg2[%c171] : memref<361xf32, #tpu.memory_space<smem>>
    %1342 = vector.broadcast %1341 : f32 to vector<6x128xf32>
    %1343 = arith.mulf %1176, %1342 : vector<6x128xf32>
    %1344 = arith.addf %1340, %1343 : vector<6x128xf32>
    %c172 = arith.constant 172 : index
    %1345 = memref.load %arg2[%c172] : memref<361xf32, #tpu.memory_space<smem>>
    %1346 = vector.broadcast %1345 : f32 to vector<6x128xf32>
    %1347 = arith.mulf %1177, %1346 : vector<6x128xf32>
    %1348 = arith.addf %1344, %1347 : vector<6x128xf32>
    %c173 = arith.constant 173 : index
    %1349 = memref.load %arg2[%c173] : memref<361xf32, #tpu.memory_space<smem>>
    %1350 = vector.broadcast %1349 : f32 to vector<6x128xf32>
    %1351 = arith.mulf %1178, %1350 : vector<6x128xf32>
    %1352 = arith.addf %1348, %1351 : vector<6x128xf32>
    %c180 = arith.constant 180 : index
    %1353 = memref.load %arg2[%c180] : memref<361xf32, #tpu.memory_space<smem>>
    %1354 = vector.broadcast %1353 : f32 to vector<6x128xf32>
    %1355 = arith.mulf %1179, %1354 : vector<6x128xf32>
    %1356 = arith.addf %1352, %1355 : vector<6x128xf32>
    %c181 = arith.constant 181 : index
    %1357 = memref.load %arg2[%c181] : memref<361xf32, #tpu.memory_space<smem>>
    %1358 = vector.broadcast %1357 : f32 to vector<6x128xf32>
    %1359 = arith.mulf %1180, %1358 : vector<6x128xf32>
    %1360 = arith.addf %1356, %1359 : vector<6x128xf32>
    %c182 = arith.constant 182 : index
    %1361 = memref.load %arg2[%c182] : memref<361xf32, #tpu.memory_space<smem>>
    %1362 = vector.broadcast %1361 : f32 to vector<6x128xf32>
    %1363 = arith.mulf %1181, %1362 : vector<6x128xf32>
    %1364 = arith.addf %1360, %1363 : vector<6x128xf32>
    %c189 = arith.constant 189 : index
    %1365 = memref.load %arg2[%c189] : memref<361xf32, #tpu.memory_space<smem>>
    %1366 = vector.broadcast %1365 : f32 to vector<6x128xf32>
    %1367 = arith.mulf %1182, %1366 : vector<6x128xf32>
    %1368 = arith.addf %1364, %1367 : vector<6x128xf32>
    %c190 = arith.constant 190 : index
    %1369 = memref.load %arg2[%c190] : memref<361xf32, #tpu.memory_space<smem>>
    %1370 = vector.broadcast %1369 : f32 to vector<6x128xf32>
    %1371 = arith.mulf %1183, %1370 : vector<6x128xf32>
    %1372 = arith.addf %1368, %1371 : vector<6x128xf32>
    %c191 = arith.constant 191 : index
    %1373 = memref.load %arg2[%c191] : memref<361xf32, #tpu.memory_space<smem>>
    %1374 = vector.broadcast %1373 : f32 to vector<6x128xf32>
    %1375 = arith.mulf %1184, %1374 : vector<6x128xf32>
    %1376 = arith.addf %1372, %1375 : vector<6x128xf32>
    %c198 = arith.constant 198 : index
    %1377 = memref.load %arg2[%c198] : memref<361xf32, #tpu.memory_space<smem>>
    %1378 = vector.broadcast %1377 : f32 to vector<6x128xf32>
    %1379 = arith.mulf %1173, %1378 : vector<6x128xf32>
    %1380 = arith.addf %1028, %1379 : vector<6x128xf32>
    %c199 = arith.constant 199 : index
    %1381 = memref.load %arg2[%c199] : memref<361xf32, #tpu.memory_space<smem>>
    %1382 = vector.broadcast %1381 : f32 to vector<6x128xf32>
    %1383 = arith.mulf %1174, %1382 : vector<6x128xf32>
    %1384 = arith.addf %1380, %1383 : vector<6x128xf32>
    %c200 = arith.constant 200 : index
    %1385 = memref.load %arg2[%c200] : memref<361xf32, #tpu.memory_space<smem>>
    %1386 = vector.broadcast %1385 : f32 to vector<6x128xf32>
    %1387 = arith.mulf %1175, %1386 : vector<6x128xf32>
    %1388 = arith.addf %1384, %1387 : vector<6x128xf32>
    %c207 = arith.constant 207 : index
    %1389 = memref.load %arg2[%c207] : memref<361xf32, #tpu.memory_space<smem>>
    %1390 = vector.broadcast %1389 : f32 to vector<6x128xf32>
    %1391 = arith.mulf %1176, %1390 : vector<6x128xf32>
    %1392 = arith.addf %1388, %1391 : vector<6x128xf32>
    %c208 = arith.constant 208 : index
    %1393 = memref.load %arg2[%c208] : memref<361xf32, #tpu.memory_space<smem>>
    %1394 = vector.broadcast %1393 : f32 to vector<6x128xf32>
    %1395 = arith.mulf %1177, %1394 : vector<6x128xf32>
    %1396 = arith.addf %1392, %1395 : vector<6x128xf32>
    %c209 = arith.constant 209 : index
    %1397 = memref.load %arg2[%c209] : memref<361xf32, #tpu.memory_space<smem>>
    %1398 = vector.broadcast %1397 : f32 to vector<6x128xf32>
    %1399 = arith.mulf %1178, %1398 : vector<6x128xf32>
    %1400 = arith.addf %1396, %1399 : vector<6x128xf32>
    %c216 = arith.constant 216 : index
    %1401 = memref.load %arg2[%c216] : memref<361xf32, #tpu.memory_space<smem>>
    %1402 = vector.broadcast %1401 : f32 to vector<6x128xf32>
    %1403 = arith.mulf %1179, %1402 : vector<6x128xf32>
    %1404 = arith.addf %1400, %1403 : vector<6x128xf32>
    %c217 = arith.constant 217 : index
    %1405 = memref.load %arg2[%c217] : memref<361xf32, #tpu.memory_space<smem>>
    %1406 = vector.broadcast %1405 : f32 to vector<6x128xf32>
    %1407 = arith.mulf %1180, %1406 : vector<6x128xf32>
    %1408 = arith.addf %1404, %1407 : vector<6x128xf32>
    %c218 = arith.constant 218 : index
    %1409 = memref.load %arg2[%c218] : memref<361xf32, #tpu.memory_space<smem>>
    %1410 = vector.broadcast %1409 : f32 to vector<6x128xf32>
    %1411 = arith.mulf %1181, %1410 : vector<6x128xf32>
    %1412 = arith.addf %1408, %1411 : vector<6x128xf32>
    %c225 = arith.constant 225 : index
    %1413 = memref.load %arg2[%c225] : memref<361xf32, #tpu.memory_space<smem>>
    %1414 = vector.broadcast %1413 : f32 to vector<6x128xf32>
    %1415 = arith.mulf %1182, %1414 : vector<6x128xf32>
    %1416 = arith.addf %1412, %1415 : vector<6x128xf32>
    %c226 = arith.constant 226 : index
    %1417 = memref.load %arg2[%c226] : memref<361xf32, #tpu.memory_space<smem>>
    %1418 = vector.broadcast %1417 : f32 to vector<6x128xf32>
    %1419 = arith.mulf %1183, %1418 : vector<6x128xf32>
    %1420 = arith.addf %1416, %1419 : vector<6x128xf32>
    %c227 = arith.constant 227 : index
    %1421 = memref.load %arg2[%c227] : memref<361xf32, #tpu.memory_space<smem>>
    %1422 = vector.broadcast %1421 : f32 to vector<6x128xf32>
    %1423 = arith.mulf %1184, %1422 : vector<6x128xf32>
    %1424 = arith.addf %1420, %1423 : vector<6x128xf32>
    %c234 = arith.constant 234 : index
    %1425 = memref.load %arg2[%c234] : memref<361xf32, #tpu.memory_space<smem>>
    %1426 = vector.broadcast %1425 : f32 to vector<6x128xf32>
    %1427 = arith.mulf %1173, %1426 : vector<6x128xf32>
    %1428 = arith.addf %1076, %1427 : vector<6x128xf32>
    %c235 = arith.constant 235 : index
    %1429 = memref.load %arg2[%c235] : memref<361xf32, #tpu.memory_space<smem>>
    %1430 = vector.broadcast %1429 : f32 to vector<6x128xf32>
    %1431 = arith.mulf %1174, %1430 : vector<6x128xf32>
    %1432 = arith.addf %1428, %1431 : vector<6x128xf32>
    %c236 = arith.constant 236 : index
    %1433 = memref.load %arg2[%c236] : memref<361xf32, #tpu.memory_space<smem>>
    %1434 = vector.broadcast %1433 : f32 to vector<6x128xf32>
    %1435 = arith.mulf %1175, %1434 : vector<6x128xf32>
    %1436 = arith.addf %1432, %1435 : vector<6x128xf32>
    %c243 = arith.constant 243 : index
    %1437 = memref.load %arg2[%c243] : memref<361xf32, #tpu.memory_space<smem>>
    %1438 = vector.broadcast %1437 : f32 to vector<6x128xf32>
    %1439 = arith.mulf %1176, %1438 : vector<6x128xf32>
    %1440 = arith.addf %1436, %1439 : vector<6x128xf32>
    %c244 = arith.constant 244 : index
    %1441 = memref.load %arg2[%c244] : memref<361xf32, #tpu.memory_space<smem>>
    %1442 = vector.broadcast %1441 : f32 to vector<6x128xf32>
    %1443 = arith.mulf %1177, %1442 : vector<6x128xf32>
    %1444 = arith.addf %1440, %1443 : vector<6x128xf32>
    %c245 = arith.constant 245 : index
    %1445 = memref.load %arg2[%c245] : memref<361xf32, #tpu.memory_space<smem>>
    %1446 = vector.broadcast %1445 : f32 to vector<6x128xf32>
    %1447 = arith.mulf %1178, %1446 : vector<6x128xf32>
    %1448 = arith.addf %1444, %1447 : vector<6x128xf32>
    %c252 = arith.constant 252 : index
    %1449 = memref.load %arg2[%c252] : memref<361xf32, #tpu.memory_space<smem>>
    %1450 = vector.broadcast %1449 : f32 to vector<6x128xf32>
    %1451 = arith.mulf %1179, %1450 : vector<6x128xf32>
    %1452 = arith.addf %1448, %1451 : vector<6x128xf32>
    %c253 = arith.constant 253 : index
    %1453 = memref.load %arg2[%c253] : memref<361xf32, #tpu.memory_space<smem>>
    %1454 = vector.broadcast %1453 : f32 to vector<6x128xf32>
    %1455 = arith.mulf %1180, %1454 : vector<6x128xf32>
    %1456 = arith.addf %1452, %1455 : vector<6x128xf32>
    %c254 = arith.constant 254 : index
    %1457 = memref.load %arg2[%c254] : memref<361xf32, #tpu.memory_space<smem>>
    %1458 = vector.broadcast %1457 : f32 to vector<6x128xf32>
    %1459 = arith.mulf %1181, %1458 : vector<6x128xf32>
    %1460 = arith.addf %1456, %1459 : vector<6x128xf32>
    %c261 = arith.constant 261 : index
    %1461 = memref.load %arg2[%c261] : memref<361xf32, #tpu.memory_space<smem>>
    %1462 = vector.broadcast %1461 : f32 to vector<6x128xf32>
    %1463 = arith.mulf %1182, %1462 : vector<6x128xf32>
    %1464 = arith.addf %1460, %1463 : vector<6x128xf32>
    %c262 = arith.constant 262 : index
    %1465 = memref.load %arg2[%c262] : memref<361xf32, #tpu.memory_space<smem>>
    %1466 = vector.broadcast %1465 : f32 to vector<6x128xf32>
    %1467 = arith.mulf %1183, %1466 : vector<6x128xf32>
    %1468 = arith.addf %1464, %1467 : vector<6x128xf32>
    %c263 = arith.constant 263 : index
    %1469 = memref.load %arg2[%c263] : memref<361xf32, #tpu.memory_space<smem>>
    %1470 = vector.broadcast %1469 : f32 to vector<6x128xf32>
    %1471 = arith.mulf %1184, %1470 : vector<6x128xf32>
    %1472 = arith.addf %1468, %1471 : vector<6x128xf32>
    %c270 = arith.constant 270 : index
    %1473 = memref.load %arg2[%c270] : memref<361xf32, #tpu.memory_space<smem>>
    %1474 = vector.broadcast %1473 : f32 to vector<6x128xf32>
    %1475 = arith.mulf %1173, %1474 : vector<6x128xf32>
    %1476 = arith.addf %1124, %1475 : vector<6x128xf32>
    %c271 = arith.constant 271 : index
    %1477 = memref.load %arg2[%c271] : memref<361xf32, #tpu.memory_space<smem>>
    %1478 = vector.broadcast %1477 : f32 to vector<6x128xf32>
    %1479 = arith.mulf %1174, %1478 : vector<6x128xf32>
    %1480 = arith.addf %1476, %1479 : vector<6x128xf32>
    %c272 = arith.constant 272 : index
    %1481 = memref.load %arg2[%c272] : memref<361xf32, #tpu.memory_space<smem>>
    %1482 = vector.broadcast %1481 : f32 to vector<6x128xf32>
    %1483 = arith.mulf %1175, %1482 : vector<6x128xf32>
    %1484 = arith.addf %1480, %1483 : vector<6x128xf32>
    %c279 = arith.constant 279 : index
    %1485 = memref.load %arg2[%c279] : memref<361xf32, #tpu.memory_space<smem>>
    %1486 = vector.broadcast %1485 : f32 to vector<6x128xf32>
    %1487 = arith.mulf %1176, %1486 : vector<6x128xf32>
    %1488 = arith.addf %1484, %1487 : vector<6x128xf32>
    %c280 = arith.constant 280 : index
    %1489 = memref.load %arg2[%c280] : memref<361xf32, #tpu.memory_space<smem>>
    %1490 = vector.broadcast %1489 : f32 to vector<6x128xf32>
    %1491 = arith.mulf %1177, %1490 : vector<6x128xf32>
    %1492 = arith.addf %1488, %1491 : vector<6x128xf32>
    %c281 = arith.constant 281 : index
    %1493 = memref.load %arg2[%c281] : memref<361xf32, #tpu.memory_space<smem>>
    %1494 = vector.broadcast %1493 : f32 to vector<6x128xf32>
    %1495 = arith.mulf %1178, %1494 : vector<6x128xf32>
    %1496 = arith.addf %1492, %1495 : vector<6x128xf32>
    %c288 = arith.constant 288 : index
    %1497 = memref.load %arg2[%c288] : memref<361xf32, #tpu.memory_space<smem>>
    %1498 = vector.broadcast %1497 : f32 to vector<6x128xf32>
    %1499 = arith.mulf %1179, %1498 : vector<6x128xf32>
    %1500 = arith.addf %1496, %1499 : vector<6x128xf32>
    %c289 = arith.constant 289 : index
    %1501 = memref.load %arg2[%c289] : memref<361xf32, #tpu.memory_space<smem>>
    %1502 = vector.broadcast %1501 : f32 to vector<6x128xf32>
    %1503 = arith.mulf %1180, %1502 : vector<6x128xf32>
    %1504 = arith.addf %1500, %1503 : vector<6x128xf32>
    %c290 = arith.constant 290 : index
    %1505 = memref.load %arg2[%c290] : memref<361xf32, #tpu.memory_space<smem>>
    %1506 = vector.broadcast %1505 : f32 to vector<6x128xf32>
    %1507 = arith.mulf %1181, %1506 : vector<6x128xf32>
    %1508 = arith.addf %1504, %1507 : vector<6x128xf32>
    %c297 = arith.constant 297 : index
    %1509 = memref.load %arg2[%c297] : memref<361xf32, #tpu.memory_space<smem>>
    %1510 = vector.broadcast %1509 : f32 to vector<6x128xf32>
    %1511 = arith.mulf %1182, %1510 : vector<6x128xf32>
    %1512 = arith.addf %1508, %1511 : vector<6x128xf32>
    %c298 = arith.constant 298 : index
    %1513 = memref.load %arg2[%c298] : memref<361xf32, #tpu.memory_space<smem>>
    %1514 = vector.broadcast %1513 : f32 to vector<6x128xf32>
    %1515 = arith.mulf %1183, %1514 : vector<6x128xf32>
    %1516 = arith.addf %1512, %1515 : vector<6x128xf32>
    %c299 = arith.constant 299 : index
    %1517 = memref.load %arg2[%c299] : memref<361xf32, #tpu.memory_space<smem>>
    %1518 = vector.broadcast %1517 : f32 to vector<6x128xf32>
    %1519 = arith.mulf %1184, %1518 : vector<6x128xf32>
    %1520 = arith.addf %1516, %1519 : vector<6x128xf32>
    %c306 = arith.constant 306 : index
    %1521 = memref.load %arg2[%c306] : memref<361xf32, #tpu.memory_space<smem>>
    %1522 = vector.broadcast %1521 : f32 to vector<6x128xf32>
    %1523 = arith.mulf %1173, %1522 : vector<6x128xf32>
    %1524 = arith.addf %1172, %1523 : vector<6x128xf32>
    %c307 = arith.constant 307 : index
    %1525 = memref.load %arg2[%c307] : memref<361xf32, #tpu.memory_space<smem>>
    %1526 = vector.broadcast %1525 : f32 to vector<6x128xf32>
    %1527 = arith.mulf %1174, %1526 : vector<6x128xf32>
    %1528 = arith.addf %1524, %1527 : vector<6x128xf32>
    %c308 = arith.constant 308 : index
    %1529 = memref.load %arg2[%c308] : memref<361xf32, #tpu.memory_space<smem>>
    %1530 = vector.broadcast %1529 : f32 to vector<6x128xf32>
    %1531 = arith.mulf %1175, %1530 : vector<6x128xf32>
    %1532 = arith.addf %1528, %1531 : vector<6x128xf32>
    %c315 = arith.constant 315 : index
    %1533 = memref.load %arg2[%c315] : memref<361xf32, #tpu.memory_space<smem>>
    %1534 = vector.broadcast %1533 : f32 to vector<6x128xf32>
    %1535 = arith.mulf %1176, %1534 : vector<6x128xf32>
    %1536 = arith.addf %1532, %1535 : vector<6x128xf32>
    %c316 = arith.constant 316 : index
    %1537 = memref.load %arg2[%c316] : memref<361xf32, #tpu.memory_space<smem>>
    %1538 = vector.broadcast %1537 : f32 to vector<6x128xf32>
    %1539 = arith.mulf %1177, %1538 : vector<6x128xf32>
    %1540 = arith.addf %1536, %1539 : vector<6x128xf32>
    %c317 = arith.constant 317 : index
    %1541 = memref.load %arg2[%c317] : memref<361xf32, #tpu.memory_space<smem>>
    %1542 = vector.broadcast %1541 : f32 to vector<6x128xf32>
    %1543 = arith.mulf %1178, %1542 : vector<6x128xf32>
    %1544 = arith.addf %1540, %1543 : vector<6x128xf32>
    %c324 = arith.constant 324 : index
    %1545 = memref.load %arg2[%c324] : memref<361xf32, #tpu.memory_space<smem>>
    %1546 = vector.broadcast %1545 : f32 to vector<6x128xf32>
    %1547 = arith.mulf %1179, %1546 : vector<6x128xf32>
    %1548 = arith.addf %1544, %1547 : vector<6x128xf32>
    %c325 = arith.constant 325 : index
    %1549 = memref.load %arg2[%c325] : memref<361xf32, #tpu.memory_space<smem>>
    %1550 = vector.broadcast %1549 : f32 to vector<6x128xf32>
    %1551 = arith.mulf %1180, %1550 : vector<6x128xf32>
    %1552 = arith.addf %1548, %1551 : vector<6x128xf32>
    %c326 = arith.constant 326 : index
    %1553 = memref.load %arg2[%c326] : memref<361xf32, #tpu.memory_space<smem>>
    %1554 = vector.broadcast %1553 : f32 to vector<6x128xf32>
    %1555 = arith.mulf %1181, %1554 : vector<6x128xf32>
    %1556 = arith.addf %1552, %1555 : vector<6x128xf32>
    %c333 = arith.constant 333 : index
    %1557 = memref.load %arg2[%c333] : memref<361xf32, #tpu.memory_space<smem>>
    %1558 = vector.broadcast %1557 : f32 to vector<6x128xf32>
    %1559 = arith.mulf %1182, %1558 : vector<6x128xf32>
    %1560 = arith.addf %1556, %1559 : vector<6x128xf32>
    %c334 = arith.constant 334 : index
    %1561 = memref.load %arg2[%c334] : memref<361xf32, #tpu.memory_space<smem>>
    %1562 = vector.broadcast %1561 : f32 to vector<6x128xf32>
    %1563 = arith.mulf %1183, %1562 : vector<6x128xf32>
    %1564 = arith.addf %1560, %1563 : vector<6x128xf32>
    %c335 = arith.constant 335 : index
    %1565 = memref.load %arg2[%c335] : memref<361xf32, #tpu.memory_space<smem>>
    %1566 = vector.broadcast %1565 : f32 to vector<6x128xf32>
    %1567 = arith.mulf %1184, %1566 : vector<6x128xf32>
    %1568 = arith.addf %1564, %1567 : vector<6x128xf32>
    %c344 = arith.constant 344 : index
    %1569 = memref.load %arg2[%c344] : memref<361xf32, #tpu.memory_space<smem>>
    %c352 = arith.constant 352 : index
    %1570 = memref.load %arg2[%c352] : memref<361xf32, #tpu.memory_space<smem>>
    %cst_104 = arith.constant 0.000000e+00 : f32
    %1571 = vector.broadcast %cst_104 : f32 to vector<6x128xf32>
    %1572 = arith.maximumf %1232, %1571 : vector<6x128xf32>
    %1573 = vector.broadcast %1569 : f32 to vector<6x128xf32>
    %1574 = arith.mulf %1572, %1573 : vector<6x128xf32>
    %1575 = vector.broadcast %1570 : f32 to vector<6x128xf32>
    %1576 = arith.addf %1574, %1575 : vector<6x128xf32>
    %c2_i32_105 = arith.constant 2 : i32
    %1577 = tpu.dynamic_rotate %1576 by %c2_i32_105 dim 1 : vector<6x128xf32>, i32 -> vector<6x128xf32>
    %1578 = vector.broadcast %1570 : f32 to vector<6x128xf32>
    %1579 = arith.select %364, %1577, %1578 : vector<6x128xi1>, vector<6x128xf32>
    %c126_i32_106 = arith.constant 126 : i32
    %1580 = tpu.dynamic_rotate %1579 by %c126_i32_106 dim 1 : vector<6x128xf32>, i32 -> vector<6x128xf32>
    %1581 = arith.maximumf %1579, %1580 : vector<6x128xf32>
    %1582 = vector.extract_strided_slice %1581 {offsets = [0, 0], sizes = [5, 128], strides = [1, 1]} : vector<6x128xf32> to vector<5x128xf32>
    %1583 = vector.extract_strided_slice %1581 {offsets = [1, 0], sizes = [5, 128], strides = [1, 1]} : vector<6x128xf32> to vector<5x128xf32>
    %1584 = arith.maximumf %1582, %1583 : vector<5x128xf32>
    %1585 = vector.extract_strided_slice %1581 {offsets = [0, 0], sizes = [1, 128], strides = [1, 1]} : vector<6x128xf32> to vector<1x128xf32>
    %1586 = vector.broadcast %1570 : f32 to vector<1x128xf32>
    %1587 = arith.maximumf %1585, %1586 : vector<1x128xf32>
    %c0_107 = arith.constant 0 : index
    %c0_108 = arith.constant 0 : index
    %1588 = vector.load %arg10[%c0_107, %c0_108] : memref<32x128xf32, #tpu.memory_space<vmem>>, vector<1x128xf32>
    tpu.vector_store %arg10[%c0_107, %c0_108], %1587 {strides = array<i32>} : memref<32x128xf32, #tpu.memory_space<vmem>>, vector<1x128xf32>,
    %1589 = vector.extract_strided_slice %1584 {offsets = [1, 0], sizes = [1, 128], strides = [1, 1]} : vector<5x128xf32> to vector<1x128xf32>
    %c1_109 = arith.constant 1 : index
    %c0_110 = arith.constant 0 : index
    %1590 = vector.load %arg10[%c1_109, %c0_110] : memref<32x128xf32, #tpu.memory_space<vmem>>, vector<1x128xf32>
    tpu.vector_store %arg10[%c1_109, %c0_110], %1589 {strides = array<i32>} : memref<32x128xf32, #tpu.memory_space<vmem>>, vector<1x128xf32>,
    %1591 = vector.extract_strided_slice %1584 {offsets = [3, 0], sizes = [1, 128], strides = [1, 1]} : vector<5x128xf32> to vector<1x128xf32>
    %c2_111 = arith.constant 2 : index
    %c0_112 = arith.constant 0 : index
    %1592 = vector.load %arg10[%c2_111, %c0_112] : memref<32x128xf32, #tpu.memory_space<vmem>>, vector<1x128xf32>
    tpu.vector_store %arg10[%c2_111, %c0_112], %1591 {strides = array<i32>} : memref<32x128xf32, #tpu.memory_space<vmem>>, vector<1x128xf32>,
    %1593 = vector.extract_strided_slice %1581 {offsets = [5, 0], sizes = [1, 128], strides = [1, 1]} : vector<6x128xf32> to vector<1x128xf32>
    %1594 = vector.broadcast %1570 : f32 to vector<1x128xf32>
    %1595 = arith.maximumf %1593, %1594 : vector<1x128xf32>
    %c3_113 = arith.constant 3 : index
    %c0_114 = arith.constant 0 : index
    %1596 = vector.load %arg10[%c3_113, %c0_114] : memref<32x128xf32, #tpu.memory_space<vmem>>, vector<1x128xf32>
    tpu.vector_store %arg10[%c3_113, %c0_114], %1595 {strides = array<i32>} : memref<32x128xf32, #tpu.memory_space<vmem>>, vector<1x128xf32>,
    %c345 = arith.constant 345 : index
    %1597 = memref.load %arg2[%c345] : memref<361xf32, #tpu.memory_space<smem>>
    %c353 = arith.constant 353 : index
    %1598 = memref.load %arg2[%c353] : memref<361xf32, #tpu.memory_space<smem>>
    %cst_115 = arith.constant 0.000000e+00 : f32
    %1599 = vector.broadcast %cst_115 : f32 to vector<6x128xf32>
    %1600 = arith.maximumf %1280, %1599 : vector<6x128xf32>
    %1601 = vector.broadcast %1597 : f32 to vector<6x128xf32>
    %1602 = arith.mulf %1600, %1601 : vector<6x128xf32>
    %1603 = vector.broadcast %1598 : f32 to vector<6x128xf32>
    %1604 = arith.addf %1602, %1603 : vector<6x128xf32>
    %c2_i32_116 = arith.constant 2 : i32
    %1605 = tpu.dynamic_rotate %1604 by %c2_i32_116 dim 1 : vector<6x128xf32>, i32 -> vector<6x128xf32>
    %1606 = vector.broadcast %1598 : f32 to vector<6x128xf32>
    %1607 = arith.select %364, %1605, %1606 : vector<6x128xi1>, vector<6x128xf32>
    %c126_i32_117 = arith.constant 126 : i32
    %1608 = tpu.dynamic_rotate %1607 by %c126_i32_117 dim 1 : vector<6x128xf32>, i32 -> vector<6x128xf32>
    %1609 = arith.maximumf %1607, %1608 : vector<6x128xf32>
    %1610 = vector.extract_strided_slice %1609 {offsets = [0, 0], sizes = [5, 128], strides = [1, 1]} : vector<6x128xf32> to vector<5x128xf32>
    %1611 = vector.extract_strided_slice %1609 {offsets = [1, 0], sizes = [5, 128], strides = [1, 1]} : vector<6x128xf32> to vector<5x128xf32>
    %1612 = arith.maximumf %1610, %1611 : vector<5x128xf32>
    %1613 = vector.extract_strided_slice %1609 {offsets = [0, 0], sizes = [1, 128], strides = [1, 1]} : vector<6x128xf32> to vector<1x128xf32>
    %1614 = vector.broadcast %1598 : f32 to vector<1x128xf32>
    %1615 = arith.maximumf %1613, %1614 : vector<1x128xf32>
    %c4_118 = arith.constant 4 : index
    %c0_119 = arith.constant 0 : index
    %1616 = vector.load %arg10[%c4_118, %c0_119] : memref<32x128xf32, #tpu.memory_space<vmem>>, vector<1x128xf32>
    tpu.vector_store %arg10[%c4_118, %c0_119], %1615 {strides = array<i32>} : memref<32x128xf32, #tpu.memory_space<vmem>>, vector<1x128xf32>,
    %1617 = vector.extract_strided_slice %1612 {offsets = [1, 0], sizes = [1, 128], strides = [1, 1]} : vector<5x128xf32> to vector<1x128xf32>
    %c5_120 = arith.constant 5 : index
    %c0_121 = arith.constant 0 : index
    %1618 = vector.load %arg10[%c5_120, %c0_121] : memref<32x128xf32, #tpu.memory_space<vmem>>, vector<1x128xf32>
    tpu.vector_store %arg10[%c5_120, %c0_121], %1617 {strides = array<i32>} : memref<32x128xf32, #tpu.memory_space<vmem>>, vector<1x128xf32>,
    %1619 = vector.extract_strided_slice %1612 {offsets = [3, 0], sizes = [1, 128], strides = [1, 1]} : vector<5x128xf32> to vector<1x128xf32>
    %c6_122 = arith.constant 6 : index
    %c0_123 = arith.constant 0 : index
    %1620 = vector.load %arg10[%c6_122, %c0_123] : memref<32x128xf32, #tpu.memory_space<vmem>>, vector<1x128xf32>
    tpu.vector_store %arg10[%c6_122, %c0_123], %1619 {strides = array<i32>} : memref<32x128xf32, #tpu.memory_space<vmem>>, vector<1x128xf32>,
    %1621 = vector.extract_strided_slice %1609 {offsets = [5, 0], sizes = [1, 128], strides = [1, 1]} : vector<6x128xf32> to vector<1x128xf32>
    %1622 = vector.broadcast %1598 : f32 to vector<1x128xf32>
    %1623 = arith.maximumf %1621, %1622 : vector<1x128xf32>
    %c7_124 = arith.constant 7 : index
    %c0_125 = arith.constant 0 : index
    %1624 = vector.load %arg10[%c7_124, %c0_125] : memref<32x128xf32, #tpu.memory_space<vmem>>, vector<1x128xf32>
    tpu.vector_store %arg10[%c7_124, %c0_125], %1623 {strides = array<i32>} : memref<32x128xf32, #tpu.memory_space<vmem>>, vector<1x128xf32>,
    %c346 = arith.constant 346 : index
    %1625 = memref.load %arg2[%c346] : memref<361xf32, #tpu.memory_space<smem>>
    %c354 = arith.constant 354 : index
    %1626 = memref.load %arg2[%c354] : memref<361xf32, #tpu.memory_space<smem>>
    %cst_126 = arith.constant 0.000000e+00 : f32
    %1627 = vector.broadcast %cst_126 : f32 to vector<6x128xf32>
    %1628 = arith.maximumf %1328, %1627 : vector<6x128xf32>
    %1629 = vector.broadcast %1625 : f32 to vector<6x128xf32>
    %1630 = arith.mulf %1628, %1629 : vector<6x128xf32>
    %1631 = vector.broadcast %1626 : f32 to vector<6x128xf32>
    %1632 = arith.addf %1630, %1631 : vector<6x128xf32>
    %c2_i32_127 = arith.constant 2 : i32
    %1633 = tpu.dynamic_rotate %1632 by %c2_i32_127 dim 1 : vector<6x128xf32>, i32 -> vector<6x128xf32>
    %1634 = vector.broadcast %1626 : f32 to vector<6x128xf32>
    %1635 = arith.select %364, %1633, %1634 : vector<6x128xi1>, vector<6x128xf32>
    %c126_i32_128 = arith.constant 126 : i32
    %1636 = tpu.dynamic_rotate %1635 by %c126_i32_128 dim 1 : vector<6x128xf32>, i32 -> vector<6x128xf32>
    %1637 = arith.maximumf %1635, %1636 : vector<6x128xf32>
    %1638 = vector.extract_strided_slice %1637 {offsets = [0, 0], sizes = [5, 128], strides = [1, 1]} : vector<6x128xf32> to vector<5x128xf32>
    %1639 = vector.extract_strided_slice %1637 {offsets = [1, 0], sizes = [5, 128], strides = [1, 1]} : vector<6x128xf32> to vector<5x128xf32>
    %1640 = arith.maximumf %1638, %1639 : vector<5x128xf32>
    %1641 = vector.extract_strided_slice %1637 {offsets = [0, 0], sizes = [1, 128], strides = [1, 1]} : vector<6x128xf32> to vector<1x128xf32>
    %1642 = vector.broadcast %1626 : f32 to vector<1x128xf32>
    %1643 = arith.maximumf %1641, %1642 : vector<1x128xf32>
    %c8_129 = arith.constant 8 : index
    %c0_130 = arith.constant 0 : index
    %1644 = vector.load %arg10[%c8_129, %c0_130] : memref<32x128xf32, #tpu.memory_space<vmem>>, vector<1x128xf32>
    tpu.vector_store %arg10[%c8_129, %c0_130], %1643 {strides = array<i32>} : memref<32x128xf32, #tpu.memory_space<vmem>>, vector<1x128xf32>,
    %1645 = vector.extract_strided_slice %1640 {offsets = [1, 0], sizes = [1, 128], strides = [1, 1]} : vector<5x128xf32> to vector<1x128xf32>
    %c9_131 = arith.constant 9 : index
    %c0_132 = arith.constant 0 : index
    %1646 = vector.load %arg10[%c9_131, %c0_132] : memref<32x128xf32, #tpu.memory_space<vmem>>, vector<1x128xf32>
    tpu.vector_store %arg10[%c9_131, %c0_132], %1645 {strides = array<i32>} : memref<32x128xf32, #tpu.memory_space<vmem>>, vector<1x128xf32>,
    %1647 = vector.extract_strided_slice %1640 {offsets = [3, 0], sizes = [1, 128], strides = [1, 1]} : vector<5x128xf32> to vector<1x128xf32>
    %c10_133 = arith.constant 10 : index
    %c0_134 = arith.constant 0 : index
    %1648 = vector.load %arg10[%c10_133, %c0_134] : memref<32x128xf32, #tpu.memory_space<vmem>>, vector<1x128xf32>
    tpu.vector_store %arg10[%c10_133, %c0_134], %1647 {strides = array<i32>} : memref<32x128xf32, #tpu.memory_space<vmem>>, vector<1x128xf32>,
    %1649 = vector.extract_strided_slice %1637 {offsets = [5, 0], sizes = [1, 128], strides = [1, 1]} : vector<6x128xf32> to vector<1x128xf32>
    %1650 = vector.broadcast %1626 : f32 to vector<1x128xf32>
    %1651 = arith.maximumf %1649, %1650 : vector<1x128xf32>
    %c11_135 = arith.constant 11 : index
    %c0_136 = arith.constant 0 : index
    %1652 = vector.load %arg10[%c11_135, %c0_136] : memref<32x128xf32, #tpu.memory_space<vmem>>, vector<1x128xf32>
    tpu.vector_store %arg10[%c11_135, %c0_136], %1651 {strides = array<i32>} : memref<32x128xf32, #tpu.memory_space<vmem>>, vector<1x128xf32>,
    %c347 = arith.constant 347 : index
    %1653 = memref.load %arg2[%c347] : memref<361xf32, #tpu.memory_space<smem>>
    %c355 = arith.constant 355 : index
    %1654 = memref.load %arg2[%c355] : memref<361xf32, #tpu.memory_space<smem>>
    %cst_137 = arith.constant 0.000000e+00 : f32
    %1655 = vector.broadcast %cst_137 : f32 to vector<6x128xf32>
    %1656 = arith.maximumf %1376, %1655 : vector<6x128xf32>
    %1657 = vector.broadcast %1653 : f32 to vector<6x128xf32>
    %1658 = arith.mulf %1656, %1657 : vector<6x128xf32>
    %1659 = vector.broadcast %1654 : f32 to vector<6x128xf32>
    %1660 = arith.addf %1658, %1659 : vector<6x128xf32>
    %c2_i32_138 = arith.constant 2 : i32
    %1661 = tpu.dynamic_rotate %1660 by %c2_i32_138 dim 1 : vector<6x128xf32>, i32 -> vector<6x128xf32>
    %1662 = vector.broadcast %1654 : f32 to vector<6x128xf32>
    %1663 = arith.select %364, %1661, %1662 : vector<6x128xi1>, vector<6x128xf32>
    %c126_i32_139 = arith.constant 126 : i32
    %1664 = tpu.dynamic_rotate %1663 by %c126_i32_139 dim 1 : vector<6x128xf32>, i32 -> vector<6x128xf32>
    %1665 = arith.maximumf %1663, %1664 : vector<6x128xf32>
    %1666 = vector.extract_strided_slice %1665 {offsets = [0, 0], sizes = [5, 128], strides = [1, 1]} : vector<6x128xf32> to vector<5x128xf32>
    %1667 = vector.extract_strided_slice %1665 {offsets = [1, 0], sizes = [5, 128], strides = [1, 1]} : vector<6x128xf32> to vector<5x128xf32>
    %1668 = arith.maximumf %1666, %1667 : vector<5x128xf32>
    %1669 = vector.extract_strided_slice %1665 {offsets = [0, 0], sizes = [1, 128], strides = [1, 1]} : vector<6x128xf32> to vector<1x128xf32>
    %1670 = vector.broadcast %1654 : f32 to vector<1x128xf32>
    %1671 = arith.maximumf %1669, %1670 : vector<1x128xf32>
    %c12_140 = arith.constant 12 : index
    %c0_141 = arith.constant 0 : index
    %1672 = vector.load %arg10[%c12_140, %c0_141] : memref<32x128xf32, #tpu.memory_space<vmem>>, vector<1x128xf32>
    tpu.vector_store %arg10[%c12_140, %c0_141], %1671 {strides = array<i32>} : memref<32x128xf32, #tpu.memory_space<vmem>>, vector<1x128xf32>,
    %1673 = vector.extract_strided_slice %1668 {offsets = [1, 0], sizes = [1, 128], strides = [1, 1]} : vector<5x128xf32> to vector<1x128xf32>
    %c13_142 = arith.constant 13 : index
    %c0_143 = arith.constant 0 : index
    %1674 = vector.load %arg10[%c13_142, %c0_143] : memref<32x128xf32, #tpu.memory_space<vmem>>, vector<1x128xf32>
    tpu.vector_store %arg10[%c13_142, %c0_143], %1673 {strides = array<i32>} : memref<32x128xf32, #tpu.memory_space<vmem>>, vector<1x128xf32>,
    %1675 = vector.extract_strided_slice %1668 {offsets = [3, 0], sizes = [1, 128], strides = [1, 1]} : vector<5x128xf32> to vector<1x128xf32>
    %c14_144 = arith.constant 14 : index
    %c0_145 = arith.constant 0 : index
    %1676 = vector.load %arg10[%c14_144, %c0_145] : memref<32x128xf32, #tpu.memory_space<vmem>>, vector<1x128xf32>
    tpu.vector_store %arg10[%c14_144, %c0_145], %1675 {strides = array<i32>} : memref<32x128xf32, #tpu.memory_space<vmem>>, vector<1x128xf32>,
    %1677 = vector.extract_strided_slice %1665 {offsets = [5, 0], sizes = [1, 128], strides = [1, 1]} : vector<6x128xf32> to vector<1x128xf32>
    %1678 = vector.broadcast %1654 : f32 to vector<1x128xf32>
    %1679 = arith.maximumf %1677, %1678 : vector<1x128xf32>
    %c15_146 = arith.constant 15 : index
    %c0_147 = arith.constant 0 : index
    %1680 = vector.load %arg10[%c15_146, %c0_147] : memref<32x128xf32, #tpu.memory_space<vmem>>, vector<1x128xf32>
    tpu.vector_store %arg10[%c15_146, %c0_147], %1679 {strides = array<i32>} : memref<32x128xf32, #tpu.memory_space<vmem>>, vector<1x128xf32>,
    %c348 = arith.constant 348 : index
    %1681 = memref.load %arg2[%c348] : memref<361xf32, #tpu.memory_space<smem>>
    %c356 = arith.constant 356 : index
    %1682 = memref.load %arg2[%c356] : memref<361xf32, #tpu.memory_space<smem>>
    %cst_148 = arith.constant 0.000000e+00 : f32
    %1683 = vector.broadcast %cst_148 : f32 to vector<6x128xf32>
    %1684 = arith.maximumf %1424, %1683 : vector<6x128xf32>
    %1685 = vector.broadcast %1681 : f32 to vector<6x128xf32>
    %1686 = arith.mulf %1684, %1685 : vector<6x128xf32>
    %1687 = vector.broadcast %1682 : f32 to vector<6x128xf32>
    %1688 = arith.addf %1686, %1687 : vector<6x128xf32>
    %c2_i32_149 = arith.constant 2 : i32
    %1689 = tpu.dynamic_rotate %1688 by %c2_i32_149 dim 1 : vector<6x128xf32>, i32 -> vector<6x128xf32>
    %1690 = vector.broadcast %1682 : f32 to vector<6x128xf32>
    %1691 = arith.select %364, %1689, %1690 : vector<6x128xi1>, vector<6x128xf32>
    %c126_i32_150 = arith.constant 126 : i32
    %1692 = tpu.dynamic_rotate %1691 by %c126_i32_150 dim 1 : vector<6x128xf32>, i32 -> vector<6x128xf32>
    %1693 = arith.maximumf %1691, %1692 : vector<6x128xf32>
    %1694 = vector.extract_strided_slice %1693 {offsets = [0, 0], sizes = [5, 128], strides = [1, 1]} : vector<6x128xf32> to vector<5x128xf32>
    %1695 = vector.extract_strided_slice %1693 {offsets = [1, 0], sizes = [5, 128], strides = [1, 1]} : vector<6x128xf32> to vector<5x128xf32>
    %1696 = arith.maximumf %1694, %1695 : vector<5x128xf32>
    %1697 = vector.extract_strided_slice %1693 {offsets = [0, 0], sizes = [1, 128], strides = [1, 1]} : vector<6x128xf32> to vector<1x128xf32>
    %1698 = vector.broadcast %1682 : f32 to vector<1x128xf32>
    %1699 = arith.maximumf %1697, %1698 : vector<1x128xf32>
    %c16_151 = arith.constant 16 : index
    %c0_152 = arith.constant 0 : index
    %1700 = vector.load %arg10[%c16_151, %c0_152] : memref<32x128xf32, #tpu.memory_space<vmem>>, vector<1x128xf32>
    tpu.vector_store %arg10[%c16_151, %c0_152], %1699 {strides = array<i32>} : memref<32x128xf32, #tpu.memory_space<vmem>>, vector<1x128xf32>,
    %1701 = vector.extract_strided_slice %1696 {offsets = [1, 0], sizes = [1, 128], strides = [1, 1]} : vector<5x128xf32> to vector<1x128xf32>
    %c17_153 = arith.constant 17 : index
    %c0_154 = arith.constant 0 : index
    %1702 = vector.load %arg10[%c17_153, %c0_154] : memref<32x128xf32, #tpu.memory_space<vmem>>, vector<1x128xf32>
    tpu.vector_store %arg10[%c17_153, %c0_154], %1701 {strides = array<i32>} : memref<32x128xf32, #tpu.memory_space<vmem>>, vector<1x128xf32>,
    %1703 = vector.extract_strided_slice %1696 {offsets = [3, 0], sizes = [1, 128], strides = [1, 1]} : vector<5x128xf32> to vector<1x128xf32>
    %c18_155 = arith.constant 18 : index
    %c0_156 = arith.constant 0 : index
    %1704 = vector.load %arg10[%c18_155, %c0_156] : memref<32x128xf32, #tpu.memory_space<vmem>>, vector<1x128xf32>
    tpu.vector_store %arg10[%c18_155, %c0_156], %1703 {strides = array<i32>} : memref<32x128xf32, #tpu.memory_space<vmem>>, vector<1x128xf32>,
    %1705 = vector.extract_strided_slice %1693 {offsets = [5, 0], sizes = [1, 128], strides = [1, 1]} : vector<6x128xf32> to vector<1x128xf32>
    %1706 = vector.broadcast %1682 : f32 to vector<1x128xf32>
    %1707 = arith.maximumf %1705, %1706 : vector<1x128xf32>
    %c19_157 = arith.constant 19 : index
    %c0_158 = arith.constant 0 : index
    %1708 = vector.load %arg10[%c19_157, %c0_158] : memref<32x128xf32, #tpu.memory_space<vmem>>, vector<1x128xf32>
    tpu.vector_store %arg10[%c19_157, %c0_158], %1707 {strides = array<i32>} : memref<32x128xf32, #tpu.memory_space<vmem>>, vector<1x128xf32>,
    %c349 = arith.constant 349 : index
    %1709 = memref.load %arg2[%c349] : memref<361xf32, #tpu.memory_space<smem>>
    %c357 = arith.constant 357 : index
    %1710 = memref.load %arg2[%c357] : memref<361xf32, #tpu.memory_space<smem>>
    %cst_159 = arith.constant 0.000000e+00 : f32
    %1711 = vector.broadcast %cst_159 : f32 to vector<6x128xf32>
    %1712 = arith.maximumf %1472, %1711 : vector<6x128xf32>
    %1713 = vector.broadcast %1709 : f32 to vector<6x128xf32>
    %1714 = arith.mulf %1712, %1713 : vector<6x128xf32>
    %1715 = vector.broadcast %1710 : f32 to vector<6x128xf32>
    %1716 = arith.addf %1714, %1715 : vector<6x128xf32>
    %c2_i32_160 = arith.constant 2 : i32
    %1717 = tpu.dynamic_rotate %1716 by %c2_i32_160 dim 1 : vector<6x128xf32>, i32 -> vector<6x128xf32>
    %1718 = vector.broadcast %1710 : f32 to vector<6x128xf32>
    %1719 = arith.select %364, %1717, %1718 : vector<6x128xi1>, vector<6x128xf32>
    %c126_i32_161 = arith.constant 126 : i32
    %1720 = tpu.dynamic_rotate %1719 by %c126_i32_161 dim 1 : vector<6x128xf32>, i32 -> vector<6x128xf32>
    %1721 = arith.maximumf %1719, %1720 : vector<6x128xf32>
    %1722 = vector.extract_strided_slice %1721 {offsets = [0, 0], sizes = [5, 128], strides = [1, 1]} : vector<6x128xf32> to vector<5x128xf32>
    %1723 = vector.extract_strided_slice %1721 {offsets = [1, 0], sizes = [5, 128], strides = [1, 1]} : vector<6x128xf32> to vector<5x128xf32>
    %1724 = arith.maximumf %1722, %1723 : vector<5x128xf32>
    %1725 = vector.extract_strided_slice %1721 {offsets = [0, 0], sizes = [1, 128], strides = [1, 1]} : vector<6x128xf32> to vector<1x128xf32>
    %1726 = vector.broadcast %1710 : f32 to vector<1x128xf32>
    %1727 = arith.maximumf %1725, %1726 : vector<1x128xf32>
    %c20_162 = arith.constant 20 : index
    %c0_163 = arith.constant 0 : index
    %1728 = vector.load %arg10[%c20_162, %c0_163] : memref<32x128xf32, #tpu.memory_space<vmem>>, vector<1x128xf32>
    tpu.vector_store %arg10[%c20_162, %c0_163], %1727 {strides = array<i32>} : memref<32x128xf32, #tpu.memory_space<vmem>>, vector<1x128xf32>,
    %1729 = vector.extract_strided_slice %1724 {offsets = [1, 0], sizes = [1, 128], strides = [1, 1]} : vector<5x128xf32> to vector<1x128xf32>
    %c21_164 = arith.constant 21 : index
    %c0_165 = arith.constant 0 : index
    %1730 = vector.load %arg10[%c21_164, %c0_165] : memref<32x128xf32, #tpu.memory_space<vmem>>, vector<1x128xf32>
    tpu.vector_store %arg10[%c21_164, %c0_165], %1729 {strides = array<i32>} : memref<32x128xf32, #tpu.memory_space<vmem>>, vector<1x128xf32>,
    %1731 = vector.extract_strided_slice %1724 {offsets = [3, 0], sizes = [1, 128], strides = [1, 1]} : vector<5x128xf32> to vector<1x128xf32>
    %c22_166 = arith.constant 22 : index
    %c0_167 = arith.constant 0 : index
    %1732 = vector.load %arg10[%c22_166, %c0_167] : memref<32x128xf32, #tpu.memory_space<vmem>>, vector<1x128xf32>
    tpu.vector_store %arg10[%c22_166, %c0_167], %1731 {strides = array<i32>} : memref<32x128xf32, #tpu.memory_space<vmem>>, vector<1x128xf32>,
    %1733 = vector.extract_strided_slice %1721 {offsets = [5, 0], sizes = [1, 128], strides = [1, 1]} : vector<6x128xf32> to vector<1x128xf32>
    %1734 = vector.broadcast %1710 : f32 to vector<1x128xf32>
    %1735 = arith.maximumf %1733, %1734 : vector<1x128xf32>
    %c23_168 = arith.constant 23 : index
    %c0_169 = arith.constant 0 : index
    %1736 = vector.load %arg10[%c23_168, %c0_169] : memref<32x128xf32, #tpu.memory_space<vmem>>, vector<1x128xf32>
    tpu.vector_store %arg10[%c23_168, %c0_169], %1735 {strides = array<i32>} : memref<32x128xf32, #tpu.memory_space<vmem>>, vector<1x128xf32>,
    %c350 = arith.constant 350 : index
    %1737 = memref.load %arg2[%c350] : memref<361xf32, #tpu.memory_space<smem>>
    %c358 = arith.constant 358 : index
    %1738 = memref.load %arg2[%c358] : memref<361xf32, #tpu.memory_space<smem>>
    %cst_170 = arith.constant 0.000000e+00 : f32
    %1739 = vector.broadcast %cst_170 : f32 to vector<6x128xf32>
    %1740 = arith.maximumf %1520, %1739 : vector<6x128xf32>
    %1741 = vector.broadcast %1737 : f32 to vector<6x128xf32>
    %1742 = arith.mulf %1740, %1741 : vector<6x128xf32>
    %1743 = vector.broadcast %1738 : f32 to vector<6x128xf32>
    %1744 = arith.addf %1742, %1743 : vector<6x128xf32>
    %c2_i32_171 = arith.constant 2 : i32
    %1745 = tpu.dynamic_rotate %1744 by %c2_i32_171 dim 1 : vector<6x128xf32>, i32 -> vector<6x128xf32>
    %1746 = vector.broadcast %1738 : f32 to vector<6x128xf32>
    %1747 = arith.select %364, %1745, %1746 : vector<6x128xi1>, vector<6x128xf32>
    %c126_i32_172 = arith.constant 126 : i32
    %1748 = tpu.dynamic_rotate %1747 by %c126_i32_172 dim 1 : vector<6x128xf32>, i32 -> vector<6x128xf32>
    %1749 = arith.maximumf %1747, %1748 : vector<6x128xf32>
    %1750 = vector.extract_strided_slice %1749 {offsets = [0, 0], sizes = [5, 128], strides = [1, 1]} : vector<6x128xf32> to vector<5x128xf32>
    %1751 = vector.extract_strided_slice %1749 {offsets = [1, 0], sizes = [5, 128], strides = [1, 1]} : vector<6x128xf32> to vector<5x128xf32>
    %1752 = arith.maximumf %1750, %1751 : vector<5x128xf32>
    %1753 = vector.extract_strided_slice %1749 {offsets = [0, 0], sizes = [1, 128], strides = [1, 1]} : vector<6x128xf32> to vector<1x128xf32>
    %1754 = vector.broadcast %1738 : f32 to vector<1x128xf32>
    %1755 = arith.maximumf %1753, %1754 : vector<1x128xf32>
    %c24_173 = arith.constant 24 : index
    %c0_174 = arith.constant 0 : index
    %1756 = vector.load %arg10[%c24_173, %c0_174] : memref<32x128xf32, #tpu.memory_space<vmem>>, vector<1x128xf32>
    tpu.vector_store %arg10[%c24_173, %c0_174], %1755 {strides = array<i32>} : memref<32x128xf32, #tpu.memory_space<vmem>>, vector<1x128xf32>,
    %1757 = vector.extract_strided_slice %1752 {offsets = [1, 0], sizes = [1, 128], strides = [1, 1]} : vector<5x128xf32> to vector<1x128xf32>
    %c25_175 = arith.constant 25 : index
    %c0_176 = arith.constant 0 : index
    %1758 = vector.load %arg10[%c25_175, %c0_176] : memref<32x128xf32, #tpu.memory_space<vmem>>, vector<1x128xf32>
    tpu.vector_store %arg10[%c25_175, %c0_176], %1757 {strides = array<i32>} : memref<32x128xf32, #tpu.memory_space<vmem>>, vector<1x128xf32>,
    %1759 = vector.extract_strided_slice %1752 {offsets = [3, 0], sizes = [1, 128], strides = [1, 1]} : vector<5x128xf32> to vector<1x128xf32>
    %c26_177 = arith.constant 26 : index
    %c0_178 = arith.constant 0 : index
    %1760 = vector.load %arg10[%c26_177, %c0_178] : memref<32x128xf32, #tpu.memory_space<vmem>>, vector<1x128xf32>
    tpu.vector_store %arg10[%c26_177, %c0_178], %1759 {strides = array<i32>} : memref<32x128xf32, #tpu.memory_space<vmem>>, vector<1x128xf32>,
    %1761 = vector.extract_strided_slice %1749 {offsets = [5, 0], sizes = [1, 128], strides = [1, 1]} : vector<6x128xf32> to vector<1x128xf32>
    %1762 = vector.broadcast %1738 : f32 to vector<1x128xf32>
    %1763 = arith.maximumf %1761, %1762 : vector<1x128xf32>
    %c27_179 = arith.constant 27 : index
    %c0_180 = arith.constant 0 : index
    %1764 = vector.load %arg10[%c27_179, %c0_180] : memref<32x128xf32, #tpu.memory_space<vmem>>, vector<1x128xf32>
    tpu.vector_store %arg10[%c27_179, %c0_180], %1763 {strides = array<i32>} : memref<32x128xf32, #tpu.memory_space<vmem>>, vector<1x128xf32>,
    %c351 = arith.constant 351 : index
    %1765 = memref.load %arg2[%c351] : memref<361xf32, #tpu.memory_space<smem>>
    %c359 = arith.constant 359 : index
    %1766 = memref.load %arg2[%c359] : memref<361xf32, #tpu.memory_space<smem>>
    %cst_181 = arith.constant 0.000000e+00 : f32
    %1767 = vector.broadcast %cst_181 : f32 to vector<6x128xf32>
    %1768 = arith.maximumf %1568, %1767 : vector<6x128xf32>
    %1769 = vector.broadcast %1765 : f32 to vector<6x128xf32>
    %1770 = arith.mulf %1768, %1769 : vector<6x128xf32>
    %1771 = vector.broadcast %1766 : f32 to vector<6x128xf32>
    %1772 = arith.addf %1770, %1771 : vector<6x128xf32>
    %c2_i32_182 = arith.constant 2 : i32
    %1773 = tpu.dynamic_rotate %1772 by %c2_i32_182 dim 1 : vector<6x128xf32>, i32 -> vector<6x128xf32>
    %1774 = vector.broadcast %1766 : f32 to vector<6x128xf32>
    %1775 = arith.select %364, %1773, %1774 : vector<6x128xi1>, vector<6x128xf32>
    %c126_i32_183 = arith.constant 126 : i32
    %1776 = tpu.dynamic_rotate %1775 by %c126_i32_183 dim 1 : vector<6x128xf32>, i32 -> vector<6x128xf32>
    %1777 = arith.maximumf %1775, %1776 : vector<6x128xf32>
    %1778 = vector.extract_strided_slice %1777 {offsets = [0, 0], sizes = [5, 128], strides = [1, 1]} : vector<6x128xf32> to vector<5x128xf32>
    %1779 = vector.extract_strided_slice %1777 {offsets = [1, 0], sizes = [5, 128], strides = [1, 1]} : vector<6x128xf32> to vector<5x128xf32>
    %1780 = arith.maximumf %1778, %1779 : vector<5x128xf32>
    %1781 = vector.extract_strided_slice %1777 {offsets = [0, 0], sizes = [1, 128], strides = [1, 1]} : vector<6x128xf32> to vector<1x128xf32>
    %1782 = vector.broadcast %1766 : f32 to vector<1x128xf32>
    %1783 = arith.maximumf %1781, %1782 : vector<1x128xf32>
    %c28_184 = arith.constant 28 : index
    %c0_185 = arith.constant 0 : index
    %1784 = vector.load %arg10[%c28_184, %c0_185] : memref<32x128xf32, #tpu.memory_space<vmem>>, vector<1x128xf32>
    tpu.vector_store %arg10[%c28_184, %c0_185], %1783 {strides = array<i32>} : memref<32x128xf32, #tpu.memory_space<vmem>>, vector<1x128xf32>,
    %1785 = vector.extract_strided_slice %1780 {offsets = [1, 0], sizes = [1, 128], strides = [1, 1]} : vector<5x128xf32> to vector<1x128xf32>
    %c29_186 = arith.constant 29 : index
    %c0_187 = arith.constant 0 : index
    %1786 = vector.load %arg10[%c29_186, %c0_187] : memref<32x128xf32, #tpu.memory_space<vmem>>, vector<1x128xf32>
    tpu.vector_store %arg10[%c29_186, %c0_187], %1785 {strides = array<i32>} : memref<32x128xf32, #tpu.memory_space<vmem>>, vector<1x128xf32>,
    %1787 = vector.extract_strided_slice %1780 {offsets = [3, 0], sizes = [1, 128], strides = [1, 1]} : vector<5x128xf32> to vector<1x128xf32>
    %c30_188 = arith.constant 30 : index
    %c0_189 = arith.constant 0 : index
    %1788 = vector.load %arg10[%c30_188, %c0_189] : memref<32x128xf32, #tpu.memory_space<vmem>>, vector<1x128xf32>
    tpu.vector_store %arg10[%c30_188, %c0_189], %1787 {strides = array<i32>} : memref<32x128xf32, #tpu.memory_space<vmem>>, vector<1x128xf32>,
    %1789 = vector.extract_strided_slice %1777 {offsets = [5, 0], sizes = [1, 128], strides = [1, 1]} : vector<6x128xf32> to vector<1x128xf32>
    %1790 = vector.broadcast %1766 : f32 to vector<1x128xf32>
    %1791 = arith.maximumf %1789, %1790 : vector<1x128xf32>
    %c31_190 = arith.constant 31 : index
    %c0_191 = arith.constant 0 : index
    %1792 = vector.load %arg10[%c31_190, %c0_191] : memref<32x128xf32, #tpu.memory_space<vmem>>, vector<1x128xf32>
    tpu.vector_store %arg10[%c31_190, %c0_191], %1791 {strides = array<i32>} : memref<32x128xf32, #tpu.memory_space<vmem>>, vector<1x128xf32>,
    %c0_192 = arith.constant 0 : index
    %c0_193 = arith.constant 0 : index
    %1793 = vector.load %arg10[%c0_192, %c0_193] : memref<32x128xf32, #tpu.memory_space<vmem>>, vector<32x128xf32>
    %c0_194 = arith.constant 0 : index
    %c0_195 = arith.constant 0 : index
    %c0_196 = arith.constant 0 : index
    %1794 = vector.load %arg3[%c0_194, %c0_195, %c0_196] : memref<4x16x32xf32, #tpu.memory_space<vmem>>, vector<1x16x32xf32>
    %1795 = vector.shape_cast %1794 : vector<1x16x32xf32> to vector<16x32xf32>
    %cst_197 = arith.constant dense<0.000000e+00> : vector<16x128xf32>
    %1796 = tpu.matmul %1795, %1793, %cst_197 {dimension_numbers = #tpu.dot_dimension_numbers<[1], [0], [0], [1], [0, 0, 1, 1], [], []>, precision = #tpu.contract_precision<fp32>} : vector<16x32xf32>, vector<32x128xf32>, vector<16x128xf32> -> vector<16x128xf32>
    %c1_198 = arith.constant 1 : index
    %c0_199 = arith.constant 0 : index
    %c0_200 = arith.constant 0 : index
    %1797 = vector.load %arg3[%c1_198, %c0_199, %c0_200] : memref<4x16x32xf32, #tpu.memory_space<vmem>>, vector<1x16x32xf32>
    %1798 = vector.shape_cast %1797 : vector<1x16x32xf32> to vector<16x32xf32>
    %cst_201 = arith.constant dense<0.000000e+00> : vector<16x128xf32>
    %1799 = tpu.matmul %1798, %1793, %cst_201 {dimension_numbers = #tpu.dot_dimension_numbers<[1], [0], [0], [1], [0, 0, 1, 1], [], []>, precision = #tpu.contract_precision<fp32>} : vector<16x32xf32>, vector<32x128xf32>, vector<16x128xf32> -> vector<16x128xf32>
    %c124_i32_202 = arith.constant 124 : i32
    %1800 = tpu.dynamic_rotate %1799 by %c124_i32_202 dim 1 : vector<16x128xf32>, i32 -> vector<16x128xf32>
    %1801 = arith.addf %1796, %1800 : vector<16x128xf32>
    %c2_203 = arith.constant 2 : index
    %c0_204 = arith.constant 0 : index
    %c0_205 = arith.constant 0 : index
    %1802 = vector.load %arg3[%c2_203, %c0_204, %c0_205] : memref<4x16x32xf32, #tpu.memory_space<vmem>>, vector<1x16x32xf32>
    %1803 = vector.shape_cast %1802 : vector<1x16x32xf32> to vector<16x32xf32>
    %cst_206 = arith.constant dense<0.000000e+00> : vector<16x128xf32>
    %1804 = tpu.matmul %1803, %1793, %cst_206 {dimension_numbers = #tpu.dot_dimension_numbers<[1], [0], [0], [1], [0, 0, 1, 1], [], []>, precision = #tpu.contract_precision<fp32>} : vector<16x32xf32>, vector<32x128xf32>, vector<16x128xf32> -> vector<16x128xf32>
    %c120_i32 = arith.constant 120 : i32
    %1805 = tpu.dynamic_rotate %1804 by %c120_i32 dim 1 : vector<16x128xf32>, i32 -> vector<16x128xf32>
    %1806 = arith.addf %1801, %1805 : vector<16x128xf32>
    %c3_207 = arith.constant 3 : index
    %c0_208 = arith.constant 0 : index
    %c0_209 = arith.constant 0 : index
    %1807 = vector.load %arg3[%c3_207, %c0_208, %c0_209] : memref<4x16x32xf32, #tpu.memory_space<vmem>>, vector<1x16x32xf32>
    %1808 = vector.shape_cast %1807 : vector<1x16x32xf32> to vector<16x32xf32>
    %cst_210 = arith.constant dense<0.000000e+00> : vector<16x128xf32>
    %1809 = tpu.matmul %1808, %1793, %cst_210 {dimension_numbers = #tpu.dot_dimension_numbers<[1], [0], [0], [1], [0, 0, 1, 1], [], []>, precision = #tpu.contract_precision<fp32>} : vector<16x32xf32>, vector<32x128xf32>, vector<16x128xf32> -> vector<16x128xf32>
    %c116_i32 = arith.constant 116 : i32
    %1810 = tpu.dynamic_rotate %1809 by %c116_i32 dim 1 : vector<16x128xf32>, i32 -> vector<16x128xf32>
    %1811 = arith.addf %1806, %1810 : vector<16x128xf32>
    %c0_211 = arith.constant 0 : index
    %c0_212 = arith.constant 0 : index
    %1812 = vector.load %arg6[%c0_211, %c0_212] : memref<16x128xf32, #tpu.memory_space<vmem>>, vector<16x128xf32>
    %1813 = arith.addf %1811, %1812 : vector<16x128xf32>
    %cst_213 = arith.constant 0.000000e+00 : f32
    %1814 = vector.broadcast %cst_213 : f32 to vector<16x128xf32>
    %1815 = arith.maximumf %1813, %1814 : vector<16x128xf32>
    %c0_214 = arith.constant 0 : index
    %c0_215 = arith.constant 0 : index
    %1816 = vector.load %arg4[%c0_214, %c0_215] : memref<4x16xf32, #tpu.memory_space<vmem>>, vector<4x16xf32>
    %cst_216 = arith.constant dense<0.000000e+00> : vector<4x128xf32>
    %1817 = tpu.matmul %1816, %1815, %cst_216 {dimension_numbers = #tpu.dot_dimension_numbers<[1], [0], [0], [1], [0, 0, 1, 1], [], []>, precision = #tpu.contract_precision<fp32>} : vector<4x16xf32>, vector<16x128xf32>, vector<4x128xf32> -> vector<4x128xf32>
    %c0_217 = arith.constant 0 : index
    %c0_218 = arith.constant 0 : index
    %1818 = vector.load %arg7[%c0_217, %c0_218] : memref<4x128xf32, #tpu.memory_space<vmem>>, vector<4x128xf32>
    %1819 = arith.addf %1817, %1818 : vector<4x128xf32>
    %cst_219 = arith.constant 0.000000e+00 : f32
    %1820 = vector.broadcast %cst_219 : f32 to vector<4x128xf32>
    %1821 = arith.maximumf %1819, %1820 : vector<4x128xf32>
    %c0_220 = arith.constant 0 : index
    %c0_221 = arith.constant 0 : index
    %1822 = vector.load %arg5[%c0_220, %c0_221] : memref<1x4xf32, #tpu.memory_space<vmem>>, vector<1x4xf32>
    %cst_222 = arith.constant dense<0.000000e+00> : vector<1x128xf32>
    %1823 = tpu.matmul %1822, %1821, %cst_222 {dimension_numbers = #tpu.dot_dimension_numbers<[1], [0], [0], [1], [0, 0, 1, 1], [], []>, precision = #tpu.contract_precision<fp32>} : vector<1x4xf32>, vector<4x128xf32>, vector<1x128xf32> -> vector<1x128xf32>
    %c360 = arith.constant 360 : index
    %1824 = memref.load %arg2[%c360] : memref<361xf32, #tpu.memory_space<smem>>
    %1825 = vector.broadcast %1824 : f32 to vector<1x128xf32>
    %1826 = arith.addf %1823, %1825 : vector<1x128xf32>
    %c0_223 = arith.constant 0 : index
    %c0_224 = arith.constant 0 : index
    %c0_225 = arith.constant 0 : index
    %1827 = vector.load %arg8[%c0_223, %c0_224, %c0_225] : memref<1x1x128xf32, #tpu.memory_space<vmem>>, vector<1x1x128xf32>
    %1828 = vector.shape_cast %1827 : vector<1x1x128xf32> to vector<1x128xf32>
    %1829 = vector.shape_cast %1826 : vector<1x128xf32> to vector<1x1x128xf32>
    tpu.vector_store %arg8[%c0_223, %c0_224, %c0_225], %1829 {strides = array<i32>} : memref<1x1x128xf32, #tpu.memory_space<vmem>>, vector<1x1x128xf32>,
    return
  }
  func.func @transform_0(%arg0: i32) -> (i32, i32, i32, i32) {
    %c0_i32 = arith.constant 0 : i32
    %c0_i32_0 = arith.constant 0 : i32
    %c0_i32_1 = arith.constant 0 : i32
    %c0_i32_2 = arith.constant 0 : i32
    return %arg0, %c0_i32, %c0_i32_0, %c0_i32_1 : i32, i32, i32, i32
  }
  func.func @transform_1(%arg0: i32) -> i32 {
    %c0_i32 = arith.constant 0 : i32
    %c0_i32_0 = arith.constant 0 : i32
    return %c0_i32 : i32
  }
  func.func @transform_2(%arg0: i32) -> (i32, i32, i32) {
    %c0_i32 = arith.constant 0 : i32
    %c0_i32_0 = arith.constant 0 : i32
    %c0_i32_1 = arith.constant 0 : i32
    %c0_i32_2 = arith.constant 0 : i32
    return %c0_i32, %c0_i32_0, %c0_i32_1 : i32, i32, i32
  }
  func.func @transform_3(%arg0: i32) -> (i32, i32) {
    %c0_i32 = arith.constant 0 : i32
    %c0_i32_0 = arith.constant 0 : i32
    %c0_i32_1 = arith.constant 0 : i32
    return %c0_i32, %c0_i32_0 : i32, i32
  }
  func.func @transform_4(%arg0: i32) -> (i32, i32) {
    %c0_i32 = arith.constant 0 : i32
    %c0_i32_0 = arith.constant 0 : i32
    %c0_i32_1 = arith.constant 0 : i32
    return %c0_i32, %c0_i32_0 : i32, i32
  }
  func.func @transform_5(%arg0: i32) -> (i32, i32) {
    %c0_i32 = arith.constant 0 : i32
    %c0_i32_0 = arith.constant 0 : i32
    %c0_i32_1 = arith.constant 0 : i32
    return %c0_i32, %c0_i32_0 : i32, i32
  }
  func.func @transform_6(%arg0: i32) -> (i32, i32) {
    %c0_i32 = arith.constant 0 : i32
    %c0_i32_0 = arith.constant 0 : i32
    %c0_i32_1 = arith.constant 0 : i32
    return %c0_i32, %c0_i32_0 : i32, i32
  }
  func.func @transform_7(%arg0: i32) -> (i32, i32, i32) {
    %c0_i32 = arith.constant 0 : i32
    %c0_i32_0 = arith.constant 0 : i32
    %c0_i32_1 = arith.constant 0 : i32
    return %arg0, %c0_i32, %c0_i32_0 : i32, i32, i32
  }
}

</mosaic_0001>

<bundles_post_ra>
// kernel: tpu_custom_call.1
= control target key start
LH: loop header
LB: loop body
LE: loop exit
PB: predicated region body
PF: predicated region fallthrough
CT: control target
= control target key end

     0   :  { %s11117_s0 = inlined_call_operand.hbm [shape: f32[2,1,16,128], index: 0, kind: input, shape index: {}]   ;;  %s11118_s1 = inlined_call_operand.hbm [shape: f32[361], index: 1, kind: input, shape index: {}]   ;;  %s11119_s2 = inlined_call_operand.hbm [shape: f32[4,16,32], index: 2, kind: input, shape index: {}]   ;;  %s11120_s3 = inlined_call_operand.hbm [shape: f32[4,16], index: 3, kind: input, shape index: {}]   ;;  %s11121_s4 = inlined_call_operand.vmem [shape: f32[1,4], index: 4, kind: input, shape index: {}]   ;;  %s11122_s5 = inlined_call_operand.vmem [shape: f32[16,128], index: 5, kind: input, shape index: {}]   ;;  %s11123_s6 = inlined_call_operand.vmem [shape: f32[4,128], index: 6, kind: input, shape index: {}]   ;;  %s11124_s7 = inlined_call_operand.hbm [shape: f32[2,1,128], index: 7, kind: output, shape index: {}]  }
   0x1   :  { %11445 = sst [smem:[#allocation230_spill]] %s11117_s0 }
   0x2   :  { %11446 = sst [smem:[#allocation231_spill]] %s11118_s1 }
   0x3   :  { %11447 = sst [smem:[#allocation232_spill]] %s11119_s2 }
   0x4   :  { %11448 = sst [smem:[#allocation233_spill]] %s11120_s3 }
   0x5   :  { %11449 = sst [smem:[#allocation234_spill]] %s11121_s4 }
   0x6   :  { %11450 = sst [smem:[#allocation235_spill]] %s11122_s5 }
   0x7   :  { %11451 = sst [smem:[#allocation236_spill]] %s11123_s6 }
   0x8   :  { %11452 = sst [smem:[#allocation237_spill]] %s11124_s7 }
   0x9   :  { %12 = vsyncpa [#allocation5], 0 }
   0xa   :  { %14 = vsyncpa [#allocation5 + $0x1], 0 }
   0xb   :  { %15 = vsyncpa [#allocation7], 0 }
   0xc   :  { %16 = vsyncpa [#allocation10], 0 }
   0xd   :  { %17 = vsyncpa [#allocation6], 0 }
   0xe   :  { %19 = vsyncpa [#allocation6 + $0x1], 0  ;;  %s7561_s24 = smov 0   ;;  %s7563_s25 = smov 0  }
   0xf   :  { %s7565_s26 = smov 0   ;;  %s7567_s27 = smov 0  }
  0x10 LB: > { %11453 = sst [smem:[#allocation17_spill]] %s7490_s24  ;;  %s7582_s28 = sadd.s32 4294967295, %s7502_s27   ;;  %s7502_s27 = sphi %s7567_s27, %s12511_s27   ;;  %s7498_s26 = sphi %s7565_s26, %s12514_s26   ;;  %s7494_s25 = sphi %s7563_s25, %s12513_s25   ;;  %s7490_s24 = sphi %s7561_s24, %s12512_s24  }
  0x11   : > { %11454 = sst [smem:[#allocation18_spill]] %s7494_s25  ;;  %s6071_s29 = sadd.s32 4294967294, %s7502_s27  }
  0x12   : > { %11455 = sst [smem:[#allocation19_spill]] %s7498_s26  ;;  %p45_p0 = scmp.ne.s32.totalorder %s7494_s25, %s7490_s24 }
  0x13   : > { %11456 = sst [smem:[#allocation20_spill]] %s7502_s27  ;;  %p11125_p1 = scmp.eq.s32.totalorder %s7582_s28, 0 }
  0x14   : > { %11457 = sst [smem:[#allocation21_spill]] %s7582_s28  ;;  %p201_p3 = scmp.eq.s32.totalorder %s6071_s29, 1 }
  0x15   : > { %p7591_p4 = por %p11125_p1, %p45_p0  ;;  %p6072_p5 = scmp.ge.s32.totalorder %s7502_s27, 1 }
  0x16   : > { %p7596_p6 = por %p201_p3, %p45_p0  ;;  %p208_p7 = scmp.lt.s32.totalorder %s7502_s27, 3 }
  0x17   : > { %s11458_s30 = scalar_select %p7591_p4, 1, 0 }
  0x18   : > { %s11459_s8 = scalar_select %p7596_p6, 1, 0 }
  0x19   : > { %p7601_p8 = pnand %p6072_p5, %p208_p7  ;;  %s7504_s10 = smov [#allocation9]  }
  0x1a   : > { %11460 = sst [smem:[#allocation22_spill]] %s11459_s8  ;;  %s229_s11 = sshll.u32 %s7504_s10, 4  ;;  %s7605_s11 = int_to_ptr.vmem [resolvable:$true] %s229_s11 }
  0x1b   : > { %p7249_p9 = pneg %p7601_p8  ;;  %s7505_s13 = smov [#allocation11]  }
  0x1c   : > { %s243_s14 = sshll.u32 %s7505_s13, 4  ;;  %s11463_s2 = sld [smem:[#allocation232_spill]]  ;;  %s7616_s14 = int_to_ptr.vmem [resolvable:$true] %s243_s14 }
  0x1d   : > { %p7612_p11 = pnand %p7249_p9, %p11125_p1 }
  0x1f   : > { %p7626_p13 = pneg %p7612_p11 }
  0x22   : > { %s7329_s17 = scalar_lea.hbm %s11463_s2, 1024 }
  0x23   : > { %p7330_p12 = scmp.ne.s32.totalorder %s11463_s2, %s7329_s17  ;;  %p7336_p5 = scmp.lt.u32.totalorder %s7329_s17, %s11463_s2 }
  0x25   : > { %p7332_p0 = pnand %p7626_p13, %p7330_p12 }
  0x27   : > { %p7333_p3 = pneg %p7332_p0 }
  0x29   : > { %p7338_p7 = pnand %p7336_p5, %p7333_p3 }
  0x2b   : > { %7341 = shalt.err (!%p7338_p7)
}
  0x2c   : > { %s7342_s23 = scalar_lea.vmem %s7605_s11, 1024  ;;  %p7350_p2 = scmp.lt.s32.totalorder %s7605_s11, %s7605_s11 }
  0x2d   : > { %p7343_p9 = scmp.ne.s32.totalorder %s7605_s11, %s7342_s23  ;;  %p7351_p6 = scmp.lt.s32.totalorder %s7342_s23, %s7342_s23 }
  0x2f   : > { %p7345_p10 = pnand %p7343_p9, %p7626_p13  ;;  %p7352_p12 = por %p7351_p6, %p7350_p2 }
  0x31   : > { %p7346_p1 = pneg %p7345_p10 }
  0x33   : > { %p7353_p0 = pnand %p7352_p12, %p7346_p1 }
  0x35   : > { %7356 = shalt.err (!%p7353_p0)
}
  0x36   : > { %s7506_s29 = smov 128   ;;  %s7507_s10 = smov 8  }
  0x37   : > { %7255 = dma.hbm_to_vmem [thread:$0]  (!%p7612_p11), %s11463_s2, 1024, %s7605_s11, [#allocation10], %s7506_s29, %s7506_s29, %s7507_s10  }
  0x38   : > { %s11465_s1 = sld [smem:[#allocation231_spill]] }
  0x3e   : > { %s7357_s18 = scalar_lea.hbm %s11465_s1, 48  ;;  %s7362_s8 = scalar_lea.hbm %s11465_s1, 64 }
  0x3f   : > { %p7358_p1 = scmp.ne.s32.totalorder %s11465_s1, %s7357_s18  ;;  %p7363_p10 = scmp.lt.u32.totalorder %s7362_s8, %s7357_s18 }
  0x40   : > { %p7364_p3 = scmp.lt.u32.totalorder %s7357_s18, %s11465_s1 }
  0x41   : > { %p7360_p2 = pnand %p7358_p1, %p7626_p13 }
  0x42   : > { %p7365_p5 = por %p7364_p3, %p7363_p10 }
  0x43   : > { %p7361_p6 = pneg %p7360_p2 }
  0x45   : > { %p7366_p7 = pnand %p7365_p5, %p7361_p6 }
  0x47   : > { %7369 = shalt.err (!%p7366_p7)
}
  0x48   : > { %s7508_s11 = smov [#allocation8]   ;;  %s11466_s3 = sld [smem:[#allocation233_spill]] }
  0x49   : > { %7252 = dma.hbm_to_smem (!%p7612_p11), %s11465_s1, 48, %s7508_s11, [#allocation7]  }
  0x4e   : > { %s7370_s19 = scalar_lea.hbm %s11466_s3, 64 }
  0x4f   : > { %p7371_p9 = scmp.ne.s32.totalorder %s11466_s3, %s7370_s19  ;;  %p7377_p1 = scmp.lt.u32.totalorder %s7370_s19, %s11466_s3 }
  0x51   : > { %p7373_p12 = pnand %p7371_p9, %p7626_p13 }
  0x53   : > { %p7374_p0 = pneg %p7373_p12 }
  0x55   : > { %p7379_p2 = pnand %p7377_p1, %p7374_p0 }
  0x57   : > { %7382 = shalt.err (!%p7379_p2)
}
  0x58   : > { %s7383_s18 = scalar_lea.vmem %s7616_s14, 64  ;;  %p7391_p5 = scmp.lt.s32.totalorder %s7616_s14, %s7616_s14 }
  0x59   : > { %p7384_p6 = scmp.ne.s32.totalorder %s7616_s14, %s7383_s18  ;;  %p7392_p7 = scmp.lt.s32.totalorder %s7383_s18, %s7383_s18 }
  0x5b   : > { %p7386_p10 = pnand %p7384_p6, %p7626_p13  ;;  %p7393_p9 = por %p7392_p7, %p7391_p5 }
  0x5d   : > { %p7387_p3 = pneg %p7386_p10 }
  0x5f   : > { %p7394_p12 = pnand %p7393_p9, %p7387_p3 }
  0x61   : > { %7397 = shalt.err (!%p7394_p12)
}
  0x62   : > { %7258 = dma.hbm_to_vmem [thread:$0]  (!%p7612_p11), %s11466_s3, 64, %s7616_s14, [#allocation10]  }
  0x63   : > { %s7693_s20 = sadd.s32 1, %s7502_s27   ;;  %s32_s11 = sadd.s32 1, %s7498_s26 }
  0x64   : > { %11467 = sst [smem:[#allocation23_spill]] %s7693_s20  ;;  %s29_s12 = ssub.s32 %s7502_s27, %s7693_s20 }
  0x65   : > { %p30_p13 = scmp.eq.s32.totalorder %s29_s12, 0  ;;  %p39_p0 = scmp.ne.s32.totalorder %s7498_s26, %s7494_s25 }
  0x66   : > { %p40_p1 = scmp.eq.s32.totalorder %s7502_s27, 0  ;;  %p7270_p2 = scmp.lt.s32.totalorder %s7502_s27, 2 }
  0x67   : > { %s7703_s13 = scalar_select %p30_p13, %s7498_s26, %s32_s11  }
  0x68   : > { %p41_p6 = por %p40_p1, %p39_p0  ;;  %p11469_p10 = scmp.eq.s32.totalorder %s7582_s28, 1 }
  0x69   : > { %11468 = sst [smem:[#allocation24_spill]] %s7703_s13  ;;  %s263_s16 = sand.u32 1, %s7498_s26  }
  0x6a   : > { %p7707_p3 = por %p11469_p10, %p39_p0  ;;  %s6448_s17 = sshll.u32 %s7502_s27, 8 }
  0x6b   : > { %s6077_s14 = sshll.u32 %s263_s16, 4  ;;  %s11472_s0 = sld [smem:[#allocation230_spill]] }
  0x6c   : > { %s11470_s15 = scalar_select %p7707_p3, 1, 0 }
  0x6d   : > { %s267_s7 = scalar_lea.vmem [#allocation4], %s6077_s14  ;;  %p7718_p11 = pnand %p7270_p2, %p41_p6 }
  0x6e   : > { %11471 = sst [smem:[#allocation25_spill]] %s11470_s15  ;;  %s274_s24 = sshll.u32 %s267_s7, 4  ;;  %s7722_s24 = int_to_ptr.vmem [resolvable:$true] %s274_s24 }
  0x6f   : > { %s7724_s22 = scalar_lea.sflag [#allocation5], %s263_s16  ;;  %p7400_p7 = pneg %p7718_p11 }
  0x71   : > { %s7716_s21 = scalar_lea.hbm %s11472_s0, %s6448_s17  ;;  %s7403_s17 = scalar_lea.hbm %s11472_s0, 512 }
  0x72   : > { %s7398_s23 = scalar_lea.hbm %s7716_s21, 256  ;;  %p7404_p13 = scmp.lt.u32.totalorder %s7716_s21, %s11472_s0 }
  0x73   : > { %p7399_p5 = scmp.ne.s32.totalorder %s7716_s21, %s7398_s23  ;;  %p7405_p0 = scmp.lt.u32.totalorder %s7403_s17, %s7398_s23 }
  0x74   : > { %p7407_p2 = scmp.lt.u32.totalorder %s7398_s23, %s7716_s21 }
  0x75   : > { %p7401_p9 = pnand %p7400_p7, %p7399_p5  ;;  %p7406_p1 = por %p7405_p0, %p7404_p13 }
  0x77   : > { %p7402_p12 = pneg %p7401_p9  ;;  %p7408_p6 = por %p7407_p2, %p7406_p1 }
  0x79   : > { %p7409_p10 = pnand %p7408_p6, %p7402_p12 }
  0x7b   : > { %7412 = shalt.err (!%p7409_p10)
}
  0x7c   : > { %s7413_s16 = scalar_lea.vmem %s7722_s24, 256  ;;  %s7509_s8 = smov [#allocation4]  }
  0x7d   : > { %p7414_p5 = scmp.ne.s32.totalorder %s7722_s24, %s7413_s16  ;;  %s7418_s7 = sshll.u32 %s7509_s8, 4  ;;  %s7419_s7 = int_to_ptr.vmem [resolvable:$false] %s7418_s7 }
  0x7e   : > { %s7420_s12 = scalar_lea.vmem %s7419_s7, 512  ;;  %p7421_p4 = scmp.lt.s32.totalorder %s7722_s24, %s7419_s7 }
  0x7f   : > { %p7416_p9 = pnand %p7414_p5, %p7400_p7  ;;  %p7422_p13 = scmp.lt.s32.totalorder %s7420_s12, %s7413_s16 }
  0x81   : > { %p7417_p3 = pneg %p7416_p9  ;;  %p7423_p0 = por %p7422_p13, %p7421_p4 }
  0x83   : > { %p7424_p1 = pnand %p7423_p0, %p7417_p3 }
  0x85   : > { %7427 = shalt.err (!%p7424_p1)
}
  0x86   : > { %7262 = dma.hbm_to_vmem [thread:$0]  (!%p7718_p11), %s7716_s21, 256, %s7722_s24, %s7724_s22, %s7506_s29, %s7506_s29, %s7507_s10  }
  0x87   : > { %286 = sbr.rel (%p7601_p8) target bundleno = 2205 (0x89d), region = 48 }
  0x8e   : > { %s7758_s23 = sand.u32 1, %s7494_s25   ;;  %p11475_p4 = scmp.ne.s32.totalorder %s11458_s30, 0 }
  0x8f   : > { %11474 = sst [smem:[#allocation26_spill]] %s7758_s23  ;;  %s6081_s11 = sshll.u32 %s7758_s23, 4 }
  0x90   : > { %s289_s17 = scalar_lea.sflag [#allocation5], %s7758_s23  ;;  %s292_s14 = scalar_lea.vmem [#allocation4], %s6081_s11 }
  0x91   : > { %7473 = dma.done.wait (%p11475_p4), %s289_s17, 256  }
  0x92   : > { %7475 = vsyncadd (%p11475_p4), %s289_s17, 4294967040  ;;  %p11476_p3 = scmp.eq.s32.totalorder %s7582_s28, 0 }
  0x94   : > { %7477 = dma.done.wait (%p11476_p3), [#allocation7], 48   ;;  %p11477_p11 = pmov %p11476_p3 }
  0x95   : > { %p11478_p8 = pmov %p11476_p3 }
  0x96   : > { %7479 = vsyncadd (%p11477_p11), [#allocation7], 4294967248 }
  0x97   : > { %7481 = dma.done.wait (%p11478_p8), [#allocation10], 1088   ;;  %p11479_p7 = pmov %p11476_p3 }
  0x99   : > { %7483 = vsyncadd (%p11479_p7), [#allocation10], 4294966208 }
  0x9a   : > { %309 = sfence }
  0x9b   : > { %v7774_v0 = vld [vmem:[%s292_s14] sm:$0xff]  ;;  %s11131_s9 = smov 126   ;;  %s11133_s30 = smov 127   ;;  %v7780_v1 = vld [vmem:[%s292_s14 + $0x8] sm:$0xff]  ;;  %vm448_vm0 = vcmask 1046528   ;;  %vm605_vm1 = vcmask 1045504  }
  0x9c   : > { %341 = vrot.lane.b32.xlu1 %v7774_v0, %s11131_s9  ;;  %337 = vrot.lane.b32.xlu0 %v7774_v0, %s11133_s30  ;;  %s6100_s29 = sld [smem:[#allocation8 + $0x3]]  ;;  %s6112_s10 = sld [smem:[#allocation8 + $0x6]]  ;;  %vm2872_vm8 = vcmask 261120   ;;  %vm7518_vm9 = vmmov 0   ;;  %vm5039_vm10 = vcmask 130048   ;;  %vm5506_vm11 = vcmask 31744  }
  0x9d   : > { %s6103_s21 = sld [smem:[#allocation8 + $0xc]]  ;;  %s6115_s24 = sld [smem:[#allocation8 + $0xf]]  ;;  %vm5510_vm12 = vcmask 1043456  }
  0x9e   : > { %s6106_s18 = sld [smem:[#allocation8 + $0x15]]  ;;  %s6118_s22 = sld [smem:[#allocation8 + $0x18]] }
  0x9f   : > { %s6109_s19 = sld [smem:[#allocation8 + $0x1e]]  ;;  %s6121_s16 = sld [smem:[#allocation8 + $0x21]] }
  0xa0   : > { %343 = vrot.lane.b32.xlu1 %v7780_v1, %s11131_s9  ;;  %339 = vrot.lane.b32.xlu0 %v7780_v1, %s11133_s30  ;;  %s7866_s8 = sld [smem:[#allocation8 + $0x24]]  ;;  %s370_s7 = sld [smem:[#allocation8]] }
  0xa1   : > { %s7868_s12 = sld [smem:[#allocation8 + $0x1]]  ;;  %s7870_s11 = sld [smem:[#allocation8 + $0x2]] }
  0xa2   : > { %v443_v2 = vstv %s6100_s29  ;;  %v600_v5 = vstv %s6112_s10  ;;  %s7872_s17 = sld [smem:[#allocation8 + $0x4]]  ;;  %s7874_s14 = sld [smem:[#allocation8 + $0x5]] }
  0xa3   : > { %v444_v3 = vmul.f32 %v443_v2, %v7774_v0  ;;  %v7788_v4 = vmul.f32 %v443_v2, %v7780_v1  ;;  %v601_v8 = vmul.f32 %v600_v5, %v7774_v0  ;;  %v7793_v9 = vmul.f32 %v600_v5, %v7780_v1  ;;  %s7876_s29 = sld [smem:[#allocation8 + $0x7]]  ;;  %s7878_s10 = sld [smem:[#allocation8 + $0x8]] }
  0xa4   : > { %v483_v13 = vstv %s6103_s21  ;;  %v640_v17 = vstv %s6115_s24  ;;  %v522_v25 = vstv %s6106_s18  ;;  %v679_v29 = vstv %s6118_s22  ;;  %s7880_s21 = sld [smem:[#allocation8 + $0x9]]  ;;  %s7882_s24 = sld [smem:[#allocation8 + $0x28]] }
  0xa5   : > { %v449_v6 = vrot.slane %v444_v3, 1  ;;  %v450_v7 = vrot.slane %v7788_v4, 1  ;;  %v606_v11 = vrot.slane %v601_v8, 2  ;;  %v607_v12 = vrot.slane %v7793_v9, 2  ;;  %s7884_s18 = sld [smem:[#allocation8 + $0x2c]]  ;;  %s7886_s22 = sld [smem:[#allocation8 + $0x25]] }
  0xa6   : > { %v484_v15 = vmul.f32 %v483_v13, %v7774_v0  ;;  %v7808_v16 = vmul.f32 %v483_v13, %v7780_v1  ;;  %v641_v20 = vmul.f32 %v640_v17, %v7774_v0  ;;  %v7813_v21 = vmul.f32 %v640_v17, %v7780_v1  ;;  %s7892_s9 = sld [smem:[#allocation8 + $0xd]]  ;;  %s7894_s30 = sld [smem:[#allocation8 + $0xe]] }
  0xa7   : > { %v7798_v10 = vsel %vm448_vm0, %v449_v6, %v450_v7  ;;  %v7804_v14 = vsel %vm605_vm1, %v606_v11, %v607_v12  ;;  %v523_v27 = vmul.f32 %v522_v25, %v7774_v0  ;;  %v7828_v28 = vmul.f32 %v522_v25, %v7780_v1  ;;  %s7896_s0 = sld [smem:[#allocation8 + $0x10]]  ;;  %s7898_s1 = sld [smem:[#allocation8 + $0x11]] }
  0xa8   : > { %v488_v18 = vrot.slane %v484_v15, 1  ;;  %v11156_v19 = vrot.slane %v7808_v16, 1  ;;  %v645_v23 = vrot.slane %v641_v20, 2  ;;  %v11155_v24 = vrot.slane %v7813_v21, 2  ;;  %11480 = sst [smem:[#allocation27_spill]] %s7872_s17  ;;  %s7902_s3 = sld [smem:[#allocation8 + $0x29]] }
  0xa9   : > { %v527_v30 = vrot.slane %v523_v27, 1  ;;  %v11154_v31 = vrot.slane %v7828_v28, 1  ;;  %v680_v32 = vmul.f32 %v679_v29, %v7774_v0  ;;  %v7833_v33 = vmul.f32 %v679_v29, %v7780_v1  ;;  %11481 = sst [smem:[#allocation28_spill]] %s7878_s10  ;;  %s7900_s2 = sld [smem:[#allocation8 + $0x12]] }
  0xaa   : > { %v7818_v22 = vsel %vm448_vm0, %v488_v18, %v11156_v19  ;;  %v7824_v26 = vsel %vm605_vm1, %v645_v23, %v11155_v24  ;;  %v561_v37 = vstv %s6109_s19  ;;  %v718_v38 = vstv %s6121_s16  ;;  %s7888_s19 = sld [smem:[#allocation8 + $0xa]]  ;;  %s7890_s16 = sld [smem:[#allocation8 + $0xb]] }
  0xab   : > { %v7838_v34 = vsel %vm448_vm0, %v527_v30, %v11154_v31  ;;  %v684_v35 = vrot.slane %v680_v32, 2  ;;  %v11152_v36 = vrot.slane %v7833_v33, 2  ;;  %v562_v40 = vmul.f32 %v561_v37, %v7774_v0  ;;  %s7904_s13 = sld [smem:[#allocation8 + $0x1b]]  ;;  %s7906_s26 = sld [smem:[#allocation8 + $0x2d]] }
  0xac   : > { %v7848_v41 = vmul.f32 %v561_v37, %v7780_v1  ;;  %v719_v42 = vmul.f32 %v718_v38, %v7774_v0  ;;  %v7852_v43 = vmul.f32 %v718_v38, %v7780_v1  ;;  %v371_v50 = vstv %s370_s7  ;;  %s7908_s25 = sld [smem:[#allocation8 + $0x26]]  ;;  %s7912_s7 = sld [smem:[#allocation8 + $0x13]] }
  0xad   : > { %v7844_v39 = vsel %vm605_vm1, %v684_v35, %v11152_v36  ;;  %v566_v44 = vrot.slane %v562_v40, 1  ;;  %v372_v51 = vmul.f32 %v371_v50, %v7774_v0  ;;  %v389_v52 = vstv %s7880_s21  ;;  %s7914_s20 = sld [smem:[#allocation8 + $0x14]]  ;;  %s7918_s27 = sld [smem:[#allocation8 + $0x16]] }
  0xae   : > { %v11151_v45 = vrot.slane %v7848_v41, 1  ;;  %v723_v46 = vrot.slane %v719_v42, 2  ;;  %v11150_v47 = vrot.slane %v7852_v43, 2  ;;  %v363_v53 = vstv %s7866_s8  ;;  %s7920_s15 = sld [smem:[#allocation8 + $0x17]]  ;;  %s7922_s23 = sld [smem:[#allocation8 + $0x19]] }
  0xaf   : > { %v373_v54 = vmul.f32 %v371_v50, %v7780_v1  ;;  %s7924_s28 = sld [smem:[#allocation8 + $0x27]]  ;;  %v377_v55 = vstv %s7868_s12  ;;  %v383_v56 = vstv %s7870_s11  ;;  %v390_v57 = vmul.f32 %v389_v52, %v7774_v0  ;;  %s7929_s8 = sld [smem:[#allocation8 + $0x1a]] }
  0xb0   : > { %v7859_v48 = vsel %vm448_vm0, %v566_v44, %v11151_v45  ;;  %v7864_v49 = vsel %vm605_vm1, %v723_v46, %v11150_v47  ;;  %s7931_s21 = sld [smem:[#allocation8 + $0x1c]]  ;;  %v374_v58 = vadd.f32 %v372_v51, %v363_v53  ;;  %v457_v59 = vstv %s7872_s17  ;;  %s7936_s6 = sld [smem:[#allocation8 + $0x1d]] }
  0xb1   : > { %v470_v60 = vstv %s7874_s14  ;;  %v365_v61 = vstv %s7886_s22  ;;  %s7938_s4 = sld [smem:[#allocation8 + $0x1f]]  ;;  %v614_v62 = vstv %s7876_s29  ;;  %v627_v63 = vstv %s7878_s10  ;;  %s7945_s5 = sld [smem:[#allocation8 + $0x20]] }
  0xb2   : > { %v7942_v2 = vadd.f32 %v373_v54, %v363_v53  ;;  %v407_v3 = vstv %s7900_s2  ;;  %s7947_s17 = sld [smem:[#allocation8 + $0x22]]  ;;  %v7951_v6 = vstv %s7884_s18  ;;  %v391_v8 = vmul.f32 %v389_v52, %v7780_v1  ;;  %s7957_s10 = sld [smem:[#allocation8 + $0x23]] }
  0xb3   : > { %s7954_s22 = sld [smem:[#allocation8 + $0x2a]]  ;;  %v425_v11 = vstv %s7904_s13  ;;  %v392_v13 = vadd.f32 %v390_v57, %v365_v61  ;;  %v395_v15 = vstv %s7888_s19  ;;  %v401_v17 = vstv %s7890_s16  ;;  %s8330_s13 = sld [smem:[#allocation8 + $0x150]] }
  0xb4   : > { %v496_v18 = vstv %s7892_s9  ;;  %v509_v20 = vstv %s7894_s30  ;;  %v653_v23 = vstv %s7896_s0  ;;  %v408_v25 = vmul.f32 %v407_v3, %v7774_v0  ;;  %s8137_s0 = sld [smem:[#allocation8 + $0x2e]]  ;;  %s8337_s9 = sld [smem:[#allocation8 + $0x5d]] }
  0xb5   : > { %v409_v27 = vmul.f32 %v407_v3, %v7780_v1  ;;  %v666_v29 = vstv %s7898_s1  ;;  %v367_v32 = vstv %s7908_s25  ;;  %v426_v35 = vmul.f32 %v425_v11, %v7774_v0  ;;  %s7512_s1 = smov 1   ;;  %s8339_s30 = sld [smem:[#allocation8 + $0x60]] }
  0xb6   : > { %v7971_v37 = vstv %s7906_s26  ;;  %v7973_v38 = vadd.f32 %v391_v8, %v365_v61  ;;  %v413_v40 = vstv %s7912_s7  ;;  %v11153_v42 = vstv %s7924_s28  ;;  %s8322_s26 = sld [smem:[#allocation8 + $0x57]]  ;;  %s8341_s12 = sld [smem:[#allocation8 + $0x63]] }
  0xb7   : > { %v419_v44 = vstv %s7914_s20  ;;  %v535_v46 = vstv %s7918_s27  ;;  %v7981_v52 = vadd.f32 %v408_v25, %v367_v32  ;;  %v7984_v53 = vadd.f32 %v409_v27, %v367_v32  ;;  %s8324_s27 = sld [smem:[#allocation8 + $0x5a]]  ;;  %s8328_s20 = sld [smem:[#allocation8 + $0x151]] }
  0xb8   : > { %v7989_v57 = vadd.f32 %v426_v35, %v11153_v42  ;;  %v8002_v32 = vmul.f32 %v425_v11, %v7780_v1  ;;  %s8345_s11 = sld [smem:[#allocation8 + $0x39]]  ;;  %s8351_s14 = sld [smem:[#allocation8 + $0x3f]] }
  0xb9   : > { %11524 = sst [smem:[#allocation33_spill]] %s8330_s13  ;;  %s8353_s29 = sld [smem:[#allocation8 + $0x153]] }
  0xba   : > { %11527 = sst [smem:[#allocation36_spill]] %s8337_s9  ;;  %s8359_s18 = sld [smem:[#allocation8 + $0x66]] }
  0xbb   : > { %11528 = sst [smem:[#allocation37_spill]] %s8339_s30  ;;  %s8361_s19 = sld [smem:[#allocation8 + $0x69]] }
  0xbc   : > { %11520 = sst [smem:[#allocation28_spill]] %s8322_s26  ;;  %s8363_s16 = sld [smem:[#allocation8 + $0x6c]] }
  0xbd   : > { %11521 = sst [smem:[#allocation30_spill]] %s8324_s27  ;;  %s8365_s7 = sld [smem:[#allocation8 + $0x42]] }
  0xbe   : > { %11523 = sst [smem:[#allocation32_spill]] %s8328_s20  ;;  %s8373_s2 = sld [smem:[#allocation8 + $0xa5]] }
  0xbf   : > { %11529 = sst [smem:[#allocation38_spill]] %s8341_s12  ;;  %s8375_s25 = sld [smem:[#allocation8 + $0x6f]] }
  0xc0   : > { %11530 = sst [smem:[#allocation39_spill]] %s8345_s11 }
  0xc1   : > { %11532 = sst [smem:[#allocation41_spill]] %s8351_s14 }
  0xc2   : > { %11533 = sst [smem:[#allocation42_spill]] %s8353_s29 }
  0xc3   : > { %11535 = sst [smem:[#allocation43_spill]] %s8359_s18 }
  0xc4   : > { %11536 = sst [smem:[#allocation44_spill]] %s8361_s19 }
  0xc5   : > { %11537 = sst [smem:[#allocation45_spill]] %s8363_s16 }
  0xc6   : > { %11538 = sst [smem:[#allocation46_spill]] %s8365_s7 }
  0xc7   : > { %11542 = sst [smem:[#allocation50_spill]] %s8373_s2  ;;  %s8394_s2 = sld [smem:[#allocation8 + $0x9f]] }
  0xc8   : > { %11543 = sst [smem:[#allocation51_spill]] %s8375_s25  ;;  %s8436_s25 = sld [smem:[#allocation8 + $0x7e]] }
  0xcd   : > { %11551 = sst [smem:[#allocation59_spill]] %s8394_s2  ;;  %s8410_s2 = sld [smem:[#allocation8 + $0xab]] }
  0xce   : > { %11569 = sst [smem:[#allocation76_spill]] %s8436_s25  ;;  %s8452_s25 = sld [smem:[#allocation8 + $0xed]] }
  0xd3   : > { %11557 = sst [smem:[#allocation64_spill]] %s8410_s2  ;;  %s8424_s2 = sld [smem:[#allocation8 + $0x8a]] }
  0xd4   : > { %11576 = sst [smem:[#allocation83_spill]] %s8452_s25  ;;  %s11609_s7 = sld [smem:[#allocation64_spill]] }
  0xd9   : > { %11563 = sst [smem:[#allocation70_spill]] %s8424_s2  ;;  %s8440_s2 = sld [smem:[#allocation8 + $0x90]] }
  0xdf   : > { %11571 = sst [smem:[#allocation78_spill]] %s8440_s2  ;;  %s8454_s2 = sld [smem:[#allocation8 + $0xea]] }
  0xe5   : > { %11577 = sst [smem:[#allocation84_spill]] %s8454_s2  ;;  %s8472_s2 = sld [smem:[#allocation8 + $0xf9]] }
  0xeb   : > { %11581 = sst [smem:[#allocation88_spill]] %s8472_s2  ;;  %s8611_s2 = sld [smem:[#allocation8 + $0x111]] }
  0xf1   : > { %11654 = sst [smem:[#allocation111_spill]] %s8611_s2 }
 0x10e   : > { %v7994_v47 = vpop.permute.xlu1 %341  ;;  %v7996_v25 = vpop.permute.xlu0 %337 }
 0x10f   : > { %v378_v35 = vmul.f32 %v377_v55, %v7996_v25  ;;  %v384_v42 = vmul.f32 %v383_v56, %v7994_v47  ;;  %v458_v31 = vmul.f32 %v457_v59, %v7996_v25  ;;  %v471_v8 = vmul.f32 %v470_v60, %v7994_v47 }
 0x110   : > { %v615_v27 = vmul.f32 %v614_v62, %v7996_v25  ;;  %v628_v1 = vmul.f32 %v627_v63, %v7994_v47  ;;  %v396_v11 = vmul.f32 %v395_v15, %v7996_v25  ;;  %v402_v36 = vmul.f32 %v401_v17, %v7994_v47 }
 0x111   : > { %v380_v45 = vadd.f32 %v378_v35, %v374_v58  ;;  %v462_v3 = vrot.slane %v458_v31, 1  ;;  %v475_v61 = vrot.slane %v471_v8, 1  ;;  %v497_v54 = vmul.f32 %v496_v18, %v7996_v25 }
 0x112   : > { %v8031_v24 = vpop.permute.xlu1 %343  ;;  %v8033_v0 = vpop.permute.xlu0 %339  ;;  %v619_v30 = vrot.slane %v615_v27, 2  ;;  %v632_v51 = vrot.slane %v628_v1, 2  ;;  %v398_v5 = vadd.f32 %v396_v11, %v392_v13  ;;  %v510_v19 = vmul.f32 %v509_v20, %v7994_v47 }
 0x113   : > { %v386_v50 = vadd.f32 %v384_v42, %v380_v45  ;;  %v459_v58 = vmul.f32 %v457_v59, %v8033_v0  ;;  %v472_v31 = vmul.f32 %v470_v60, %v8031_v24  ;;  %v616_v8 = vmul.f32 %v614_v62, %v8033_v0 }
 0x114   : > { %v8050_v35 = vmul.f32 %v627_v63, %v8031_v24  ;;  %v379_v13 = vmul.f32 %v377_v55, %v8033_v0  ;;  %v385_v27 = vmul.f32 %v383_v56, %v8031_v24  ;;  %v404_v45 = vadd.f32 %v402_v36, %v398_v5 }
 0x115   : > { %v454_v42 = vadd.f32 %v7798_v10, %v386_v50  ;;  %v463_v59 = vrot.slane %v459_v58, 1  ;;  %v476_v1 = vrot.slane %v472_v31, 1  ;;  %v620_v60 = vrot.slane %v616_v8, 2 }
 0x116   : > { %v633_v62 = vrot.slane %v8050_v35, 2  ;;  %v381_v63 = vadd.f32 %v379_v13, %v7942_v2  ;;  %v493_v11 = vadd.f32 %v7818_v22, %v404_v45  ;;  %v498_v55 = vmul.f32 %v496_v18, %v8033_v0 }
 0x117   : > { %v464_v36 = vsel %vm448_vm0, %v462_v3, %v463_v59  ;;  %v477_v10 = vsel %vm448_vm0, %v475_v61, %v476_v1  ;;  %v621_v56 = vsel %vm605_vm1, %v619_v30, %v620_v60  ;;  %v501_v5 = vrot.slane %v497_v54, 1 }
 0x118   : > { %v467_v50 = vadd.f32 %v464_v36, %v454_v42  ;;  %v634_v58 = vsel %vm605_vm1, %v632_v51, %v633_v62  ;;  %v387_v31 = vadd.f32 %v385_v27, %v381_v63  ;;  %v502_v8 = vrot.slane %v498_v55, 1 }
 0x119   : > { %v511_v22 = vmul.f32 %v509_v20, %v8031_v24  ;;  %v514_v2 = vrot.slane %v510_v19, 1  ;;  %v654_v18 = vmul.f32 %v653_v23, %v7996_v25  ;;  %v8078_v61 = vmul.f32 %v653_v23, %v8033_v0 }
 0x11a   : > { %v480_v30 = vadd.f32 %v477_v10, %v467_v50  ;;  %v455_v51 = vadd.f32 %v450_v7, %v387_v31  ;;  %v503_v54 = vsel %vm448_vm0, %v501_v5, %v502_v8  ;;  %v667_v3 = vmul.f32 %v666_v29, %v7994_v47 }
 0x11b   : > { %v506_v20 = vadd.f32 %v503_v54, %v493_v11  ;;  %v515_v19 = vrot.slane %v511_v22, 1  ;;  %v658_v35 = vrot.slane %v654_v18, 2  ;;  %v659_v13 = vrot.slane %v8078_v61, 2 }
 0x11c   : > { %v611_v23 = vadd.f32 %v7804_v14, %v480_v30  ;;  %v468_v27 = vadd.f32 %v463_v59, %v455_v51  ;;  %v8091_v4 = vmul.f32 %v666_v29, %v8031_v24  ;;  %v671_v7 = vrot.slane %v667_v3, 2 }
 0x11d   : > { %v516_v45 = vsel %vm448_vm0, %v514_v2, %v515_v19  ;;  %v660_v42 = vsel %vm605_vm1, %v658_v35, %v659_v13  ;;  %v397_v63 = vmul.f32 %v395_v15, %v8033_v0  ;;  %v403_v11 = vmul.f32 %v401_v17, %v8031_v24 }
 0x11e   : > { %v624_v14 = vadd.f32 %v621_v56, %v611_v23  ;;  %v481_v59 = vadd.f32 %v476_v1, %v468_v27  ;;  %v519_v55 = vadd.f32 %v516_v45, %v506_v20  ;;  %v672_v29 = vrot.slane %v8091_v4, 2 }
 0x11f   : > { %v399_v36 = vadd.f32 %v397_v63, %v7973_v38  ;;  %v414_v10 = vmul.f32 %v413_v40, %v7996_v25  ;;  %v420_v5 = vmul.f32 %v419_v44, %v7994_v47  ;;  %v536_v15 = vmul.f32 %v535_v46, %v7996_v25 }
 0x120   : > { %v637_v50 = vadd.f32 %v634_v58, %v624_v14  ;;  %v612_v17 = vadd.f32 %v607_v12, %v481_v59  ;;  %v650_v1 = vadd.f32 %v7824_v26, %v519_v55  ;;  %v673_v56 = vsel %vm605_vm1, %v671_v7, %v672_v29 }
 0x121   : > { %v405_v38 = vadd.f32 %v403_v11, %v399_v36  ;;  %v416_v31 = vadd.f32 %v414_v10, %v7981_v52  ;;  %v8122_v22 = vmul.f32 %v535_v46, %v8033_v0  ;;  %v540_v2 = vrot.slane %v536_v15, 1 }
 0x122   : > { %v758_v18 = vmax.f32 %v637_v50, 0.0  ;;  %v625_v30 = vadd.f32 %v620_v60, %v612_v17  ;;  %v663_v51 = vadd.f32 %v660_v42, %v650_v1  ;;  %v11484_v58 = vstv %s7920_s15  ;;  %s8332_s15 = sld [smem:[#allocation8 + $0x33]] }
 0x123   : > { %v549_v9 = vmul.f32 %v11484_v58, %v7994_v47  ;;  %v11485_v12 = vrot.slane %v7808_v16, 1  ;;  %v422_v26 = vadd.f32 %v420_v5, %v416_v31  ;;  %v541_v3 = vrot.slane %v8122_v22, 1 }
 0x124   : > { %v11486_v52 = vmov %v11484_v58  ;;  %v11487_v46 = vstv %s7882_s24  ;;  %v638_v23 = vadd.f32 %v633_v62, %v625_v30  ;;  %v676_v60 = vadd.f32 %v673_v56, %v663_v51  ;;  %s11534_s24 = smov 126  }
 0x125   : > { %v494_v54 = vadd.f32 %v11485_v12, %v405_v38  ;;  %v8133_v20 = vmul.f32 %v11486_v52, %v8031_v24  ;;  %v761_v35 = vmul.f32 %v11487_v46, %v758_v18  ;;  %v553_v27 = vrot.slane %v549_v9, 1 }
 0x126   : > { %v532_v4 = vadd.f32 %v7838_v34, %v422_v26  ;;  %v542_v7 = vsel %vm448_vm0, %v540_v2, %v541_v3  ;;  %v759_v63 = vmax.f32 %v638_v23, 0.0  ;;  %v799_v62 = vmax.f32 %v676_v60, 0.0 }
 0x127   : > { %v507_v16 = vadd.f32 %v502_v8, %v494_v54  ;;  %v554_v45 = vrot.slane %v8133_v20, 1  ;;  %v764_v42 = vadd.f32 %v7951_v6, %v761_v35  ;;  %v11488_v11 = vstv %s7922_s23  ;;  %s8334_s23 = sld [smem:[#allocation8 + $0x36]] }
 0x128   : > { %v693_v14 = vmul.f32 %v11488_v11, %v7996_v25  ;;  %v545_v55 = vadd.f32 %v542_v7, %v532_v4  ;;  %v11489_v8 = vmov %v11488_v11  ;;  %v11490_v10 = vmov %v11487_v46  ;;  %11525 = sst [smem:[#allocation34_spill]] %s8332_s15 }
 0x129   : > { %v520_v59 = vadd.f32 %v515_v19, %v507_v16  ;;  %v555_v34 = vsel %vm448_vm0, %v553_v27, %v554_v45  ;;  %v8152_v36 = vmul.f32 %v11489_v8, %v8033_v0  ;;  %766 = vrot.lane.b32.xlu0 %v764_v42, %s7512_s1  ;;  %v762_v5 = vmul.f32 %v11490_v10, %v759_v63 }
 0x12a   : > { %v11491_v15 = vstv %s7902_s3  ;;  %v697_v17 = vrot.slane %v693_v14, 2  ;;  %v11492_v1 = vstv %s7929_s8  ;;  %v11493_v56 = vrot.slane %v7813_v21, 2  ;;  %s8238_s3 = sld [smem:[#allocation8 + $0x2b]]  ;;  %s8367_s8 = sld [smem:[#allocation8 + $0x45]] }
 0x12b   : > { %v802_v50 = vmul.f32 %v11491_v15, %v799_v62  ;;  %v706_v19 = vmul.f32 %v11492_v1, %v7994_v47  ;;  %v558_v31 = vadd.f32 %v555_v34, %v545_v55  ;;  %v698_v2 = vrot.slane %v8152_v36, 2 }
 0x12c   : > { %v651_v38 = vadd.f32 %v11493_v56, %v520_v59  ;;  %v11494_v18 = vmov %v11492_v1  ;;  %v765_v51 = vadd.f32 %v7951_v6, %v762_v5  ;;  %v415_v12 = vmul.f32 %v413_v40, %v8033_v0 }
 0x12d   : > { %v8168_v30 = vmul.f32 %v11494_v18, %v8031_v24  ;;  %v805_v58 = vadd.f32 %v7971_v37, %v802_v50  ;;  %v710_v9 = vrot.slane %v706_v19, 2  ;;  %v689_v54 = vadd.f32 %v7844_v39, %v558_v31  ;;  %11526 = sst [smem:[#allocation35_spill]] %s8334_s23 }
 0x12e   : > { %v664_v21 = vadd.f32 %v659_v13, %v651_v38  ;;  %v699_v26 = vsel %vm605_vm1, %v697_v17, %v698_v2  ;;  %768 = vrot.lane.b32.xlu1 %v765_v51, %s7512_s1  ;;  %v8183_v20 = vstv %s8137_s0  ;;  %v417_v40 = vadd.f32 %v415_v12, %v7984_v53  ;;  %s8377_s0 = sld [smem:[#allocation8 + $0x72]] }
 0x12f   : > { %v711_v52 = vrot.slane %v8168_v30, 2  ;;  %807 = vrot.lane.b32.xlu0 %v805_v58, %s7512_s1  ;;  %v421_v61 = vmul.f32 %v419_v44, %v8031_v24  ;;  %v11495_v39 = vstv %s7931_s21  ;;  %v702_v35 = vadd.f32 %v699_v26, %v689_v54  ;;  %s8369_s21 = sld [smem:[#allocation8 + $0x48]] }
 0x130   : > { %v432_v13 = vmul.f32 %v11495_v39, %v7996_v25  ;;  %v677_v46 = vadd.f32 %v672_v29, %v664_v21  ;;  %v11496_v60 = vstv %s7936_s6  ;;  %v11497_v53 = vstv %s7938_s4  ;;  %s6131_s4 = sld [smem:[#allocation8 + $0x2f]]  ;;  %s8320_s6 = sld [smem:[#allocation8 + $0x54]] }
 0x131   : > { %v712_v23 = vsel %vm605_vm1, %v710_v9, %v711_v52  ;;  %v438_v27 = vmul.f32 %v11496_v60, %v7994_v47  ;;  %v423_v16 = vadd.f32 %v421_v61, %v417_v40  ;;  %v575_v7 = vmul.f32 %v11497_v53, %v7996_v25  ;;  %11539 = sst [smem:[#allocation47_spill]] %s8367_s8 }
 0x132   : > { %v434_v4 = vadd.f32 %v432_v13, %v7989_v57  ;;  %v11498_v44 = vmov %v11497_v53  ;;  %v800_v63 = vmax.f32 %v677_v46, 0.0  ;;  %v715_v62 = vadd.f32 %v712_v23, %v702_v35 }
 0x133   : > { %v576_v42 = vmul.f32 %v11498_v44, %v8033_v0  ;;  %v11499_v29 = vstv %s7945_s5  ;;  %v11501_v55 = vrot.slane %v7828_v28, 1  ;;  %v579_v8 = vrot.slane %v575_v7, 1  ;;  %s11518_s5 = smov 127  }
 0x134   : > { %v588_v11 = vmul.f32 %v11499_v29, %v7994_v47  ;;  %v11500_v14 = vmov %v11499_v29  ;;  %v440_v34 = vadd.f32 %v438_v27, %v434_v4  ;;  %v11502_v10 = vmov %v11491_v15  ;;  %11544 = sst [smem:[#allocation52_spill]] %s8377_s0  ;;  %s8396_s0 = sld [smem:[#allocation8 + $0xa8]] }
 0x135   : > { %v589_v59 = vmul.f32 %v11500_v14, %v8031_v24  ;;  %v533_v57 = vadd.f32 %v11501_v55, %v423_v16  ;;  %v580_v36 = vrot.slane %v576_v42, 1  ;;  %v803_v5 = vmul.f32 %v11502_v10, %v800_v63  ;;  %11540 = sst [smem:[#allocation48_spill]] %s8369_s21  ;;  %s8443_s21 = sld [smem:[#allocation8 + $0x155]] }
 0x136   : > { %v840_v15 = vmax.f32 %v715_v62, 0.0  ;;  %v11503_v17 = vstv %s7924_s28  ;;  %v571_v56 = vadd.f32 %v7859_v48, %v440_v34  ;;  %v592_v38 = vrot.slane %v588_v11, 1  ;;  %11519 = sst [smem:[#allocation27_spill]] %s8320_s6  ;;  %s8326_s28 = sld [smem:[#allocation8 + $0x30]] }
 0x137   : > { %v593_v50 = vrot.slane %v589_v59, 1  ;;  %v429_v1 = vadd.f32 %v8002_v32, %v11503_v17  ;;  %v546_v19 = vadd.f32 %v541_v3, %v533_v57  ;;  %v581_v28 = vsel %vm448_vm0, %v579_v8, %v580_v36  ;;  %s11799_s2 = sld [smem:[#allocation52_spill]] }
 0x138   : > { %v806_v31 = vadd.f32 %v7971_v37, %v803_v5  ;;  %v11504_v18 = vstv %s7954_s22  ;;  %v11505_v51 = vstv %s7947_s17  ;;  %v584_v12 = vadd.f32 %v581_v28, %v571_v56  ;;  %s8347_s17 = sld [smem:[#allocation8 + $0x3c]] }
 0x139   : > { %v843_v30 = vmul.f32 %v11504_v18, %v840_v15  ;;  %v732_v58 = vmul.f32 %v11505_v51, %v7996_v25  ;;  %v11506_v32 = vmov %v11505_v51  ;;  %v559_v22 = vadd.f32 %v554_v45, %v546_v19  ;;  %s8371_s22 = sld [smem:[#allocation8 + $0x9c]] }
 0x13a   : > { %v733_v9 = vmul.f32 %v11506_v32, %v8033_v0  ;;  %v594_v3 = vsel %vm448_vm0, %v592_v38, %v593_v50  ;;  %v11507_v48 = vstv %s7957_s10  ;;  %809 = vrot.lane.b32.xlu1 %v806_v31, %s7512_s1  ;;  %v11509_v25 = vmov %v11495_v39  ;;  %s11157_s10 = smov 124   ;;  %11552 = sst [smem:[#allocation60_spill]] %s8396_s0 }
 0x13b   : > { %v745_v21 = vmul.f32 %v11507_v48, %v7994_v47  ;;  %v846_v54 = vadd.f32 %v8183_v20, %v843_v30  ;;  %v11508_v40 = vmov %v11507_v48  ;;  %v433_v39 = vmul.f32 %v11509_v25, %v8033_v0  ;;  %s8414_s0 = sld [smem:[#allocation8 + $0xb4]]  ;;  %11572 = sst [smem:[#allocation79_spill]] %s8443_s21 }
 0x13c   : > { %v737_v26 = vrot.slane %v733_v9, 2  ;;  %v746_v61 = vmul.f32 %v11508_v40, %v8031_v24  ;;  %v11510_v45 = vrot.slane %v7833_v33, 2  ;;  %v597_v46 = vadd.f32 %v594_v3, %v584_v12  ;;  %11522 = sst [smem:[#allocation31_spill]] %s8326_s28 }
 0x13d   : > { %v11511_v35 = vmov %v11496_v60  ;;  %848 = vrot.lane.b32.xlu0 %v846_v54, %s7512_s1  ;;  %v736_v23 = vrot.slane %v732_v58, 2  ;;  %v435_v27 = vadd.f32 %v433_v39, %v429_v1  ;;  %v749_v53 = vrot.slane %v745_v21, 2 }
 0x13e   : > { %v690_v13 = vadd.f32 %v11510_v45, %v559_v22  ;;  %v439_v47 = vmul.f32 %v11511_v35, %v8031_v24  ;;  %v750_v60 = vrot.slane %v746_v61, 2  ;;  %v728_v4 = vadd.f32 %v7864_v49, %v597_v46  ;;  %11531 = sst [smem:[#allocation40_spill]] %s8347_s17 }
 0x13f   : > { %v738_v0 = vsel %vm605_vm1, %v736_v23, %v737_v26  ;;  %v11512_v24 = vrot.slane %v7848_v41, 1  ;;  %v883_v11 = vstv %s8238_s3  ;;  %v11513_v59 = vmov %v11504_v18  ;;  %11541 = sst [smem:[#allocation49_spill]] %s8371_s22  ;;  %s8381_s3 = sld [smem:[#allocation8 + $0x4b]] }
 0x140   : > { %v703_v16 = vadd.f32 %v698_v2, %v690_v13  ;;  %v441_v33 = vadd.f32 %v439_v47, %v435_v27  ;;  %v741_v44 = vadd.f32 %v738_v0, %v728_v4  ;;  %v751_v42 = vsel %vm605_vm1, %v749_v53, %v750_v60  ;;  %s8390_s22 = sld [smem:[#allocation8 + $0xb7]] }
 0x141   : > { %v8257_v57 = vstv %s6131_s4  ;;  %s8383_s4 = sld [smem:[#allocation8 + $0x4e]]  ;;  %11558 = sst [smem:[#allocation65_spill]] %s8414_s0 }
 0x142   : > { %v716_v7 = vadd.f32 %v711_v52, %v703_v16  ;;  %v572_v63 = vadd.f32 %v11512_v24, %v441_v33  ;;  %v754_v29 = vadd.f32 %v751_v42, %v741_v44  ;;  %v11514_v52 = vrot.slane %v7852_v43, 2  ;;  %s8428_s0 = sld [smem:[#allocation8 + $0x7b]] }
 0x144   : > { %v841_v62 = vmax.f32 %v716_v7, 0.0  ;;  %v585_v14 = vadd.f32 %v580_v36, %v572_v63  ;;  %v881_v2 = vmax.f32 %v754_v29, 0.0 }
 0x145   : > { %11546 = sst [smem:[#allocation54_spill]] %s8381_s3  ;;  %s8416_s3 = sld [smem:[#allocation8 + $0xbd]] }
 0x146   : > { %v844_v55 = vmul.f32 %v11513_v59, %v841_v62  ;;  %v598_v49 = vadd.f32 %v593_v50, %v585_v14  ;;  %v884_v8 = vmul.f32 %v883_v11, %v881_v2  ;;  %v345_v50 = vlaneseq  ;;  %11550 = sst [smem:[#allocation58_spill]] %s8390_s22  ;;  %s8404_s22 = sld [smem:[#allocation8 + $0xb1]] }
 0x147   : > { %11547 = sst [smem:[#allocation55_spill]] %s8383_s4  ;;  %s8408_s4 = sld [smem:[#allocation8 + $0xa2]] }
 0x148   : > { %v847_v34 = vadd.f32 %v8183_v20, %v844_v55  ;;  %v729_v10 = vadd.f32 %v11514_v52, %v598_v49  ;;  %v887_v41 = vadd.f32 %v8257_v57, %v884_v8  ;;  %v346_v19 = vand.u32 127, %v345_v50  ;;  %11565 = sst [smem:[#allocation72_spill]] %s8428_s0  ;;  %s8447_s0 = sld [smem:[#allocation8 + $0x99]] }
 0x14a   : > { %850 = vrot.lane.b32.xlu1 %v847_v34, %s7512_s1  ;;  %v742_v5 = vadd.f32 %v737_v26, %v729_v10  ;;  %889 = vrot.lane.b32.xlu0 %v887_v41, %s7512_s1  ;;  %v8267_v56 = vand.u32 15, %v346_v19  ;;  %v1008_v19 = vstv %s8320_s6  ;;  %s8470_s6 = sld [smem:[#allocation8 + $0xff]] }
 0x14b   : > { %11559 = sst [smem:[#allocation66_spill]] %s8416_s3  ;;  %s8430_s3 = sld [smem:[#allocation8 + $0x84]] }
 0x14c   : > { %v755_v36 = vadd.f32 %v750_v60, %v742_v5  ;;  %11515 = vst [vmem:[#allocation29_spill] sm:$0xff] %v8267_v56  ;;  %vm359_vm2 = vcmp.ge.s32.totalorder %v8267_v56, 1  ;;  %vm360_vm3 = vcmp.le.s32.totalorder %v8267_v56, 14  ;;  %11554 = sst [smem:[#allocation61_spill]] %s8404_s22  ;;  %s8420_s22 = sld [smem:[#allocation8 + $0x78]] }
 0x14d   : > { %vm8271_vm4 = vmand %vm359_vm2, %vm360_vm3  ;;  %11556 = sst [smem:[#allocation63_spill]] %s8408_s4  ;;  %s8422_s4 = sld [smem:[#allocation8 + $0x81]] }
 0x14e   : > { %v882_v15 = vmax.f32 %v755_v36, 0.0  ;;  %11574 = sst [smem:[#allocation81_spill]] %s8447_s0  ;;  %s8461_s0 = sld [smem:[#allocation8 + $0xf0]] }
 0x150   : > { %v885_v17 = vmul.f32 %v883_v11, %v882_v15  ;;  %11580 = sst [smem:[#allocation87_spill]] %s8470_s6  ;;  %s8603_s6 = sld [smem:[#allocation8 + $0x10b]] }
 0x151   : > { %11566 = sst [smem:[#allocation73_spill]] %s8430_s3 }
 0x152   : > { %v888_v1 = vadd.f32 %v8257_v57, %v885_v17  ;;  %11561 = sst [smem:[#allocation68_spill]] %s8420_s22  ;;  %s8434_s22 = sld [smem:[#allocation8 + $0x96]] }
 0x153   : > { %11562 = sst [smem:[#allocation69_spill]] %s8422_s4  ;;  %s8438_s4 = sld [smem:[#allocation8 + $0x87]] }
 0x154   : > { %891 = vrot.lane.b32.xlu1 %v888_v1, %s7512_s1  ;;  %s8379_s1 = sld [smem:[#allocation8 + $0x75]]  ;;  %11579 = sst [smem:[#allocation86_spill]] %s8461_s0 }
 0x155   : > { %s8477_s0 = sld [smem:[#allocation8 + $0x102]] }
 0x158   : > { %11568 = sst [smem:[#allocation75_spill]] %s8434_s22 }
 0x159   : > { %11570 = sst [smem:[#allocation77_spill]] %s8438_s4 }
 0x15a   : > { %11545 = sst [smem:[#allocation53_spill]] %s8379_s1  ;;  %s8418_s1 = sld [smem:[#allocation8 + $0x152]] }
 0x15b   : > { %11582 = sst [smem:[#allocation89_spill]] %s8477_s0  ;;  %s8501_s0 = sld [smem:[#allocation8 + $0x105]] }
 0x160   : > { %11560 = sst [smem:[#allocation67_spill]] %s8418_s1  ;;  %s8432_s1 = sld [smem:[#allocation8 + $0x8d]] }
 0x161   : > { %11596 = sst [smem:[#allocation95_spill]] %s8501_s0 }
 0x162   : > { %s11607_s0 = sld [smem:[#allocation63_spill]] }
 0x166   : > { %11567 = sst [smem:[#allocation74_spill]] %s8432_s1  ;;  %s8449_s1 = sld [smem:[#allocation8 + $0xe7]] }
 0x16c   : > { %11575 = sst [smem:[#allocation82_spill]] %s8449_s1 }
 0x19b   : > { %v767_v28 = vpop.permute.xlu0 %766 }
 0x19c   : > { %v770_v38 = vsel %vm8271_vm4, %v767_v28, %v7951_v6 }
 0x19d   : > { %772 = vrot.lane.b32.xlu0 %v770_v38, %s11518_s5 }
 0x1a0   : > { %v769_v31 = vpop.permute.xlu1 %768 }
 0x1a1   : > { %v808_v18 = vpop.permute.xlu0 %807  ;;  %v771_v30 = vsel %vm8271_vm4, %v769_v31, %v7951_v6 }
 0x1a2   : > { %v811_v51 = vsel %vm8271_vm4, %v808_v18, %v7971_v37  ;;  %774 = vrot.lane.b32.xlu1 %v771_v30, %s11518_s5  ;;  %v946_v18 = vstv %s8328_s20  ;;  %s8487_s20 = sld [smem:[#allocation8 + $0x154]] }
 0x1a3   : > { %813 = vrot.lane.b32.xlu0 %v811_v51, %s11518_s5 }
 0x1a8   : > { %11585 = sst [smem:[#allocation92_spill]] %s8487_s20  ;;  %s11620_s20 = sld [smem:[#allocation72_spill]] }
 0x1ac   : > { %v810_v58 = vpop.permute.xlu1 %809 }
 0x1ad   : > { %v812_v32 = vsel %vm8271_vm4, %v810_v58, %v7971_v37  ;;  %v1020_v58 = vstv %s8337_s9  ;;  %s8527_s9 = sld [smem:[#allocation8 + $0x12c]] }
 0x1ae   : > { %815 = vrot.lane.b32.xlu1 %v812_v32, %s11518_s5 }
 0x1af   : > { %v849_v9 = vpop.permute.xlu0 %848 }
 0x1b0   : > { %v852_v22 = vsel %vm8271_vm4, %v849_v9, %v8183_v20  ;;  %v1344_v9 = vstv %s8332_s15  ;;  %s11615_s15 = sld [smem:[#allocation68_spill]] }
 0x1b1   : > { %854 = vrot.lane.b32.xlu0 %v852_v22, %s11518_s5 }
 0x1b3   : > { %11614 = sst [smem:[#allocation101_spill]] %s8527_s9  ;;  %s8543_s9 = sld [smem:[#allocation8 + $0x12f]] }
 0x1bc   : > { %v851_v12 = vpop.permute.xlu1 %850  ;;  %v890_v48 = vpop.permute.xlu0 %889 }
 0x1bd   : > { %v8298_v3 = vsel %vm8271_vm4, %v851_v12, %v8183_v20  ;;  %v8305_v21 = vsel %vm8271_vm4, %v890_v48, %v8257_v57  ;;  %v2121_v12 = vstv %s8341_s12  ;;  %v1365_v48 = vstv %s8347_s17  ;;  %s8541_s17 = sld [smem:[#allocation8 + $0xcf]]  ;;  %s8609_s12 = sld [smem:[#allocation8 + $0x14d]] }
 0x1be   : > { %856 = vrot.lane.b32.xlu1 %v8298_v3, %s11518_s5  ;;  %895 = vrot.lane.b32.xlu0 %v8305_v21, %s11518_s5 }
 0x1c3   : > { %11653 = sst [smem:[#allocation110_spill]] %s8609_s12  ;;  %s8750_s12 = sld [smem:[#allocation8 + $0x70]] }
 0x1c6   : > { %v892_v54 = vpop.permute.xlu1 %891 }
 0x1c7   : > { %v8312_v26 = vsel %vm8271_vm4, %v892_v54, %v8257_v57  ;;  %v1032_v54 = vstv %s8359_s18  ;;  %s11603_s18 = sld [smem:[#allocation60_spill]] }
 0x1c8   : > { %897 = vrot.lane.b32.xlu1 %v8312_v26, %s11518_s5  ;;  %s8385_s5 = sld [smem:[#allocation8 + $0x51]] }
 0x1c9   : > { %11703 = sst [smem:[#allocation37_spill]] %s8750_s12  ;;  %s8769_s12 = sld [smem:[#allocation8 + $0x62]] }
 0x1ce   : > { %11548 = sst [smem:[#allocation56_spill]] %s8385_s5  ;;  %s11553_s5 = smov 124  }
 0x1cf   : > { %11708 = sst [smem:[#allocation38_spill]] %s8769_s12  ;;  %s8800_s12 = sld [smem:[#allocation8 + $0x65]] }
 0x20f   : > { %v773_v40 = vpop.permute.xlu0 %772 }
 0x210   : > { %v776_v61 = vmax.f32 %v770_v38, %v773_v40  ;;  %v2100_v38 = vstv %s8324_s27  ;;  %s11587_s27 = sld [smem:[#allocation49_spill]]  ;;  %v2142_v40 = vstv %s8363_s16  ;;  %s11622_s16 = sld [smem:[#allocation76_spill]] }
 0x212   : > { %v787_v25 = vmax.f32 %v776_v61, %v7951_v6  ;;  %v780_v35 = vrot.slane %v776_v61, 1 }
 0x214   : > { %v775_v39 = vpop.permute.xlu1 %774  ;;  %788 = vst [vmem:[#allocation2] sm:$0x1] %v787_v25 }
 0x215   : > { %v814_v45 = vpop.permute.xlu0 %813  ;;  %v777_v13 = vmax.f32 %v771_v30, %v775_v39  ;;  %v944_v30 = vstv %s8330_s13  ;;  %s8485_s13 = sld [smem:[#allocation8 + $0xf3]]  ;;  %v1386_v39 = vstv %s8367_s8  ;;  %s8519_s8 = sld [smem:[#allocation8 + $0xcc]] }
 0x216   : > { %v817_v46 = vmax.f32 %v811_v51, %v814_v45  ;;  %v960_v51 = vstv %s8326_s28  ;;  %s8553_s28 = sld [smem:[#allocation8 + $0x132]] }
 0x217   : > { %v781_v47 = vrot.slane %v777_v13, 1  ;;  %v795_v23 = vmax.f32 %v777_v13, %v7951_v6 }
 0x218   : > { %v828_v60 = vmax.f32 %v817_v46, %v7971_v37  ;;  %v821_v33 = vrot.slane %v817_v46, 1 }
 0x219   : > { %v782_v27 = vsel %vm448_vm0, %v780_v35, %v781_v47  ;;  %v786_v16 = vmax.f32 %v777_v13, %v781_v47  ;;  %796 = vst [vmem:[#allocation2 + $0x2] sm:$0x20] %v795_v23  ;;  %v1104_v13 = vstv %s11587_s27  ;;  %v2373_v47 = vstv %s8541_s17  ;;  %s8939_s17 = sld [smem:[#allocation8 + $0x3d]] }
 0x21a   : > { %829 = vst [vmem:[#allocation2 + $0x8] sm:$0x1] %v828_v60  ;;  %v785_v4 = vmax.f32 %v776_v61, %v782_v27  ;;  %v950_v61 = vstv %s8353_s29  ;;  %s8551_s29 = sld [smem:[#allocation8 + $0xd8]] }
 0x21b   : > { %793 = vst [vmem:[#allocation2 + $0x4] sm:$0x2] %v786_v16  ;;  %794 = vst [vmem:[#allocation2 + $0x3] sm:$0x8] %v786_v16  ;;  %11584 = sst [smem:[#allocation91_spill]] %s8485_s13  ;;  %s11593_s13 = sld [smem:[#allocation50_spill]]  ;;  %v1701_v27 = vstv %s8519_s8 }
 0x21c   : > { %789 = vst [vmem:[#allocation2] sm:$0x2] %v785_v4  ;;  %790 = vst [vmem:[#allocation2 - $0x1] sm:$0x8] %v785_v4  ;;  %11625 = sst [smem:[#allocation104_spill]] %s8553_s28  ;;  %s11638_s22 = sld [smem:[#allocation91_spill]] }
 0x21d   : > { %791 = vst [vmem:[#allocation2 - $0x2] sm:$0x20] %v785_v4  ;;  %792 = vst [vmem:[#allocation2 - $0x3] sm:$0x80] %v785_v4  ;;  %s8585_s28 = sld [smem:[#allocation8 + $0x147]]  ;;  %s8909_s8 = sld [smem:[#allocation8 + $0x4d]] }
 0x21f   : > { %11756 = sst [smem:[#allocation45_spill]] %s8939_s17  ;;  %s9014_s17 = sld [smem:[#allocation8 + $0x49]] }
 0x220   : > { %v816_v0 = vpop.permute.xlu1 %815  ;;  %11623 = sst [smem:[#allocation103_spill]] %s8551_s29  ;;  %s8637_s29 = sld [smem:[#allocation8 + $0x114]] }
 0x221   : > { %v818_v6 = vmax.f32 %v812_v32, %v816_v0  ;;  %v1449_v32 = vstv %s8339_s30  ;;  %v1116_v23 = vstv %s11593_s13  ;;  %s11616_s30 = sld [smem:[#allocation69_spill]]  ;;  %s8533_s13 = sld [smem:[#allocation8 + $0xde]] }
 0x223   : > { %v855_v53 = vpop.permute.xlu0 %854  ;;  %v822_v7 = vrot.slane %v818_v6, 1  ;;  %v836_v44 = vmax.f32 %v818_v6, %v7971_v37  ;;  %11747 = sst [smem:[#allocation128_spill]] %s8909_s8  ;;  %s8925_s8 = sld [smem:[#allocation8 + $0x35]] }
 0x224   : > { %v858_v42 = vmax.f32 %v852_v22, %v855_v53  ;;  %v8349_v29 = vld [vmem:[#allocation2] sm:$0xff]  ;;  %v2016_v22 = vstv %s8334_s23  ;;  %s8493_s23 = sld [smem:[#allocation8 + $0xfc]]  ;;  %v1617_v53 = vstv %s11603_s18  ;;  %s8595_s18 = sld [smem:[#allocation8 + $0x13b]] }
 0x225   : > { %v823_v24 = vsel %vm448_vm0, %v821_v33, %v822_v7  ;;  %v827_v63 = vmax.f32 %v818_v6, %v822_v7  ;;  %837 = vst [vmem:[#allocation2 + $0xa] sm:$0x20] %v836_v44  ;;  %926 = vrot.lane.b32.xlu1 %v8349_v29, %s11157_s10  ;;  %924 = vrot.lane.b32.xlu0 %v8349_v29, %s11534_s24  ;;  %s8388_s10 = sld [smem:[#allocation8 + $0xae]]  ;;  %v2268_v44 = vstv %s11607_s0  ;;  %s11631_s0 = sld [smem:[#allocation86_spill]] }
 0x226   : > { %v869_v62 = vmax.f32 %v858_v42, %v8183_v20  ;;  %v826_v37 = vmax.f32 %v817_v46, %v823_v24  ;;  %v862_v2 = vrot.slane %v858_v42, 1  ;;  %11665 = sst [smem:[#allocation30_spill]] %s8637_s29  ;;  %v1009_v4 = vmul.f32 %v1008_v19, %v8349_v29 }
 0x227   : > { %834 = vst [vmem:[#allocation2 + $0xc] sm:$0x2] %v827_v63  ;;  %835 = vst [vmem:[#allocation2 + $0xb] sm:$0x8] %v827_v63  ;;  %11617 = sst [smem:[#allocation102_spill]] %s8533_s13  ;;  %s8635_s13 = sld [smem:[#allocation8 + $0x123]]  ;;  %v8661_v33 = vmul.f32 %v2100_v38, %v8349_v29  ;;  %v8672_v25 = vmul.f32 %v1344_v9, %v8349_v29  ;;  %v961_v45 = vmul.f32 %v960_v51, %v8349_v29 }
 0x228   : > { %870 = vst [vmem:[#allocation2 + $0x10] sm:$0x1] %v869_v62  ;;  %830 = vst [vmem:[#allocation2 + $0x8] sm:$0x2] %v826_v37  ;;  %v8703_v35 = vadd.f32 %v1009_v4, %v946_v18  ;;  %s8863_s29 = sld [smem:[#allocation8 + $0x74]] }
 0x229   : > { %831 = vst [vmem:[#allocation2 + $0x7] sm:$0x8] %v826_v37  ;;  %832 = vst [vmem:[#allocation2 + $0x6] sm:$0x20] %v826_v37  ;;  %11752 = sst [smem:[#allocation131_spill]] %s8925_s8  ;;  %s11861_s8 = sld [smem:[#allocation75_spill]] }
 0x22a   : > { %833 = vst [vmem:[#allocation2 + $0x5] sm:$0x80] %v826_v37  ;;  %11590 = sst [smem:[#allocation93_spill]] %s8493_s23  ;;  %s11601_s23 = sld [smem:[#allocation59_spill]]  ;;  %11676 = vst [vmem:[#allocation112_spill] sm:$0xff] %v8661_v33 }
 0x22b   : > { %11549 = sst [smem:[#allocation57_spill]] %s8388_s10  ;;  %s8406_s10 = sld [smem:[#allocation8 + $0xba]] }
 0x22c   : > { %11647 = sst [smem:[#allocation109_spill]] %s8595_s18  ;;  %s8877_s18 = sld [smem:[#allocation8 + $0x76]] }
 0x22d   : > { %11663 = sst [smem:[#allocation28_spill]] %s8635_s13  ;;  %s8923_s13 = sld [smem:[#allocation8 + $0x34]] }
 0x22e   : > { %11737 = sst [smem:[#allocation39_spill]] %s8863_s29  ;;  %s8893_s29 = sld [smem:[#allocation8 + $0x44]] }
 0x230   : > { %v857_v11 = vpop.permute.xlu1 %856  ;;  %v896_v55 = vpop.permute.xlu0 %895  ;;  %v1596_v6 = vstv %s11601_s23  ;;  %s8577_s23 = sld [smem:[#allocation8 + $0x156]] }
 0x231   : > { %v859_v14 = vmax.f32 %v8298_v3, %v857_v11  ;;  %v8392_v59 = vld [vmem:[#allocation2 + $0x8] sm:$0xff]  ;;  %v899_v8 = vmax.f32 %v8305_v21, %v896_v55  ;;  %11555 = sst [smem:[#allocation62_spill]] %s8406_s10  ;;  %s8426_s10 = sld [smem:[#allocation8 + $0x93]]  ;;  %v972_v3 = vstv %s8345_s11  ;;  %v2037_v21 = vstv %s8351_s14 }
 0x232   : > { %930 = vrot.lane.b32.xlu1 %v8392_v59, %s11553_s5  ;;  %928 = vrot.lane.b32.xlu0 %v8392_v59, %s11534_s24  ;;  %s8503_s11 = sld [smem:[#allocation8 + $0xc9]]  ;;  %v1056_v11 = vstv %s11615_s15  ;;  %s8601_s15 = sld [smem:[#allocation8 + $0x144]]  ;;  %v1932_v55 = vstv %s8543_s9  ;;  %v8694_v9 = vmul.f32 %v1596_v6, %v8349_v29 }
 0x233   : > { %v863_v49 = vrot.slane %v859_v14, 1  ;;  %v877_v34 = vmax.f32 %v859_v14, %v8183_v20  ;;  %v910_v20 = vmax.f32 %v899_v8, %v8257_v57  ;;  %v903_v15 = vrot.slane %v899_v8, 1  ;;  %11740 = sst [smem:[#allocation91_spill]] %s8877_s18  ;;  %s8972_s9 = sld [smem:[#allocation8 + $0x4f]] }
 0x234   : > { %v1057_v51 = vmul.f32 %v1056_v11, %v8349_v29  ;;  %11745 = sst [smem:[#allocation83_spill]] %s8893_s29  ;;  %s9154_s29 = sld [smem:[#allocation8 + $0xa3]] }
 0x235   : > { %v864_v52 = vsel %vm448_vm0, %v862_v2, %v863_v49  ;;  %v868_v10 = vmax.f32 %v859_v14, %v863_v49  ;;  %878 = vst [vmem:[#allocation2 + $0x12] sm:$0x20] %v877_v34  ;;  %911 = vst [vmem:[#allocation2 + $0x18] sm:$0x1] %v910_v20  ;;  %v1068_v14 = vstv %s11616_s30  ;;  %s8563_s30 = sld [smem:[#allocation8 + $0x135]]  ;;  %v1512_v49 = vstv %s11620_s20  ;;  %s11635_s20 = sld [smem:[#allocation92_spill]] }
 0x236   : > { %v867_v41 = vmax.f32 %v858_v42, %v864_v52  ;;  %v2289_v42 = vstv %s11609_s7  ;;  %v1533_v34 = vstv %s8430_s3  ;;  %v2205_v20 = vstv %s8438_s4  ;;  %s8579_s3 = sld [smem:[#allocation8 + $0x108]]  ;;  %s8587_s4 = sld [smem:[#allocation8 + $0x141]] }
 0x237   : > { %875 = vst [vmem:[#allocation2 + $0x14] sm:$0x2] %v868_v10  ;;  %876 = vst [vmem:[#allocation2 + $0x13] sm:$0x8] %v868_v10  ;;  %11564 = sst [smem:[#allocation71_spill]] %s8426_s10  ;;  %s8445_s10 = sld [smem:[#allocation8 + $0xe4]]  ;;  %v2184_v10 = vstv %s11622_s16 }
 0x238   : > { %871 = vst [vmem:[#allocation2 + $0x10] sm:$0x2] %v867_v41  ;;  %872 = vst [vmem:[#allocation2 + $0xf] sm:$0x8] %v867_v41  ;;  %11598 = sst [smem:[#allocation96_spill]] %s8503_s11  ;;  %s8517_s11 = sld [smem:[#allocation8 + $0xdb]]  ;;  %v8720_v6 = vmul.f32 %v2184_v10, %v8349_v29 }
 0x239   : > { %873 = vst [vmem:[#allocation2 + $0xe] sm:$0x20] %v867_v41  ;;  %874 = vst [vmem:[#allocation2 + $0xd] sm:$0x80] %v867_v41  ;;  %s8781_s16 = sld [smem:[#allocation8 + $0x6a]]  ;;  %11766 = sst [smem:[#allocation47_spill]] %s8972_s9 }
 0x23a   : > { %v898_v5 = vpop.permute.xlu1 %897  ;;  %11691 = vst [vmem:[#allocation115_spill] sm:$0xff] %v8720_v6  ;;  %11719 = sst [smem:[#allocation92_spill]] %s8800_s12  ;;  %s8990_s9 = sld [smem:[#allocation8 + $0x37]] }
 0x23b   : > { %v900_v36 = vmax.f32 %v8312_v26, %v898_v5  ;;  %v1470_v26 = vstv %s8361_s19  ;;  %s8511_s19 = sld [smem:[#allocation8 + $0xc6]]  ;;  %v954_v5 = vstv %s8443_s21  ;;  %v952_v62 = vstv %s11635_s20  ;;  %11751 = sst [smem:[#allocation44_spill]] %s8923_s13 }
 0x23c   : > { %11636 = sst [smem:[#allocation107_spill]] %s8579_s3  ;;  %s11644_s21 = sld [smem:[#allocation96_spill]]  ;;  %v1308_v16 = vstv %s8563_s30 }
 0x23d   : > { %11573 = sst [smem:[#allocation80_spill]] %s8445_s10  ;;  %v904_v17 = vrot.slane %v900_v36, 1  ;;  %v918_v1 = vmax.f32 %v900_v36, %v8257_v57  ;;  %v1428_v57 = vstv %s8322_s26  ;;  %s8495_s26 = sld [smem:[#allocation8 + $0xc3]] }
 0x23e   : > { %s8459_s10 = sld [smem:[#allocation8 + $0xf6]]  ;;  %11608 = sst [smem:[#allocation99_spill]] %s8517_s11  ;;  %v8656_v19 = vmul.f32 %v1428_v57, %v8349_v29  ;;  %v8677_v57 = vmul.f32 %v2016_v22, %v8349_v29  ;;  %v8699_v22 = vmul.f32 %v2268_v44, %v8349_v29 }
 0x23f   : > { %v905_v43 = vsel %vm448_vm0, %v903_v15, %v904_v17  ;;  %v909_v28 = vmax.f32 %v900_v36, %v904_v17  ;;  %919 = vst [vmem:[#allocation2 + $0x1a] sm:$0x20] %v918_v1  ;;  %s8535_s11 = sld [smem:[#allocation8 + $0x157]]  ;;  %s11627_s27 = sld [smem:[#allocation80_spill]]  ;;  %v1212_v17 = vstv %s8452_s25  ;;  %v1764_v1 = vstv %s8449_s1 }
 0x240   : > { %v8456_v50 = vld [vmem:[#allocation2 + $0x10] sm:$0xff]  ;;  %v908_v31 = vmax.f32 %v899_v8, %v905_v43  ;;  %11642 = sst [smem:[#allocation108_spill]] %s8587_s4  ;;  %s8647_s4 = sld [smem:[#allocation8 + $0x126]]  ;;  %11682 = vst [vmem:[#allocation113_spill] sm:$0xff] %v8677_v57  ;;  %v1105_v8 = vmul.f32 %v1104_v13, %v8349_v29  ;;  %11687 = vst [vmem:[#allocation114_spill] sm:$0xff] %v8699_v22  ;;  %v8715_v13 = vmul.f32 %v1512_v49, %v8349_v29 }
 0x241   : > { %934 = vrot.lane.b32.xlu1 %v8456_v50, %s11553_s5  ;;  %932 = vrot.lane.b32.xlu0 %v8456_v50, %s11534_s24  ;;  %916 = vst [vmem:[#allocation2 + $0x1c] sm:$0x2] %v909_v28  ;;  %917 = vst [vmem:[#allocation2 + $0x1b] sm:$0x8] %v909_v28  ;;  %11604 = sst [smem:[#allocation98_spill]] %s8511_s19  ;;  %s11613_s19 = sld [smem:[#allocation67_spill]]  ;;  %v2457_v28 = vstv %s11638_s22  ;;  %v8734_v11 = vmul.f32 %v1764_v1, %v8349_v29  ;;  %v8756_v1 = vadd.f32 %v961_v45, %v944_v30 }
 0x242   : > { %912 = vst [vmem:[#allocation2 + $0x18] sm:$0x2] %v908_v31  ;;  %913 = vst [vmem:[#allocation2 + $0x17] sm:$0x8] %v908_v31  ;;  %s8593_s3 = sld [smem:[#allocation8 + $0x14a]]  ;;  %s11648_s25 = sld [smem:[#allocation98_spill]]  ;;  %v1164_v2 = vstv %s11644_s21  ;;  %v8760_v4 = vadd.f32 %v1105_v8, %v950_v61  ;;  %v8810_v45 = vmul.f32 %v1617_v53, %v8392_v59 }
 0x243   : > { %914 = vst [vmem:[#allocation2 + $0x16] sm:$0x20] %v908_v31  ;;  %915 = vst [vmem:[#allocation2 + $0x15] sm:$0x80] %v908_v31  ;;  %11592 = sst [smem:[#allocation94_spill]] %s8495_s26  ;;  %s8509_s26 = sld [smem:[#allocation8 + $0xd2]]  ;;  %v1785_v31 = vstv %s11631_s0 }
 0x244   : > { %11578 = sst [smem:[#allocation85_spill]] %s8459_s10  ;;  %s8479_s10 = sld [smem:[#allocation8 + $0xc0]]  ;;  %11696 = vst [vmem:[#allocation116_spill] sm:$0xff] %v8734_v11 }
 0x245   : > { %v1200_v15 = vstv %s11627_s27  ;;  %s11643_s7 = sld [smem:[#allocation94_spill]]  ;;  %s11650_s27 = sld [smem:[#allocation101_spill]]  ;;  %v958_v60 = vstv %s8535_s11 }
 0x246   : > { %11651 = sst [smem:[#allocation98_spill]] %s8601_s15  ;;  %s8629_s21 = sld [smem:[#allocation8 + $0x11a]]  ;;  %v1201_v44 = vmul.f32 %v1200_v15, %v8349_v29 }
 0x247   : > { %v948_v37 = vstv %s11613_s19  ;;  %s8561_s19 = sld [smem:[#allocation8 + $0xe1]]  ;;  %11652 = sst [smem:[#allocation101_spill]] %s8603_s6 }
 0x248   : > { %11646 = sst [smem:[#allocation94_spill]] %s8593_s3  ;;  %v2352_v43 = vstv %s11648_s25  ;;  %s8651_s20 = sld [smem:[#allocation8 + $0x56]]  ;;  %v8775_v30 = vadd.f32 %v1057_v51, %v948_v37  ;;  %v8791_v37 = vmul.f32 %v1365_v48, %v8392_v59  ;;  %v8795_v8 = vadd.f32 %v1201_v44, %v954_v5 }
 0x249   : > { %11602 = sst [smem:[#allocation97_spill]] %s8509_s26  ;;  %s8525_s26 = sld [smem:[#allocation8 + $0xd5]]  ;;  %v8824_v44 = vmul.f32 %v2289_v42, %v8392_v59 }
 0x24a   : > { %11583 = sst [smem:[#allocation90_spill]] %s8479_s10  ;;  %v8545_v63 = vld [vmem:[#allocation2 + $0x18] sm:$0xff]  ;;  %s11632_s10 = sld [smem:[#allocation84_spill]] }
 0x24b   : > { %938 = vrot.lane.b32.xlu1 %v8545_v63, %s11553_s5  ;;  %936 = vrot.lane.b32.xlu0 %v8545_v63, %s11534_s24  ;;  %s8569_s5 = sld [smem:[#allocation8 + $0x13e]]  ;;  %s8571_s24 = sld [smem:[#allocation8 + $0x138]]  ;;  %v1680_v36 = vstv %s11643_s7  ;;  %v1296_v41 = vstv %s11650_s27  ;;  %11727 = vst [vmem:[#allocation121_spill] sm:$0xff] %v8824_v44 }
 0x24c   : > { %11634 = sst [smem:[#allocation84_spill]] %s8577_s23  ;;  %s11637_s14 = sld [smem:[#allocation90_spill]]  ;;  %v8834_v53 = vmul.f32 %v1680_v36, %v8349_v29  ;;  %v8859_v36 = vmul.f32 %v1785_v31, %v8392_v59  ;;  %v8952_v31 = vmul.f32 %v1932_v55, %v8349_v29 }
 0x24d   : > { %11628 = sst [smem:[#allocation105_spill]] %s8561_s19  ;;  %s8681_s23 = sld [smem:[#allocation8 + $0x5b]] }
 0x24e   : > { %11640 = sst [smem:[#allocation90_spill]] %s8585_s28  ;;  %s8667_s28 = sld [smem:[#allocation8 + $0x59]]  ;;  %11728 = vst [vmem:[#allocation122_spill] sm:$0xff] %v8834_v53  ;;  %11734 = vst [vmem:[#allocation125_spill] sm:$0xff] %v8859_v36 }
 0x24f   : > { %11612 = sst [smem:[#allocation100_spill]] %s8525_s26  ;;  %s8683_s6 = sld [smem:[#allocation8 + $0x5c]]  ;;  %11760 = vst [vmem:[#allocation136_spill] sm:$0xff] %v8952_v31 }
 0x250   : > { %v2436_v52 = vstv %s11632_s10  ;;  %11661 = sst [smem:[#allocation27_spill]] %s8629_s21  ;;  %s8645_s21 = sld [smem:[#allocation8 + $0x11d]] }
 0x251   : > { %11630 = sst [smem:[#allocation106_spill]] %s8569_s5  ;;  %v1953_v24 = vstv %s8571_s24  ;;  %s8649_s5 = sld [smem:[#allocation8 + $0x55]]  ;;  %v8745_v18 = vmul.f32 %v2436_v52, %v8349_v29  ;;  %v8904_v52 = vmul.f32 %v1068_v14, %v8392_v59  ;;  %v8921_v14 = vmul.f32 %v2373_v47, %v8392_v59 }
 0x252   : > { %v1152_v0 = vstv %s11637_s14  ;;  %11669 = sst [smem:[#allocation35_spill]] %s8647_s4  ;;  %s8665_s4 = sld [smem:[#allocation8 + $0x58]]  ;;  %v8960_v47 = vmul.f32 %v1470_v26, %v8456_v50  ;;  %v8980_v55 = vmul.f32 %v1953_v24, %v8392_v59  ;;  %v11813_v24 = vstv %s11799_s2 }
 0x253   : > { %11673 = sst [smem:[#allocation49_spill]] %s8651_s20  ;;  %s8705_s26 = sld [smem:[#allocation8 + $0x31]]  ;;  %11700 = vst [vmem:[#allocation117_spill] sm:$0xff] %v8745_v18  ;;  %v1153_v15 = vmul.f32 %v1152_v0, %v8349_v29  ;;  %v8767_v0 = vmul.f32 %v1449_v32, %v8392_v59  ;;  %v8786_v32 = vmul.f32 %v2121_v12, %v8392_v59  ;;  %v8805_v12 = vmul.f32 %v2037_v21, %v8392_v59 }
 0x254   : > { %11680 = sst [smem:[#allocation63_spill]] %s8667_s28  ;;  %s8707_s19 = sld [smem:[#allocation8 + $0x32]]  ;;  %v8829_v21 = vmul.f32 %v1533_v34, %v8392_v59  ;;  %v8854_v34 = vmul.f32 %v2205_v20, %v8392_v59  ;;  %v8875_v20 = vmul.f32 %v2457_v28, %v8392_v59  ;;  %v8898_v28 = vmul.f32 %v1116_v23, %v8392_v59  ;;  %11749 = vst [vmem:[#allocation130_spill] sm:$0xff] %v8921_v14 }
 0x255   : > { %11683 = sst [smem:[#allocation32_spill]] %s8681_s23  ;;  %s8724_s0 = sld [smem:[#allocation8 + $0x5f]]  ;;  %11715 = vst [vmem:[#allocation118_spill] sm:$0xff] %v8786_v32  ;;  %11721 = vst [vmem:[#allocation119_spill] sm:$0xff] %v8805_v12  ;;  %v8815_v5 = vadd.f32 %v1153_v15, %v952_v62  ;;  %v8839_v62 = vmul.f32 %v2352_v43, %v8349_v29  ;;  %v8844_v15 = vmul.f32 %v1020_v58, %v8392_v59 }
 0x256   : > { %11667 = sst [smem:[#allocation34_spill]] %s8645_s21  ;;  %s8722_s22 = sld [smem:[#allocation8 + $0x5e]]  ;;  %11732 = vst [vmem:[#allocation124_spill] sm:$0xff] %v8854_v34  ;;  %v8869_v43 = vmul.f32 %v972_v3, %v8392_v59  ;;  %11738 = vst [vmem:[#allocation126_spill] sm:$0xff] %v8875_v20  ;;  %v8886_v3 = vmul.f32 %v1701_v27, %v8392_v59  ;;  %v1297_v58 = vmul.f32 %v1296_v41, %v8349_v29 }
 0x257   : > { %11671 = sst [smem:[#allocation31_spill]] %s8649_s5  ;;  %s8736_s21 = sld [smem:[#allocation8 + $0x67]]  ;;  %11722 = vst [vmem:[#allocation120_spill] sm:$0xff] %v8815_v5  ;;  %11729 = vst [vmem:[#allocation123_spill] sm:$0xff] %v8839_v62  ;;  %v8915_v23 = vmul.f32 %v1212_v17, %v8392_v59  ;;  %v8931_v17 = vmul.f32 %v1164_v2, %v8392_v59  ;;  %v8937_v27 = vmul.f32 %v1308_v16, %v8392_v59 }
 0x258   : > { %11678 = sst [smem:[#allocation59_spill]] %s8665_s4  ;;  %s8738_s3 = sld [smem:[#allocation8 + $0x68]]  ;;  %11742 = vst [vmem:[#allocation127_spill] sm:$0xff] %v8886_v3  ;;  %v8947_v2 = vadd.f32 %v1297_v58, %v958_v60  ;;  %v8970_v29 = vmul.f32 %v2142_v40, %v8456_v50  ;;  %11770 = vst [vmem:[#allocation140_spill] sm:$0xff] %v8980_v55  ;;  %v8986_v41 = vmul.f32 %v1032_v54, %v8456_v50 }
 0x259   : > { %11685 = sst [smem:[#allocation68_spill]] %s8683_s6  ;;  %s8817_s15 = sld [smem:[#allocation8 + $0x6d]]  ;;  %11748 = vst [vmem:[#allocation129_spill] sm:$0xff] %v8915_v23  ;;  %11753 = vst [vmem:[#allocation132_spill] sm:$0xff] %v8931_v17  ;;  %v9000_v59 = vmul.f32 %v1386_v39, %v8456_v50  ;;  %v9081_v61 = vmul.f32 %v11813_v24, %v8545_v63 }
 0x25a   : > { %11688 = sst [smem:[#allocation72_spill]] %s8705_s26  ;;  %s8849_s14 = sld [smem:[#allocation8 + $0x3b]]  ;;  %11755 = vst [vmem:[#allocation133_spill] sm:$0xff] %v8937_v27  ;;  %11759 = vst [vmem:[#allocation135_spill] sm:$0xff] %v8947_v2 }
 0x25b   : > { %11689 = sst [smem:[#allocation76_spill]] %s8707_s19  ;;  %s8752_s19 = sld [smem:[#allocation8 + $0x61]]  ;;  %11765 = vst [vmem:[#allocation138_spill] sm:$0xff] %v8970_v29 }
 0x25c   : > { %11693 = sst [smem:[#allocation80_spill]] %s8722_s22  ;;  %s8861_s25 = sld [smem:[#allocation8 + $0x73]] }
 0x25d   : > { %11694 = sst [smem:[#allocation82_spill]] %s8724_s0  ;;  %s8879_s1 = sld [smem:[#allocation8 + $0x77]] }
 0x25e   : > { %11698 = sst [smem:[#allocation33_spill]] %s8736_s21  ;;  %s8779_s21 = sld [smem:[#allocation8 + $0x71]] }
 0x25f   : > { %11699 = sst [smem:[#allocation42_spill]] %s8738_s3  ;;  %s8847_s3 = sld [smem:[#allocation8 + $0x3a]] }
 0x260   : > { %11714 = sst [smem:[#allocation41_spill]] %s8781_s16  ;;  %s8891_s10 = sld [smem:[#allocation8 + $0x43]] }
 0x261   : > { %11705 = sst [smem:[#allocation67_spill]] %s8752_s19  ;;  %s8771_s19 = sld [smem:[#allocation8 + $0x64]] }
 0x262   : > { %11724 = sst [smem:[#allocation64_spill]] %s8817_s15  ;;  %s8907_s27 = sld [smem:[#allocation8 + $0x4c]] }
 0x263   : > { %11731 = sst [smem:[#allocation77_spill]] %s8849_s14  ;;  %s8962_s30 = sld [smem:[#allocation8 + $0x46]] }
 0x264   : > { %11713 = sst [smem:[#allocation79_spill]] %s8779_s21  ;;  %s8974_s20 = sld [smem:[#allocation8 + $0x50]] }
 0x265   : > { %11730 = sst [smem:[#allocation36_spill]] %s8847_s3  ;;  %s11771_s5 = sld [smem:[#allocation48_spill]] }
 0x266   : > { %11735 = sst [smem:[#allocation86_spill]] %s8861_s25  ;;  %s9002_s22 = sld [smem:[#allocation8 + $0x40]] }
 0x267   : > { %11710 = sst [smem:[#allocation40_spill]] %s8771_s19  ;;  %s8798_s19 = sld [smem:[#allocation8 + $0x6b]] }
 0x268   : > { %11741 = sst [smem:[#allocation50_spill]] %s8879_s1  ;;  %s11780_s23 = sld [smem:[#allocation46_spill]] }
 0x269   : > { %11744 = sst [smem:[#allocation69_spill]] %s8891_s10  ;;  %s11782_s6 = sld [smem:[#allocation65_spill]] }
 0x26a   : > { %11746 = sst [smem:[#allocation96_spill]] %s8907_s27  ;;  %s9016_s11 = sld [smem:[#allocation8 + $0x4a]] }
 0x26b   : > { %s8941_s27 = sld [smem:[#allocation8 + $0x3e]]  ;;  %11761 = sst [smem:[#allocation43_spill]] %s8962_s30  ;;  %v11783_v42 = vstv %s11771_s5 }
 0x26c   : > { %11768 = sst [smem:[#allocation139_spill]] %s8974_s20  ;;  %s8992_s20 = sld [smem:[#allocation8 + $0x38]]  ;;  %v9012_v48 = vmul.f32 %v11783_v42, %v8456_v50 }
 0x26d   : > { %11717 = sst [smem:[#allocation60_spill]] %s8798_s19  ;;  %s8819_s19 = sld [smem:[#allocation8 + $0x6e]] }
 0x26e   : > { %11774 = sst [smem:[#allocation48_spill]] %s8990_s9  ;;  %s9004_s30 = sld [smem:[#allocation8 + $0x41]]  ;;  %11785 = vst [vmem:[#allocation142_spill] sm:$0xff] %v9012_v48  ;;  %v11793_v51 = vstv %s11780_s23 }
 0x26f   : > { %11786 = sst [smem:[#allocation65_spill]] %s9014_s17  ;;  %s9021_s7 = sld [smem:[#allocation8 + $0x52]]  ;;  %v9035_v39 = vmul.f32 %v11793_v51, %v8456_v50  ;;  %v11796_v60 = vstv %s11782_s6 }
 0x270   : > { %11787 = sst [smem:[#allocation143_spill]] %s9016_s11  ;;  %s11788_s26 = sld [smem:[#allocation57_spill]]  ;;  %v9044_v40 = vmul.f32 %v11796_v60, %v8456_v50 }
 0x271   : > { %11757 = sst [smem:[#allocation134_spill]] %s8941_s27  ;;  %s8964_s27 = sld [smem:[#allocation8 + $0x47]] }
 0x272   : > { %11775 = sst [smem:[#allocation141_spill]] %s8992_s20  ;;  %s9037_s5 = sld [smem:[#allocation8 + $0x9d]]  ;;  %11797 = vst [vmem:[#allocation147_spill] sm:$0xff] %v9044_v40 }
 0x273   : > { %11725 = sst [smem:[#allocation73_spill]] %s8819_s19  ;;  %s9039_s21 = sld [smem:[#allocation8 + $0x9e]] }
 0x274   : > { %11781 = sst [smem:[#allocation46_spill]] %s9004_s30  ;;  %s9023_s30 = sld [smem:[#allocation8 + $0x53]] }
 0x275   : > { %11790 = sst [smem:[#allocation57_spill]] %s9021_s7  ;;  %s9049_s24 = sld [smem:[#allocation8 + $0xa6]] }
 0x276   : > { %s11801_s23 = sld [smem:[#allocation53_spill]]  ;;  %s9051_s28 = sld [smem:[#allocation8 + $0xa7]]  ;;  %v11803_v51 = vstv %s11788_s26 }
 0x277   : > { %11763 = sst [smem:[#allocation137_spill]] %s8964_s27  ;;  %s11776_s27 = sld [smem:[#allocation61_spill]]  ;;  %v9056_v54 = vmul.f32 %v11803_v51, %v8456_v50 }
 0x278   : > { %11779 = sst [smem:[#allocation61_spill]] %s9002_s22  ;;  %s9062_s0 = sld [smem:[#allocation8 + $0xaf]] }
 0x279   : > { %11794 = sst [smem:[#allocation145_spill]] %s9037_s5  ;;  %s9064_s16 = sld [smem:[#allocation8 + $0xb0]] }
 0x27a   : > { %11791 = sst [smem:[#allocation144_spill]] %s9023_s30  ;;  %s11810_s26 = sld [smem:[#allocation51_spill]] }
 0x27b   : > { %11795 = sst [smem:[#allocation146_spill]] %s9039_s21  ;;  %s9068_s21 = sld [smem:[#allocation8 + $0xb8]] }
 0x27c   : > { %11802 = sst [smem:[#allocation52_spill]] %s9051_s28  ;;  %s11808_s28 = sld [smem:[#allocation78_spill]] }
 0x27d   : > { %v11792_v49 = vstv %s11776_s27  ;;  %s11798_s27 = sld [smem:[#allocation70_spill]]  ;;  %s9070_s5 = sld [smem:[#allocation8 + $0xb9]] }
 0x27e   : > { %v9028_v42 = vmul.f32 %v11792_v49, %v8456_v50  ;;  %11800 = sst [smem:[#allocation70_spill]] %s9049_s24  ;;  %s11807_s24 = sld [smem:[#allocation74_spill]]  ;;  %v11814_v49 = vstv %s11801_s23 }
 0x27f   : > { %11805 = sst [smem:[#allocation53_spill]] %s9062_s0  ;;  %v9086_v10 = vmul.f32 %v11814_v49, %v8545_v63  ;;  %s9089_s15 = sld [smem:[#allocation8 + $0xa0]] }
 0x280   : > { %11806 = sst [smem:[#allocation148_spill]] %s9064_s16  ;;  %s11816_s19 = sld [smem:[#allocation85_spill]]  ;;  %v11828_v7 = vstv %s11810_s26 }
 0x281   : > { %11809 = sst [smem:[#allocation74_spill]] %s9068_s21  ;;  %11815 = vst [vmem:[#allocation149_spill] sm:$0xff] %v9086_v10  ;;  %s9091_s4 = sld [smem:[#allocation8 + $0xa1]] }
 0x282   : > { %s11820_s12 = sld [smem:[#allocation56_spill]]  ;;  %s9096_s2 = sld [smem:[#allocation8 + $0xa9]]  ;;  %v11825_v26 = vstv %s11808_s28 }
 0x283   : > { %11811 = sst [smem:[#allocation78_spill]] %s9070_s5  ;;  %v11812_v60 = vstv %s11798_s27  ;;  %s11819_s27 = sld [smem:[#allocation55_spill]]  ;;  %v9108_v38 = vmul.f32 %v11825_v26, %v8456_v50 }
 0x284   : > { %v9076_v58 = vmul.f32 %v11812_v60, %v8456_v50  ;;  %s9098_s3 = sld [smem:[#allocation8 + $0xaa]]  ;;  %v11823_v24 = vstv %s11807_s24  ;;  %s11826_s23 = sld [smem:[#allocation54_spill]]  ;;  %v9113_v60 = vmul.f32 %v11828_v7, %v8545_v63 }
 0x285   : > { %11817 = sst [smem:[#allocation51_spill]] %s9089_s15  ;;  %v9103_v49 = vmul.f32 %v11823_v24, %v8456_v50  ;;  %11827 = vst [vmem:[#allocation151_spill] sm:$0xff] %v9108_v38  ;;  %s11829_s14 = sld [smem:[#allocation62_spill]] }
 0x286   : > { %s9117_s25 = sld [smem:[#allocation8 + $0xb2]]  ;;  %v11834_v24 = vstv %s11816_s19  ;;  %s9138_s26 = sld [smem:[#allocation8 + $0xbb]] }
 0x287   : > { %11818 = sst [smem:[#allocation85_spill]] %s9091_s4  ;;  %11824 = vst [vmem:[#allocation150_spill] sm:$0xff] %v9103_v49  ;;  %v9124_v46 = vmul.f32 %v11834_v24, %v8456_v50  ;;  %s11842_s1 = sld [smem:[#allocation58_spill]] }
 0x288   : > { %11821 = sst [smem:[#allocation55_spill]] %s9096_s2  ;;  %s9119_s2 = sld [smem:[#allocation8 + $0xb3]]  ;;  %v11837_v16 = vstv %s11820_s12 }
 0x289   : > { %11835 = vst [vmem:[#allocation152_spill] sm:$0xff] %v9124_v46  ;;  %v11836_v14 = vstv %s11819_s27  ;;  %v9136_v51 = vmul.f32 %v11837_v16, %v8545_v63  ;;  %s9140_s19 = sld [smem:[#allocation8 + $0xbc]]  ;;  %s11845_s27 = sld [smem:[#allocation66_spill]] }
 0x28a   : > { %11822 = sst [smem:[#allocation56_spill]] %s9098_s3  ;;  %v9131_v7 = vmul.f32 %v11836_v14, %v8545_v63  ;;  %v11844_v56 = vstv %s11826_s23  ;;  %s9156_s10 = sld [smem:[#allocation8 + $0xa4]] }
 0x28b   : > { %11839 = vst [vmem:[#allocation153_spill] sm:$0xff] %v9136_v51  ;;  %v9147_v14 = vmul.f32 %v11844_v56, %v8545_v63  ;;  %v11846_v62 = vstv %s11829_s14  ;;  %11849 = sst [smem:[#allocation66_spill]] %s9154_s29  ;;  %s9162_s23 = sld [smem:[#allocation8 + $0xac]] }
 0x28c   : > { %11831 = sst [smem:[#allocation54_spill]] %s9117_s25  ;;  %v9152_v16 = vmul.f32 %v11846_v62, %v8545_v63  ;;  %s9173_s14 = sld [smem:[#allocation8 + $0xb5]] }
 0x28d   : > { %11841 = sst [smem:[#allocation154_spill]] %s9138_s26  ;;  %v11855_v62 = vstv %s11842_s1  ;;  %s9175_s6 = sld [smem:[#allocation8 + $0xb6]] }
 0x28e   : > { %11833 = sst [smem:[#allocation62_spill]] %s9119_s2  ;;  %s9164_s2 = sld [smem:[#allocation8 + $0xad]]  ;;  %v9171_v53 = vmul.f32 %v11855_v62, %v8545_v63 }
 0x28f   : > { %11843 = sst [smem:[#allocation58_spill]] %s9140_s19  ;;  %v11858_v27 = vstv %s11845_s27  ;;  %s11860_s3 = sld [smem:[#allocation71_spill]] }
 0x290   : > { %11850 = sst [smem:[#allocation155_spill]] %s9156_s10  ;;  %v9180_v3 = vmul.f32 %v11858_v27, %v8545_v63  ;;  %s9186_s24 = sld [smem:[#allocation8 + $0xbe]]  ;;  %v11872_v27 = vstv %s11861_s8 }
 0x291   : > { %11853 = sst [smem:[#allocation156_spill]] %s9162_s23  ;;  %s9188_s28 = sld [smem:[#allocation8 + $0xbf]]  ;;  %v9212_v24 = vmul.f32 %v11872_v27, %v8545_v63 }
 0x292   : > { %11856 = sst [smem:[#allocation158_spill]] %s9173_s14  ;;  %11859 = vst [vmem:[#allocation160_spill] sm:$0xff] %v9180_v3  ;;  %s11865_s13 = sld [smem:[#allocation81_spill]] }
 0x293   : > { %11857 = sst [smem:[#allocation159_spill]] %s9175_s6  ;;  %s9194_s27 = sld [smem:[#allocation8 + $0x79]]  ;;  %11873 = vst [vmem:[#allocation163_spill] sm:$0xff] %v9212_v24 }
 0x294   : > { %11854 = sst [smem:[#allocation157_spill]] %s9164_s2  ;;  %s9196_s18 = sld [smem:[#allocation8 + $0x7a]] }
 0x295   : > { %s9199_s12 = sld [smem:[#allocation8 + $0x82]]  ;;  %s11869_s6 = sld [smem:[#allocation88_spill]]  ;;  %v11871_v20 = vstv %s11860_s3 }
 0x296   : > { %11863 = sst [smem:[#allocation71_spill]] %s9186_s24  ;;  %s9201_s14 = sld [smem:[#allocation8 + $0x83]]  ;;  %v9206_v2 = vmul.f32 %v11871_v20, %v8545_v63 }
 0x297   : > { %11864 = sst [smem:[#allocation75_spill]] %s9188_s28  ;;  %s11874_s26 = sld [smem:[#allocation89_spill]] }
 0x298   : > { %s11875_s19 = sld [smem:[#allocation93_spill]]  ;;  %v11880_v20 = vstv %s11865_s13  ;;  %s11882_s8 = sld [smem:[#allocation87_spill]] }
 0x299   : > { %11866 = sst [smem:[#allocation81_spill]] %s9194_s27  ;;  %s9217_s9 = sld [smem:[#allocation8 + $0x8b]]  ;;  %v9224_v17 = vmul.f32 %v11880_v20, %v8545_v63 }
 0x29a   : > { %11867 = sst [smem:[#allocation161_spill]] %s9196_s18  ;;  %s9230_s1 = sld [smem:[#allocation8 + $0x95]] }
 0x29b   : > { %11868 = sst [smem:[#allocation162_spill]] %s9199_s12  ;;  %11881 = vst [vmem:[#allocation164_spill] sm:$0xff] %v9224_v17  ;;  %s9228_s12 = sld [smem:[#allocation8 + $0x94]]  ;;  %v11887_v18 = vstv %s11869_s6 }
 0x29c   : > { %11870 = sst [smem:[#allocation88_spill]] %s9201_s14  ;;  %s9219_s14 = sld [smem:[#allocation8 + $0x8c]]  ;;  %v9236_v56 = vmul.f32 %v11887_v18, %v8456_v50 }
 0x29d   : > { %s11889_s13 = sld [smem:[#allocation95_spill]]  ;;  %v11892_v20 = vstv %s11874_s26  ;;  %s9258_s30 = sld [smem:[#allocation8 + $0x86]] }
 0x29e   : > { %11888 = vst [vmem:[#allocation166_spill] sm:$0xff] %v9236_v56  ;;  %s9242_s11 = sld [smem:[#allocation8 + $0x7d]]  ;;  %v9247_v5 = vmul.f32 %v11892_v20, %v8545_v63  ;;  %v11894_v62 = vstv %s11875_s19  ;;  %v11898_v26 = vstv %s11882_s8  ;;  %s11900_s26 = sld [smem:[#allocation100_spill]] }
 0x29f   : > { %11877 = sst [smem:[#allocation89_spill]] %s9217_s9  ;;  %v9252_v27 = vmul.f32 %v11894_v62, %v8456_v50  ;;  %s9256_s6 = sld [smem:[#allocation8 + $0x85]]  ;;  %v9264_v3 = vmul.f32 %v11898_v26, %v8545_v63 }
 0x2a0   : > { %11885 = sst [smem:[#allocation165_spill]] %s9230_s1  ;;  %11893 = vst [vmem:[#allocation168_spill] sm:$0xff] %v9247_v5  ;;  %s9268_s19 = sld [smem:[#allocation8 + $0x8e]] }
 0x2a1   : > { %11883 = sst [smem:[#allocation87_spill]] %s9228_s12  ;;  %11895 = vst [vmem:[#allocation169_spill] sm:$0xff] %v9252_v27  ;;  %11899 = vst [vmem:[#allocation172_spill] sm:$0xff] %v9264_v3  ;;  %s9270_s7 = sld [smem:[#allocation8 + $0x8f]] }
 0x2a2   : > { %11879 = sst [smem:[#allocation93_spill]] %s9219_s14  ;;  %s9240_s14 = sld [smem:[#allocation8 + $0x7c]] }
 0x2a3   : > { %11897 = sst [smem:[#allocation171_spill]] %s9258_s30  ;;  %v11903_v38 = vstv %s11889_s13  ;;  %s11906_s8 = sld [smem:[#allocation103_spill]] }
 0x2a4   : > { %11891 = sst [smem:[#allocation167_spill]] %s9242_s11  ;;  %v9276_v18 = vmul.f32 %v11903_v38, %v8545_v63  ;;  %s11905_s17 = sld [smem:[#allocation102_spill]]  ;;  %v11915_v26 = vstv %s11900_s26 }
 0x2a5   : > { %11896 = sst [smem:[#allocation170_spill]] %s9256_s6  ;;  %s9281_s18 = sld [smem:[#allocation8 + $0x97]]  ;;  %v9296_v51 = vmul.f32 %v11915_v26, %v8456_v50 }
 0x2a6   : > { %11901 = sst [smem:[#allocation100_spill]] %s9268_s19  ;;  %11904 = vst [vmem:[#allocation174_spill] sm:$0xff] %v9276_v18  ;;  %s9283_s3 = sld [smem:[#allocation8 + $0x98]] }
 0x2a7   : > { %11902 = sst [smem:[#allocation173_spill]] %s9270_s7  ;;  %s11910_s20 = sld [smem:[#allocation97_spill]]  ;;  %11917 = vst [vmem:[#allocation175_spill] sm:$0xff] %v9296_v51 }
 0x2a8   : > { %11890 = sst [smem:[#allocation95_spill]] %s9240_s14  ;;  %s9287_s7 = sld [smem:[#allocation8 + $0x7f]] }
 0x2a9   : > { %s11912_s19 = sld [smem:[#allocation105_spill]]  ;;  %s9289_s13 = sld [smem:[#allocation8 + $0x80]]  ;;  %v11925_v62 = vstv %s11906_s8 }
 0x2aa   : > { %s11918_s5 = sld [smem:[#allocation99_spill]]  ;;  %s9300_s16 = sld [smem:[#allocation8 + $0x88]]  ;;  %v11922_v20 = vstv %s11905_s17  ;;  %v9312_v27 = vmul.f32 %v11925_v62, %v8456_v50 }
 0x2ab   : > { %11908 = sst [smem:[#allocation102_spill]] %s9281_s18  ;;  %v9307_v38 = vmul.f32 %v11922_v20, %v8545_v63  ;;  %s9315_s26 = sld [smem:[#allocation8 + $0x91]] }
 0x2ac   : > { %11909 = sst [smem:[#allocation103_spill]] %s9283_s3  ;;  %s9302_s3 = sld [smem:[#allocation8 + $0x89]]  ;;  %11926 = vst [vmem:[#allocation178_spill] sm:$0xff] %v9312_v27 }
 0x2ad   : > { %11924 = vst [vmem:[#allocation177_spill] sm:$0xff] %v9307_v38  ;;  %s9317_s4 = sld [smem:[#allocation8 + $0x92]]  ;;  %v11929_v36 = vstv %s11910_s20  ;;  %s9335_s8 = sld [smem:[#allocation8 + $0x9b]]  ;;  %v7323_v38 = vld [vmem:[#allocation2 + $0x8] sm:$0xff] }
 0x2ae   : > { %11911 = sst [smem:[#allocation97_spill]] %s9287_s7  ;;  %v9323_v5 = vmul.f32 %v11929_v36, %v8456_v50  ;;  %s9333_s17 = sld [smem:[#allocation8 + $0x9a]] }
 0x2af   : > { %11913 = sst [smem:[#allocation105_spill]] %s9289_s13  ;;  %v11931_v20 = vstv %s11912_s19  ;;  %s11937_s20 = sld [smem:[#allocation106_spill]] }
 0x2b0   : > { %11919 = sst [smem:[#allocation99_spill]] %s9300_s16  ;;  %11930 = vst [vmem:[#allocation181_spill] sm:$0xff] %v9323_v5  ;;  %v9328_v17 = vmul.f32 %v11931_v20, %v8545_v63  ;;  %v11935_v26 = vstv %s11918_s5  ;;  %s11938_s22 = sld [smem:[#allocation108_spill]] }
 0x2b1   : > { %11927 = sst [smem:[#allocation179_spill]] %s9315_s26  ;;  %v9340_v34 = vmul.f32 %v11935_v26, %v8545_v63  ;;  %s9345_s15 = sld [smem:[#allocation8 + $0xe5]] }
 0x2b2   : > { %11921 = sst [smem:[#allocation176_spill]] %s9302_s3  ;;  %11932 = vst [vmem:[#allocation182_spill] sm:$0xff] %v9328_v17  ;;  %s11943_s21 = sld [smem:[#allocation94_spill]] }
 0x2b3   : > { %11928 = sst [smem:[#allocation180_spill]] %s9317_s4  ;;  %11936 = vst [vmem:[#allocation185_spill] sm:$0xff] %v9340_v34  ;;  %s9347_s25 = sld [smem:[#allocation8 + $0xe6]] }
 0x2b4   : > { %11933 = sst [smem:[#allocation183_spill]] %s9333_s17  ;;  %s11945_s5 = sld [smem:[#allocation104_spill]] }
 0x2b5   : > { %11934 = sst [smem:[#allocation184_spill]] %s9335_s8  ;;  %s9352_s8 = sld [smem:[#allocation8 + $0xee]]  ;;  %v11950_v62 = vstv %s11937_s20 }
 0x2b6   : > { %s9354_s17 = sld [smem:[#allocation8 + $0xef]]  ;;  %s11947_s13 = sld [smem:[#allocation90_spill]]  ;;  %v9367_v56 = vmul.f32 %v11950_v62, %v8456_v50  ;;  %v11953_v11 = vstv %s11938_s22  ;;  %v7322_v62 = vld [vmem:[#allocation2] sm:$0xff] }
 0x2b7   : > { %11940 = sst [smem:[#allocation106_spill]] %s9345_s15  ;;  %s9359_s7 = sld [smem:[#allocation8 + $0xf7]]  ;;  %v9372_v5 = vmul.f32 %v11953_v11, %v8456_v50 }
 0x2b8   : > { %s9361_s29 = sld [smem:[#allocation8 + $0xf8]]  ;;  %s11951_s23 = sld [smem:[#allocation109_spill]]  ;;  %11952 = vst [vmem:[#allocation187_spill] sm:$0xff] %v9367_v56  ;;  %v11956_v20 = vstv %s11943_s21 }
 0x2b9   : > { %11942 = sst [smem:[#allocation108_spill]] %s9347_s25  ;;  %11954 = vst [vmem:[#allocation188_spill] sm:$0xff] %v9372_v5  ;;  %s9376_s10 = sld [smem:[#allocation8 + $0x100]]  ;;  %v9383_v18 = vmul.f32 %v11956_v20, %v8545_v63 }
 0x2ba   : > { %v11959_v17 = vstv %s11945_s5  ;;  %s9390_s22 = sld [smem:[#allocation8 + $0xe8]]  ;;  %s9392_s19 = sld [smem:[#allocation8 + $0xe9]] }
 0x2bb   : > { %11944 = sst [smem:[#allocation94_spill]] %s9352_s8  ;;  %11957 = vst [vmem:[#allocation189_spill] sm:$0xff] %v9383_v18  ;;  %v9387_v27 = vmul.f32 %v7322_v62, %v11959_v17  ;;  %s9407_s5 = sld [smem:[#allocation8 + $0xf1]] }
 0x2bc   : > { %11946 = sst [smem:[#allocation104_spill]] %s9354_s17  ;;  %v11964_v26 = vstv %s11947_s13  ;;  %s9409_s24 = sld [smem:[#allocation8 + $0xf2]] }
 0x2bd   : > { %11948 = sst [smem:[#allocation90_spill]] %s9359_s7  ;;  %s9378_s7 = sld [smem:[#allocation8 + $0x101]]  ;;  %11961 = vst [vmem:[#allocation190_spill] sm:$0xff] %v9387_v27  ;;  %v9397_v36 = vmul.f32 %v11964_v26, %v8545_v63 }
 0x2be   : > { %11949 = sst [smem:[#allocation186_spill]] %s9361_s29  ;;  %v11967_v51 = vstv %s11951_s23  ;;  %s11971_s13 = sld [smem:[#allocation98_spill]] }
 0x2bf   : > { %11965 = vst [vmem:[#allocation192_spill] sm:$0xff] %v9397_v36  ;;  %v9402_v56 = vmul.f32 %v7323_v38, %v11967_v51  ;;  %s11972_s0 = sld [smem:[#allocation107_spill]]  ;;  %s9417_s23 = sld [smem:[#allocation8 + $0xfb]] }
 0x2c0   : > { %11962 = sst [smem:[#allocation109_spill]] %s9390_s22  ;;  %s11975_s28 = sld [smem:[#allocation30_spill]] }
 0x2c1   : > { %11963 = sst [smem:[#allocation191_spill]] %s9392_s19  ;;  %11968 = vst [vmem:[#allocation193_spill] sm:$0xff] %v9402_v56  ;;  %s9415_s19 = sld [smem:[#allocation8 + $0xfa]] }
 0x2c2   : > { %11969 = sst [smem:[#allocation194_spill]] %s9407_s5  ;;  %s9422_s2 = sld [smem:[#allocation8 + $0x103]] }
 0x2c3   : > { %11970 = sst [smem:[#allocation195_spill]] %s9409_s24  ;;  %s9424_s27 = sld [smem:[#allocation8 + $0x104]] }
 0x2c4   : > { %s11978_s9 = sld [smem:[#allocation111_spill]]  ;;  %s11979_s29 = sld [smem:[#allocation27_spill]]  ;;  %v11984_v10 = vstv %s11971_s13 }
 0x2c5   : > { %11974 = sst [smem:[#allocation107_spill]] %s9417_s23  ;;  %s9429_s20 = sld [smem:[#allocation8 + $0xeb]]  ;;  %v9437_v17 = vmul.f32 %v11984_v10, %v8456_v50  ;;  %v11987_v11 = vstv %s11972_s0 }
 0x2c6   : > { %s11981_s23 = sld [smem:[#allocation34_spill]]  ;;  %v1249_v26 = vmul.f32 %v7322_v62, %v11987_v11  ;;  %s11989_s1 = sld [smem:[#allocation101_spill]]  ;;  %v1869_v27 = vstv %s11975_s28 }
 0x2c7   : > { %11973 = sst [smem:[#allocation98_spill]] %s9415_s19  ;;  %s9431_s19 = sld [smem:[#allocation8 + $0xec]]  ;;  %11986 = vst [vmem:[#allocation197_spill] sm:$0xff] %v9437_v17  ;;  %v9481_v20 = vmul.f32 %v7323_v38, %v1869_v27 }
 0x2c8   : > { %11976 = sst [smem:[#allocation30_spill]] %s9422_s2  ;;  %s9449_s24 = sld [smem:[#allocation8 + $0x159]] }
 0x2c9   : > { %11977 = sst [smem:[#allocation196_spill]] %s9424_s27  ;;  %s11988_s27 = sld [smem:[#allocation28_spill]]  ;;  %12007 = vst [vmem:[#allocation203_spill] sm:$0xff] %v9481_v20 }
 0x2ca   : > { %s11993_s13 = sld [smem:[#allocation84_spill]]  ;;  %s9451_s5 = sld [smem:[#allocation8 + $0x161]]  ;;  %v11994_v10 = vstv %s11978_s9  ;;  %v1272_v51 = vstv %s11979_s29 }
 0x2cb   : > { %11980 = sst [smem:[#allocation111_spill]] %s9429_s20  ;;  %s9444_s20 = sld [smem:[#allocation8 + $0xf4]]  ;;  %v9456_v11 = vmul.f32 %v7323_v38, %v11994_v10 }
 0x2cc   : > { %v1890_v36 = vstv %s11981_s23  ;;  %s9462_s6 = sld [smem:[#allocation8 + $0xfd]]  ;;  %s9464_s14 = sld [smem:[#allocation8 + $0xfe]]  ;;  %v12000_v56 = vstv %s11989_s1 }
 0x2cd   : > { %11982 = sst [smem:[#allocation27_spill]] %s9431_s19  ;;  %s9446_s19 = sld [smem:[#allocation8 + $0xf5]]  ;;  %11996 = vst [vmem:[#allocation198_spill] sm:$0xff] %v9456_v11  ;;  %v9469_v18 = vmul.f32 %v7322_v62, %v12000_v56  ;;  %v7324_v56 = vld [vmem:[#allocation2 + $0x10] sm:$0xff] }
 0x2ce   : > { %s9473_s9 = sld [smem:[#allocation8 + $0x106]]  ;;  %s9475_s28 = sld [smem:[#allocation8 + $0x107]]  ;;  %v9489_v62 = vmul.f32 %v7324_v56, %v1272_v51  ;;  %v9491_v5 = vmul.f32 %v7324_v56, %v1890_v36 }
 0x2cf   : > { %v1284_v17 = vstv %s11988_s27  ;;  %12001 = vst [vmem:[#allocation199_spill] sm:$0xff] %v9469_v18  ;;  %s9485_s1 = sld [smem:[#allocation8 + $0xc1]]  ;;  %s9487_s27 = sld [smem:[#allocation8 + $0xc2]] }
 0x2d0   : > { %v12004_v10 = vstv %s11993_s13  ;;  %12009 = vst [vmem:[#allocation204_spill] sm:$0xff] %v9489_v62  ;;  %12010 = vst [vmem:[#allocation205_spill] sm:$0xff] %v9491_v5  ;;  %s9496_s2 = sld [smem:[#allocation8 + $0xca]]  ;;  %s9498_s18 = sld [smem:[#allocation8 + $0xcb]]  ;;  %v9501_v27 = vmul.f32 %v1284_v17, %v8545_v63  ;;  %v9545_v63 = vpop.permute.xlu0 %924  ;;  %v9567_v17 = vstv %s9451_s5 }
 0x2d1   : > { %11990 = sst [smem:[#allocation34_spill]] %s9444_s20  ;;  %v9479_v34 = vadd.f32 %v1249_v26, %v12004_v10  ;;  %s9506_s21 = sld [smem:[#allocation8 + $0xd3]]  ;;  %v9543_v10 = vpop.permute.xlu1 %926  ;;  %12038 = vst [vmem:[#allocation213_spill] sm:$0xff] %v9567_v17 }
 0x2d2   : > { %11998 = sst [smem:[#allocation101_spill]] %s9462_s6  ;;  %12013 = vst [vmem:[#allocation207_spill] sm:$0xff] %v9501_v27  ;;  %s9508_s12 = sld [smem:[#allocation8 + $0xd4]] }
 0x2d3   : > { %11992 = sst [smem:[#allocation28_spill]] %s9446_s19  ;;  %12005 = vst [vmem:[#allocation202_spill] sm:$0xff] %v9479_v34  ;;  %s9513_s26 = sld [smem:[#allocation8 + $0xdc]] }
 0x2d4   : > { %11999 = sst [smem:[#allocation84_spill]] %s9464_s14  ;;  %s9515_s16 = sld [smem:[#allocation8 + $0xdd]] }
 0x2d5   : > { %12002 = sst [smem:[#allocation200_spill]] %s9473_s9  ;;  %s9524_s15 = sld [smem:[#allocation8 + $0xc4]]  ;;  %v9633_v20 = vpop.permute.xlu1 %930 }
 0x2d6   : > { %12003 = sst [smem:[#allocation201_spill]] %s9475_s28  ;;  %s9519_s0 = sld [smem:[#allocation8 + $0x158]]  ;;  %12068 = vst [vmem:[#allocation217_spill] sm:$0xff] %v9633_v20 }
 0x2d7   : > { %12012 = sst [smem:[#allocation206_spill]] %s9498_s18  ;;  %s12029_s13 = sld [smem:[#allocation31_spill]] }
 0x2d8   : > { %12015 = sst [smem:[#allocation208_spill]] %s9506_s21  ;;  %s9541_s11 = sld [smem:[#allocation8 + $0xc5]] }
 0x2d9   : > { %12016 = sst [smem:[#allocation209_spill]] %s9508_s12  ;;  %s9527_s12 = sld [smem:[#allocation8 + $0x160]]  ;;  %v9757_v12 = vpop.permute.xlu1 %934 }
 0x2da   : > { %12018 = sst [smem:[#allocation210_spill]] %s9513_s26  ;;  %s9529_s21 = sld [smem:[#allocation8 + $0x15b]] }
 0x2db   : > { %12019 = sst [smem:[#allocation211_spill]] %s9515_s16  ;;  %s9535_s17 = sld [smem:[#allocation8 + $0x163]] }
 0x2dc   : > { %12024 = sst [smem:[#allocation212_spill]] %s9524_s15  ;;  %s12032_s3 = sld [smem:[#allocation72_spill]] }
 0x2dd   : > { %s12033_s22 = sld [smem:[#allocation49_spill]]  ;;  %s9551_s4 = sld [smem:[#allocation8 + $0xcd]]  ;;  %v12035_v51 = vstv %s12029_s13 }
 0x2de   : > { %12031 = sst [smem:[#allocation31_spill]] %s9541_s11  ;;  %s9553_s29 = sld [smem:[#allocation8 + $0xce]]  ;;  %v1013_v38 = vmul.f32 %v12035_v51, %v9545_v63 }
 0x2df   : > { %s12036_s30 = sld [smem:[#allocation76_spill]]  ;;  %s9561_s23 = sld [smem:[#allocation8 + $0xd6]]  ;;  %v9610_v56 = vstv %s9527_s12 }
 0x2e0   : > { %s9563_s26 = sld [smem:[#allocation8 + $0xd7]]  ;;  %s12040_s13 = sld [smem:[#allocation206_spill]]  ;;  %v1014_v51 = vadd.f32 %v1013_v38, %v8703_v35  ;;  %12053 = vst [vmem:[#allocation214_spill] sm:$0xff] %v9610_v56 }
 0x2e1   : > { %s9573_s8 = sld [smem:[#allocation8 + $0xdf]]  ;;  %s12042_s20 = sld [smem:[#allocation208_spill]] }
 0x2e2   : > { %v12039_v26 = vstv %s12032_s3  ;;  %s9575_s19 = sld [smem:[#allocation8 + $0xc7]]  ;;  %s12043_s18 = sld [smem:[#allocation209_spill]] }
 0x2e3   : > { %v965_v50 = vmul.f32 %v12039_v26, %v9545_v63  ;;  %v12041_v55 = vstv %s12033_s22  ;;  %s9583_s3 = sld [smem:[#allocation8 + $0xe0]]  ;;  %s12046_s6 = sld [smem:[#allocation145_spill]] }
 0x2e4   : > { %12034 = sst [smem:[#allocation72_spill]] %s9553_s29  ;;  %v1017_v11 = vmul.f32 %v12041_v55, %v9543_v10  ;;  %s9585_s16 = sld [smem:[#allocation8 + $0xc8]] }
 0x2e5   : > { %12037 = sst [smem:[#allocation49_spill]] %s9561_s23  ;;  %v966_v26 = vadd.f32 %v965_v50, %v8756_v1  ;;  %v12047_v5 = vstv %s12036_s30  ;;  %s9596_s22 = sld [smem:[#allocation8 + $0xd0]]  ;;  %v9617_v50 = vpop.permute.xlu0 %928 }
 0x2e6   : > { %v969_v35 = vmul.f32 %v12047_v5, %v9543_v10  ;;  %v1018_v36 = vadd.f32 %v1017_v11, %v1014_v51  ;;  %s9601_s30 = sld [smem:[#allocation8 + $0xd1]]  ;;  %s12052_s28 = sld [smem:[#allocation80_spill]]  ;;  %12057 = vst [vmem:[#allocation216_spill] sm:$0xff] %v9617_v50 }
 0x2e7   : > { %s12055_s9 = sld [smem:[#allocation59_spill]]  ;;  %s12056_s14 = sld [smem:[#allocation63_spill]] }
 0x2e8   : > { %v970_v27 = vadd.f32 %v969_v35, %v966_v26  ;;  %v9614_v35 = vstv %s9535_s17  ;;  %s12058_s5 = sld [smem:[#allocation32_spill]]  ;;  %v1022_v1 = vadd.f32 %v8844_v15, %v1018_v36  ;;  %s12060_s25 = sld [smem:[#allocation68_spill]] }
 0x2e9   : > { %v12051_v11 = vstv %s12046_s6  ;;  %12054 = vst [vmem:[#allocation215_spill] sm:$0xff] %v9614_v35  ;;  %s12059_s6 = sld [smem:[#allocation36_spill]]  ;;  %s12061_s12 = sld [smem:[#allocation146_spill]] }
 0x2ea   : > { %12045 = sst [smem:[#allocation76_spill]] %s9585_s16  ;;  %v1109_v51 = vmul.f32 %v12051_v11, %v9545_v63  ;;  %v974_v18 = vadd.f32 %v8869_v43, %v970_v27  ;;  %s12064_s11 = sld [smem:[#allocation131_spill]] }
 0x2eb   : > { %12049 = sst [smem:[#allocation206_spill]] %s9596_s22  ;;  %s12065_s15 = sld [smem:[#allocation82_spill]] }
 0x2ec   : > { %12050 = sst [smem:[#allocation208_spill]] %s9601_s30  ;;  %s12062_s17 = sld [smem:[#allocation44_spill]]  ;;  %v12063_v5 = vstv %s12052_s28  ;;  %v1110_v15 = vadd.f32 %v1109_v51, %v8760_v4 }
 0x2ed   : > { %v1025_v31 = vmul.f32 %v12063_v5, %v9617_v50  ;;  %s12066_s29 = sld [smem:[#allocation48_spill]]  ;;  %s12067_s23 = sld [smem:[#allocation141_spill]]  ;;  %v12069_v43 = vstv %s12055_s9  ;;  %v12070_v62 = vstv %s12056_s14 }
 0x2ee   : > { %v9638_v27 = vmul.f32 %v12069_v43, %v9545_v63  ;;  %v9643_v55 = vmul.f32 %v12070_v62, %v9543_v10  ;;  %v12071_v5 = vstv %s12058_s5  ;;  %s12074_s28 = sld [smem:[#allocation77_spill]]  ;;  %v12075_v36 = vstv %s12060_s25  ;;  %s12078_s14 = sld [smem:[#allocation51_spill]] }
 0x2ef   : > { %v9648_v26 = vmul.f32 %v12071_v5, %v9545_v63  ;;  %v12073_v4 = vstv %s12059_s6  ;;  %v1026_v38 = vadd.f32 %v1025_v31, %v1022_v1  ;;  %v9656_v11 = vmul.f32 %v12075_v36, %v9543_v10  ;;  %s12082_s25 = sld [smem:[#allocation70_spill]]  ;;  %s12084_s9 = sld [smem:[#allocation67_spill]] }
 0x2f0   : > { %v977_v51 = vmul.f32 %v12073_v4, %v9617_v50  ;;  %v12077_v43 = vstv %s12061_s12  ;;  %v12080_v5 = vstv %s12064_s11  ;;  %s12087_s5 = sld [smem:[#allocation38_spill]]  ;;  %s12089_s11 = sld [smem:[#allocation40_spill]] }
 0x2f1   : > { %12072 = vst [vmem:[#allocation218_spill] sm:$0xff] %v9648_v26  ;;  %12076 = vst [vmem:[#allocation219_spill] sm:$0xff] %v9656_v11  ;;  %v1113_v34 = vmul.f32 %v12077_v43, %v9543_v10  ;;  %v9670_v40 = vmul.f32 %v12080_v5, %v9543_v10  ;;  %v12081_v31 = vstv %s12065_s15  ;;  %s12091_s15 = sld [smem:[#allocation85_spill]]  ;;  %s12095_s6 = sld [smem:[#allocation155_spill]] }
 0x2f2   : > { %v978_v62 = vadd.f32 %v977_v51, %v974_v18  ;;  %v12079_v56 = vstv %s12062_s17  ;;  %v1029_v1 = vmul.f32 %v12081_v31, %v9633_v20  ;;  %s12097_s12 = sld [smem:[#allocation45_spill]]  ;;  %s12099_s17 = sld [smem:[#allocation52_spill]] }
 0x2f3   : > { %v9665_v17 = vmul.f32 %v12079_v56, %v9545_v63  ;;  %v12083_v36 = vstv %s12066_s29  ;;  %v12086_v18 = vstv %s12067_s23  ;;  %v1114_v56 = vadd.f32 %v1113_v34, %v1110_v15  ;;  %s12092_s29 = sld [smem:[#allocation66_spill]]  ;;  %s12093_s23 = sld [smem:[#allocation92_spill]] }
 0x2f4   : > { %v9679_v43 = vmul.f32 %v12083_v36, %v9545_v63  ;;  %v9684_v51 = vmul.f32 %v12086_v18, %v9543_v10  ;;  %v12090_v31 = vstv %s12074_s28  ;;  %v1030_v36 = vadd.f32 %v1029_v1, %v1026_v38  ;;  %s12101_s28 = sld [smem:[#allocation81_spill]]  ;;  %s12159_s22 = sld [smem:[#allocation43_spill]] }
 0x2f5   : > { %v981_v6 = vmul.f32 %v12090_v31, %v9633_v20  ;;  %v1118_v18 = vadd.f32 %v8898_v28, %v1114_v56  ;;  %v12094_v34 = vstv %s12078_s14  ;;  %v12096_v3 = vstv %s12082_s25  ;;  %s12102_s14 = sld [smem:[#allocation33_spill]] }
 0x2f6   : > { %12085 = vst [vmem:[#allocation220_spill] sm:$0xff] %v9679_v43  ;;  %12088 = vst [vmem:[#allocation221_spill] sm:$0xff] %v9684_v51  ;;  %v9697_v15 = vmul.f32 %v12094_v34, %v9545_v63  ;;  %v1121_v31 = vmul.f32 %v12096_v3, %v9617_v50  ;;  %v12098_v38 = vstv %s12084_s9  ;;  %v12100_v28 = vstv %s12087_s5  ;;  %s12106_s25 = sld [smem:[#allocation161_spill]]  ;;  %s12109_s9 = sld [smem:[#allocation69_spill]] }
 0x2f7   : > { %v982_v35 = vadd.f32 %v981_v6, %v978_v62  ;;  %v9707_v1 = vmul.f32 %v12098_v38, %v9617_v50  ;;  %v9712_v56 = vmul.f32 %v12100_v28, %v9633_v20  ;;  %v12103_v34 = vstv %s12089_s11  ;;  %s12111_s5 = sld [smem:[#allocation134_spill]]  ;;  %s12115_s11 = sld [smem:[#allocation61_spill]] }
 0x2f8   : > { %v9719_v48 = vmul.f32 %v12103_v34, %v9617_v50  ;;  %v1122_v3 = vadd.f32 %v1121_v31, %v1118_v18  ;;  %v12105_v4 = vstv %s12091_s15  ;;  %v1034_v28 = vadd.f32 %v8986_v41, %v1030_v36  ;;  %s12117_s15 = sld [smem:[#allocation46_spill]]  ;;  %s12158_s30 = sld [smem:[#allocation73_spill]] }
 0x2f9   : > { %v9724_v38 = vmul.f32 %v12105_v4, %v9543_v10  ;;  %v12107_v5 = vstv %s12092_s29  ;;  %v12110_v6 = vstv %s12093_s23  ;;  %v12113_v18 = vstv %s12095_s6  ;;  %v9743_v4 = vpop.permute.xlu0 %932  ;;  %s12119_s29 = sld [smem:[#allocation42_spill]]  ;;  %s12122_s23 = sld [smem:[#allocation83_spill]] }
 0x2fa   : > { %12104 = vst [vmem:[#allocation222_spill] sm:$0xff] %v9719_v48  ;;  %v9729_v29 = vmul.f32 %v12107_v5, %v9545_v63  ;;  %v9735_v62 = vmul.f32 %v12110_v6, %v9633_v20  ;;  %v9741_v31 = vmul.f32 %v12113_v18, %v9543_v10  ;;  %v986_v5 = vadd.f32 %v9035_v39, %v982_v35  ;;  %s12123_s6 = sld [smem:[#allocation55_spill]]  ;;  %s12166_s16 = sld [smem:[#allocation97_spill]] }
 0x2fb   : > { %v12116_v44 = vstv %s12097_s12  ;;  %v12118_v36 = vstv %s12099_s17  ;;  %v12120_v34 = vstv %s12101_s28  ;;  %v12121_v18 = vstv %s12102_s14  ;;  %s12125_s12 = sld [smem:[#allocation56_spill]]  ;;  %s12126_s17 = sld [smem:[#allocation156_spill]] }
 0x2fc   : > { %12108 = vst [vmem:[#allocation223_spill] sm:$0xff] %v9729_v29  ;;  %12112 = vst [vmem:[#allocation224_spill] sm:$0xff] %v9735_v62  ;;  %v9749_v41 = vmul.f32 %v12116_v44, %v9617_v50  ;;  %v1125_v6 = vmul.f32 %v12118_v36, %v9633_v20  ;;  %v1061_v24 = vmul.f32 %v12120_v34, %v9545_v63  ;;  %v12124_v44 = vstv %s12106_s25  ;;  %s12129_s28 = sld [smem:[#allocation157_spill]]  ;;  %s12135_s14 = sld [smem:[#allocation53_spill]] }
 0x2fd   : > { %12114 = vst [vmem:[#allocation225_spill] sm:$0xff] %v9741_v31  ;;  %v1037_v46 = vmul.f32 %v12121_v18, %v9743_v4  ;;  %v1065_v32 = vmul.f32 %v12124_v44, %v9543_v10  ;;  %v12127_v34 = vstv %s12109_s9  ;;  %v12128_v51 = vstv %s12111_s5  ;;  %s12142_s25 = sld [smem:[#allocation162_spill]]  ;;  %s12144_s9 = sld [smem:[#allocation88_spill]] }
 0x2fe   : > { %v989_v22 = vmul.f32 %v12127_v34, %v9743_v4  ;;  %v9774_v49 = vmul.f32 %v12128_v51, %v9633_v20  ;;  %v1126_v18 = vadd.f32 %v1125_v6, %v1122_v3  ;;  %v12130_v35 = vstv %s12115_s11  ;;  %s12146_s5 = sld [smem:[#allocation148_spill]]  ;;  %s12147_s11 = sld [smem:[#allocation95_spill]] }
 0x2ff   : > { %v1038_v39 = vadd.f32 %v1037_v46, %v1034_v28  ;;  %v9780_v43 = vmul.f32 %v12130_v35, %v9617_v50  ;;  %v12132_v44 = vstv %s12117_s15  ;;  %v12134_v36 = vstv %s12119_s29  ;;  %s12148_s15 = sld [smem:[#allocation167_spill]]  ;;  %s12149_s29 = sld [smem:[#allocation37_spill]] }
 0x300   : > { %v9785_v26 = vmul.f32 %v12132_v44, %v9633_v20  ;;  %v1041_v34 = vmul.f32 %v12134_v36, %v9757_v12  ;;  %v990_v48 = vadd.f32 %v989_v22, %v986_v5  ;;  %v1062_v3 = vadd.f32 %v1061_v24, %v8775_v30 }
 0x301   : > { %12131 = vst [vmem:[#allocation226_spill] sm:$0xff] %v9780_v43  ;;  %v12136_v46 = vstv %s12122_s23  ;;  %v12137_v6 = vstv %s12123_s6  ;;  %v12138_v11 = vstv %s12125_s12  ;;  %v12139_v62 = vstv %s12126_s17  ;;  %s12150_s23 = sld [smem:[#allocation41_spill]]  ;;  %s12151_s6 = sld [smem:[#allocation60_spill]] }
 0x302   : > { %12133 = vst [vmem:[#allocation227_spill] sm:$0xff] %v9785_v26  ;;  %v993_v28 = vmul.f32 %v12136_v46, %v9757_v12  ;;  %v9798_v35 = vmul.f32 %v12137_v6, %v9617_v50  ;;  %v9803_v44 = vmul.f32 %v12138_v11, %v9633_v20  ;;  %v9808_v57 = vmul.f32 %v12139_v62, %v9617_v50  ;;  %s12152_s12 = sld [smem:[#allocation64_spill]] }
 0x303   : > { %v1042_v22 = vadd.f32 %v1041_v34, %v1038_v39  ;;  %v1130_v30 = vadd.f32 %v9056_v54, %v1126_v18  ;;  %v12141_v24 = vstv %s12129_s28  ;;  %v12145_v51 = vstv %s12135_s14  ;;  %s12153_s17 = sld [smem:[#allocation96_spill]]  ;;  %s12155_s28 = sld [smem:[#allocation170_spill]] }
 0x304   : > { %12140 = vst [vmem:[#allocation228_spill] sm:$0xff] %v9808_v57  ;;  %v9815_v36 = vmul.f32 %v12141_v24, %v9633_v20  ;;  %v994_v46 = vadd.f32 %v993_v28, %v990_v48  ;;  %v1133_v62 = vmul.f32 %v12145_v51, %v9743_v4  ;;  %v1066_v34 = vadd.f32 %v1065_v32, %v1062_v3  ;;  %s12157_s14 = sld [smem:[#allocation79_spill]] }
 0x305   : > { %v1046_v11 = vadd.f32 %v9113_v60, %v1042_v22  ;;  %v12154_v54 = vstv %s12142_s25  ;;  %v12156_v32 = vstv %s12144_s9  ;;  %v12160_v60 = vstv %s12146_s5  ;;  %s12162_s25 = sld [smem:[#allocation128_spill]]  ;;  %s12164_s9 = sld [smem:[#allocation171_spill]] }
 0x306   : > { %12143 = vst [vmem:[#allocation229_spill] sm:$0xff] %v9815_v36  ;;  %v1134_v48 = vadd.f32 %v1133_v62, %v1130_v30  ;;  %v1073_v18 = vmul.f32 %v12154_v54, %v9617_v50  ;;  %v1077_v3 = vmul.f32 %v12156_v32, %v9633_v20  ;;  %v9836_v30 = vpop.permute.xlu1 %938  ;;  %v9838_v62 = vpop.permute.xlu0 %936  ;;  %v998_v51 = vadd.f32 %v9147_v14, %v994_v46  ;;  %s12172_s5 = sld [smem:[#allocation74_spill]] }
 0x307   : > { %v1137_v22 = vmul.f32 %v12160_v60, %v9757_v12  ;;  %v12161_v6 = vstv %s12147_s11  ;;  %v12163_v54 = vstv %s12148_s15  ;;  %v12165_v28 = vstv %s12149_s29  ;;  %s12176_s11 = sld [smem:[#allocation137_spill]]  ;;  %s12179_s15 = sld [smem:[#allocation65_spill]] }
 0x308   : > { %v9847_v24 = vmul.f32 %v12161_v6, %v9545_v63  ;;  %v9852_v32 = vmul.f32 %v12163_v54, %v9543_v10  ;;  %v1049_v5 = vmul.f32 %v12165_v28, %v9838_v62  ;;  %v12167_v39 = vstv %s12150_s23  ;;  %s12183_s29 = sld [smem:[#allocation54_spill]] }
 0x309   : > { %v9860_v14 = vmul.f32 %v12167_v39, %v9743_v4  ;;  %v12168_v46 = vstv %s12151_s6  ;;  %v1070_v6 = vadd.f32 %v8904_v52, %v1066_v34  ;;  %v12169_v36 = vstv %s12152_s12  ;;  %s12185_s23 = sld [smem:[#allocation62_spill]]  ;;  %s12188_s6 = sld [smem:[#allocation159_spill]] }
 0x30a   : > { %v9865_v60 = vmul.f32 %v12168_v46, %v9757_v12  ;;  %v9871_v57 = vmul.f32 %v12169_v36, %v9743_v4  ;;  %v12170_v54 = vstv %s12153_s17  ;;  %v1138_v31 = vadd.f32 %v1137_v22, %v1134_v48  ;;  %s12191_s12 = sld [smem:[#allocation89_spill]]  ;;  %s12198_s17 = sld [smem:[#allocation93_spill]] }
 0x30b   : > { %v1001_v26 = vmul.f32 %v12170_v54, %v9838_v62  ;;  %v12171_v28 = vstv %s12155_s28  ;;  %v1050_v39 = vadd.f32 %v1049_v5, %v1046_v11  ;;  %v12173_v29 = vstv %s12157_s14  ;;  %s12205_s28 = sld [smem:[#allocation86_spill]]  ;;  %s12206_s14 = sld [smem:[#allocation39_spill]] }
 0x30c   : > { %v9879_v43 = vmul.f32 %v12171_v28, %v9617_v50  ;;  %v1053_v46 = vmul.f32 %v12173_v29, %v9836_v30  ;;  %v12174_v23 = vstv %s12158_s30  ;;  %v12175_v36 = vstv %s12159_s22  ;;  %s12181_s30 = sld [smem:[#allocation78_spill]] }
 0x30d   : > { %v9887_v52 = vmul.f32 %v12174_v23, %v9757_v12  ;;  %v9892_v34 = vmul.f32 %v12175_v36, %v9743_v4  ;;  %v1002_v54 = vadd.f32 %v1001_v26, %v998_v51  ;;  %v12177_v48 = vstv %s12162_s25  ;;  %s12182_s22 = sld [smem:[#allocation143_spill]]  ;;  %s12209_s25 = sld [smem:[#allocation91_spill]] }
 0x30e   : > { %v1005_v22 = vmul.f32 %v12177_v48, %v9836_v30  ;;  %v12178_v28 = vstv %s12164_s9  ;;  %v12180_v29 = vstv %s12166_s16  ;;  %v1054_v23 = vadd.f32 %v1053_v46, %v1050_v39  ;;  %s12187_s16 = sld [smem:[#allocation158_spill]] }
 0x30f   : > { %v9900_v5 = vmul.f32 %v12178_v28, %v9633_v20  ;;  %v9905_v11 = vmul.f32 %v12180_v29, %v9545_v63  ;;  %v1074_v26 = vadd.f32 %v1073_v18, %v1070_v6  ;;  %v1142_v33 = vadd.f32 %v9171_v53, %v1138_v31  ;;  %s12212_s9 = sld [smem:[#allocation87_spill]] }
 0x310   : > { %v1006_v48 = vadd.f32 %v1005_v22, %v1002_v54  ;;  %v12184_v28 = vstv %s12172_s5  ;;  %v12186_v29 = vrot.slane %v8656_v19, 1  ;;  %v1396_v36 = vrot.slane %v9892_v34, 1  ;;  %s12214_s5 = sld [smem:[#allocation50_spill]] }
 0x311   : > { %v1145_v20 = vmul.f32 %v12184_v28, %v9838_v62  ;;  %v12189_v18 = vstv %s12176_s11  ;;  %v12190_v54 = vrot.slane %v8672_v25, 1  ;;  %v12192_v31 = vstv %s12179_s15  ;;  %s12216_s11 = sld [smem:[#allocation47_spill]]  ;;  %s12218_s15 = sld [smem:[#allocation165_spill]] }
 0x312   : > { %v1433_v39 = vadd.f32 %v12186_v29, %v1054_v23  ;;  %v9921_v6 = vmul.f32 %v12189_v18, %v9757_v12  ;;  %v9928_v22 = vmul.f32 %v12192_v31, %v9743_v4  ;;  %v12193_v23 = vstv %s12181_s30  ;;  %s12225_s30 = sld [smem:[#allocation139_spill]] }
 0x313   : > { %v1349_v53 = vadd.f32 %v12190_v54, %v1006_v48  ;;  %v1146_v19 = vadd.f32 %v1145_v20, %v1142_v33  ;;  %v1149_v28 = vmul.f32 %v12193_v23, %v9836_v30  ;;  %v12194_v29 = vrot.slane %v9638_v27, 1 }
 0x314   : > { %v12195_v34 = vstv %s12182_s22  ;;  %v12196_v18 = vstv %s12183_s29  ;;  %v1078_v48 = vadd.f32 %v1077_v3, %v1074_v26  ;;  %v12197_v54 = vrot.slane %v9665_v17, 1  ;;  %s12229_s22 = sld [smem:[#allocation57_spill]]  ;;  %s12233_s29 = sld [smem:[#allocation144_spill]] }
 0x315   : > { %v1440_v46 = vadd.f32 %v12194_v29, %v1433_v39  ;;  %v9938_v51 = vmul.f32 %v12195_v34, %v9757_v12  ;;  %v9943_v25 = vmul.f32 %v12196_v18, %v9743_v4  ;;  %v1150_v33 = vadd.f32 %v1149_v28, %v1146_v19 }
 0x316   : > { %v1356_v31 = vadd.f32 %v12197_v54, %v1349_v53  ;;  %v12199_v20 = vstv %s12185_s23  ;;  %v12200_v27 = vstv %s12187_s16  ;;  %v12201_v29 = vrot.slane %v9643_v55, 1  ;;  %s12236_s23 = sld [smem:[#allocation154_spill]]  ;;  %s12238_s16 = sld [smem:[#allocation106_spill]] }
 0x317   : > { %v9950_v23 = vmul.f32 %v12199_v20, %v9757_v12  ;;  %v9955_v39 = vmul.f32 %v12200_v27, %v9743_v4  ;;  %v12202_v18 = vstv %s12188_s6  ;;  %v1082_v17 = vadd.f32 %v9076_v58, %v1078_v48  ;;  %s12244_s6 = sld [smem:[#allocation58_spill]] }
 0x318   : > { %v1447_v34 = vadd.f32 %v12201_v29, %v1440_v46  ;;  %v9962_v50 = vmul.f32 %v12202_v18, %v9757_v12  ;;  %v12203_v3 = vstv %s12191_s12  ;;  %v12204_v53 = vrot.slane %v9670_v40, 1  ;;  %s12246_s12 = sld [smem:[#allocation108_spill]] }
 0x319   : > { %v1085_v26 = vmul.f32 %v12203_v3, %v9743_v4  ;;  %v1403_v28 = vrot.slane %v9921_v6, 1  ;;  %v2068_v54 = vrot.slane %v9928_v22, 2  ;;  %v12207_v55 = vrot.slane %v8694_v9, 1 }
 0x31a   : > { %v1363_v19 = vadd.f32 %v12204_v53, %v1356_v31  ;;  %v12208_v20 = vrot.slane %v8767_v0, 1  ;;  %v2075_v58 = vrot.slane %v9938_v51, 2  ;;  %v12210_v29 = vstv %s12198_s17  ;;  %s12251_s17 = sld [smem:[#allocation71_spill]] }
 0x31b   : > { %v1601_v46 = vadd.f32 %v12207_v55, %v1150_v33  ;;  %v1086_v48 = vadd.f32 %v1085_v26, %v1082_v17  ;;  %v1089_v40 = vmul.f32 %v12210_v29, %v9757_v12  ;;  %v12211_v31 = vrot.slane %v8791_v37, 1 }
 0x31c   : > { %v1454_v27 = vadd.f32 %v12208_v20, %v1447_v34  ;;  %v12213_v18 = vrot.slane %v9697_v15, 1  ;;  %v1648_v9 = vrot.slane %v9943_v25, 1  ;;  %v1655_v0 = vrot.slane %v9950_v23, 1 }
 0x31d   : > { %v1370_v6 = vadd.f32 %v12211_v31, %v1363_v19  ;;  %v12215_v33 = vrot.slane %v9707_v1, 1  ;;  %v2320_v17 = vrot.slane %v9955_v39, 2  ;;  %v2327_v26 = vrot.slane %v9962_v50, 2 }
 0x31e   : > { %v1608_v3 = vadd.f32 %v12213_v18, %v1601_v46  ;;  %v1090_v53 = vadd.f32 %v1089_v40, %v1086_v48  ;;  %v12217_v37 = vstv %s12205_s28  ;;  %v12219_v15 = vstv %s12206_s14  ;;  %s12253_s28 = sld [smem:[#allocation100_spill]]  ;;  %s12256_s14 = sld [smem:[#allocation94_spill]] }
 0x31f   : > { %v1461_v34 = vadd.f32 %v12215_v33, %v1454_v27  ;;  %v1499_v19 = vmul.f32 %v12217_v37, %v9838_v62  ;;  %v1506_v55 = vmul.f32 %v12219_v15, %v9836_v30  ;;  %v12220_v25 = vrot.slane %v9749_v41, 1 }
 0x320   : > { %v12221_v23 = vrot.slane %v9724_v38, 1  ;;  %v12222_v20 = vrot.slane %v9712_v56, 1  ;;  %v12223_v29 = vstv %s12209_s25  ;;  %v1094_v48 = vadd.f32 %v9206_v2, %v1090_v53  ;;  %s12258_s25 = sld [smem:[#allocation173_spill]] }
 0x321   : > { %v1377_v46 = vadd.f32 %v12220_v25, %v1370_v6  ;;  %v10005_v31 = vmul.f32 %v12223_v29, %v9838_v62  ;;  %v12224_v40 = vstv %s12212_s9  ;;  %v12226_v33 = vstv %s12214_s5  ;;  %s12260_s9 = sld [smem:[#allocation104_spill]]  ;;  %s12263_s5 = sld [smem:[#allocation75_spill]] }
 0x322   : > { %v1615_v1 = vadd.f32 %v12221_v23, %v1608_v3  ;;  %v1468_v27 = vadd.f32 %v12222_v20, %v1461_v34  ;;  %v1097_v18 = vmul.f32 %v12224_v40, %v9838_v62  ;;  %v10014_v41 = vmul.f32 %v12226_v33, %v9836_v30 }
 0x323   : > { %v12227_v38 = vrot.slane %v9774_v49, 1  ;;  %v12228_v56 = vrot.slane %v8810_v45, 1  ;;  %v1522_v34 = vrot.slane %v9847_v24, 1  ;;  %v12230_v37 = vrot.slane %v8960_v47, 1 }
 0x324   : > { %v12231_v53 = vstv %s12216_s11  ;;  %v1098_v25 = vadd.f32 %v1097_v18, %v1094_v48  ;;  %v12232_v23 = vstv %s12218_s15  ;;  %v1501_v29 = vrot.slane %v1499_v19, 1  ;;  %s12266_s11 = sld [smem:[#allocation102_spill]]  ;;  %s12275_s15 = sld [smem:[#allocation103_spill]] }
 0x325   : > { %v1384_v6 = vadd.f32 %v12227_v38, %v1377_v46  ;;  %v1622_v3 = vadd.f32 %v12228_v56, %v1615_v1  ;;  %v1475_v2 = vadd.f32 %v12230_v37, %v1468_v27  ;;  %v1415_v15 = vmul.f32 %v12231_v53, %v9838_v62 }
 0x326   : > { %v1101_v20 = vmul.f32 %v12232_v23, %v9836_v30  ;;  %v1508_v49 = vrot.slane %v1506_v55, 1  ;;  %v12234_v46 = vrot.slane %v9000_v59, 1  ;;  %v12235_v1 = vrot.slane %v9798_v35, 1 }
 0x327   : > { %v12237_v47 = vrot.slane %v9860_v14, 1  ;;  %v2173_v40 = vrot.slane %v10005_v31, 2  ;;  %v12239_v48 = vstv %s12225_s30  ;;  %v2180_v19 = vrot.slane %v10014_v41, 2  ;;  %s12280_s30 = sld [smem:[#allocation90_spill]] }
 0x328   : > { %v1391_v45 = vadd.f32 %v12234_v46, %v1384_v6  ;;  %v1629_v24 = vadd.f32 %v12235_v1, %v1622_v3  ;;  %v1422_v18 = vmul.f32 %v12239_v48, %v9836_v30  ;;  %v1102_v33 = vadd.f32 %v1101_v20, %v1098_v25 }
 0x329   : > { %v1482_v27 = vadd.f32 %v12237_v47, %v1475_v2  ;;  %v12240_v59 = vstv %s12229_s22  ;;  %v12241_v35 = vrot.slane %v9803_v44, 1  ;;  %v12242_v14 = vrot.slane %v9865_v60, 1  ;;  %s12289_s22 = sld [smem:[#allocation186_spill]] }
 0x32a   : > { %v1398_v55 = vadd.f32 %v1396_v36, %v1391_v45  ;;  %v10043_v38 = vmul.f32 %v12240_v59, %v9838_v62  ;;  %v1417_v3 = vrot.slane %v1415_v15, 1  ;;  %v12243_v37 = vstv %s12233_s29  ;;  %s12303_s29 = sld [smem:[#allocation105_spill]] }
 0x32b   : > { %v1636_v6 = vadd.f32 %v12241_v35, %v1629_v24  ;;  %v1489_v56 = vadd.f32 %v12242_v14, %v1482_v27  ;;  %v10052_v2 = vmul.f32 %v12243_v37, %v9836_v30  ;;  %v12245_v53 = vrot.slane %v8715_v13, 1 }
 0x32c   : > { %v1405_v36 = vadd.f32 %v1403_v28, %v1398_v55  ;;  %v12247_v23 = vrot.slane %v9028_v42, 1  ;;  %v12248_v44 = vstv %s12236_s23  ;;  %v12249_v60 = vstv %s12238_s16  ;;  %s12309_s23 = sld [smem:[#allocation99_spill]]  ;;  %s12316_s16 = sld [smem:[#allocation109_spill]] }
 0x32d   : > { %v1517_v25 = vadd.f32 %v12245_v53, %v1102_v33  ;;  %v1667_v46 = vmul.f32 %v12248_v44, %v9838_v62  ;;  %v1205_v45 = vmul.f32 %v12249_v60, %v9545_v63  ;;  %v12250_v15 = vrot.slane %v9081_v61, 1  ;;  %v12264_v44 = vld [vmem:[#allocation112_spill] sm:$0xff] }
 0x32e   : > { %v1643_v20 = vadd.f32 %v12247_v23, %v1636_v6  ;;  %v1424_v24 = vrot.slane %v1422_v18, 1  ;;  %v1529_v13 = vrot.slane %v9852_v32, 1  ;;  %v12252_v27 = vrot.slane %v9131_v7, 1  ;;  %v12267_v60 = vld [vmem:[#allocation129_spill] sm:$0xff] }
 0x32f   : > { %v1496_v1 = vadd.f32 %v12250_v15, %v1489_v56  ;;  %v1524_v47 = vadd.f32 %v1522_v34, %v1517_v25  ;;  %v2089_v42 = vrot.slane %v10043_v38, 2  ;;  %v1206_v33 = vadd.f32 %v1205_v45, %v8795_v8 }
 0x330   : > { %v1412_v28 = vadd.f32 %v12252_v27, %v1405_v36  ;;  %v1650_v48 = vadd.f32 %v1648_v9, %v1643_v20  ;;  %v12254_v59 = vstv %s12244_s6  ;;  %v12255_v6 = vstv %s12246_s12  ;;  %s12320_s6 = sld [smem:[#allocation176_spill]]  ;;  %s12323_s12 = sld [smem:[#allocation179_spill]] }
 0x331   : > { %v1503_v55 = vadd.f32 %v1501_v29, %v1496_v1  ;;  %v1674_v35 = vmul.f32 %v12254_v59, %v9836_v30  ;;  %v1531_v61 = vadd.f32 %v1529_v13, %v1524_v47  ;;  %v1209_v18 = vmul.f32 %v12255_v6, %v9543_v10  ;;  %v12276_v6 = vld [vmem:[#allocation217_spill] sm:$0xff] }
 0x332   : > { %v1419_v34 = vadd.f32 %v1417_v3, %v1412_v28  ;;  %v1657_v32 = vadd.f32 %v1655_v0, %v1650_v48  ;;  %v1669_v14 = vrot.slane %v1667_v46, 1  ;;  %v12257_v7 = vstv %s12251_s17  ;;  %v12273_v48 = vld [vmem:[#allocation218_spill] sm:$0xff]  ;;  %s12328_s17 = sld [smem:[#allocation191_spill]] }
 0x333   : > { %v10080_v56 = vmul.f32 %v12257_v7, %v9838_v62  ;;  %v1510_v9 = vadd.f32 %v1508_v49, %v1503_v55  ;;  %v12259_v8 = vrot.slane %v8829_v21, 1  ;;  %v1543_v37 = vrot.slane %v9879_v43, 1  ;;  %v12268_v43 = vld [vmem:[#allocation216_spill] sm:$0xff] }
 0x334   : > { %v1210_v53 = vadd.f32 %v1209_v18, %v1206_v33  ;;  %v1426_v25 = vadd.f32 %v1424_v24, %v1419_v34  ;;  %v12261_v36 = vrot.slane %v9152_v16, 1  ;;  %v1550_v0 = vrot.slane %v9900_v5, 1  ;;  %v12270_v24 = vld [vmem:[#allocation113_spill] sm:$0xff] }
 0x335   : > { %v1538_v29 = vadd.f32 %v12259_v8, %v1531_v61  ;;  %v12262_v3 = vstv %s12253_s28  ;;  %v12265_v46 = vrot.slane %v12264_v44, 2  ;;  %v12269_v15 = vstv %s12256_s14  ;;  %s12353_s28 = sld [smem:[#allocation195_spill]]  ;;  %s12355_s14 = sld [smem:[#allocation98_spill]] }
 0x336   : > { %v1664_v23 = vadd.f32 %v12261_v36, %v1657_v32  ;;  %v1562_v20 = vmul.f32 %v12262_v3, %v9743_v4  ;;  %v1214_v45 = vadd.f32 %v12267_v60, %v1210_v53  ;;  %v1217_v1 = vmul.f32 %v12269_v15, %v12268_v43  ;;  %v12278_v32 = vld [vmem:[#allocation220_spill] sm:$0xff]  ;;  %v12283_v53 = vld [vmem:[#allocation219_spill] sm:$0xff] }
 0x337   : > { %v2105_v49 = vadd.f32 %v12265_v46, %v1510_v9  ;;  %v1545_v21 = vadd.f32 %v1543_v37, %v1538_v29  ;;  %v12271_v47 = vrot.slane %v12270_v24, 2  ;;  %v1676_v27 = vrot.slane %v1674_v35, 1 }
 0x338   : > { %v1671_v13 = vadd.f32 %v1669_v14, %v1664_v23  ;;  %v12272_v5 = vstv %s12258_s25  ;;  %v12274_v33 = vrot.slane %v12273_v48, 2  ;;  %v1218_v61 = vadd.f32 %v1217_v1, %v1214_v45  ;;  %v12285_v23 = vld [vmem:[#allocation150_spill] sm:$0xff]  ;;  %v12290_v45 = vld [vmem:[#allocation114_spill] sm:$0xff]  ;;  %s12363_s25 = sld [smem:[#allocation183_spill]] }
 0x339   : > { %v2021_v16 = vadd.f32 %v12271_v47, %v1426_v25  ;;  %v1569_v28 = vmul.f32 %v12272_v5, %v9757_v12  ;;  %v1552_v59 = vadd.f32 %v1550_v0, %v1545_v21  ;;  %v12277_v18 = vstv %s12260_s9  ;;  %s10248_s9 = sld [smem:[#allocation8 + $0x15a]] }
 0x33a   : > { %v2112_v55 = vadd.f32 %v12274_v33, %v2105_v49  ;;  %v1221_v34 = vmul.f32 %v12277_v18, %v12276_v6  ;;  %v12279_v7 = vrot.slane %v12278_v32, 2  ;;  %v1678_v8 = vadd.f32 %v1676_v27, %v1671_v13  ;;  %v12287_v49 = vld [vmem:[#allocation221_spill] sm:$0xff]  ;;  %v12293_v13 = vld [vmem:[#allocation118_spill] sm:$0xff]  ;;  %v12295_v33 = vld [vmem:[#allocation152_spill] sm:$0xff] }
 0x33b   : > { %v12281_v14 = vstv %s12263_s5  ;;  %v12282_v29 = vstv %s12266_s11  ;;  %v12284_v25 = vrot.slane %v12283_v53, 2  ;;  %v12286_v0 = vrot.slane %v12285_v23, 1  ;;  %s10254_s5 = sld [smem:[#allocation8 + $0x12d]]  ;;  %s10265_s11 = sld [smem:[#allocation8 + $0x162]] }
 0x33c   : > { %v2028_v9 = vadd.f32 %v12279_v7, %v2021_v16  ;;  %v10112_v35 = vmul.f32 %v12281_v14, %v9836_v30  ;;  %v1583_v37 = vmul.f32 %v12282_v29, %v9838_v62  ;;  %v1564_v44 = vrot.slane %v1562_v20, 1  ;;  %v12299_v7 = vld [vmem:[#allocation223_spill] sm:$0xff]  ;;  %v12301_v14 = vld [vmem:[#allocation222_spill] sm:$0xff] }
 0x33d   : > { %v2119_v36 = vadd.f32 %v12284_v25, %v2112_v55  ;;  %v1559_v3 = vadd.f32 %v12286_v0, %v1552_v59  ;;  %v1222_v46 = vadd.f32 %v1221_v34, %v1218_v61  ;;  %v12288_v21 = vrot.slane %v12287_v49, 2  ;;  %v12297_v61 = vld [vmem:[#allocation119_spill] sm:$0xff] }
 0x33e   : > { %v12291_v15 = vrot.slane %v12290_v45, 2  ;;  %v1571_v24 = vrot.slane %v1569_v28, 1  ;;  %v12292_v47 = vstv %s12275_s15  ;;  %v12294_v27 = vrot.slane %v12293_v13, 2  ;;  %v12307_v49 = vld [vmem:[#allocation225_spill] sm:$0xff]  ;;  %s10282_s15 = sld [smem:[#allocation8 + $0x12e]] }
 0x33f   : > { %v2035_v60 = vadd.f32 %v12288_v21, %v2028_v9  ;;  %v1590_v16 = vmul.f32 %v12292_v47, %v9836_v30  ;;  %v1566_v48 = vadd.f32 %v1564_v44, %v1559_v3  ;;  %v1226_v55 = vadd.f32 %v12295_v33, %v1222_v46  ;;  %v12305_v3 = vld [vmem:[#allocation226_spill] sm:$0xff] }
 0x340   : > { %v2273_v1 = vadd.f32 %v12291_v15, %v1678_v8  ;;  %v2126_v5 = vadd.f32 %v12294_v27, %v2119_v36  ;;  %v12296_v20 = vstv %s12280_s30  ;;  %v12298_v18 = vrot.slane %v12297_v61, 2  ;;  %v12317_v61 = vld [vmem:[#allocation121_spill] sm:$0xff]  ;;  %s7514_s30 = smov 2  }
 0x341   : > { %v1229_v59 = vmul.f32 %v12296_v20, %v9743_v4  ;;  %v2096_v32 = vrot.slane %v10052_v2, 2  ;;  %v12300_v9 = vrot.slane %v12299_v7, 2  ;;  %v2341_v8 = vrot.slane %v10080_v56, 2 }
 0x342   : > { %v2042_v34 = vadd.f32 %v12298_v18, %v2035_v60  ;;  %v12302_v29 = vrot.slane %v12301_v14, 2  ;;  %v1573_v25 = vadd.f32 %v1571_v24, %v1566_v48  ;;  %v12304_v23 = vstv %s12289_s22  ;;  %v12312_v24 = vld [vmem:[#allocation163_spill] sm:$0xff]  ;;  %s12381_s22 = sld [smem:[#allocation30_spill]] }
 0x343   : > { %v2280_v28 = vadd.f32 %v12300_v9, %v2273_v1  ;;  %v1230_v36 = vadd.f32 %v1229_v59, %v1226_v55  ;;  %v1233_v0 = vmul.f32 %v12304_v23, %v9757_v12  ;;  %v12306_v44 = vrot.slane %v12305_v3, 2  ;;  %v12310_v1 = vld [vmem:[#allocation224_spill] sm:$0xff]  ;;  %v12314_v55 = vld [vmem:[#allocation227_spill] sm:$0xff] }
 0x344   : > { %v2133_v53 = vadd.f32 %v12302_v29, %v2126_v5  ;;  %v12308_v21 = vrot.slane %v12307_v49, 2  ;;  %v2348_v45 = vrot.slane %v10112_v35, 2  ;;  %v1585_v15 = vrot.slane %v1583_v37, 1  ;;  %v12377_v35 = vld [vmem:[#allocation214_spill] sm:$0xff] }
 0x345   : > { %v2049_v46 = vadd.f32 %v12306_v44, %v2042_v34  ;;  %v12311_v47 = vrot.slane %v12310_v1, 2  ;;  %v12313_v27 = vrot.slane %v12312_v24, 1  ;;  %v1592_v48 = vrot.slane %v1590_v16, 1  ;;  %v12324_v16 = vld [vmem:[#allocation172_spill] sm:$0xff] }
 0x346   : > { %v2287_v60 = vadd.f32 %v12308_v21, %v2280_v28  ;;  %v1234_v33 = vadd.f32 %v1233_v0, %v1230_v36  ;;  %v12315_v20 = vrot.slane %v12314_v55, 2  ;;  %v12318_v18 = vrot.slane %v12317_v61, 2  ;;  %v12321_v28 = vld [vmem:[#allocation138_spill] sm:$0xff]  ;;  %v12326_v0 = vld [vmem:[#allocation142_spill] sm:$0xff] }
 0x347   : > { %v2140_v13 = vadd.f32 %v12311_v47, %v2133_v53  ;;  %v1580_v5 = vadd.f32 %v12313_v27, %v1573_v25  ;;  %v2194_v7 = vrot.slane %v9905_v11, 2  ;;  %v12319_v37 = vstv %s12303_s29  ;;  %s10287_s29 = sld [smem:[#allocation8 + $0x130]] }
 0x348   : > { %v2056_v59 = vadd.f32 %v12315_v20, %v2049_v46  ;;  %v2294_v34 = vadd.f32 %v12318_v18, %v2287_v60  ;;  %v2199_v9 = vmul.f32 %v12319_v37, %v9543_v10  ;;  %v12322_v14 = vrot.slane %v12321_v28, 2  ;;  %v12329_v46 = vld [vmem:[#allocation228_spill] sm:$0xff]  ;;  %v12335_v20 = vld [vmem:[#allocation229_spill] sm:$0xff] }
 0x349   : > { %v1587_v53 = vadd.f32 %v1585_v15, %v1580_v5  ;;  %v1238_v25 = vadd.f32 %v12324_v16, %v1234_v33  ;;  %v12325_v36 = vstv %s9376_s10  ;;  %v12327_v3 = vrot.slane %v12326_v0, 2  ;;  %s12340_s10 = sld [smem:[#allocation194_spill]] }
 0x34a   : > { %v2147_v29 = vadd.f32 %v12322_v14, %v2140_v13  ;;  %v1241_v23 = vmul.f32 %v12325_v36, %v9838_v62  ;;  %v12330_v11 = vrot.slane %v12329_v46, 2  ;;  %v12331_v21 = vstv %s12309_s23  ;;  %v12341_v14 = vld [vmem:[#allocation115_spill] sm:$0xff]  ;;  %v12344_v36 = vld [vmem:[#allocation147_spill] sm:$0xff]  ;;  %v12346_v46 = vld [vmem:[#allocation149_spill] sm:$0xff]  ;;  %s12387_s23 = sld [smem:[#allocation196_spill]] }
 0x34b   : > { %v2063_v44 = vadd.f32 %v12327_v3, %v2056_v59  ;;  %v2213_v60 = vmul.f32 %v12331_v21, %v12268_v43  ;;  %v12332_v1 = vstv %s9378_s7  ;;  %v12333_v15 = vrot.slane %v9871_v57, 2  ;;  %s12348_s7 = sld [smem:[#allocation180_spill]]  ;;  %v12349_v21 = vld [vmem:[#allocation116_spill] sm:$0xff] }
 0x34c   : > { %v2301_v49 = vadd.f32 %v12330_v11, %v2294_v34  ;;  %v1245_v47 = vmul.f32 %v12332_v1, %v9836_v30  ;;  %v1594_v24 = vadd.f32 %v1592_v48, %v1587_v53  ;;  %v1242_v27 = vadd.f32 %v1241_v23, %v1238_v25 }
 0x34d   : > { %v2154_v13 = vadd.f32 %v12333_v15, %v2147_v29  ;;  %v12334_v5 = vstv %s12316_s16  ;;  %v2070_v55 = vadd.f32 %v2068_v54, %v2063_v44  ;;  %v12336_v59 = vrot.slane %v12335_v20, 2  ;;  %s10300_s16 = sld [smem:[#allocation8 + $0x133]] }
 0x34e   : > { %v1772_v33 = vmul.f32 %v12334_v5, %v9545_v63  ;;  %v12337_v18 = vstv %s12320_s6  ;;  %v12338_v37 = vstv %s12323_s12  ;;  %v12339_v57 = vrot.slane %v9887_v52, 2  ;;  %s10312_s6 = sld [smem:[#allocation8 + $0x137]]  ;;  %s10319_s12 = sld [smem:[#allocation8 + $0x139]] }
 0x34f   : > { %v2308_v61 = vadd.f32 %v12336_v59, %v2301_v49  ;;  %v2220_v34 = vmul.f32 %v12337_v18, %v12276_v6  ;;  %v10193_v28 = vmul.f32 %v12338_v37, %v9743_v4  ;;  %v12342_v29 = vrot.slane %v12341_v14, 2  ;;  %v12357_v18 = vld [vmem:[#allocation124_spill] sm:$0xff] }
 0x350   : > { %v2161_v48 = vadd.f32 %v12339_v57, %v2154_v13  ;;  %v1246_v16 = vadd.f32 %v1245_v47, %v1242_v27  ;;  %v12343_v22 = vstv %s12328_s17  ;;  %v2077_v25 = vadd.f32 %v2075_v58, %v2070_v55  ;;  %v12351_v13 = vld [vmem:[#allocation153_spill] sm:$0xff]  ;;  %s12393_s17 = sld [smem:[#allocation111_spill]] }
 0x351   : > { %v2189_v53 = vadd.f32 %v12342_v29, %v1594_v24  ;;  %v1779_v54 = vmul.f32 %v12343_v22, %v9543_v10  ;;  %v12345_v23 = vrot.slane %v12344_v36, 2  ;;  %v2201_v3 = vrot.slane %v2199_v9, 2 }
 0x352   : > { %v2215_v44 = vrot.slane %v2213_v60, 2  ;;  %v12347_v11 = vrot.slane %v12346_v46, 2  ;;  %v12350_v1 = vrot.slane %v12349_v21, 1  ;;  %v1774_v47 = vrot.slane %v1772_v33, 1 }
 0x353   : > { %v2315_v0 = vadd.f32 %v12345_v23, %v2308_v61  ;;  %v2196_v49 = vadd.f32 %v2194_v7, %v2189_v53  ;;  %v12352_v24 = vrot.slane %v12351_v13, 2  ;;  %v2222_v58 = vrot.slane %v2220_v34, 2  ;;  %v12364_v53 = vld [vmem:[#allocation125_spill] sm:$0xff]  ;;  %v12373_v13 = vld [vmem:[#allocation213_spill] sm:$0xff] }
 0x354   : > { %v2168_v52 = vadd.f32 %v12347_v11, %v2161_v48  ;;  %v1769_v15 = vadd.f32 %v12350_v1, %v1246_v16  ;;  %v12354_v9 = vstv %s12340_s10  ;;  %v1781_v20 = vrot.slane %v1779_v54, 1  ;;  %s12399_s10 = sld [smem:[#allocation27_spill]] }
 0x355   : > { %v2084_v27 = vadd.f32 %v12352_v24, %v2077_v25  ;;  %v2322_v51 = vadd.f32 %v2320_v17, %v2315_v0  ;;  %v1793_v60 = vmul.f32 %v12354_v9, %v12268_v43  ;;  %v2203_v7 = vadd.f32 %v2201_v3, %v2196_v49 }
 0x356   : > { %v2175_v5 = vadd.f32 %v2173_v40, %v2168_v52  ;;  %v1776_v55 = vadd.f32 %v1774_v47, %v1769_v15  ;;  %v2236_v39 = vrot.slane %v10193_v28, 2  ;;  %v12356_v17 = vstv %s12348_s7  ;;  %s10340_s7 = sld [smem:[#allocation8 + $0x13f]] }
 0x357   : > { %v2091_v33 = vadd.f32 %v2089_v42, %v2084_v27  ;;  %v2329_v59 = vadd.f32 %v2327_v26, %v2322_v51  ;;  %v2241_v61 = vmul.f32 %v12356_v17, %v9757_v12  ;;  %v12358_v40 = vrot.slane %v12357_v18, 2  ;;  %v12360_v26 = vld [vmem:[#allocation160_spill] sm:$0xff]  ;;  %v12374_v27 = vld [vmem:[#allocation151_spill] sm:$0xff]  ;;  %v12382_v18 = vld [vmem:[#allocation166_spill] sm:$0xff] }
 0x358   : > { %v2182_v31 = vadd.f32 %v2180_v19, %v2175_v5  ;;  %v1783_v37 = vadd.f32 %v1781_v20, %v1776_v55  ;;  %v12359_v38 = vstv %s12353_s28  ;;  %v12361_v28 = vrot.slane %v12360_v26, 2  ;;  %v12379_v55 = vld [vmem:[#allocation132_spill] sm:$0xff]  ;;  %s10342_s28 = sld [smem:[#allocation8 + $0x13a]] }
 0x359   : > { %v2210_v34 = vadd.f32 %v12358_v40, %v2203_v7  ;;  %v1800_v42 = vmul.f32 %v12359_v38, %v12276_v6  ;;  %v2098_v50 = vadd.f32 %v2096_v32, %v2091_v33  ;;  %v1795_v48 = vrot.slane %v1793_v60, 1  ;;  %v12367_v32 = vld [vmem:[#allocation120_spill] sm:$0xff] }
 0x35a   : > { %v2336_v57 = vadd.f32 %v12361_v28, %v2329_v59  ;;  %v12362_v14 = vstv %s9485_s1  ;;  %v2711_v19 = vmax.f32 %v2182_v31, 0.0  ;;  %v12365_v16 = vrot.slane %v12364_v53, 1  ;;  %s12369_s1 = sld [smem:[#allocation107_spill]] }
 0x35b   : > { %v1157_v41 = vmul.f32 %v12362_v14, %v9545_v63  ;;  %v2217_v29 = vadd.f32 %v2215_v44, %v2210_v34  ;;  %v12366_v54 = vstv %s12355_s14  ;;  %v2689_v36 = vmax.f32 %v2098_v50, 0.0  ;;  %s12402_s14 = sld [smem:[#allocation211_spill]] }
 0x35c   : > { %v1790_v22 = vadd.f32 %v12365_v16, %v1783_v37  ;;  %v1814_v25 = vmul.f32 %v12366_v54, %v9743_v4  ;;  %v2343_v2 = vadd.f32 %v2341_v8, %v2336_v57  ;;  %v12368_v0 = vstv %s9487_s27  ;;  %s10267_s27 = sld [smem:[#allocation8 + $0xd9]] }
 0x35d   : > { %v1158_v23 = vadd.f32 %v1157_v41, %v12367_v32  ;;  %v1161_v3 = vmul.f32 %v12368_v0, %v9543_v10  ;;  %v12370_v44 = vstv %s9449_s24  ;;  %v2224_v11 = vadd.f32 %v2222_v58, %v2217_v29  ;;  %s12378_s24 = sld [smem:[#allocation184_spill]]  ;;  %v12389_v29 = vld [vmem:[#allocation215_spill] sm:$0xff] }
 0x35e   : > { %v2713_v46 = vmul.f32 %v12370_v44, %v2711_v19  ;;  %v1797_v52 = vadd.f32 %v1795_v48, %v1790_v22  ;;  %v1802_v49 = vrot.slane %v1800_v42, 1  ;;  %v12371_v21 = vstv %s9519_s0  ;;  %s10280_s0 = sld [smem:[#allocation8 + $0xda]] }
 0x35f   : > { %v2691_v1 = vmul.f32 %v12371_v21, %v2689_v36  ;;  %v2350_v56 = vadd.f32 %v2348_v45, %v2343_v2  ;;  %v12372_v8 = vstv %s12363_s25  ;;  %v1162_v47 = vadd.f32 %v1161_v3, %v1158_v23  ;;  %s12403_s25 = sld [smem:[#allocation212_spill]] }
 0x360   : > { %v2255_v15 = vmul.f32 %v12372_v8, %v9838_v62  ;;  %v2715_v24 = vadd.f32 %v12373_v13, %v2713_v46  ;;  %v12375_v51 = vrot.slane %v12374_v27, 2  ;;  %v1804_v9 = vadd.f32 %v1802_v49, %v1797_v52  ;;  %v12394_v46 = vld [vmem:[#allocation181_spill] sm:$0xff]  ;;  %v12396_v8 = vld [vmem:[#allocation168_spill] sm:$0xff] }
 0x361   : > { %v12376_v60 = vstv %s12369_s1  ;;  %v2693_v45 = vadd.f32 %v12377_v35, %v2691_v1  ;;  %v2755_v7 = vmax.f32 %v2350_v56, 0.0  ;;  %v1166_v20 = vadd.f32 %v12379_v55, %v1162_v47  ;;  %s12407_s1 = sld [smem:[#allocation34_spill]] }
 0x362   : > { %v2231_v58 = vadd.f32 %v12375_v51, %v2224_v11  ;;  %v1821_v5 = vmul.f32 %v12376_v60, %v9757_v12  ;;  %v12380_v33 = vstv %s9496_s2  ;;  %2716 = vrot.lane.b32.xlu1 %v2715_v24, %s7514_s30  ;;  %v2243_v31 = vrot.slane %v2241_v61, 2  ;;  %s10298_s2 = sld [smem:[#allocation8 + $0x131]] }
 0x363   : > { %v1169_v59 = vmul.f32 %v12380_v33, %v12268_v43  ;;  %v12383_v40 = vrot.slane %v12382_v18, 1  ;;  %v1816_v37 = vrot.slane %v1814_v25, 1  ;;  %2694 = vrot.lane.b32.xlu0 %v2693_v45, %s7514_s30  ;;  %v12384_v38 = vstv %s9529_s21  ;;  %s10305_s21 = sld [smem:[#allocation8 + $0x136]]  ;;  %v12390_v25 = vld [vmem:[#allocation164_spill] sm:$0xff] }
 0x364   : > { %v2238_v17 = vadd.f32 %v2236_v39, %v2231_v58  ;;  %v2757_v42 = vmul.f32 %v12384_v38, %v2755_v7  ;;  %v12385_v50 = vstv %s12378_s24  ;;  %v12386_v57 = vstv %s12040_s13  ;;  %s10309_s13 = sld [smem:[#allocation8 + $0xe2]] }
 0x365   : > { %v1811_v34 = vadd.f32 %v12383_v40, %v1804_v9  ;;  %v2262_v26 = vmul.f32 %v12385_v50, %v9836_v30  ;;  %v1170_v28 = vadd.f32 %v1169_v59, %v1166_v20  ;;  %v1173_v39 = vmul.f32 %v12386_v57, %v12276_v6  ;;  %s10371_s24 = sld [smem:[#allocation8 + $0x142]] }
 0x366   : > { %v2245_v61 = vadd.f32 %v2243_v31, %v2238_v17  ;;  %v1823_v14 = vrot.slane %v1821_v5, 1  ;;  %v12388_v41 = vstv %s12381_s22  ;;  %v2759_v53 = vadd.f32 %v12389_v29, %v2757_v42  ;;  %v12405_v42 = vld [vmem:[#allocation185_spill] sm:$0xff]  ;;  %s10379_s22 = sld [smem:[#allocation8 + $0x143]] }
 0x367   : > { %v1818_v48 = vadd.f32 %v1816_v37, %v1811_v34  ;;  %v1835_v19 = vmul.f32 %v12388_v41, %v9838_v62  ;;  %v2734_v16 = vstv %s10248_s9  ;;  %v1174_v22 = vadd.f32 %v1173_v39, %v1170_v28  ;;  %s10353_s9 = sld [smem:[#allocation8 + $0x109]] }
 0x368   : > { %v1300_v54 = vstv %s10254_s5  ;;  %v12391_v36 = vrot.slane %v12390_v25, 2  ;;  %v2257_v32 = vrot.slane %v2255_v15, 2  ;;  %v12392_v0 = vstv %s12387_s23  ;;  %2760 = vrot.lane.b32.xlu1 %v2759_v53, %s7514_s30  ;;  %s12410_s5 = sld [smem:[#allocation31_spill]]  ;;  %s10386_s23 = sld [smem:[#allocation8 + $0x149]] }
 0x369   : > { %v1825_v23 = vadd.f32 %v1823_v14, %v1818_v48  ;;  %v1842_v3 = vmul.f32 %v12392_v0, %v9836_v30  ;;  %v10323_v44 = vstv %s10265_s11  ;;  %v1178_v11 = vadd.f32 %v12394_v46, %v1174_v22  ;;  %v12408_v48 = vld [vmem:[#allocation117_spill] sm:$0xff]  ;;  %s12413_s11 = sld [smem:[#allocation28_spill]] }
 0x36a   : > { %v2252_v2 = vadd.f32 %v12391_v36, %v2245_v61  ;;  %v12395_v52 = vstv %s12042_s20  ;;  %v2401_v21 = vstv %s10267_s27  ;;  %v2264_v56 = vrot.slane %v2262_v26, 2  ;;  %s12400_s20 = sld [smem:[#allocation210_spill]]  ;;  %s10553_s27 = sld [smem:[#allocation8 + $0x116]] }
 0x36b   : > { %v1181_v49 = vmul.f32 %v12395_v52, %v9743_v4  ;;  %v12397_v15 = vrot.slane %v12396_v8, 1  ;;  %v1837_v24 = vrot.slane %v1835_v19, 1  ;;  %v12398_v51 = vstv %s12043_s18  ;;  %s10344_s18 = sld [smem:[#allocation8 + $0x140]] }
 0x36c   : > { %v2259_v1 = vadd.f32 %v2257_v32, %v2252_v2  ;;  %v1185_v58 = vmul.f32 %v12398_v51, %v9757_v12  ;;  %v2408_v9 = vstv %s10280_s0  ;;  %v1304_v60 = vstv %s10282_s15  ;;  %s10377_s15 = sld [smem:[#allocation8 + $0x148]]  ;;  %s10565_s0 = sld [smem:[#allocation8 + $0x13c]] }
 0x36d   : > { %v1832_v47 = vadd.f32 %v12397_v15, %v1825_v23  ;;  %v1182_v27 = vadd.f32 %v1181_v49, %v1178_v11  ;;  %v1844_v7 = vrot.slane %v1842_v3, 1  ;;  %v12401_v55 = vstv %s12393_s17  ;;  %s12426_s17 = sld [smem:[#allocation84_spill]] }
 0x36e   : > { %v2266_v5 = vadd.f32 %v2264_v56, %v2259_v1  ;;  %v2444_v20 = vmul.f32 %v12401_v55, %v9545_v63  ;;  %v1939_v59 = vstv %s10287_s29  ;;  %v1946_v17 = vstv %s10298_s2  ;;  %v12416_v1 = vld [vmem:[#allocation135_spill] sm:$0xff]  ;;  %s12451_s29 = sld [smem:[#allocation76_spill]]  ;;  %s10503_s2 = sld [smem:[#allocation8 + $0x10c]] }
 0x36f   : > { %v1839_v45 = vadd.f32 %v1837_v24, %v1832_v47  ;;  %v1186_v33 = vadd.f32 %v1185_v58, %v1182_v27  ;;  %v2611_v31 = vstv %s10300_s16  ;;  %v12404_v34 = vstv %s12399_s10  ;;  %v12418_v58 = vld [vmem:[#allocation122_spill] sm:$0xff]  ;;  %s10405_s10 = sld [smem:[#allocation8 + $0x14b]]  ;;  %s10607_s16 = sld [smem:[#allocation8 + $0x127]] }
 0x370   : > { %v2733_v18 = vmax.f32 %v2266_v5, 0.0  ;;  %v2451_v37 = vmul.f32 %v12404_v34, %v9543_v10  ;;  %v1312_v38 = vstv %s10305_s21  ;;  %v12406_v26 = vstv %s12400_s20  ;;  %s12420_s21 = sld [smem:[#allocation101_spill]]  ;;  %s10415_s20 = sld [smem:[#allocation8 + $0x10a]] }
 0x371   : > { %v1846_v40 = vadd.f32 %v1844_v7, %v1839_v45  ;;  %v1190_v50 = vadd.f32 %v12405_v42, %v1186_v33  ;;  %v1193_v28 = vmul.f32 %v12406_v26, %v9838_v62  ;;  %v2422_v57 = vstv %s10309_s13  ;;  %v12422_v33 = vld [vmem:[#allocation126_spill] sm:$0xff]  ;;  %s10595_s13 = sld [smem:[#allocation8 + $0x10e]] }
 0x372   : > { %v1316_v39 = vstv %s10312_s6  ;;  %v2735_v61 = vmul.f32 %v2734_v16, %v2733_v18  ;;  %v12409_v14 = vrot.slane %v12408_v48, 2  ;;  %v2446_v19 = vrot.slane %v2444_v20, 2  ;;  %s12421_s6 = sld [smem:[#allocation72_spill]] }
 0x373   : > { %v1960_v53 = vstv %s10319_s12  ;;  %v1194_v22 = vadd.f32 %v1193_v28, %v1190_v50  ;;  %v12411_v25 = vstv %s12402_s14  ;;  %v12412_v2 = vstv %s12403_s25  ;;  %v12425_v28 = vld [vmem:[#allocation133_spill] sm:$0xff]  ;;  %s12430_s14 = sld [smem:[#allocation49_spill]]  ;;  %s12432_s25 = sld [smem:[#allocation201_spill]] }
 0x374   : > { %v2441_v41 = vadd.f32 %v12409_v14, %v1846_v40  ;;  %v1197_v36 = vmul.f32 %v12411_v25, %v9836_v30  ;;  %v1688_v32 = vmul.f32 %v12412_v2, %v9545_v63  ;;  %v1301_v23 = vmul.f32 %v1300_v54, %v9545_v63  ;;  %s12461_s12 = sld [smem:[#allocation208_spill]] }
 0x375   : > { %v2737_v16 = vadd.f32 %v10323_v44, %v2735_v61  ;;  %v2453_v3 = vrot.slane %v2451_v37, 2  ;;  %v12414_v46 = vstv %s12407_s1  ;;  %v12415_v49 = vstv %s12410_s5  ;;  %s10451_s1 = sld [smem:[#allocation8 + $0x113]]  ;;  %s12458_s5 = sld [smem:[#allocation206_spill]] }
 0x376   : > { %v2448_v0 = vadd.f32 %v2446_v19, %v2441_v41  ;;  %v2465_v11 = vmul.f32 %v12414_v46, %v12268_v43  ;;  %v1198_v52 = vadd.f32 %v1197_v36, %v1194_v22  ;;  %v1695_v54 = vmul.f32 %v12415_v49, %v9543_v10 }
 0x377   : > { %v1302_v56 = vadd.f32 %v1301_v23, %v12416_v1  ;;  %v1305_v8 = vmul.f32 %v1304_v60, %v9543_v10  ;;  %2738 = vrot.lane.b32.xlu0 %v2737_v16, %s7514_s30  ;;  %v12417_v47 = vstv %s12413_s11  ;;  %v1324_v27 = vstv %s10340_s7  ;;  %s12429_s7 = sld [smem:[#allocation200_spill]]  ;;  %s10511_s11 = sld [smem:[#allocation8 + $0x125]] }
 0x378   : > { %v2455_v15 = vadd.f32 %v2453_v3, %v2448_v0  ;;  %v2472_v24 = vmul.f32 %v12417_v47, %v12276_v6  ;;  %v1967_v51 = vstv %s10342_s28  ;;  %v12419_v5 = vrot.slane %v12418_v58, 1  ;;  %s10522_s28 = sld [smem:[#allocation8 + $0xe3]] }
 0x379   : > { %v1690_v7 = vrot.slane %v1688_v32, 1  ;;  %v1306_v55 = vadd.f32 %v1305_v8, %v1302_v56  ;;  %v1328_v20 = vstv %s10344_s18  ;;  %v12423_v60 = vrot.slane %v12422_v33, 2  ;;  %s10417_s18 = sld [smem:[#allocation8 + $0x165]] }
 0x37a   : > { %v1685_v45 = vadd.f32 %v12419_v5, %v1198_v52  ;;  %v2467_v40 = vrot.slane %v2465_v11, 2  ;;  %v12424_v34 = vstv %s9551_s4  ;;  %v1252_v42 = vstv %s10353_s9  ;;  %s10410_s4 = sld [smem:[#allocation8 + $0x15d]]  ;;  %v12433_v52 = vld [vmem:[#allocation127_spill] sm:$0xff]  ;;  %s10445_s9 = sld [smem:[#allocation8 + $0x112]] }
 0x37b   : > { %v2462_v18 = vadd.f32 %v12423_v60, %v2455_v15  ;;  %v1709_v37 = vmul.f32 %v12424_v34, %v12268_v43  ;;  %v1697_v26 = vrot.slane %v1695_v54, 1  ;;  %v1310_v61 = vadd.f32 %v12425_v28, %v1306_v55  ;;  %v12435_v15 = vld [vmem:[#allocation169_spill] sm:$0xff]  ;;  %v12439_v60 = vld [vmem:[#allocation187_spill] sm:$0xff] }
 0x37c   : > { %v1692_v50 = vadd.f32 %v1690_v7, %v1685_v45  ;;  %v1313_v48 = vmul.f32 %v1312_v38, %v12268_v43  ;;  %v2474_v41 = vrot.slane %v2472_v24, 2  ;;  %v12427_v19 = vstv %s12420_s21  ;;  %s10573_s21 = sld [smem:[#allocation8 + $0x13d]] }
 0x37d   : > { %v2469_v14 = vadd.f32 %v2467_v40, %v2462_v18  ;;  %v2486_v22 = vmul.f32 %v12427_v19, %v9743_v4  ;;  %v12428_v25 = vstv %s12421_s6  ;;  %v1317_v32 = vmul.f32 %v1316_v39, %v12276_v6  ;;  %s10576_s6 = sld [smem:[#allocation8 + $0x11f]] }
 0x37e   : > { %v1716_v36 = vmul.f32 %v12428_v25, %v12276_v6  ;;  %v1699_v38 = vadd.f32 %v1697_v26, %v1692_v50  ;;  %v1314_v2 = vadd.f32 %v1313_v48, %v1310_v61  ;;  %v1981_v23 = vstv %s10371_s24  ;;  %s10549_s24 = sld [smem:[#allocation8 + $0x115]] }
 0x37f   : > { %v2476_v16 = vadd.f32 %v2474_v41, %v2469_v14  ;;  %v12431_v0 = vstv %s12426_s17  ;;  %v1336_v46 = vstv %s10377_s15  ;;  %v1988_v11 = vstv %s10379_s22  ;;  %s10516_s15 = sld [smem:[#allocation8 + $0x10d]]  ;;  %s10569_s22 = sld [smem:[#allocation8 + $0x11e]] }
 0x380   : > { %v2493_v3 = vmul.f32 %v12431_v0, %v9757_v12  ;;  %v12434_v49 = vrot.slane %v12433_v52, 1  ;;  %v1711_v1 = vrot.slane %v1709_v37, 1  ;;  %v1318_v56 = vadd.f32 %v1317_v32, %v1314_v2  ;;  %v12442_v2 = vld [vmem:[#allocation175_spill] sm:$0xff]  ;;  %v12444_v52 = vld [vmem:[#allocation174_spill] sm:$0xff]  ;;  %s10590_s17 = sld [smem:[#allocation8 + $0x15c]] }
 0x381   : > { %v1340_v8 = vstv %s10386_s23  ;;  %v12436_v47 = vrot.slane %v12435_v15, 2  ;;  %v2488_v39 = vrot.slane %v2486_v22, 2  ;;  %v12437_v58 = vstv %s12429_s7  ;;  %s10535_s23 = sld [smem:[#allocation8 + $0x134]]  ;;  %s12480_s7 = sld [smem:[#allocation35_spill]] }
 0x382   : > { %v1706_v54 = vadd.f32 %v12434_v49, %v1699_v38  ;;  %v2507_v5 = vmul.f32 %v12437_v58, %v9838_v62  ;;  %v1718_v45 = vrot.slane %v1716_v36, 1  ;;  %v12438_v55 = vstv %s12430_s14  ;;  %s10627_s14 = sld [smem:[#allocation8 + $0x14e]] }
 0x383   : > { %v2483_v24 = vadd.f32 %v12436_v47, %v2476_v16  ;;  %v1730_v33 = vmul.f32 %v12438_v55, %v9743_v4  ;;  %v1322_v18 = vadd.f32 %v12439_v60, %v1318_v56  ;;  %v1325_v40 = vmul.f32 %v1324_v27, %v9743_v4 }
 0x384   : > { %v1713_v7 = vadd.f32 %v1711_v1, %v1706_v54  ;;  %v2495_v37 = vrot.slane %v2493_v3, 2  ;;  %v12440_v50 = vstv %s12432_s25  ;;  %v12441_v28 = vstv %s9563_s26  ;;  %s10473_s26 = sld [smem:[#allocation8 + $0x11b]]  ;;  %s10631_s25 = sld [smem:[#allocation8 + $0x14f]] }
 0x385   : > { %v2490_v34 = vadd.f32 %v2488_v39, %v2483_v24  ;;  %v2514_v26 = vmul.f32 %v12440_v50, %v9836_v30  ;;  %v1737_v61 = vmul.f32 %v12441_v28, %v9757_v12  ;;  %v1326_v14 = vadd.f32 %v1325_v40, %v1322_v18  ;;  %v12447_v24 = vld [vmem:[#allocation192_spill] sm:$0xff]  ;;  %v12452_v28 = vld [vmem:[#allocation177_spill] sm:$0xff] }
 0x386   : > { %v1720_v48 = vadd.f32 %v1718_v45, %v1713_v7  ;;  %v1329_v41 = vmul.f32 %v1328_v20, %v9757_v12  ;;  %v2002_v19 = vstv %s10405_s10  ;;  %v2509_v25 = vrot.slane %v2507_v5, 2  ;;  %s10597_s10 = sld [smem:[#allocation8 + $0x145]] }
 0x387   : > { %v2497_v22 = vadd.f32 %v2495_v37, %v2490_v34  ;;  %v2800_v36 = vstv %s10410_s4  ;;  %v1256_v27 = vstv %s10415_s20  ;;  %v10454_v38 = vstv %s10417_s18  ;;  %v12449_v34 = vld [vmem:[#allocation202_spill] sm:$0xff]  ;;  %s10599_s4 = sld [smem:[#allocation8 + $0x146]]  ;;  %s10602_s20 = sld [smem:[#allocation8 + $0x164]] }
 0x388   : > { %v12443_v32 = vrot.slane %v12442_v2, 1  ;;  %v1732_v0 = vrot.slane %v1730_v33, 1  ;;  %v1330_v3 = vadd.f32 %v1329_v41, %v1326_v14  ;;  %v12445_v49 = vrot.slane %v12444_v52, 2  ;;  %v12456_v52 = vld [vmem:[#allocation198_spill] sm:$0xff]  ;;  %s10614_s18 = sld [smem:[#allocation8 + $0x128]] }
 0x389   : > { %v2516_v20 = vrot.slane %v2514_v26, 2  ;;  %v1739_v1 = vrot.slane %v1737_v61, 1  ;;  %v12446_v56 = vstv %s9573_s8  ;;  %v1337_v58 = vmul.f32 %v1336_v46, %v9838_v62  ;;  %s10477_s8 = sld [smem:[#allocation8 + $0x11c]] }
 0x38a   : > { %v1727_v16 = vadd.f32 %v12443_v32, %v1720_v48  ;;  %v2504_v54 = vadd.f32 %v12445_v49, %v2497_v22  ;;  %v1751_v15 = vmul.f32 %v12446_v56, %v9838_v62  ;;  %v1334_v39 = vadd.f32 %v12447_v24, %v1330_v3 }
 0x38b   : > { %v1253_v5 = vmul.f32 %v1252_v42, %v9545_v63  ;;  %v12448_v7 = vstv %s9583_s3  ;;  %v1341_v33 = vmul.f32 %v1340_v8, %v9836_v30  ;;  %v1940_v60 = vmul.f32 %v1939_v59, %v9545_v63  ;;  %s10485_s3 = sld [smem:[#allocation8 + $0x14c]] }
 0x38c   : > { %v1734_v47 = vadd.f32 %v1732_v0, %v1727_v16  ;;  %v2511_v45 = vadd.f32 %v2509_v25, %v2504_v54  ;;  %v1758_v55 = vmul.f32 %v12448_v7, %v9836_v30  ;;  %v1338_v40 = vadd.f32 %v1337_v58, %v1334_v39  ;;  %v12454_v0 = vld [vmem:[#allocation136_spill] sm:$0xff] }
 0x38d   : > { %v1254_v37 = vadd.f32 %v1253_v5, %v12449_v34  ;;  %v1257_v46 = vmul.f32 %v1256_v27, %v9543_v10  ;;  %v12450_v50 = vstv %s9575_s19  ;;  %v1947_v8 = vmul.f32 %v1946_v17, %v9543_v10  ;;  %s10495_s19 = sld [smem:[#allocation8 + $0x124]] }
 0x38e   : > { %v1741_v18 = vadd.f32 %v1739_v1, %v1734_v47  ;;  %v2518_v42 = vadd.f32 %v2516_v20, %v2511_v45  ;;  %v2360_v26 = vmul.f32 %v12450_v50, %v9545_v63  ;;  %v1264_v59 = vstv %s10445_s9  ;;  %s10635_s9 = sld [smem:[#allocation8 + $0x10f]] }
 0x38f   : > { %v12453_v61 = vrot.slane %v12452_v28, 1  ;;  %v1753_v14 = vrot.slane %v1751_v15, 1  ;;  %v1342_v41 = vadd.f32 %v1341_v33, %v1338_v40  ;;  %v1258_v22 = vadd.f32 %v1257_v46, %v1254_v37  ;;  %v12459_v33 = vld [vmem:[#allocation123_spill] sm:$0xff] }
 0x390   : > { %v2799_v25 = vmax.f32 %v2518_v42, 0.0  ;;  %v1760_v27 = vrot.slane %v1758_v55, 1  ;;  %v1942_v2 = vrot.slane %v1940_v60, 1  ;;  %v1268_v32 = vstv %s10451_s1  ;;  %s10643_s1 = sld [smem:[#allocation8 + $0x110]] }
 0x391   : > { %v1748_v48 = vadd.f32 %v12453_v61, %v1741_v18  ;;  %v12455_v3 = vrot.slane %v12454_v0, 1  ;;  %v1262_v49 = vadd.f32 %v12456_v52, %v1258_v22  ;;  %v1265_v54 = vmul.f32 %v1264_v59, %v12268_v43  ;;  %v12465_v61 = vld [vmem:[#allocation204_spill] sm:$0xff] }
 0x392   : > { %v2801_v20 = vmul.f32 %v2800_v36, %v2799_v25  ;;  %v12457_v1 = vstv %s12451_s29  ;;  %v1949_v15 = vrot.slane %v1947_v8, 1  ;;  %v1961_v47 = vmul.f32 %v1960_v53, %v12268_v43  ;;  %v12463_v8 = vld [vmem:[#allocation140_spill] sm:$0xff]  ;;  %s10667_s29 = sld [smem:[#allocation8 + $0x119]] }
 0x393   : > { %v1755_v16 = vadd.f32 %v1753_v14, %v1748_v48  ;;  %v1937_v17 = vadd.f32 %v12455_v3, %v1342_v41  ;;  %v2367_v56 = vmul.f32 %v12457_v1, %v9543_v10  ;;  %v1266_v58 = vadd.f32 %v1265_v54, %v1262_v49  ;;  %v12467_v54 = vld [vmem:[#allocation130_spill] sm:$0xff] }
 0x394   : > { %v1269_v5 = vmul.f32 %v1268_v32, %v12276_v6  ;;  %v2803_v45 = vadd.f32 %v10454_v38, %v2801_v20  ;;  %v2362_v36 = vrot.slane %v2360_v26, 2  ;;  %v1968_v7 = vmul.f32 %v1967_v51, %v12276_v6 }
 0x395   : > { %v1762_v24 = vadd.f32 %v1760_v27, %v1755_v16  ;;  %v1944_v39 = vadd.f32 %v1942_v2, %v1937_v17  ;;  %v1276_v55 = vstv %s10473_s26  ;;  %v12460_v53 = vrot.slane %v12459_v33, 2  ;;  %s10645_s26 = sld [smem:[#allocation8 + $0x117]] }
 0x396   : > { %v1270_v40 = vadd.f32 %v1269_v5, %v1266_v58  ;;  %v1280_v34 = vstv %s10477_s8  ;;  %2804 = vrot.lane.b32.xlu1 %v2803_v45, %s7514_s30  ;;  %v2369_v37 = vrot.slane %v2367_v56, 2  ;;  %v12462_v46 = vstv %s12458_s5  ;;  %s12490_s8 = sld [smem:[#allocation110_spill]]  ;;  %s10678_s5 = sld [smem:[#allocation8 + $0x121]] }
 0x397   : > { %v2357_v60 = vadd.f32 %v12460_v53, %v1762_v24  ;;  %v1951_v18 = vadd.f32 %v1949_v15, %v1944_v39  ;;  %v2381_v42 = vmul.f32 %v12462_v46, %v12268_v43  ;;  %v1963_v51 = vrot.slane %v1961_v47, 1 }
 0x398   : > { %v2009_v50 = vstv %s10485_s3  ;;  %v12464_v59 = vrot.slane %v12463_v8, 1  ;;  %v1274_v48 = vadd.f32 %v12465_v61, %v1270_v40  ;;  %v1277_v14 = vmul.f32 %v1276_v55, %v9743_v4  ;;  %v12472_v8 = vld [vmem:[#allocation178_spill] sm:$0xff]  ;;  %s10657_s3 = sld [smem:[#allocation8 + $0x118]] }
 0x399   : > { %v2364_v26 = vadd.f32 %v2362_v36, %v2357_v60  ;;  %v12466_v41 = vstv %s12461_s12  ;;  %v1970_v25 = vrot.slane %v1968_v7, 1  ;;  %v1982_v27 = vmul.f32 %v1981_v23, %v9743_v4  ;;  %v12471_v36 = vld [vmem:[#allocation207_spill] sm:$0xff]  ;;  %s10682_s12 = sld [smem:[#allocation8 + $0x122]] }
 0x39a   : > { %v1958_v28 = vadd.f32 %v12464_v59, %v1951_v18  ;;  %v2388_v22 = vmul.f32 %v12466_v41, %v12276_v6  ;;  %v1281_v2 = vmul.f32 %v1280_v34, %v9757_v12  ;;  %v1278_v0 = vadd.f32 %v1277_v14, %v1274_v48 }
 0x39b   : > { %v2371_v32 = vadd.f32 %v2369_v37, %v2364_v26  ;;  %v1288_v3 = vstv %s10495_s19  ;;  %v2402_v17 = vmul.f32 %v2401_v21, %v9743_v4  ;;  %v2409_v52 = vmul.f32 %v2408_v9, %v9757_v12  ;;  %s10672_s19 = sld [smem:[#allocation8 + $0x120]] }
 0x39c   : > { %v1965_v16 = vadd.f32 %v1963_v51, %v1958_v28  ;;  %v1989_v49 = vmul.f32 %v1988_v11, %v9757_v12  ;;  %v1855_v23 = vstv %s10503_s2  ;;  %v12468_v20 = vrot.slane %v12467_v54, 2  ;;  %v12469_v11 = vld [vmem:[#allocation188_spill] sm:$0xff]  ;;  %s10676_s2 = sld [smem:[#allocation8 + $0x15f]] }
 0x39d   : > { %v2383_v56 = vrot.slane %v2381_v42, 2  ;;  %v1282_v47 = vadd.f32 %v1281_v2, %v1278_v0  ;;  %v2390_v21 = vrot.slane %v2388_v22, 2  ;;  %v1984_v24 = vrot.slane %v1982_v27, 1  ;;  %v12474_v2 = vld [vmem:[#allocation189_spill] sm:$0xff]  ;;  %v12476_v0 = vld [vmem:[#allocation199_spill] sm:$0xff] }
 0x39e   : > { %v2378_v1 = vadd.f32 %v12468_v20, %v2371_v32  ;;  %v1972_v15 = vadd.f32 %v1970_v25, %v1965_v16  ;;  %v1289_v9 = vmul.f32 %v1288_v3, %v9838_v62  ;;  %v1292_v39 = vstv %s10511_s11  ;;  %s6443_s11 = sld [smem:[#allocation8 + $0x167]] }
 0x39f   : > { %v12470_v5 = vrot.slane %v12469_v11, 1  ;;  %v1286_v7 = vadd.f32 %v12471_v36, %v1282_v47  ;;  %v1862_v55 = vstv %s10516_s15  ;;  %v2429_v33 = vstv %s10522_s28  ;;  %s10685_s15 = sld [smem:[#allocation8 + $0x129]]  ;;  %s10689_s28 = sld [smem:[#allocation8 + $0x12a]] }
 0x3a0   : > { %v2385_v58 = vadd.f32 %v2383_v56, %v2378_v1  ;;  %v1991_v53 = vrot.slane %v1989_v49, 1  ;;  %v2003_v60 = vmul.f32 %v2002_v19, %v9838_v62  ;;  %v1856_v18 = vmul.f32 %v1855_v23, %v9545_v63 }
 0x3a1   : > { %v1979_v45 = vadd.f32 %v12470_v5, %v1972_v15  ;;  %v1290_v37 = vadd.f32 %v1289_v9, %v1286_v7  ;;  %v1293_v46 = vmul.f32 %v1292_v39, %v9836_v30  ;;  %v2404_v42 = vrot.slane %v2402_v17, 2  ;;  %v12478_v9 = vld [vmem:[#allocation182_spill] sm:$0xff] }
 0x3a2   : > { %v2392_v40 = vadd.f32 %v2390_v21, %v2385_v58  ;;  %v2010_v51 = vmul.f32 %v2009_v50, %v9836_v30  ;;  %v2618_v26 = vstv %s10535_s23  ;;  %v1863_v19 = vmul.f32 %v1862_v55, %v9543_v10  ;;  %s6415_s23 = sld [smem:[#allocation8 + $0x12b]] }
 0x3a3   : > { %v1986_v34 = vadd.f32 %v1984_v24, %v1979_v45  ;;  %v12473_v59 = vrot.slane %v12472_v8, 2  ;;  %v2411_v61 = vrot.slane %v2409_v52, 2  ;;  %v1294_v14 = vadd.f32 %v1293_v46, %v1290_v37  ;;  %v10622_v8 = vld [vmem:[#allocation2 + $0x18] sm:$0xff] }
 0x3a4   : > { %v2423_v41 = vmul.f32 %v2422_v57, %v9838_v62  ;;  %v2005_v22 = vrot.slane %v2003_v60, 1  ;;  %v1858_v50 = vrot.slane %v1856_v18, 1  ;;  %v1876_v25 = vstv %s10549_s24  ;;  %v12481_v60 = vld [vmem:[#allocation190_spill] sm:$0xff]  ;;  %s6440_s24 = sld [smem:[#allocation8 + $0x15e]] }
 0x3a5   : > { %v2399_v28 = vadd.f32 %v12473_v59, %v2392_v40  ;;  %v1993_v48 = vadd.f32 %v1991_v53, %v1986_v34  ;;  %v12475_v32 = vrot.slane %v12474_v2, 1  ;;  %v12477_v3 = vrot.slane %v12476_v0, 1  ;;  %v12483_v34 = vld [vmem:[#allocation203_spill] sm:$0xff] }
 0x3a6   : > { %v1883_v49 = vstv %s10553_s27  ;;  %v2430_v23 = vmul.f32 %v2429_v33, %v9836_v30  ;;  %v2012_v52 = vrot.slane %v2010_v51, 1  ;;  %v2612_v57 = vmul.f32 %v2611_v31, %v9545_v63  ;;  %s6441_s27 = sld [smem:[#allocation8 + $0x166]] }
 0x3a7   : > { %v2406_v27 = vadd.f32 %v2404_v42, %v2399_v28  ;;  %v2000_v16 = vadd.f32 %v12475_v32, %v1993_v48  ;;  %v1853_v17 = vadd.f32 %v12477_v3, %v1294_v14  ;;  %v1865_v54 = vrot.slane %v1863_v19, 1 }
 0x3a8   : > { %v1877_v15 = vmul.f32 %v1876_v25, %v12268_v43  ;;  %v2425_v47 = vrot.slane %v2423_v41, 2  ;;  %v2619_v31 = vmul.f32 %v2618_v26, %v9543_v10  ;;  %v2632_v21 = vstv %s10565_s0  ;;  %s12496_s0 = smov 126  }
 0x3a9   : > { %v2413_v20 = vadd.f32 %v2411_v61, %v2406_v27  ;;  %v2007_v1 = vadd.f32 %v2005_v22, %v2000_v16  ;;  %v1860_v56 = vadd.f32 %v1858_v50, %v1853_v17  ;;  %v1884_v24 = vmul.f32 %v1883_v49, %v12276_v6 }
 0x3aa   : > { %v12479_v39 = vrot.slane %v12478_v9, 2  ;;  %v1897_v45 = vstv %s10569_s22  ;;  %v2432_v36 = vrot.slane %v2430_v23, 2  ;;  %v2614_v7 = vrot.slane %v2612_v57, 2  ;;  %v12486_v57 = vld [vmem:[#allocation193_spill] sm:$0xff]  ;;  %s7515_s22 = smov 120  }
 0x3ab   : > { %v2014_v11 = vadd.f32 %v2012_v52, %v2007_v1  ;;  %v1867_v5 = vadd.f32 %v1865_v54, %v1860_v56  ;;  %v2639_v55 = vstv %s10573_s21  ;;  %v1904_v33 = vstv %s10576_s6  ;;  %v12488_v1 = vld [vmem:[#allocation205_spill] sm:$0xff]  ;;  %s7516_s21 = smov 116  }
 0x3ac   : > { %v2420_v58 = vadd.f32 %v12479_v39, %v2413_v20  ;;  %v12482_v18 = vrot.slane %v12481_v60, 2  ;;  %v12484_v37 = vrot.slane %v12483_v34, 1  ;;  %v1879_v42 = vrot.slane %v1877_v15, 1 }
 0x3ad   : > { %v2621_v51 = vrot.slane %v2619_v31, 2  ;;  %v2633_v26 = vmul.f32 %v2632_v21, %v12268_v43  ;;  %v1898_v19 = vmul.f32 %v1897_v45, %v9743_v4  ;;  %v12485_v59 = vstv %s12480_s7  ;;  %v12491_v45 = vld [vmem:[#allocation197_spill] sm:$0xff]  ;;  %s12499_s7 = sld [smem:[#allocation234_spill]] }
 0x3ae   : > { %v2427_v53 = vadd.f32 %v2425_v47, %v2420_v58  ;;  %v2609_v40 = vadd.f32 %v12482_v18, %v2014_v11  ;;  %v1874_v46 = vadd.f32 %v12484_v37, %v1867_v5  ;;  %v1912_v28 = vmul.f32 %v10622_v8, %v12485_v59 }
 0x3af   : > { %v1886_v41 = vrot.slane %v1884_v24, 1  ;;  %v2778_v22 = vstv %s10590_s17  ;;  %v2640_v50 = vmul.f32 %v2639_v55, %v12276_v6  ;;  %v1905_v25 = vmul.f32 %v1904_v33, %v9757_v12 }
 0x3b0   : > { %v2434_v61 = vadd.f32 %v2432_v36, %v2427_v53  ;;  %v2616_v48 = vadd.f32 %v2614_v7, %v2609_v40  ;;  %v1881_v14 = vadd.f32 %v1879_v42, %v1874_v46  ;;  %v2520_v27 = vstv %s10595_s13  ;;  %v7326_v46 = vld [vmem:[#allocation2] sm:$0xff]  ;;  %s12498_s13 = sld [smem:[#allocation235_spill]] }
 0x3b1   : > { %v2653_v16 = vstv %s10597_s10  ;;  %v10639_v3 = vstv %s10602_s20  ;;  %v2635_v17 = vrot.slane %v2633_v26, 2  ;;  %v2660_v49 = vstv %s10599_s4 }
 0x3b2   : > { %v2777_v2 = vmax.f32 %v2434_v61, 0.0  ;;  %v2623_v32 = vadd.f32 %v2621_v51, %v2616_v48  ;;  %v1888_v0 = vadd.f32 %v1886_v41, %v1881_v14  ;;  %v1918_v23 = vstv %s10607_s16 }
 0x3b3   : > { %v12487_v54 = vrot.slane %v12486_v57, 2  ;;  %v12489_v56 = vrot.slane %v12488_v1, 1  ;;  %v1900_v47 = vrot.slane %v1898_v19, 1  ;;  %v2642_v31 = vrot.slane %v2640_v50, 2 }
 0x3b4   : > { %v2779_v52 = vmul.f32 %v2778_v22, %v2777_v2  ;;  %v2654_v21 = vmul.f32 %v2653_v16, %v9743_v4  ;;  %v1907_v24 = vrot.slane %v1905_v25, 1  ;;  %v1925_v9 = vstv %s10614_s18 }
 0x3b5   : > { %v2630_v20 = vadd.f32 %v12487_v54, %v2623_v32  ;;  %v1895_v15 = vadd.f32 %v12489_v56, %v1888_v0  ;;  %v1919_v5 = vmul.f32 %v1918_v23, %v9838_v62  ;;  %v2649_v36 = vrot.slane %v12491_v45, 2  ;;  %v7327_v23 = vld [vmem:[#allocation2 + $0x8] sm:$0xff] }
 0x3b6   : > { %v2781_v39 = vadd.f32 %v10639_v3, %v2779_v52  ;;  %v2661_v7 = vmul.f32 %v2660_v49, %v9757_v12  ;;  %v1914_v55 = vrot.slane %v1912_v28, 1  ;;  %v2674_v53 = vstv %s10627_s14 }
 0x3b7   : > { %v2637_v58 = vadd.f32 %v2635_v17, %v2630_v20  ;;  %v1902_v11 = vadd.f32 %v1900_v47, %v1895_v15  ;;  %v1926_v18 = vmul.f32 %v1925_v9, %v9836_v30  ;;  %v12492_v40 = vstv %s12490_s8  ;;  %s6444_s8 = sld [smem:[#allocation8 + $0x168]] }
 0x3b8   : > { %2782 = vrot.lane.b32.xlu0 %v2781_v39, %s7514_s30  ;;  %v2668_v34 = vmul.f32 %v10622_v8, %v12492_v40  ;;  %v2681_v37 = vstv %s10631_s25  ;;  %v2521_v42 = vmul.f32 %v7326_v46, %v2520_v27  ;;  %v2527_v51 = vstv %s10635_s9  ;;  %s12500_s25 = sld [smem:[#allocation236_spill]] }
 0x3b9   : > { %v2644_v33 = vadd.f32 %v2642_v31, %v2637_v58  ;;  %v1909_v60 = vadd.f32 %v1907_v24, %v1902_v11  ;;  %v2656_v19 = vrot.slane %v2654_v21, 2  ;;  %v1921_v28 = vrot.slane %v1919_v5, 1  ;;  %s12501_s9 = sld [smem:[#allocation21_spill]] }
 0x3ba   : > { %v2663_v61 = vrot.slane %v2661_v7, 2  ;;  %v2675_v48 = vmul.f32 %v2674_v53, %v9838_v62  ;;  %v2534_v14 = vstv %s10643_s1  ;;  %v2541_v41 = vstv %s10645_s26  ;;  %s12502_s1 = sld [smem:[#allocation26_spill]]  ;;  %s12503_s26 = sld [smem:[#allocation25_spill]] }
 0x3bb   : > { %v2651_v26 = vadd.f32 %v2649_v36, %v2644_v33  ;;  %v1916_v59 = vadd.f32 %v1914_v55, %v1909_v60  ;;  %v1928_v25 = vrot.slane %v1926_v18, 1  ;;  %v2528_v27 = vmul.f32 %v2527_v51, %v9545_v63  ;;  %v7328_v33 = vld [vmem:[#allocation2 + $0x10] sm:$0xff] }
 0x3bc   : > { %v2670_v2 = vrot.slane %v2668_v34, 2  ;;  %v2682_v32 = vmul.f32 %v2681_v37, %v9836_v30  ;;  %v2523_v17 = vrot.slane %v2521_v42, 2  ;;  %v2535_v49 = vmul.f32 %v2534_v14, %v9543_v10 }
 0x3bd   : > { %v2658_v22 = vadd.f32 %v2656_v19, %v2651_v26  ;;  %v1923_v50 = vadd.f32 %v1921_v28, %v1916_v59  ;;  %v2542_v52 = vmul.f32 %v7327_v23, %v2541_v41  ;;  %v2548_v57 = vstv %s10657_s3 }
 0x3be   : > { %v2677_v54 = vrot.slane %v2675_v48, 2  ;;  %v2530_v1 = vrot.slane %v2528_v27, 2  ;;  %v2684_v56 = vrot.slane %v2682_v32, 2  ;;  %v2555_v15 = vstv %s10667_s29 }
 0x3bf   : > { %v2665_v16 = vadd.f32 %v2663_v61, %v2658_v22  ;;  %v1930_v0 = vadd.f32 %v1928_v25, %v1923_v50  ;;  %v2537_v10 = vrot.slane %v2535_v49, 2  ;;  %v2549_v21 = vmul.f32 %v2548_v57, %v12268_v43  ;;  %s6445_s3 = sshll.u32 %s12501_s9, 4 }
 0x3c0   : > { %v2562_v24 = vstv %s10672_s19  ;;  %v2544_v58 = vrot.slane %v2542_v52, 2  ;;  %v2556_v11 = vmul.f32 %v2555_v15, %v12276_v6  ;;  %v2844_v5 = vstv %s10676_s2  ;;  %s334_s29 = scalar_lea.vmem [#allocation12], %s12502_s1  ;;  %p12505_p2 = scmp.ne.s32.totalorder %s12503_s26, 0 }
 0x3c1   : > { %v2672_v63 = vadd.f32 %v2670_v2, %v2665_v16  ;;  %v2525_v20 = vadd.f32 %v2523_v17, %v1930_v0  ;;  %v2569_v45 = vstv %s10678_s5  ;;  %v2551_v55 = vrot.slane %v2549_v21, 2  ;;  %s5974_s19 = sshll.u32 %s334_s29, 4  ;;  %s11075_s19 = int_to_ptr.vmem [resolvable:$true] %s5974_s19 }
 0x3c2   : > { %v2563_v53 = vmul.f32 %v7328_v33, %v2562_v24  ;;  %v10694_v43 = vstv %s6443_s11  ;;  %v2576_v60 = vstv %s10682_s12  ;;  %v2558_v34 = vrot.slane %v2556_v11, 2  ;;  %s12504_s11 = sld [smem:[#allocation237_spill]] }
 0x3c3   : > { %v2679_v47 = vadd.f32 %v2677_v54, %v2672_v63  ;;  %v2532_v31 = vadd.f32 %v2530_v1, %v2525_v20  ;;  %v2570_v37 = vmul.f32 %v2569_v45, %v9743_v4  ;;  %v2583_v46 = vstv %s10685_s15  ;;  %s5962_s15 = scalar_lea.sflag [#allocation6], %s12502_s1 }
 0x3c4   : > { %v2565_v51 = vrot.slane %v2563_v53, 2  ;;  %v2577_v26 = vmul.f32 %v2576_v60, %v9757_v12  ;;  %v2590_v19 = vstv %s10689_s28  ;;  %v2584_v61 = vmul.f32 %v10622_v8, %v2583_v46  ;;  %s7428_s28 = scalar_lea.vmem %s11075_s19, 16 }
 0x3c5   : > { %v2686_v9 = vadd.f32 %v2684_v56, %v2679_v47  ;;  %v2539_v39 = vadd.f32 %v2537_v10, %v2532_v31  ;;  %v2572_v28 = vrot.slane %v2570_v37, 2  ;;  %v2597_v48 = vstv %s6415_s23  ;;  %p7429_p12 = scmp.ne.s32.totalorder %s11075_s19, %s7428_s28  ;;  %s7520_s23 = smov [#allocation12]  }
 0x3c6   : > { %v2579_v41 = vrot.slane %v2577_v26, 2  ;;  %v2591_v22 = vmul.f32 %v2590_v19, %v9838_v62  ;;  %v2586_v50 = vrot.slane %v2584_v61, 2  ;;  %v2598_v25 = vmul.f32 %v2597_v48, %v9836_v30  ;;  %v12493_v62 = vld [vmem:[#allocation29_spill] sm:$0xff] }
 0x3c7   : > { %v2843_v36 = vmax.f32 %v2686_v9, 0.0  ;;  %v2546_v7 = vadd.f32 %v2544_v58, %v2539_v39  ;;  %v2822_v0 = vstv %s6440_s24  ;;  %v10706_v49 = vstv %s6441_s27  ;;  %p7430_p6 = pnand %p7429_p12, %p12505_p2  ;;  %s7432_s24 = sshll.u32 %s7520_s23, 4  ;;  %s7433_s24 = int_to_ptr.vmem [resolvable:$false] %s7432_s24 }
 0x3c8   : > { %v2593_v12 = vrot.slane %v2591_v22, 2  ;;  %v2600_v32 = vrot.slane %v2598_v25, 2  ;;  %vm940_vm5 = vcmp.ge.s32.totalorder %v12493_v62, 2  ;;  %vm941_vm6 = vcmp.le.s32.totalorder %v12493_v62, 12  ;;  %s11073_s12 = scalar_lea.hbm %s12504_s11, %s6445_s3  ;;  %s7434_s27 = scalar_lea.vmem %s7433_s24, 32 }
 0x3c9   : > { %v2845_v18 = vmul.f32 %v2844_v5, %v2843_v36  ;;  %v2553_v40 = vadd.f32 %v2551_v55, %v2546_v7  ;;  %vm10712_vm7 = vmand %vm940_vm5, %vm941_vm6  ;;  %v2870_v7 = vld [vmem:[#allocation9 + $0x10] sm:$0xff]  ;;  %v2867_v55 = vld [vmem:[#allocation9] sm:$0xff]  ;;  %p7431_p10 = pneg %p7430_p6  ;;  %p7435_p5 = scmp.lt.s32.totalorder %s11075_s19, %s7433_s24 }
 0x3ca   : > { %v2874_v60 = vsel %vm2872_vm8, %v2870_v7, 0  ;;  %p7436_p9 = scmp.lt.s32.totalorder %s7434_s27, %s7428_s28 }
 0x3cb   : > { %v2847_v6 = vadd.f32 %v10694_v43, %v2845_v18  ;;  %v2560_v42 = vadd.f32 %v2558_v34, %v2553_v40  ;;  %v3412_v18 = vsel %vm2872_vm8, %v2867_v55, 0  ;;  %v10764_v37 = vand.u32 4294901760, %v2874_v60 }
 0x3cc   : > { %v10766_v46 = vand.u32 4294901760, %v3412_v18  ;;  %p7437_p13 = por %p7436_p9, %p7435_p5 }
 0x3cd   : > { %2848 = vrot.lane.b32.xlu1 %v2847_v6, %s7514_s30  ;;  %v2567_v59 = vadd.f32 %v2565_v51, %v2560_v42 }
 0x3ce   : > { %v10772_v19 = vsub.f32 %v3412_v18, %v10766_v46  ;;  %p7438_p0 = pnand %p7437_p13, %p7431_p10 }
 0x3cf   : > { %v2574_v14 = vadd.f32 %v2572_v28, %v2567_v59 }
 0x3d0   : > { %v3488_v61 = vand.u32 4294901760, %v10772_v19 }
 0x3d1   : > { %v2581_v4 = vadd.f32 %v2579_v41, %v2574_v14 }
 0x3d2   : > { %v3489_v41 = vsub.f32 %v10772_v19, %v3488_v61 }
 0x3d3   : > { %v2588_v27 = vadd.f32 %v2586_v50, %v2581_v4 }
 0x3d4   : > { %v2717_v52 = vpop.permute.xlu1 %2716  ;;  %v3490_v4 = vand.u32 4294901760, %v3489_v41 }
 0x3d5   : > { %v2595_v2 = vadd.f32 %v2593_v12, %v2588_v27  ;;  %v2695_v57 = vpop.permute.xlu0 %2694  ;;  %v2718_v63 = vsel %vm10712_vm7, %v2717_v52, %v12373_v13 }
 0x3d6   : > { %2719 = vrot.lane.b32.xlu1 %v2718_v63, %s12496_s0  ;;  %v2696_v54 = vsel %vm10712_vm7, %v2695_v57, %v12377_v35  ;;  %6697 = vmatprep.mubr.f32.mxu1 %v3490_v4 }
 0x3d7   : > { %v2602_v16 = vadd.f32 %v2600_v32, %v2595_v2 }
 0x3d9   : > { %v2821_v17 = vmax.f32 %v2602_v16, 0.0 }
 0x3da   : > { %v2761_v20 = vpop.permute.xlu1 %2760 }
 0x3db   : > { %v2823_v8 = vmul.f32 %v2822_v0, %v2821_v17  ;;  %v2762_v1 = vsel %vm10712_vm7, %v2761_v20, %v12389_v29 }
 0x3dc   : > { %2763 = vrot.lane.b32.xlu1 %v2762_v1, %s12496_s0 }
 0x3dd   : > { %v2825_v23 = vadd.f32 %v10706_v49, %v2823_v8 }
 0x3df   : > { %2826 = vrot.lane.b32.xlu0 %v2825_v23, %s7514_s30  ;;  %s12497_s30 = smov 124  }
 0x3e3   : > { %2697 = vrot.lane.b32.xlu0 %v2696_v54, %s12496_s0 }
 0x3e9   : > { %v2739_v56 = vpop.permute.xlu0 %2738 }
 0x3ea   : > { %v2740_v15 = vsel %vm10712_vm7, %v2739_v56, %v10323_v44 }
 0x3eb   : > { %2741 = vrot.lane.b32.xlu0 %v2740_v15, %s12496_s0 }
 0x408   : > { %v2805_v47 = vpop.permute.xlu1 %2804 }
 0x409   : > { %v10735_v31 = vsel %vm10712_vm7, %v2805_v47, %v10454_v38 }
 0x40a   : > { %2807 = vrot.lane.b32.xlu1 %v10735_v31, %s12496_s0 }
 0x42a   : > { %v2783_v10 = vpop.permute.xlu0 %2782 }
 0x42b   : > { %v10742_v21 = vsel %vm10712_vm7, %v2783_v10, %v10639_v3 }
 0x42c   : > { %2785 = vrot.lane.b32.xlu0 %v10742_v21, %s12496_s0 }
 0x43f   : > { %v2849_v24 = vpop.permute.xlu1 %2848 }
 0x440   : > { %v10749_v9 = vsel %vm10712_vm7, %v2849_v24, %v10694_v43 }
 0x441   : > { %2851 = vrot.lane.b32.xlu1 %v10749_v9, %s12496_s0 }
 0x448   : > { %v2720_v11 = vpop.permute.xlu1 %2719 }
 0x449   : > { %v2721_v5 = vmax.f32 %v2718_v63, %v2720_v11 }
 0x44b   : > { %v2723_v33 = vrot.slane %v2721_v5, 1  ;;  %v2726_v53 = vmax.f32 %v2721_v5, %v12373_v13  ;;  %v10769_v13 = vsub.f32 %v2874_v60, %v10764_v37 }
 0x44d   : > { %v2725_v6 = vmax.f32 %v2721_v5, %v2723_v33  ;;  %2727 = vst [vmem:[#allocation3 + $0x4] sm:$0x1] %v2726_v53  ;;  %2730 = vst [vmem:[#allocation3 + $0x2] sm:$0x20] %v2726_v53  ;;  %v2950_v28 = vand.u32 4294901760, %v10769_v13  ;;  %v2868_v53 = vld [vmem:[#allocation9 + $0x8] sm:$0xff] }
 0x44e   : > { %v2764_v42 = vpop.permute.xlu1 %2763  ;;  %v3415_v18 = vsel %vm2872_vm8, %v2868_v53, 0 }
 0x44f   : > { %v2765_v26 = vmax.f32 %v2762_v1, %v2764_v42  ;;  %2728 = vst [vmem:[#allocation3 + $0x4] sm:$0x2] %v2725_v6  ;;  %2729 = vst [vmem:[#allocation3 + $0x3] sm:$0x8] %v2725_v6  ;;  %v2951_v14 = vsub.f32 %v10769_v13, %v2950_v28 }
 0x451   : > { %v2827_v39 = vpop.permute.xlu0 %2826  ;;  %v2770_v59 = vmax.f32 %v2765_v26, %v12389_v29  ;;  %v2952_v22 = vand.u32 4294901760, %v2951_v14 }
 0x452   : > { %v10756_v58 = vsel %vm10712_vm7, %v2827_v39, %v10706_v49 }
 0x453   : > { %2829 = vrot.lane.b32.xlu0 %v10756_v58, %s12496_s0  ;;  %2771 = vst [vmem:[#allocation3 + $0xc] sm:$0x1] %v2770_v59  ;;  %2774 = vst [vmem:[#allocation3 + $0xa] sm:$0x20] %v2770_v59  ;;  %6631 = vmatprep.mubr.f32.mxu0 %v2952_v22 }
 0x455   : > { %v2698_v45 = vpop.permute.xlu0 %2697 }
 0x456   : > { %v2699_v36 = vmax.f32 %v2696_v54, %v2698_v45 }
 0x458   : > { %v2701_v40 = vrot.slane %v2699_v36, 1  ;;  %v2704_v34 = vmax.f32 %v2699_v36, %v12377_v35  ;;  %v2767_v35 = vrot.slane %v2765_v26, 1 }
 0x45a   : > { %v2703_v51 = vmax.f32 %v2699_v36, %v2701_v40  ;;  %2705 = vst [vmem:[#allocation3] sm:$0x1] %v2704_v34  ;;  %2708 = vst [vmem:[#allocation3 - $0x2] sm:$0x20] %v2704_v34  ;;  %v2769_v48 = vmax.f32 %v2765_v26, %v2767_v35 }
 0x45c   : > { %2706 = vst [vmem:[#allocation3] sm:$0x2] %v2703_v51  ;;  %2707 = vst [vmem:[#allocation3 - $0x1] sm:$0x8] %v2703_v51 }
 0x45d   : > { %2772 = vst [vmem:[#allocation3 + $0xc] sm:$0x2] %v2769_v48  ;;  %2773 = vst [vmem:[#allocation3 + $0xb] sm:$0x8] %v2769_v48  ;;  %v2742_v25 = vpop.permute.xlu0 %2741 }
 0x45e   : > { %v2743_v27 = vmax.f32 %v2740_v15, %v2742_v25 }
 0x460   : > { %v2745_v2 = vrot.slane %v2743_v27, 1  ;;  %v2748_v32 = vmax.f32 %v2743_v27, %v10323_v44 }
 0x462   : > { %v2747_v16 = vmax.f32 %v2743_v27, %v2745_v2  ;;  %2749 = vst [vmem:[#allocation3 + $0x8] sm:$0x1] %v2748_v32  ;;  %2752 = vst [vmem:[#allocation3 + $0x6] sm:$0x20] %v2748_v32 }
 0x463   : > { %v2863_v29 = vld [vmem:[#allocation3] sm:$0xff] }
 0x464   : > { %v2880_v50 = vand.u32 4294901760, %v2863_v29  ;;  %2750 = vst [vmem:[#allocation3 + $0x8] sm:$0x2] %v2747_v16  ;;  %2751 = vst [vmem:[#allocation3 + $0x7] sm:$0x8] %v2747_v16 }
 0x466   : > { %v2970_v12 = vsub.f32 %v2863_v29, %v2880_v50 }
 0x468   : > { %v2971_v8 = vand.u32 4294901760, %v2970_v12 }
 0x46a   : > { %v2972_v30 = vsub.f32 %v2970_v12, %v2971_v8 }
 0x46b   : > { %v2864_v0 = vld [vmem:[#allocation3 + $0x8] sm:$0xff] }
 0x46c   : > { %v2883_v17 = vand.u32 4294901760, %v2864_v0  ;;  %v2973_v54 = vand.u32 4294901760, %v2972_v30  ;;  %v3946_v30 = vld [vmem:[#allocation9 + $0x20] sm:$0xff] }
 0x46e   : > { %v10784_v23 = vpack.c.bf16 %v2883_v17, %v2880_v50  ;;  %v2977_v62 = vsub.f32 %v2864_v0, %v2883_v17 }
 0x470   : > { %6960 = vmatprep.subr.bf16.mxu0 %v10784_v23  ;;  %7008 = vmatprep.subr.bf16.mxu1 %v10784_v23  ;;  %v2978_v52 = vand.u32 4294901760, %v2977_v62  ;;  %v10788_v57 = vpack.c.bf16 %v2977_v62, %v2970_v12 }
 0x471   : > { %6962 = vmatpush3.bf16.msra.mxu0 %v10784_v23  ;;  %7010 = vmatpush3.bf16.msra.mxu1 %v10784_v23 }
 0x472   : > { %v2979_v44 = vsub.f32 %v2977_v62, %v2978_v52  ;;  %v10792_v63 = vpack.c.bf16 %v2978_v52, %v2971_v8  ;;  %v4489_v52 = vld [vmem:[#allocation9 + $0x30] sm:$0xff] }
 0x474   : > { %v2980_v20 = vand.u32 4294901760, %v2979_v44  ;;  %v3949_v44 = vsel %vm2872_vm8, %v3946_v30, 0 }
 0x476   : > { %v10794_v1 = vpack.c.bf16 %v2980_v20, %v2973_v54  ;;  %v4492_v54 = vsel %vm2872_vm8, %v4489_v52, 0  ;;  %v3947_v20 = vld [vmem:[#allocation9 + $0x28] sm:$0xff] }
 0x47c   : > { %v2808_v56 = vpop.permute.xlu1 %2807 }
 0x47d   : > { %v2809_v15 = vmax.f32 %v10735_v31, %v2808_v56  ;;  %v4490_v56 = vld [vmem:[#allocation9 + $0x38] sm:$0xff] }
 0x47f   : > { %v2811_v47 = vrot.slane %v2809_v15, 1  ;;  %v2814_v10 = vmax.f32 %v2809_v15, %v10454_v38 }
 0x481   : > { %v2813_v24 = vmax.f32 %v2809_v15, %v2811_v47  ;;  %2815 = vst [vmem:[#allocation3 + $0x14] sm:$0x1] %v2814_v10  ;;  %2818 = vst [vmem:[#allocation3 + $0x12] sm:$0x20] %v2814_v10  ;;  %v10886_v15 = vand.u32 4294901760, %v3949_v44 }
 0x483   : > { %2816 = vst [vmem:[#allocation3 + $0x14] sm:$0x2] %v2813_v24  ;;  %2817 = vst [vmem:[#allocation3 + $0x13] sm:$0x8] %v2813_v24  ;;  %v10907_v47 = vsub.f32 %v3949_v44, %v10886_v15 }
 0x49e   : > { %v2786_v39 = vpop.permute.xlu0 %2785 }
 0x49f   : > { %v2787_v11 = vmax.f32 %v10742_v21, %v2786_v39  ;;  %v2871_v21 = vld [vmem:[#allocation9 + $0x18] sm:$0xff] }
 0x4a1   : > { %v2789_v5 = vrot.slane %v2787_v11, 1  ;;  %v2792_v45 = vmax.f32 %v2787_v11, %v10639_v3  ;;  %v2877_v3 = vsel %vm2872_vm8, %v2871_v21, 0 }
 0x4a2   : > { %v10806_v6 = vand.u32 4294901760, %v2877_v3 }
 0x4a3   : > { %v2791_v36 = vmax.f32 %v2787_v11, %v2789_v5  ;;  %2793 = vst [vmem:[#allocation3 + $0x10] sm:$0x1] %v2792_v45  ;;  %2796 = vst [vmem:[#allocation3 + $0xe] sm:$0x20] %v2792_v45  ;;  %v4025_v11 = vand.u32 4294901760, %v10907_v47 }
 0x4a4   : > { %v10811_v35 = vsub.f32 %v2877_v3, %v10806_v6 }
 0x4a5   : > { %2794 = vst [vmem:[#allocation3 + $0x10] sm:$0x2] %v2791_v36  ;;  %2795 = vst [vmem:[#allocation3 + $0xf] sm:$0x8] %v2791_v36 }
 0x4ac   : > { %v2865_v42 = vld [vmem:[#allocation3 + $0x10] sm:$0xff] }
 0x4ad   : > { %v2886_v26 = vand.u32 4294901760, %v2865_v42 }
 0x4af   : > { %v10818_v48 = vsub.f32 %v2865_v42, %v2886_v26 }
 0x4b1   : > { %v2985_v29 = vand.u32 4294901760, %v10818_v48 }
 0x4b3   : > { %v2852_v31 = vpop.permute.xlu1 %2851  ;;  %v2986_v2 = vsub.f32 %v10818_v48, %v2985_v29 }
 0x4b4   : > { %v2853_v7 = vmax.f32 %v10749_v9, %v2852_v31  ;;  %v4026_v31 = vsub.f32 %v10907_v47, %v4025_v11 }
 0x4b5   : > { %v2987_v0 = vand.u32 4294901760, %v2986_v2 }
 0x4b6   : > { %v2855_v38 = vrot.slane %v2853_v7, 1  ;;  %v2858_v55 = vmax.f32 %v2853_v7, %v10694_v43  ;;  %v10808_v43 = vand.u32 4294901760, %v3415_v18 }
 0x4b8   : > { %v2857_v33 = vmax.f32 %v2853_v7, %v2855_v38  ;;  %2859 = vst [vmem:[#allocation3 + $0x1c] sm:$0x1] %v2858_v55  ;;  %2862 = vst [vmem:[#allocation3 + $0x1a] sm:$0x20] %v2858_v55  ;;  %v10814_v59 = vsub.f32 %v3415_v18, %v10808_v43 }
 0x4ba   : > { %2860 = vst [vmem:[#allocation3 + $0x1c] sm:$0x2] %v2857_v33  ;;  %2861 = vst [vmem:[#allocation3 + $0x1b] sm:$0x8] %v2857_v33 }
 0x4c5   : > { %v2830_v60 = vpop.permute.xlu0 %2829 }
 0x4c6   : > { %v2831_v40 = vmax.f32 %v10756_v58, %v2830_v60  ;;  %v2960_v58 = vand.u32 4294901760, %v10811_v35 }
 0x4c8   : > { %v2833_v34 = vrot.slane %v2831_v40, 1  ;;  %v2836_v9 = vmax.f32 %v2831_v40, %v10706_v49  ;;  %v3498_v49 = vand.u32 4294901760, %v10814_v59  ;;  %v2961_v22 = vsub.f32 %v10811_v35, %v2960_v58 }
 0x4ca   : > { %v2835_v51 = vmax.f32 %v2831_v40, %v2833_v34  ;;  %2837 = vst [vmem:[#allocation3 + $0x18] sm:$0x1] %v2836_v9  ;;  %2840 = vst [vmem:[#allocation3 + $0x16] sm:$0x20] %v2836_v9  ;;  %v3499_v4 = vsub.f32 %v10814_v59, %v3498_v49  ;;  %v2962_v27 = vand.u32 4294901760, %v2961_v22  ;;  %v7517_v9 = vmov 0.0|0.0  }
 0x4cc   : > { %2838 = vst [vmem:[#allocation3 + $0x18] sm:$0x2] %v2835_v51  ;;  %2839 = vst [vmem:[#allocation3 + $0x17] sm:$0x8] %v2835_v51  ;;  %v3500_v12 = vand.u32 4294901760, %v3499_v4  ;;  %v5032_v4 = vld [vmem:[%s12498_s13 + $0x8] sm:$0xff] }
 0x4d3   : > { %v2866_v14 = vld [vmem:[#allocation3 + $0x18] sm:$0xff] }
 0x4d4   : > { %v2889_v41 = vand.u32 4294901760, %v2866_v14 }
 0x4d6   : > { %v10827_v50 = vpack.c.bf16 %v2889_v41, %v2886_v26  ;;  %v10829_v25 = vsub.f32 %v2866_v14, %v2889_v41 }
 0x4d8   : > { %6964 = vmatprep.subr.bf16.mxu0 %v10827_v50  ;;  %7012 = vmatprep.subr.bf16.mxu1 %v10827_v50  ;;  %v2992_v32 = vand.u32 4294901760, %v10829_v25  ;;  %v10858_v62 = vpack.c.bf16 %v10829_v25, %v10818_v48 }
 0x4d9   : > { %6966 = vmatpush3.bf16.msra.mxu0 %v10827_v50  ;;  %7014 = vmatpush3.bf16.msra.mxu1 %v10827_v50 }
 0x4da   : > { %6968 = vmatprep.subr.bf16.mxu0 %v10794_v1  ;;  %7016 = vmatprep.subr.bf16.mxu1 %v10794_v1  ;;  %v2993_v16 = vsub.f32 %v10829_v25, %v2992_v32  ;;  %v5031_v25 = vld [vmem:[%s12498_s13] sm:$0xff] }
 0x4dc   : > { %6632 = vmatmul.mubr.f32.vlgmr.msra.gmra.mrb[0].mxu0 %v2962_v27  ;;  %6698 = vmatmul.mubr.f32.vlgmr.msra.gmra.mrb[0].mxu1 %v3500_v12  ;;  %v2994_v17 = vand.u32 4294901760, %v2993_v16 }
 0x4dd   : > { %6970 = vmatpush3.bf16.msra.mxu0 %v10794_v1  ;;  %7018 = vmatpush3.bf16.msra.mxu1 %v10794_v1 }
 0x4de   : > { %v10844_v8 = vpack.c.bf16 %v2994_v17, %v2987_v0  ;;  %6642 = vmatprep.mubr.f32.mxu0 %v10764_v37  ;;  %6708 = vmatprep.mubr.f32.mxu1 %v10766_v46 }
 0x4e0   : > { %6972 = vmatprep.subr.bf16.mxu0 %v10844_v8  ;;  %7020 = vmatprep.subr.bf16.mxu1 %v10844_v8 }
 0x4e1   : > { %6974 = vmatpush3.bf16.msra.mxu0 %v10844_v8  ;;  %7022 = vmatpush3.bf16.msra.mxu1 %v10844_v8 }
 0x4e2   : > { %6976 = vmatprep.subr.bf16.mxu0 %v10788_v57  ;;  %7024 = vmatprep.subr.bf16.mxu1 %v10788_v57 }
 0x4e4   : > { %6643 = vmatmul.mubr.f32.vlgmr.msra.gmra.mrb[0].mxu0 %v10806_v6  ;;  %6709 = vmatmul.mubr.f32.vlgmr.msra.gmra.mrb[0].mxu1 %v10808_v43 }
 0x4e5   : > { %6978 = vmatpush3.bf16.msra.mxu0 %v10788_v57  ;;  %7026 = vmatpush3.bf16.msra.mxu1 %v10788_v57 }
 0x4e6   : > { %6980 = vmatprep.subr.bf16.mxu0 %v10858_v62  ;;  %7028 = vmatprep.subr.bf16.mxu1 %v10858_v62 }
 0x4e7   : > { %6653 = vmatprep.mubr.f32.mxu0 %v10769_v13  ;;  %6719 = vmatprep.mubr.f32.mxu1 %v10772_v19  ;;  %v10888_v13 = vand.u32 4294901760, %v4492_v54  ;;  %v10896_v19 = vpack.c.bf16 %v2992_v32, %v2985_v29 }
 0x4e9   : > { %6982 = vmatpush3.bf16.msra.mxu0 %v10858_v62  ;;  %7030 = vmatpush3.bf16.msra.mxu1 %v10858_v62  ;;  %v10910_v10 = vsub.f32 %v4492_v54, %v10888_v13 }
 0x4ea   : > { %6984 = vmatprep.subr.bf16.mxu0 %v10784_v23  ;;  %7032 = vmatprep.subr.bf16.mxu1 %v10784_v23 }
 0x4eb   : > { %v4568_v5 = vand.u32 4294901760, %v10910_v10 }
 0x4ec   : > { %6654 = vmatmul.mubr.f32.vlgmr.msra.gmra.mrb[0].mxu0 %v10811_v35  ;;  %6720 = vmatmul.mubr.f32.vlgmr.msra.gmra.mrb[0].mxu1 %v10814_v59 }
 0x4ed   : > { %6986 = vmatpush3.bf16.msra.mxu0 %v10784_v23  ;;  %7034 = vmatpush3.bf16.msra.mxu1 %v10784_v23  ;;  %v4569_v7 = vsub.f32 %v10910_v10, %v4568_v5 }
 0x4ee   : > { %6988 = vmatprep.subr.bf16.mxu0 %v10827_v50  ;;  %7036 = vmatprep.subr.bf16.mxu1 %v10827_v50 }
 0x4ef   : > { %6664 = vmatprep.mubr.f32.mxu0 %v2950_v28  ;;  %6730 = vmatprep.mubr.f32.mxu1 %v3488_v61  ;;  %v3952_v28 = vsel %vm2872_vm8, %v3947_v20, 0  ;;  %v4495_v61 = vsel %vm2872_vm8, %v4490_v56, 0 }
 0x4f0   : > { %v10912_v24 = vand.u32 4294901760, %v3952_v28  ;;  %v10914_v39 = vand.u32 4294901760, %v4495_v61 }
 0x4f1   : > { %6990 = vmatpush3.bf16.msra.mxu0 %v10827_v50  ;;  %7038 = vmatpush3.bf16.msra.mxu1 %v10827_v50 }
 0x4f2   : > { %6992 = vmatprep.subr.bf16.mxu0 %v10792_v63  ;;  %7040 = vmatprep.subr.bf16.mxu1 %v10792_v63  ;;  %v10925_v45 = vsub.f32 %v3952_v28, %v10912_v24  ;;  %v10928_v36 = vsub.f32 %v4495_v61, %v10914_v39 }
 0x4f4   : > { %6665 = vmatmul.mubr.f32.vlgmr.msra.gmra.mrb[0].mxu0 %v2960_v58  ;;  %6731 = vmatmul.mubr.f32.vlgmr.msra.gmra.mrb[0].mxu1 %v3498_v49  ;;  %v4035_v38 = vand.u32 4294901760, %v10925_v45  ;;  %v4578_v55 = vand.u32 4294901760, %v10928_v36 }
 0x4f5   : > { %6994 = vmatpush3.bf16.msra.mxu0 %v10792_v63  ;;  %7042 = vmatpush3.bf16.msra.mxu1 %v10792_v63 }
 0x4f6   : > { %6996 = vmatprep.subr.bf16.mxu0 %v10896_v19  ;;  %7044 = vmatprep.subr.bf16.mxu1 %v10896_v19  ;;  %v4036_v33 = vsub.f32 %v10925_v45, %v4035_v38  ;;  %v4579_v21 = vsub.f32 %v10928_v36, %v4578_v55 }
 0x4f7   : > { %6675 = vmatprep.mubr.f32.mxu0 %v10764_v37  ;;  %6741 = vmatprep.mubr.f32.mxu1 %v10766_v46 }
 0x4f8   : > { %v4037_v53 = vand.u32 4294901760, %v4036_v33  ;;  %v4580_v60 = vand.u32 4294901760, %v4579_v21 }
 0x4f9   : > { %6998 = vmatpush3.bf16.msra.mxu0 %v10896_v19  ;;  %7046 = vmatpush3.bf16.msra.mxu1 %v10896_v19 }
 0x4fa   : > { %7000 = vmatprep.subr.bf16.mxu0 %v10784_v23  ;;  %7048 = vmatprep.subr.bf16.mxu1 %v10784_v23 }
 0x4fc   : > { %6676 = vmatmul.mubr.f32.vlgmr.msra.gmra.mrb[0].mxu0 %v10806_v6  ;;  %6742 = vmatmul.mubr.f32.vlgmr.msra.gmra.mrb[0].mxu1 %v10808_v43 }
 0x4fd   : > { %7002 = vmatpush3.bf16.msra.mxu0 %v10784_v23  ;;  %7050 = vmatpush3.bf16.msra.mxu1 %v10784_v23 }
 0x4fe   : > { %7004 = vmatprep.subr.bf16.mxu0 %v10827_v50  ;;  %7052 = vmatprep.subr.bf16.mxu1 %v10827_v50 }
 0x4ff   : > { %6686 = vmatprep.mubr.f32.mxu0 %v10764_v37  ;;  %6752 = vmatprep.mubr.f32.mxu1 %v10766_v46  ;;  %v4027_v37 = vand.u32 4294901760, %v4026_v31  ;;  %v4570_v46 = vand.u32 4294901760, %v4569_v7  ;;  %v5038_v31 = vld [vmem:[%s12500_s25] sm:$0xf] }
 0x501   : > { %7006 = vmatpush3.bf16.msra.mxu0 %v10827_v50  ;;  %7054 = vmatpush3.bf16.msra.mxu1 %v10827_v50 }
 0x502   : > { %7056 = vmatprep.subr.bf16.mxu0 %v10784_v23  ;;  %7104 = vmatprep.subr.bf16.mxu1 %v10784_v23 }
 0x504   : > { %6687 = vmatmul.mubr.f32.vlgmr.msra.gmra.mrb[0].mxu0 %v10806_v6  ;;  %6753 = vmatmul.mubr.f32.vlgmr.msra.gmra.mrb[0].mxu1 %v10808_v43  ;;  %v7519_v6 = vmov 0.0   ;;  %v5037_v43 = vld [vmem:[#allocation11] sm:$0xf] }
 0x505   : > { %7058 = vmatpush3.bf16.msra.mxu0 %v10784_v23  ;;  %7106 = vmatpush3.bf16.msra.mxu1 %v10784_v23  ;;  %v5041_v51 = vsel %vm5039_vm10, %v5037_v43, 0 }
 0x506   : > { %7060 = vmatprep.subr.bf16.mxu0 %v10827_v50  ;;  %7108 = vmatprep.subr.bf16.mxu1 %v10827_v50  ;;  %v5110_v35 = vand.u32 4294901760, %v5041_v51 }
 0x507   : > { %6763 = vmatprep.mubr.f32.mxu0 %v4027_v37  ;;  %6829 = vmatprep.mubr.f32.mxu1 %v4570_v46 }
 0x508   : > { %v5111_v41 = vsub.f32 %v5041_v51, %v5110_v35 }
 0x509   : > { %7062 = vmatpush3.bf16.msra.mxu0 %v10827_v50  ;;  %7110 = vmatpush3.bf16.msra.mxu1 %v10827_v50 }
 0x50a   : > { %7064 = vmatprep.subr.bf16.mxu0 %v10794_v1  ;;  %7112 = vmatprep.subr.bf16.mxu1 %v10794_v1  ;;  %v5112_v32 = vand.u32 4294901760, %v5111_v41 }
 0x50c   : > { %6764 = vmatmul.mubr.f32.vlgmr.msra.gmra.mrb[2].mxu0 %v4037_v53  ;;  %6830 = vmatmul.mubr.f32.vlgmr.msra.gmra.mrb[2].mxu1 %v4580_v60 }
 0x50d   : > { %7066 = vmatpush3.bf16.msra.mxu0 %v10794_v1  ;;  %7114 = vmatpush3.bf16.msra.mxu1 %v10794_v1 }
 0x50e   : > { %7068 = vmatprep.subr.bf16.mxu0 %v10844_v8  ;;  %7116 = vmatprep.subr.bf16.mxu1 %v10844_v8 }
 0x50f   : > { %6774 = vmatprep.mubr.f32.mxu0 %v10886_v15  ;;  %6840 = vmatprep.mubr.f32.mxu1 %v10888_v13 }
 0x511   : > { %7070 = vmatpush3.bf16.msra.mxu0 %v10844_v8  ;;  %7118 = vmatpush3.bf16.msra.mxu1 %v10844_v8 }
 0x512   : > { %7072 = vmatprep.subr.bf16.mxu0 %v10788_v57  ;;  %7120 = vmatprep.subr.bf16.mxu1 %v10788_v57 }
 0x514   : > { %6775 = vmatmul.mubr.f32.vlgmr.msra.gmra.mrb[2].mxu0 %v10912_v24  ;;  %6841 = vmatmul.mubr.f32.vlgmr.msra.gmra.mrb[2].mxu1 %v10914_v39 }
 0x515   : > { %7074 = vmatpush3.bf16.msra.mxu0 %v10788_v57  ;;  %7122 = vmatpush3.bf16.msra.mxu1 %v10788_v57 }
 0x516   : > { %7076 = vmatprep.subr.bf16.mxu0 %v10858_v62  ;;  %7124 = vmatprep.subr.bf16.mxu1 %v10858_v62 }
 0x517   : > { %6785 = vmatprep.mubr.f32.mxu0 %v10907_v47  ;;  %6851 = vmatprep.mubr.f32.mxu1 %v10910_v10 }
 0x519   : > { %7078 = vmatpush3.bf16.msra.mxu0 %v10858_v62  ;;  %7126 = vmatpush3.bf16.msra.mxu1 %v10858_v62  ;;  %v5113_v62 = vsub.f32 %v5111_v41, %v5112_v32 }
 0x51a   : > { %7080 = vmatprep.subr.bf16.mxu0 %v10784_v23  ;;  %7128 = vmatprep.subr.bf16.mxu1 %v10784_v23 }
 0x51b   : > { %v5114_v56 = vand.u32 4294901760, %v5113_v62 }
 0x51c   : > { %6786 = vmatmul.mubr.f32.vlgmr.msra.gmra.mrb[2].mxu0 %v10925_v45  ;;  %6852 = vmatmul.mubr.f32.vlgmr.msra.gmra.mrb[2].mxu1 %v10928_v36 }
 0x51d   : > { %7082 = vmatpush3.bf16.msra.mxu0 %v10784_v23  ;;  %7130 = vmatpush3.bf16.msra.mxu1 %v10784_v23 }
 0x51e   : > { %7084 = vmatprep.subr.bf16.mxu0 %v10827_v50  ;;  %7132 = vmatprep.subr.bf16.mxu1 %v10827_v50 }
 0x51f   : > { %6796 = vmatprep.mubr.f32.mxu0 %v4025_v11  ;;  %6862 = vmatprep.mubr.f32.mxu1 %v4568_v5 }
 0x521   : > { %7086 = vmatpush3.bf16.msra.mxu0 %v10827_v50  ;;  %7134 = vmatpush3.bf16.msra.mxu1 %v10827_v50 }
 0x522   : > { %7088 = vmatprep.subr.bf16.mxu0 %v10792_v63  ;;  %7136 = vmatprep.subr.bf16.mxu1 %v10792_v63 }
 0x524   : > { %6797 = vmatmul.mubr.f32.vlgmr.msra.gmra.mrb[2].mxu0 %v4035_v38  ;;  %6863 = vmatmul.mubr.f32.vlgmr.msra.gmra.mrb[2].mxu1 %v4578_v55 }
 0x525   : > { %7090 = vmatpush3.bf16.msra.mxu0 %v10792_v63  ;;  %7138 = vmatpush3.bf16.msra.mxu1 %v10792_v63 }
 0x526   : > { %7092 = vmatprep.subr.bf16.mxu0 %v10896_v19  ;;  %7140 = vmatprep.subr.bf16.mxu1 %v10896_v19 }
 0x527   : > { %6807 = vmatprep.mubr.f32.mxu0 %v10886_v15  ;;  %6873 = vmatprep.mubr.f32.mxu1 %v10888_v13 }
 0x529   : > { %7094 = vmatpush3.bf16.msra.mxu0 %v10896_v19  ;;  %7142 = vmatpush3.bf16.msra.mxu1 %v10896_v19 }
 0x52a   : > { %7096 = vmatprep.subr.bf16.mxu0 %v10784_v23  ;;  %7144 = vmatprep.subr.bf16.mxu1 %v10784_v23 }
 0x52c   : > { %6808 = vmatmul.mubr.f32.vlgmr.msra.gmra.mrb[2].mxu0 %v10912_v24  ;;  %6874 = vmatmul.mubr.f32.vlgmr.msra.gmra.mrb[2].mxu1 %v10914_v39 }
 0x52d   : > { %7098 = vmatpush3.bf16.msra.mxu0 %v10784_v23  ;;  %7146 = vmatpush3.bf16.msra.mxu1 %v10784_v23 }
 0x52e   : > { %7100 = vmatprep.subr.bf16.mxu0 %v10827_v50  ;;  %7148 = vmatprep.subr.bf16.mxu1 %v10827_v50 }
 0x52f   : > { %6818 = vmatprep.mubr.f32.mxu0 %v10886_v15  ;;  %6884 = vmatprep.mubr.f32.mxu1 %v10888_v13 }
 0x531   : > { %7102 = vmatpush3.bf16.msra.mxu0 %v10827_v50  ;;  %7150 = vmatpush3.bf16.msra.mxu1 %v10827_v50 }
 0x532   : > { %7151 = vmatprep.subr.bf16.mxu0 %v7517_v9  ;;  %6929 = vmatprep.subr.mxu1 %v7519_v6 }
 0x534   : > { %6819 = vmatmul.mubr.f32.vlgmr.msra.gmra.mrb[2].mxu0 %v10912_v24  ;;  %6885 = vmatmul.mubr.f32.vlgmr.msra.gmra.mrb[2].mxu1 %v10914_v39  ;;  %v5503_v39 = vld [vmem:[%s12499_s7] sm:$0x1] }
 0x535   : > { %6891 = vmatprep.mubr.msk.f32.mxu0 %vm7518_vm9, %v7519_v6  ;;  %6931 = vmatprep.mubr.msk.f32.mxu1 %vm7518_vm9, %v7519_v6  ;;  %v5508_v11 = vsel %vm5506_vm11, %v5503_v39, 0 }
 0x536   : > { %v5580_v5 = vand.u32 4294901760, %v5508_v11 }
 0x538   : > { %v5581_v45 = vsub.f32 %v5508_v11, %v5580_v5 }
 0x53a   : > { %v5582_v36 = vand.u32 4294901760, %v5581_v45 }
 0x53c   : > { %v5583_v37 = vsub.f32 %v5581_v45, %v5582_v36 }
 0x53e   : > { %v5584_v21 = vand.u32 4294901760, %v5583_v37 }
 0x5d7   : > { %v6688_v57 = vpop.f32.mrb[0].mxu0  ;;  %v6754_v63 = vpop.f32.mrb[0].mxu1 }
 0x5d8   : > { %v3935_v1 = vpop.f32.mrb[1].mxu1  ;;  %3409 = vrot.lane.b32.xlu1 %v6688_v57, %s12497_s30  ;;  %v3397_v23 = vpop.f32.mrb[1].mxu0 }
 0x5d9   : > { %3407 = vrot.lane.b32.xlu0 %v3397_v23, %s12497_s30  ;;  %v5505_v23 = vstv %s6444_s8 }
 0x607   : > { %v6820_v3 = vpop.f32.mrb[2].mxu0  ;;  %v6886_v18 = vpop.f32.mrb[2].mxu1 }
 0x608   : > { %v5015_v40 = vpop.f32.mrb[3].mxu1  ;;  %4484 = vrot.lane.b32.xlu1 %v6820_v3, %s7515_s22  ;;  %v4472_v34 = vpop.f32.mrb[3].mxu0 }
 0x609   : > { %4482 = vrot.lane.b32.xlu0 %v4472_v34, %s7515_s22 }
 0x60c   : > { %5027 = vrot.lane.b32.xlu1 %v6886_v18, %s7516_s21 }
 0x60d   : > { %5025 = vrot.lane.b32.xlu0 %v5015_v40, %s7516_s21 }
 0x64a   : > { %v3410_v42 = vpop.permute.xlu1 %3409 }
 0x64b   : > { %v3408_v26 = vpop.permute.xlu0 %3407  ;;  %v7169_v58 = vadd.f32 %v6754_v63, %v3410_v42 }
 0x64c   : > { %v7170_v48 = vadd.f32 %v3935_v1, %v3408_v26 }
 0x67a   : > { %v4485_v59 = vpop.permute.xlu1 %4484 }
 0x67b   : > { %v4483_v49 = vpop.permute.xlu0 %4482  ;;  %v4487_v14 = vadd.f32 %v7169_v58, %v4485_v59 }
 0x67c   : > { %v4486_v22 = vadd.f32 %v7170_v48, %v4483_v49 }
 0x67e   : > { %v5028_v29 = vpop.permute.xlu1 %5027 }
 0x67f   : > { %v5030_v50 = vadd.f32 %v5028_v29, %v4487_v14  ;;  %v5026_v27 = vpop.permute.xlu0 %5025 }
 0x680   : > { %v5029_v12 = vadd.f32 %v5026_v27, %v4486_v22 }
 0x681   : > { %v5034_v2 = vadd.f32 %v5032_v4, %v5030_v50 }
 0x682   : > { %v5033_v16 = vadd.f32 %v5031_v25, %v5029_v12 }
 0x683   : > { %v5036_v0 = vmax.f32 %v5034_v2, 0.0 }
 0x684   : > { %v5035_v17 = vmax.f32 %v5033_v16, 0.0 }
 0x685   : > { %v5047_v8 = vand.u32 4294901760, %v5036_v0 }
 0x686   : > { %v5044_v30 = vand.u32 4294901760, %v5035_v17 }
 0x687   : > { %v5129_v52 = vsub.f32 %v5036_v0, %v5047_v8 }
 0x688   : > { %v7152_v44 = vpack.c.bf16 %v5047_v8, %v5044_v30  ;;  %v5122_v54 = vsub.f32 %v5035_v17, %v5044_v30 }
 0x689   : > { %v5130_v20 = vand.u32 4294901760, %v5129_v52 }
 0x68a   : > { %v5123_v15 = vand.u32 4294901760, %v5122_v54  ;;  %7153 = vmatpush3.bf16.msra.mxu0 %v7152_v44  ;;  %v7158_v13 = vpack.c.bf16 %v5129_v52, %v5122_v54 }
 0x68b   : > { %v5131_v19 = vsub.f32 %v5129_v52, %v5130_v20  ;;  %7154 = vmatprep.subr.bf16.mxu0 %v7517_v9 }
 0x68c   : > { %v5124_v28 = vsub.f32 %v5122_v54, %v5123_v15  ;;  %v7164_v61 = vpack.c.bf16 %v5130_v20, %v5123_v15 }
 0x68d   : > { %6892 = vmatmul.mubr.f32.vlgmr.msra.gmra.mrb[4].mxu0 %v5114_v56  ;;  %v5132_v47 = vand.u32 4294901760, %v5131_v19 }
 0x68e   : > { %v5125_v10 = vand.u32 4294901760, %v5124_v28  ;;  %6898 = vmatprep.mubr.msk.f32.mxu0 %vm7518_vm9, %v7519_v6 }
 0x690   : > { %v7155_v24 = vpack.c.bf16 %v5132_v47, %v5125_v10 }
 0x692   : > { %7156 = vmatpush3.bf16.msra.mxu0 %v7155_v24 }
 0x693   : > { %7157 = vmatprep.subr.bf16.mxu0 %v7517_v9 }
 0x695   : > { %6899 = vmatmul.mubr.f32.vlgmr.msra.gmra.mrb[4].mxu0 %v5110_v35 }
 0x696   : > { %7159 = vmatpush3.bf16.msra.mxu0 %v7158_v13  ;;  %6905 = vmatprep.mubr.msk.f32.mxu0 %vm7518_vm9, %v7519_v6 }
 0x697   : > { %7160 = vmatprep.subr.bf16.mxu0 %v7517_v9 }
 0x69d   : > { %6906 = vmatmul.mubr.f32.vlgmr.msra.gmra.mrb[4].mxu0 %v5111_v41 }
 0x69e   : > { %7162 = vmatpush3.bf16.msra.mxu0 %v7152_v44  ;;  %6912 = vmatprep.mubr.msk.f32.mxu0 %vm7518_vm9, %v7519_v6 }
 0x69f   : > { %7163 = vmatprep.subr.bf16.mxu0 %v7517_v9 }
 0x6a5   : > { %6913 = vmatmul.mubr.f32.vlgmr.msra.gmra.mrb[4].mxu0 %v5112_v32 }
 0x6a6   : > { %7165 = vmatpush3.bf16.msra.mxu0 %v7164_v61  ;;  %6919 = vmatprep.mubr.msk.f32.mxu0 %vm7518_vm9, %v7519_v6 }
 0x6a7   : > { %7166 = vmatprep.subr.bf16.mxu0 %v7517_v9 }
 0x6ad   : > { %6920 = vmatmul.mubr.f32.vlgmr.msra.gmra.mrb[4].mxu0 %v5110_v35 }
 0x6ae   : > { %7168 = vmatpush3.bf16.msra.mxu0 %v7152_v44  ;;  %6926 = vmatprep.mubr.msk.f32.mxu0 %vm7518_vm9, %v7519_v6 }
 0x6b5   : > { %6927 = vmatmul.mubr.f32.vlgmr.msra.gmra.mrb[4].mxu0 %v5110_v35 }
 0x788   : > { %v5498_v7 = vpop.f32.mrb[4].mxu0 }
 0x789   : > { %v7171_v38 = vadd.f32 %v5498_v7, %v5038_v31  ;;  %v6928_v55 = vpop.f32.mrb[5].mxu0 }
 0x78b   : > { %v5502_v46 = vmax.f32 %v7171_v38, 0.0 }
 0x78d   : > { %v5512_v33 = vsel %vm5510_vm12, %v5502_v46, 0 }
 0x78e   : > { %v5515_v53 = vand.u32 4294901760, %v5512_v33 }
 0x790   : > { %v5592_v60 = vsub.f32 %v5512_v33, %v5515_v53  ;;  %6930 = vmatpush3.msra.mxu1 %v5515_v53 }
 0x791   : > { %6932 = vmatmul.mubr.f32.vlgmr.msra.gmra.mrb[4].mxu1 %v5584_v21  ;;  %6934 = vmatprep.subr.mxu1 %v7519_v6 }
 0x792   : > { %v5593_v57 = vand.u32 4294901760, %v5592_v60  ;;  %6936 = vmatprep.mubr.msk.f32.mxu1 %vm7518_vm9, %v7519_v6 }
 0x794   : > { %v5594_v63 = vsub.f32 %v5592_v60, %v5593_v57 }
 0x796   : > { %v5595_v1 = vand.u32 4294901760, %v5594_v63 }
 0x798   : > { %6935 = vmatpush3.msra.mxu1 %v5595_v1 }
 0x799   : > { %6937 = vmatmul.mubr.f32.vlgmr.msra.gmra.mrb[4].mxu1 %v5580_v5  ;;  %6939 = vmatprep.subr.mxu1 %v7519_v6 }
 0x79a   : > { %6940 = vmatpush3.msra.mxu1 %v5592_v60  ;;  %6941 = vmatprep.mubr.msk.f32.mxu1 %vm7518_vm9, %v7519_v6 }
 0x79b   : > { %6944 = vmatprep.subr.mxu1 %v7519_v6 }
 0x7a1   : > { %6942 = vmatmul.mubr.f32.vlgmr.msra.gmra.mrb[4].mxu1 %v5581_v45 }
 0x7a2   : > { %6945 = vmatpush3.msra.mxu1 %v5515_v53  ;;  %6946 = vmatprep.mubr.msk.f32.mxu1 %vm7518_vm9, %v7519_v6 }
 0x7a3   : > { %6949 = vmatprep.subr.mxu1 %v7519_v6 }
 0x7a9   : > { %6947 = vmatmul.mubr.f32.vlgmr.msra.gmra.mrb[4].mxu1 %v5582_v36 }
 0x7aa   : > { %6950 = vmatpush3.msra.mxu1 %v5593_v57  ;;  %6951 = vmatprep.mubr.msk.f32.mxu1 %vm7518_vm9, %v7519_v6 }
 0x7ab   : > { %6954 = vmatprep.subr.mxu1 %v7519_v6 }
 0x7b1   : > { %6952 = vmatmul.mubr.f32.vlgmr.msra.gmra.mrb[4].mxu1 %v5580_v5 }
 0x7b2   : > { %6955 = vmatpush3.msra.mxu1 %v5515_v53  ;;  %6956 = vmatprep.mubr.msk.f32.mxu1 %vm7518_vm9, %v7519_v6 }
 0x7b9   : > { %6957 = vmatmul.mubr.f32.vlgmr.msra.gmra.mrb[4].mxu1 %v5580_v5 }
 0x88c   : > { %v5956_v3 = vpop.f32.mrb[4].mxu1 }
 0x88d   : > { %v7172_v18 = vadd.f32 %v5956_v3, %v5505_v23  ;;  %v6958_v40 = vpop.f32.mrb[5].mxu1 }
 0x88f   : > { %5960 = vst [vmem:[%s334_s29] sm:$0x1] %v7172_v18 }
 0x890   : > { %7441 = shalt.err (!%p7438_p0)
}
 0x891   : > { %s7442_s0 = scalar_lea.hbm %s11073_s12, 16  ;;  %s7446_s21 = scalar_lea.hbm %s12504_s11, 32 }
 0x892   : > { %p7443_p1 = scmp.ne.s32.totalorder %s11073_s12, %s7442_s0  ;;  %p7447_p11 = scmp.lt.u32.totalorder %s11073_s12, %s12504_s11 }
 0x893   : > { %p7448_p8 = scmp.lt.u32.totalorder %s7446_s21, %s7442_s0  ;;  %p7450_p12 = scmp.lt.u32.totalorder %s7442_s0, %s11073_s12 }
 0x894   : > { %p7444_p4 = pnand %p7443_p1, %p12505_p2 }
 0x895   : > { %p7449_p7 = por %p7448_p8, %p7447_p11 }
 0x896   : > { %p7445_p3 = pneg %p7444_p4 }
 0x897   : > { %p7451_p6 = por %p7450_p12, %p7449_p7 }
 0x899   : > { %p7452_p10 = pnand %p7451_p6, %p7445_p3 }
 0x89b   : > { %7455 = shalt.err (!%p7452_p10)
}
 0x89c   : > { %7247 = dma.vmem_to_hbm [thread:$0]  (%p12505_p2), %s11075_s19, 16, %s11073_s12, %s5962_s15  }
 0x89d PF: > { %s12506_s10 = sld [smem:[#allocation17_spill]]  ;;  %s12507_s4 = sld [smem:[#allocation22_spill]] }
 0x89e   : > { %s12508_s20 = sld [smem:[#allocation20_spill]] }
 0x8a3   : > { %s5986_s16 = sand.u32 1, %s12506_s10   ;;  %p12509_p5 = scmp.ne.s32.totalorder %s12507_s4, 0 }
 0x8a4   : > { %p12510_p9 = scmp.ge.s32.totalorder %s12508_s20, 2  ;;  %s5987_s7 = scalar_lea.sflag [#allocation6], %s5986_s16 }
 0x8a6   : > { %p7264_p13 = pnand %p12510_p9, %p12509_p5 }
 0x8a8   : > { %7485 = dma.done.wait (!%p7264_p13), %s5987_s7, 16  }
 0x8a9   : > { %7487 = vsyncadd (!%p7264_p13), %s5987_s7, 4294967280  ;;  %s12511_s27 = sld [smem:[#allocation23_spill]]  ;;  %s12512_s24 = sld [smem:[#allocation18_spill]] }
 0x8aa   : > { %s12513_s25 = sld [smem:[#allocation19_spill]]  ;;  %s12514_s26 = sld [smem:[#allocation24_spill]] }
 0x8af   : > { %p22_p0 = scmp.ge.s32.totalorder %s12511_s27, 4  }
 0x8b1   :  { %24 = sbr.rel (!%p22_p0) target bundleno = 16 (0x10), region = 109 }
 0x8b8   :  { %5991 = vsyncpa [#allocation5], 1 }
 0x8b9   :  { %5993 = vsyncpa [#allocation5 + $0x1], 1 }
 0x8ba   :  { %5994 = vsyncpa [#allocation10], 1 }
 0x8bb   :  { %5995 = vsyncpa [#allocation6], 1 }
 0x8bc   :  { %5997 = vsyncpa [#allocation6 + $0x1], 1 }
 0x8bd   :  { %5998 = vsyncpa [#allocation7], 1 }
 0x8be   :  { %6000 = vsyncpa [#allocation7 + $0x1], 1 }

</bundles_post_ra>
